<compile_context>
chip_gen: v6e
topology: v6e:2x2x1
jax: 0.10.0
libtpu: 0.0.40
codegen_flags: <defaults>
</compile_context>

<pallas_src>
import math
from functools import partial

import jax
import jax.numpy as jnp
from jax.experimental import pallas as pl
from jax.experimental.pallas import tpu as pltpu

N_KEYPOINTS = 6
N_DIMS = 2
HIDDEN = 64
N_LAYERS = 6
EPS = 1e-9
LOG_2PI = math.log(2.0 * math.pi)   # -(D/2)*log(2pi) == -log(2pi) only because D == 2
LN2 = math.log(2.0)
LEAKY_SLOPE = 0.01                  # torch.nn.LeakyReLU default
FUSED = 2 * HIDDEN                  # 128: fused (scale|trans) hidden width
TILE_N = 512                        # lanes per grid block (use ~256 on v5e)


def _leaky_relu(x):
    # max(x, slope*x) is exact for slope in (0, 1): drops the cmp+select of jnp.where.
    return jnp.maximum(x, LEAKY_SLOPE * x)


def _rle_loss_kernel(pts_ref, w2t_ref, wcol_ref, out_ref):
    # pts_ref:  (8, TILE_N)        rows 0-1 mu, 2-3 sigma (pad lanes = 1.0), 4-5 x, 6 valid
    # w2t_ref:  (L, 128, 128) bf16 block_diag(sW2, tW2)^T per layer (MXU operand), resident
    # wcol_ref: (128, 128) f32     col i: fused W1[a,:]; col 8+i: fused B1; col 16+i: fused B2;
    #                              col 24+i: [sW3[:,b] | tW3[:,b]];
    #                              row0 col 32+i: sB3[b];  row0 col 40+i: tB3[b]
    # out_ref:  (1, 1)             this block's masked partial sum
    pts = pts_ref[...]
    mu = pts[0:2, :]
    sigma = pts[2:4, :]
    x = pts[4:6, :]
    valid = pts[6:7, :]

    error = (mu - x) / (sigma + EPS)           # (2, T), points on lanes

    # --- RealNVP backward pass (log_prob), static coupling masks ---
    zs = [error[0:1, :], error[1:2, :]]        # z split by spatial dim
    log_det = jnp.zeros_like(zs[0])            # (1, T)

    for i in reversed(range(N_LAYERS)):        # static unroll over 6 coupling layers
        a = 1 if (i % 2 == 0) else 0           # passthrough (conditioner-input) dim
        b = 1 - a                              # transformed dim
        z_a = zs[a]                            # (1, T)

        # Single-lane column reads + broadcasts: XLU has slack, leave as is.
        w1c = wcol_ref[:, i:i + 1]             # (128, 1)
        b1c = wcol_ref[:, 8 + i:9 + i]         # (128, 1)
        b2c = wcol_ref[:, 16 + i:17 + i]       # (128, 1)
        w3c = wcol_ref[:, 24 + i:25 + i]       # (128, 1): rows 0-63 sW3[:,b], 64-127 tW3[:,b]
        sb3 = wcol_ref[0:1, 32 + i:33 + i]     # (1, 1)
        tb3 = wcol_ref[0:1, 40 + i:41 + i]     # (1, 1)

        # layer 1: rank-1 outer product on the VPU (no K=2 MXU push), f32
        h = _leaky_relu(w1c * z_a + b1c)                                      # (128, T)
        # layer 2: fused block-diagonal 128x128 contraction, bf16 MXU, f32 accumulate
        h = _leaky_relu(
            jnp.dot(w2t_ref[i], h.astype(jnp.bfloat16),
                    preferred_element_type=jnp.float32) + b2c)                # (128, T)
        # layer 3: only the transformed output dim of each net. A (2,128)x(128,T) dot is a
        # pathological M=2 MXU shape -> do it as a VPU multiply + sublane reduce instead.
        prod = w3c * h                                                        # (128, T)
        s_pre = jnp.sum(prod[0:HIDDEN, :], axis=0, keepdims=True)             # (1, T)
        t_pre = jnp.sum(prod[HIDDEN:, :], axis=0, keepdims=True)              # (1, T)
        s = jnp.tanh(s_pre + sb3)                                             # (1, T)
        t = t_pre + tb3                                                       # (1, T)

        zs[b] = (zs[b] - t) * jnp.exp(-s)
        log_det = log_det - s

    z0, z1 = zs
    # standard 2D normal prior: -0.5*||z||^2 - log(2*pi)  (D == 2)
    log_phi = -0.5 * (z0 * z0 + z1 * z1) - LOG_2PI + log_det                  # (1, T)

    # Laplace residual: log(sigma) + log(2*sigma) + |err| == 2*log(sigma) + ln2 + |err|
    log_sigma = jnp.log(sigma)                                                # single EUP log
    row_terms = 2.0 * log_sigma + LN2 + jnp.abs(error)                        # (2, T)
    per_point = row_terms[0:1, :] + row_terms[1:2, :] - float(N_DIMS) * log_phi
    # valid mask is required: pad lanes still produce nonzero per_point via t/log_det.
    out_ref[...] = jnp.sum(per_point * valid, axis=1, keepdims=True)          # (1, 1)


def init_params(key):
    """Deterministic RealNVP parameter init (same shapes as the torch module)."""
    n_keys = 2 * N_LAYERS * 6
    keys = iter(jax.random.split(key, n_keys))
    params = {}
    for prefix in ("s", "t"):
        W1s, B1s, W2s, B2s, W3s, B3s = [], [], [], [], [], []
        for _ in range(N_LAYERS):
            W1s.append(jax.random.normal(next(keys), (N_DIMS, HIDDEN), jnp.float32) * 0.1)
            B1s.append(jax.random.normal(next(keys), (1, HIDDEN), jnp.float32) * 0.01)
            W2s.append(jax.random.normal(next(keys), (HIDDEN, HIDDEN), jnp.float32) * 0.1)
            B2s.append(jax.random.normal(next(keys), (1, HIDDEN), jnp.float32) * 0.01)
            W3s.append(jax.random.normal(next(keys), (HIDDEN, N_DIMS), jnp.float32) * 0.1)
            B3s.append(jax.random.normal(next(keys), (1, N_DIMS), jnp.float32) * 0.01)
        params[prefix + "W1"] = jnp.stack(W1s)
        params[prefix + "B1"] = jnp.stack(B1s)
        params[prefix + "W2"] = jnp.stack(W2s)
        params[prefix + "B2"] = jnp.stack(B2s)
        params[prefix + "W3"] = jnp.stack(W3s)
        params[prefix + "B3"] = jnp.stack(B3s)
    # RealNVP coupling masks: ([[0,1],[1,0]] * 3); the kernel bakes this alternation in.
    params["cmask"] = jnp.array([[[0.0, 1.0]], [[1.0, 0.0]]] * 3, dtype=jnp.float32)
    return params


def pack_params(params):
    """Fuse scale/trans nets and pack weights into two lane-friendly slabs."""
    w2t_list = []
    wcol = jnp.zeros((FUSED, 128), jnp.float32)
    for i in range(N_LAYERS):
        a = 1 if (i % 2 == 0) else 0           # cmask[i] active (passthrough) dim
        b = 1 - a                              # transformed dim
        w1a = jnp.concatenate([params["sW1"][i, a, :], params["tW1"][i, a, :]])   # (128,)
        b1 = jnp.concatenate([params["sB1"][i, 0, :], params["tB1"][i, 0, :]])    # (128,)
        b2 = jnp.concatenate([params["sB2"][i, 0, :], params["tB2"][i, 0, :]])    # (128,)
        w3sel = jnp.concatenate([params["sW3"][i, :, b], params["tW3"][i, :, b]])  # (128,)
        wcol = (wcol.at[:, i].set(w1a)
                    .at[:, 8 + i].set(b1)
                    .at[:, 16 + i].set(b2)
                    .at[:, 24 + i].set(w3sel)
                    .at[0, 32 + i].set(params["sB3"][i, 0, b])
                    .at[0, 40 + i].set(params["tB3"][i, 0, b]))

        blk = jnp.zeros((FUSED, FUSED), jnp.float32)
        blk = blk.at[:HIDDEN, :HIDDEN].set(params["sW2"][i])
        blk = blk.at[HIDDEN:, HIDDEN:].set(params["tW2"][i])
        w2t_list.append(blk.T)                 # (128, 128)

    return {
        "w2t": jnp.stack(w2t_list).astype(jnp.bfloat16),   # (L, 128, 128) bf16 MXU operand
        "wcol": wcol,                                       # (128, 128) f32 (VPU/EUP stays f32)
    }


def _pack_points(mu, sigma, x, tile_n):
    """One fused pass: points onto the lane axis, padded to a multiple of tile_n lanes."""
    D = N_DIMS
    mu2 = mu.reshape(-1, D).astype(jnp.float32)
    sig2 = sigma.reshape(-1, D).astype(jnp.float32)
    x2 = x.reshape(-1, D).astype(jnp.float32)
    n = mu2.shape[0]
    batch = n // N_KEYPOINTS

    n_pad = ((n + tile_n - 1) // tile_n) * tile_n
    pad = n_pad - n

    stacked = jnp.stack([mu2, sig2, x2], axis=0)           # (3, n, 2)
    rows6 = stacked.transpose(0, 2, 1).reshape(6, n)        # rows: mu0,mu1,sig0,sig1,x0,x1
    if pad:
        # sigma pad lanes = 1.0 keeps log() finite; the valid mask zeroes them later.
        pad_vals = jnp.array([0.0, 0.0, 1.0, 1.0, 0.0, 0.0], jnp.float32).reshape(6, 1)
        rows6 = jnp.concatenate([rows6, jnp.broadcast_to(pad_vals, (6, pad))], axis=1)
    valid = (jnp.arange(n_pad, dtype=jnp.int32) < n).astype(jnp.float32).reshape(1, n_pad)
    pts = jnp.concatenate(
        [rows6, valid, jnp.zeros((1, n_pad), jnp.float32)], axis=0)   # (8, n_pad)
    return pts, batch, n_pad


@partial(jax.jit, static_argnames=("tile_n",))
def rle_loss_pallas(mu, sigma, x, packed, tile_n=TILE_N):
    """mu, sigma: (B, K*2); x: anything reshapeable to (B*K, 2). Returns scalar nll."""
    pts, batch, n_pad = _pack_points(mu, sigma, x, tile_n)
    num_blocks = n_pad // tile_n

    # 1-D parallel grid over the lane axis: per-block (128, tile_n) intermediates stay
    # bounded (mandatory earlier on v7x's 64 MiB VMEM), weights stay resident (constant
    # index_map -> no re-DMA), and the parallel axis shards across both v7x TensorCores.
    partials = pl.pallas_call(
        _rle_loss_kernel,
        out_shape=jax.ShapeDtypeStruct((num_blocks, 1), jnp.float32),
        grid=(num_blocks,),
        in_specs=[
            pl.BlockSpec((8, tile_n), lambda j: (0, j)),                 # pts (tiled)
            pl.BlockSpec((N_LAYERS, FUSED, FUSED), lambda j: (0, 0, 0)),  # w2t (resident)
            pl.BlockSpec((FUSED, 128), lambda j: (0, 0)),                 # wcol (resident)
        ],
        out_specs=pl.BlockSpec((1, 1), lambda j: (j, 0)),                 # per-block partials
        compiler_params=pltpu.CompilerParams(dimension_semantics=("parallel",)),
    )(pts, packed["w2t"], packed["wcol"])

    # nll /= len(nll); nll.sum()  ->  total / batch, done outside so batch isn't baked in.
    return jnp.sum(partials) / batch


def rle_loss_ref(mu, sigma, x, params):
    """Pure-JAX f32 reference mirroring the torch forward() semantics."""
    K, D = N_KEYPOINTS, N_DIMS
    mu3 = mu.reshape(-1, K, D)
    sig3 = sigma.reshape(-1, K, D)
    x3 = x.reshape(-1, K, D)
    error = (mu3 - x3) / (sig3 + EPS)

    def net(h, W1, B1, W2, B2, W3, B3, tanh_out):
        h = _leaky_relu(h @ W1 + B1)
        h = _leaky_relu(h @ W2 + B2)
        h = h @ W3 + B3
        return jnp.tanh(h) if tanh_out else h

    z = error.reshape(-1, D)
    log_det = jnp.zeros(z.shape[0], jnp.float32)
    for i in reversed(range(N_LAYERS)):
        m = params["cmask"][i]  # (1, 2)
        z_ = z * m
        s = net(z_, params["sW1"][i], params["sB1"][i], params["sW2"][i],
                params["sB2"][i], params["sW3"][i], params["sB3"][i], True) * (1.0 - m)
        t = net(z_, params["tW1"][i], params["tB1"][i], params["tW2"][i],
                params["tB2"][i], params["tW3"][i], params["tB3"][i], False) * (1.0 - m)
        z = (1.0 - m) * (z - t) * jnp.exp(-s) + z_
        log_det = log_det - s.sum(axis=1)
    log_prob = -0.5 * jnp.sum(z * z, axis=-1) - LOG_2PI + log_det

    log_phi = log_prob.reshape(-1, K, 1)
    log_sigma = jnp.log(sig3)
    log_q = jnp.log(2.0 * sig3) + jnp.abs(error)  # laplace prior
    nll = log_sigma - log_phi + log_q
    nll = nll / nll.shape[0]
    return nll.sum()


if __name__ == "__main__":
    key = jax.random.PRNGKey(0)
    k_params, k_mu, k_sigma, k_x = jax.random.split(key, 4)
    params = init_params(k_params)
    packed = pack_params(params)

    B = 2
    mu = jax.random.normal(k_mu, (B, N_KEYPOINTS * N_DIMS), jnp.float32)
    sigma = jax.nn.softplus(
        jax.random.normal(k_sigma, (B, N_KEYPOINTS * N_DIMS), jnp.float32)) + 0.1
    x = jax.random.normal(k_x, (B * N_KEYPOINTS, N_DIMS), jnp.float32)

    out = rle_loss_pallas(mu, sigma, x, packed)
    out = jax.block_until_ready(out)

    ref = rle_loss_ref(mu, sigma, x, params)
    # bf16 MXU operands (W2 and the hidden activations) perturb the flow slightly vs the
    # pure-f32 reference; per-point relative deviation is bounded well under 1% at these
    # weight scales (~0.1) with f32 accumulation, so 2e-2 is a comfortable bound.
    assert bool(jnp.isfinite(out)), out
    assert jnp.allclose(out, ref, rtol=2e-2, atol=2e-2), (out, ref)
    print("KERNEL_OK")
</pallas_src>

<mosaic_0001>
module attributes {stable_mosaic.version = 11 : i64} {
  func.func @_rle_loss_kernel(%arg0: i32, %arg1: memref<8x512xf32, #tpu.memory_space<vmem>>, %arg2: memref<6x128x128xbf16, #tpu.memory_space<vmem>>, %arg3: memref<128x128xf32, #tpu.memory_space<vmem>>, %arg4: memref<1x1xf32, #tpu.memory_space<vmem>>) attributes {dimension_semantics = [#tpu.dimension_semantics<parallel>], iteration_bounds = array<i64: 1>, scalar_prefetch = 0 : i64, scratch_operands = 0 : i64, tpu.core_type = #tpu.core_type<tc>, window_params = [{transform_indices = @transform_0, window_bounds = array<i64: 8, 512>}, {pipeline_mode = #tpu.pipeline_mode<synchronous>, transform_indices = @transform_1, window_bounds = array<i64: 6, 128, 128>}, {pipeline_mode = #tpu.pipeline_mode<synchronous>, transform_indices = @transform_2, window_bounds = array<i64: 128, 128>}, {transform_indices = @transform_3, window_bounds = array<i64: 1, 1>}]} {
    %c0 = arith.constant 0 : index
    %c0_0 = arith.constant 0 : index
    %0 = vector.load %arg1[%c0, %c0_0] : memref<8x512xf32, #tpu.memory_space<vmem>>, vector<8x512xf32>
    %1 = vector.extract_strided_slice %0 {offsets = [0, 0], sizes = [2, 512], strides = [1, 1]} : vector<8x512xf32> to vector<2x512xf32>
    %2 = vector.extract_strided_slice %0 {offsets = [2, 0], sizes = [2, 512], strides = [1, 1]} : vector<8x512xf32> to vector<2x512xf32>
    %3 = vector.extract_strided_slice %0 {offsets = [4, 0], sizes = [2, 512], strides = [1, 1]} : vector<8x512xf32> to vector<2x512xf32>
    %4 = vector.extract_strided_slice %0 {offsets = [6, 0], sizes = [1, 512], strides = [1, 1]} : vector<8x512xf32> to vector<1x512xf32>
    %5 = arith.subf %1, %3 : vector<2x512xf32>
    %cst = arith.constant 9.99999971E-10 : f32
    %6 = vector.broadcast %cst : f32 to vector<2x512xf32>
    %7 = arith.addf %2, %6 : vector<2x512xf32>
    %8 = arith.divf %5, %7 : vector<2x512xf32>
    %9 = vector.extract_strided_slice %8 {offsets = [0, 0], sizes = [1, 512], strides = [1, 1]} : vector<2x512xf32> to vector<1x512xf32>
    %10 = vector.extract_strided_slice %8 {offsets = [1, 0], sizes = [1, 512], strides = [1, 1]} : vector<2x512xf32> to vector<1x512xf32>
    %cst_1 = arith.constant 0.000000e+00 : f32
    %11 = vector.broadcast %cst_1 : f32 to vector<1x512xf32>
    %c0_2 = arith.constant 0 : index
    %c5 = arith.constant 5 : index
    %12 = vector.load %arg3[%c0_2, %c5] : memref<128x128xf32, #tpu.memory_space<vmem>>, vector<128x1xf32>
    %c0_3 = arith.constant 0 : index
    %c13 = arith.constant 13 : index
    %13 = vector.load %arg3[%c0_3, %c13] : memref<128x128xf32, #tpu.memory_space<vmem>>, vector<128x1xf32>
    %c0_4 = arith.constant 0 : index
    %c21 = arith.constant 21 : index
    %14 = vector.load %arg3[%c0_4, %c21] : memref<128x128xf32, #tpu.memory_space<vmem>>, vector<128x1xf32>
    %c0_5 = arith.constant 0 : index
    %c29 = arith.constant 29 : index
    %15 = vector.load %arg3[%c0_5, %c29] : memref<128x128xf32, #tpu.memory_space<vmem>>, vector<128x1xf32>
    %c0_6 = arith.constant 0 : index
    %c37 = arith.constant 37 : index
    %16 = vector.load %arg3[%c0_6, %c37] : memref<128x128xf32, #tpu.memory_space<vmem>>, vector<1x1xf32>
    %c0_7 = arith.constant 0 : index
    %c45 = arith.constant 45 : index
    %17 = vector.load %arg3[%c0_7, %c45] : memref<128x128xf32, #tpu.memory_space<vmem>>, vector<1x1xf32>
    %18 = vector.broadcast %12 : vector<128x1xf32> to vector<128x512xf32>
    %19 = vector.broadcast %9 : vector<1x512xf32> to vector<128x512xf32>
    %20 = arith.mulf %18, %19 : vector<128x512xf32>
    %21 = vector.broadcast %13 : vector<128x1xf32> to vector<128x512xf32>
    %22 = arith.addf %20, %21 : vector<128x512xf32>
    %cst_8 = arith.constant 0.00999999977 : f32
    %23 = vector.broadcast %cst_8 : f32 to vector<128x512xf32>
    %24 = arith.mulf %23, %22 : vector<128x512xf32>
    %25 = arith.maximumf %22, %24 : vector<128x512xf32>
    %c5_9 = arith.constant 5 : index
    %c0_10 = arith.constant 0 : index
    %c0_11 = arith.constant 0 : index
    %26 = vector.load %arg2[%c5_9, %c0_10, %c0_11] : memref<6x128x128xbf16, #tpu.memory_space<vmem>>, vector<1x128x128xbf16>
    %27 = vector.shape_cast %26 : vector<1x128x128xbf16> to vector<128x128xbf16>
    %28 = arith.truncf %25 : vector<128x512xf32> to vector<128x512xbf16>
    %cst_12 = arith.constant dense<0.000000e+00> : vector<128x512xf32>
    %29 = tpu.matmul %27, %28, %cst_12 {dimension_numbers = #tpu.dot_dimension_numbers<[1], [0], [0], [1], [0, 0, 1, 1], [], []>} : vector<128x128xbf16>, vector<128x512xbf16>, vector<128x512xf32> -> vector<128x512xf32>
    %30 = vector.broadcast %14 : vector<128x1xf32> to vector<128x512xf32>
    %31 = arith.addf %29, %30 : vector<128x512xf32>
    %cst_13 = arith.constant 0.00999999977 : f32
    %32 = vector.broadcast %cst_13 : f32 to vector<128x512xf32>
    %33 = arith.mulf %32, %31 : vector<128x512xf32>
    %34 = arith.maximumf %31, %33 : vector<128x512xf32>
    %35 = vector.broadcast %15 : vector<128x1xf32> to vector<128x512xf32>
    %36 = arith.mulf %35, %34 : vector<128x512xf32>
    %37 = vector.extract_strided_slice %36 {offsets = [0, 0], sizes = [64, 512], strides = [1, 1]} : vector<128x512xf32> to vector<64x512xf32>
    %cst_14 = arith.constant dense<0.000000e+00> : vector<512xf32>
    %38 = vector.multi_reduction <add>, %37, %cst_14 [0] : vector<64x512xf32> to vector<512xf32>
    %39 = vector.shape_cast %38 : vector<512xf32> to vector<1x512xf32>
    %40 = vector.extract_strided_slice %36 {offsets = [64, 0], sizes = [64, 512], strides = [1, 1]} : vector<128x512xf32> to vector<64x512xf32>
    %cst_15 = arith.constant dense<0.000000e+00> : vector<512xf32>
    %41 = vector.multi_reduction <add>, %40, %cst_15 [0] : vector<64x512xf32> to vector<512xf32>
    %42 = vector.shape_cast %41 : vector<512xf32> to vector<1x512xf32>
    %43 = vector.broadcast %16 : vector<1x1xf32> to vector<1x512xf32>
    %44 = arith.addf %39, %43 : vector<1x512xf32>
    %45 = math.tanh %44 : vector<1x512xf32>
    %46 = vector.broadcast %17 : vector<1x1xf32> to vector<1x512xf32>
    %47 = arith.addf %42, %46 : vector<1x512xf32>
    %48 = arith.subf %10, %47 : vector<1x512xf32>
    %cst_16 = arith.constant 0.000000e+00 : f32
    %49 = vector.broadcast %cst_16 : f32 to vector<1x512xf32>
    %50 = arith.subf %49, %45 : vector<1x512xf32>
    %51 = math.exp %50 : vector<1x512xf32>
    %52 = arith.mulf %48, %51 : vector<1x512xf32>
    %53 = arith.subf %11, %45 : vector<1x512xf32>
    %c0_17 = arith.constant 0 : index
    %c4 = arith.constant 4 : index
    %54 = vector.load %arg3[%c0_17, %c4] : memref<128x128xf32, #tpu.memory_space<vmem>>, vector<128x1xf32>
    %c0_18 = arith.constant 0 : index
    %c12 = arith.constant 12 : index
    %55 = vector.load %arg3[%c0_18, %c12] : memref<128x128xf32, #tpu.memory_space<vmem>>, vector<128x1xf32>
    %c0_19 = arith.constant 0 : index
    %c20 = arith.constant 20 : index
    %56 = vector.load %arg3[%c0_19, %c20] : memref<128x128xf32, #tpu.memory_space<vmem>>, vector<128x1xf32>
    %c0_20 = arith.constant 0 : index
    %c28 = arith.constant 28 : index
    %57 = vector.load %arg3[%c0_20, %c28] : memref<128x128xf32, #tpu.memory_space<vmem>>, vector<128x1xf32>
    %c0_21 = arith.constant 0 : index
    %c36 = arith.constant 36 : index
    %58 = vector.load %arg3[%c0_21, %c36] : memref<128x128xf32, #tpu.memory_space<vmem>>, vector<1x1xf32>
    %c0_22 = arith.constant 0 : index
    %c44 = arith.constant 44 : index
    %59 = vector.load %arg3[%c0_22, %c44] : memref<128x128xf32, #tpu.memory_space<vmem>>, vector<1x1xf32>
    %60 = vector.broadcast %54 : vector<128x1xf32> to vector<128x512xf32>
    %61 = vector.broadcast %52 : vector<1x512xf32> to vector<128x512xf32>
    %62 = arith.mulf %60, %61 : vector<128x512xf32>
    %63 = vector.broadcast %55 : vector<128x1xf32> to vector<128x512xf32>
    %64 = arith.addf %62, %63 : vector<128x512xf32>
    %cst_23 = arith.constant 0.00999999977 : f32
    %65 = vector.broadcast %cst_23 : f32 to vector<128x512xf32>
    %66 = arith.mulf %65, %64 : vector<128x512xf32>
    %67 = arith.maximumf %64, %66 : vector<128x512xf32>
    %c4_24 = arith.constant 4 : index
    %c0_25 = arith.constant 0 : index
    %c0_26 = arith.constant 0 : index
    %68 = vector.load %arg2[%c4_24, %c0_25, %c0_26] : memref<6x128x128xbf16, #tpu.memory_space<vmem>>, vector<1x128x128xbf16>
    %69 = vector.shape_cast %68 : vector<1x128x128xbf16> to vector<128x128xbf16>
    %70 = arith.truncf %67 : vector<128x512xf32> to vector<128x512xbf16>
    %cst_27 = arith.constant dense<0.000000e+00> : vector<128x512xf32>
    %71 = tpu.matmul %69, %70, %cst_27 {dimension_numbers = #tpu.dot_dimension_numbers<[1], [0], [0], [1], [0, 0, 1, 1], [], []>} : vector<128x128xbf16>, vector<128x512xbf16>, vector<128x512xf32> -> vector<128x512xf32>
    %72 = vector.broadcast %56 : vector<128x1xf32> to vector<128x512xf32>
    %73 = arith.addf %71, %72 : vector<128x512xf32>
    %cst_28 = arith.constant 0.00999999977 : f32
    %74 = vector.broadcast %cst_28 : f32 to vector<128x512xf32>
    %75 = arith.mulf %74, %73 : vector<128x512xf32>
    %76 = arith.maximumf %73, %75 : vector<128x512xf32>
    %77 = vector.broadcast %57 : vector<128x1xf32> to vector<128x512xf32>
    %78 = arith.mulf %77, %76 : vector<128x512xf32>
    %79 = vector.extract_strided_slice %78 {offsets = [0, 0], sizes = [64, 512], strides = [1, 1]} : vector<128x512xf32> to vector<64x512xf32>
    %cst_29 = arith.constant dense<0.000000e+00> : vector<512xf32>
    %80 = vector.multi_reduction <add>, %79, %cst_29 [0] : vector<64x512xf32> to vector<512xf32>
    %81 = vector.shape_cast %80 : vector<512xf32> to vector<1x512xf32>
    %82 = vector.extract_strided_slice %78 {offsets = [64, 0], sizes = [64, 512], strides = [1, 1]} : vector<128x512xf32> to vector<64x512xf32>
    %cst_30 = arith.constant dense<0.000000e+00> : vector<512xf32>
    %83 = vector.multi_reduction <add>, %82, %cst_30 [0] : vector<64x512xf32> to vector<512xf32>
    %84 = vector.shape_cast %83 : vector<512xf32> to vector<1x512xf32>
    %85 = vector.broadcast %58 : vector<1x1xf32> to vector<1x512xf32>
    %86 = arith.addf %81, %85 : vector<1x512xf32>
    %87 = math.tanh %86 : vector<1x512xf32>
    %88 = vector.broadcast %59 : vector<1x1xf32> to vector<1x512xf32>
    %89 = arith.addf %84, %88 : vector<1x512xf32>
    %90 = arith.subf %9, %89 : vector<1x512xf32>
    %cst_31 = arith.constant 0.000000e+00 : f32
    %91 = vector.broadcast %cst_31 : f32 to vector<1x512xf32>
    %92 = arith.subf %91, %87 : vector<1x512xf32>
    %93 = math.exp %92 : vector<1x512xf32>
    %94 = arith.mulf %90, %93 : vector<1x512xf32>
    %95 = arith.subf %53, %87 : vector<1x512xf32>
    %c0_32 = arith.constant 0 : index
    %c3 = arith.constant 3 : index
    %96 = vector.load %arg3[%c0_32, %c3] : memref<128x128xf32, #tpu.memory_space<vmem>>, vector<128x1xf32>
    %c0_33 = arith.constant 0 : index
    %c11 = arith.constant 11 : index
    %97 = vector.load %arg3[%c0_33, %c11] : memref<128x128xf32, #tpu.memory_space<vmem>>, vector<128x1xf32>
    %c0_34 = arith.constant 0 : index
    %c19 = arith.constant 19 : index
    %98 = vector.load %arg3[%c0_34, %c19] : memref<128x128xf32, #tpu.memory_space<vmem>>, vector<128x1xf32>
    %c0_35 = arith.constant 0 : index
    %c27 = arith.constant 27 : index
    %99 = vector.load %arg3[%c0_35, %c27] : memref<128x128xf32, #tpu.memory_space<vmem>>, vector<128x1xf32>
    %c0_36 = arith.constant 0 : index
    %c35 = arith.constant 35 : index
    %100 = vector.load %arg3[%c0_36, %c35] : memref<128x128xf32, #tpu.memory_space<vmem>>, vector<1x1xf32>
    %c0_37 = arith.constant 0 : index
    %c43 = arith.constant 43 : index
    %101 = vector.load %arg3[%c0_37, %c43] : memref<128x128xf32, #tpu.memory_space<vmem>>, vector<1x1xf32>
    %102 = vector.broadcast %96 : vector<128x1xf32> to vector<128x512xf32>
    %103 = vector.broadcast %94 : vector<1x512xf32> to vector<128x512xf32>
    %104 = arith.mulf %102, %103 : vector<128x512xf32>
    %105 = vector.broadcast %97 : vector<128x1xf32> to vector<128x512xf32>
    %106 = arith.addf %104, %105 : vector<128x512xf32>
    %cst_38 = arith.constant 0.00999999977 : f32
    %107 = vector.broadcast %cst_38 : f32 to vector<128x512xf32>
    %108 = arith.mulf %107, %106 : vector<128x512xf32>
    %109 = arith.maximumf %106, %108 : vector<128x512xf32>
    %c3_39 = arith.constant 3 : index
    %c0_40 = arith.constant 0 : index
    %c0_41 = arith.constant 0 : index
    %110 = vector.load %arg2[%c3_39, %c0_40, %c0_41] : memref<6x128x128xbf16, #tpu.memory_space<vmem>>, vector<1x128x128xbf16>
    %111 = vector.shape_cast %110 : vector<1x128x128xbf16> to vector<128x128xbf16>
    %112 = arith.truncf %109 : vector<128x512xf32> to vector<128x512xbf16>
    %cst_42 = arith.constant dense<0.000000e+00> : vector<128x512xf32>
    %113 = tpu.matmul %111, %112, %cst_42 {dimension_numbers = #tpu.dot_dimension_numbers<[1], [0], [0], [1], [0, 0, 1, 1], [], []>} : vector<128x128xbf16>, vector<128x512xbf16>, vector<128x512xf32> -> vector<128x512xf32>
    %114 = vector.broadcast %98 : vector<128x1xf32> to vector<128x512xf32>
    %115 = arith.addf %113, %114 : vector<128x512xf32>
    %cst_43 = arith.constant 0.00999999977 : f32
    %116 = vector.broadcast %cst_43 : f32 to vector<128x512xf32>
    %117 = arith.mulf %116, %115 : vector<128x512xf32>
    %118 = arith.maximumf %115, %117 : vector<128x512xf32>
    %119 = vector.broadcast %99 : vector<128x1xf32> to vector<128x512xf32>
    %120 = arith.mulf %119, %118 : vector<128x512xf32>
    %121 = vector.extract_strided_slice %120 {offsets = [0, 0], sizes = [64, 512], strides = [1, 1]} : vector<128x512xf32> to vector<64x512xf32>
    %cst_44 = arith.constant dense<0.000000e+00> : vector<512xf32>
    %122 = vector.multi_reduction <add>, %121, %cst_44 [0] : vector<64x512xf32> to vector<512xf32>
    %123 = vector.shape_cast %122 : vector<512xf32> to vector<1x512xf32>
    %124 = vector.extract_strided_slice %120 {offsets = [64, 0], sizes = [64, 512], strides = [1, 1]} : vector<128x512xf32> to vector<64x512xf32>
    %cst_45 = arith.constant dense<0.000000e+00> : vector<512xf32>
    %125 = vector.multi_reduction <add>, %124, %cst_45 [0] : vector<64x512xf32> to vector<512xf32>
    %126 = vector.shape_cast %125 : vector<512xf32> to vector<1x512xf32>
    %127 = vector.broadcast %100 : vector<1x1xf32> to vector<1x512xf32>
    %128 = arith.addf %123, %127 : vector<1x512xf32>
    %129 = math.tanh %128 : vector<1x512xf32>
    %130 = vector.broadcast %101 : vector<1x1xf32> to vector<1x512xf32>
    %131 = arith.addf %126, %130 : vector<1x512xf32>
    %132 = arith.subf %52, %131 : vector<1x512xf32>
    %cst_46 = arith.constant 0.000000e+00 : f32
    %133 = vector.broadcast %cst_46 : f32 to vector<1x512xf32>
    %134 = arith.subf %133, %129 : vector<1x512xf32>
    %135 = math.exp %134 : vector<1x512xf32>
    %136 = arith.mulf %132, %135 : vector<1x512xf32>
    %137 = arith.subf %95, %129 : vector<1x512xf32>
    %c0_47 = arith.constant 0 : index
    %c2 = arith.constant 2 : index
    %138 = vector.load %arg3[%c0_47, %c2] : memref<128x128xf32, #tpu.memory_space<vmem>>, vector<128x1xf32>
    %c0_48 = arith.constant 0 : index
    %c10 = arith.constant 10 : index
    %139 = vector.load %arg3[%c0_48, %c10] : memref<128x128xf32, #tpu.memory_space<vmem>>, vector<128x1xf32>
    %c0_49 = arith.constant 0 : index
    %c18 = arith.constant 18 : index
    %140 = vector.load %arg3[%c0_49, %c18] : memref<128x128xf32, #tpu.memory_space<vmem>>, vector<128x1xf32>
    %c0_50 = arith.constant 0 : index
    %c26 = arith.constant 26 : index
    %141 = vector.load %arg3[%c0_50, %c26] : memref<128x128xf32, #tpu.memory_space<vmem>>, vector<128x1xf32>
    %c0_51 = arith.constant 0 : index
    %c34 = arith.constant 34 : index
    %142 = vector.load %arg3[%c0_51, %c34] : memref<128x128xf32, #tpu.memory_space<vmem>>, vector<1x1xf32>
    %c0_52 = arith.constant 0 : index
    %c42 = arith.constant 42 : index
    %143 = vector.load %arg3[%c0_52, %c42] : memref<128x128xf32, #tpu.memory_space<vmem>>, vector<1x1xf32>
    %144 = vector.broadcast %138 : vector<128x1xf32> to vector<128x512xf32>
    %145 = vector.broadcast %136 : vector<1x512xf32> to vector<128x512xf32>
    %146 = arith.mulf %144, %145 : vector<128x512xf32>
    %147 = vector.broadcast %139 : vector<128x1xf32> to vector<128x512xf32>
    %148 = arith.addf %146, %147 : vector<128x512xf32>
    %cst_53 = arith.constant 0.00999999977 : f32
    %149 = vector.broadcast %cst_53 : f32 to vector<128x512xf32>
    %150 = arith.mulf %149, %148 : vector<128x512xf32>
    %151 = arith.maximumf %148, %150 : vector<128x512xf32>
    %c2_54 = arith.constant 2 : index
    %c0_55 = arith.constant 0 : index
    %c0_56 = arith.constant 0 : index
    %152 = vector.load %arg2[%c2_54, %c0_55, %c0_56] : memref<6x128x128xbf16, #tpu.memory_space<vmem>>, vector<1x128x128xbf16>
    %153 = vector.shape_cast %152 : vector<1x128x128xbf16> to vector<128x128xbf16>
    %154 = arith.truncf %151 : vector<128x512xf32> to vector<128x512xbf16>
    %cst_57 = arith.constant dense<0.000000e+00> : vector<128x512xf32>
    %155 = tpu.matmul %153, %154, %cst_57 {dimension_numbers = #tpu.dot_dimension_numbers<[1], [0], [0], [1], [0, 0, 1, 1], [], []>} : vector<128x128xbf16>, vector<128x512xbf16>, vector<128x512xf32> -> vector<128x512xf32>
    %156 = vector.broadcast %140 : vector<128x1xf32> to vector<128x512xf32>
    %157 = arith.addf %155, %156 : vector<128x512xf32>
    %cst_58 = arith.constant 0.00999999977 : f32
    %158 = vector.broadcast %cst_58 : f32 to vector<128x512xf32>
    %159 = arith.mulf %158, %157 : vector<128x512xf32>
    %160 = arith.maximumf %157, %159 : vector<128x512xf32>
    %161 = vector.broadcast %141 : vector<128x1xf32> to vector<128x512xf32>
    %162 = arith.mulf %161, %160 : vector<128x512xf32>
    %163 = vector.extract_strided_slice %162 {offsets = [0, 0], sizes = [64, 512], strides = [1, 1]} : vector<128x512xf32> to vector<64x512xf32>
    %cst_59 = arith.constant dense<0.000000e+00> : vector<512xf32>
    %164 = vector.multi_reduction <add>, %163, %cst_59 [0] : vector<64x512xf32> to vector<512xf32>
    %165 = vector.shape_cast %164 : vector<512xf32> to vector<1x512xf32>
    %166 = vector.extract_strided_slice %162 {offsets = [64, 0], sizes = [64, 512], strides = [1, 1]} : vector<128x512xf32> to vector<64x512xf32>
    %cst_60 = arith.constant dense<0.000000e+00> : vector<512xf32>
    %167 = vector.multi_reduction <add>, %166, %cst_60 [0] : vector<64x512xf32> to vector<512xf32>
    %168 = vector.shape_cast %167 : vector<512xf32> to vector<1x512xf32>
    %169 = vector.broadcast %142 : vector<1x1xf32> to vector<1x512xf32>
    %170 = arith.addf %165, %169 : vector<1x512xf32>
    %171 = math.tanh %170 : vector<1x512xf32>
    %172 = vector.broadcast %143 : vector<1x1xf32> to vector<1x512xf32>
    %173 = arith.addf %168, %172 : vector<1x512xf32>
    %174 = arith.subf %94, %173 : vector<1x512xf32>
    %cst_61 = arith.constant 0.000000e+00 : f32
    %175 = vector.broadcast %cst_61 : f32 to vector<1x512xf32>
    %176 = arith.subf %175, %171 : vector<1x512xf32>
    %177 = math.exp %176 : vector<1x512xf32>
    %178 = arith.mulf %174, %177 : vector<1x512xf32>
    %179 = arith.subf %137, %171 : vector<1x512xf32>
    %c0_62 = arith.constant 0 : index
    %c1 = arith.constant 1 : index
    %180 = vector.load %arg3[%c0_62, %c1] : memref<128x128xf32, #tpu.memory_space<vmem>>, vector<128x1xf32>
    %c0_63 = arith.constant 0 : index
    %c9 = arith.constant 9 : index
    %181 = vector.load %arg3[%c0_63, %c9] : memref<128x128xf32, #tpu.memory_space<vmem>>, vector<128x1xf32>
    %c0_64 = arith.constant 0 : index
    %c17 = arith.constant 17 : index
    %182 = vector.load %arg3[%c0_64, %c17] : memref<128x128xf32, #tpu.memory_space<vmem>>, vector<128x1xf32>
    %c0_65 = arith.constant 0 : index
    %c25 = arith.constant 25 : index
    %183 = vector.load %arg3[%c0_65, %c25] : memref<128x128xf32, #tpu.memory_space<vmem>>, vector<128x1xf32>
    %c0_66 = arith.constant 0 : index
    %c33 = arith.constant 33 : index
    %184 = vector.load %arg3[%c0_66, %c33] : memref<128x128xf32, #tpu.memory_space<vmem>>, vector<1x1xf32>
    %c0_67 = arith.constant 0 : index
    %c41 = arith.constant 41 : index
    %185 = vector.load %arg3[%c0_67, %c41] : memref<128x128xf32, #tpu.memory_space<vmem>>, vector<1x1xf32>
    %186 = vector.broadcast %180 : vector<128x1xf32> to vector<128x512xf32>
    %187 = vector.broadcast %178 : vector<1x512xf32> to vector<128x512xf32>
    %188 = arith.mulf %186, %187 : vector<128x512xf32>
    %189 = vector.broadcast %181 : vector<128x1xf32> to vector<128x512xf32>
    %190 = arith.addf %188, %189 : vector<128x512xf32>
    %cst_68 = arith.constant 0.00999999977 : f32
    %191 = vector.broadcast %cst_68 : f32 to vector<128x512xf32>
    %192 = arith.mulf %191, %190 : vector<128x512xf32>
    %193 = arith.maximumf %190, %192 : vector<128x512xf32>
    %c1_69 = arith.constant 1 : index
    %c0_70 = arith.constant 0 : index
    %c0_71 = arith.constant 0 : index
    %194 = vector.load %arg2[%c1_69, %c0_70, %c0_71] : memref<6x128x128xbf16, #tpu.memory_space<vmem>>, vector<1x128x128xbf16>
    %195 = vector.shape_cast %194 : vector<1x128x128xbf16> to vector<128x128xbf16>
    %196 = arith.truncf %193 : vector<128x512xf32> to vector<128x512xbf16>
    %cst_72 = arith.constant dense<0.000000e+00> : vector<128x512xf32>
    %197 = tpu.matmul %195, %196, %cst_72 {dimension_numbers = #tpu.dot_dimension_numbers<[1], [0], [0], [1], [0, 0, 1, 1], [], []>} : vector<128x128xbf16>, vector<128x512xbf16>, vector<128x512xf32> -> vector<128x512xf32>
    %198 = vector.broadcast %182 : vector<128x1xf32> to vector<128x512xf32>
    %199 = arith.addf %197, %198 : vector<128x512xf32>
    %cst_73 = arith.constant 0.00999999977 : f32
    %200 = vector.broadcast %cst_73 : f32 to vector<128x512xf32>
    %201 = arith.mulf %200, %199 : vector<128x512xf32>
    %202 = arith.maximumf %199, %201 : vector<128x512xf32>
    %203 = vector.broadcast %183 : vector<128x1xf32> to vector<128x512xf32>
    %204 = arith.mulf %203, %202 : vector<128x512xf32>
    %205 = vector.extract_strided_slice %204 {offsets = [0, 0], sizes = [64, 512], strides = [1, 1]} : vector<128x512xf32> to vector<64x512xf32>
    %cst_74 = arith.constant dense<0.000000e+00> : vector<512xf32>
    %206 = vector.multi_reduction <add>, %205, %cst_74 [0] : vector<64x512xf32> to vector<512xf32>
    %207 = vector.shape_cast %206 : vector<512xf32> to vector<1x512xf32>
    %208 = vector.extract_strided_slice %204 {offsets = [64, 0], sizes = [64, 512], strides = [1, 1]} : vector<128x512xf32> to vector<64x512xf32>
    %cst_75 = arith.constant dense<0.000000e+00> : vector<512xf32>
    %209 = vector.multi_reduction <add>, %208, %cst_75 [0] : vector<64x512xf32> to vector<512xf32>
    %210 = vector.shape_cast %209 : vector<512xf32> to vector<1x512xf32>
    %211 = vector.broadcast %184 : vector<1x1xf32> to vector<1x512xf32>
    %212 = arith.addf %207, %211 : vector<1x512xf32>
    %213 = math.tanh %212 : vector<1x512xf32>
    %214 = vector.broadcast %185 : vector<1x1xf32> to vector<1x512xf32>
    %215 = arith.addf %210, %214 : vector<1x512xf32>
    %216 = arith.subf %136, %215 : vector<1x512xf32>
    %cst_76 = arith.constant 0.000000e+00 : f32
    %217 = vector.broadcast %cst_76 : f32 to vector<1x512xf32>
    %218 = arith.subf %217, %213 : vector<1x512xf32>
    %219 = math.exp %218 : vector<1x512xf32>
    %220 = arith.mulf %216, %219 : vector<1x512xf32>
    %221 = arith.subf %179, %213 : vector<1x512xf32>
    %c0_77 = arith.constant 0 : index
    %c0_78 = arith.constant 0 : index
    %222 = vector.load %arg3[%c0_77, %c0_78] : memref<128x128xf32, #tpu.memory_space<vmem>>, vector<128x1xf32>
    %c0_79 = arith.constant 0 : index
    %c8 = arith.constant 8 : index
    %223 = vector.load %arg3[%c0_79, %c8] : memref<128x128xf32, #tpu.memory_space<vmem>>, vector<128x1xf32>
    %c0_80 = arith.constant 0 : index
    %c16 = arith.constant 16 : index
    %224 = vector.load %arg3[%c0_80, %c16] : memref<128x128xf32, #tpu.memory_space<vmem>>, vector<128x1xf32>
    %c0_81 = arith.constant 0 : index
    %c24 = arith.constant 24 : index
    %225 = vector.load %arg3[%c0_81, %c24] : memref<128x128xf32, #tpu.memory_space<vmem>>, vector<128x1xf32>
    %c0_82 = arith.constant 0 : index
    %c32 = arith.constant 32 : index
    %226 = vector.load %arg3[%c0_82, %c32] : memref<128x128xf32, #tpu.memory_space<vmem>>, vector<1x1xf32>
    %c0_83 = arith.constant 0 : index
    %c40 = arith.constant 40 : index
    %227 = vector.load %arg3[%c0_83, %c40] : memref<128x128xf32, #tpu.memory_space<vmem>>, vector<1x1xf32>
    %228 = vector.broadcast %222 : vector<128x1xf32> to vector<128x512xf32>
    %229 = vector.broadcast %220 : vector<1x512xf32> to vector<128x512xf32>
    %230 = arith.mulf %228, %229 : vector<128x512xf32>
    %231 = vector.broadcast %223 : vector<128x1xf32> to vector<128x512xf32>
    %232 = arith.addf %230, %231 : vector<128x512xf32>
    %cst_84 = arith.constant 0.00999999977 : f32
    %233 = vector.broadcast %cst_84 : f32 to vector<128x512xf32>
    %234 = arith.mulf %233, %232 : vector<128x512xf32>
    %235 = arith.maximumf %232, %234 : vector<128x512xf32>
    %c0_85 = arith.constant 0 : index
    %c0_86 = arith.constant 0 : index
    %c0_87 = arith.constant 0 : index
    %236 = vector.load %arg2[%c0_85, %c0_86, %c0_87] : memref<6x128x128xbf16, #tpu.memory_space<vmem>>, vector<1x128x128xbf16>
    %237 = vector.shape_cast %236 : vector<1x128x128xbf16> to vector<128x128xbf16>
    %238 = arith.truncf %235 : vector<128x512xf32> to vector<128x512xbf16>
    %cst_88 = arith.constant dense<0.000000e+00> : vector<128x512xf32>
    %239 = tpu.matmul %237, %238, %cst_88 {dimension_numbers = #tpu.dot_dimension_numbers<[1], [0], [0], [1], [0, 0, 1, 1], [], []>} : vector<128x128xbf16>, vector<128x512xbf16>, vector<128x512xf32> -> vector<128x512xf32>
    %240 = vector.broadcast %224 : vector<128x1xf32> to vector<128x512xf32>
    %241 = arith.addf %239, %240 : vector<128x512xf32>
    %cst_89 = arith.constant 0.00999999977 : f32
    %242 = vector.broadcast %cst_89 : f32 to vector<128x512xf32>
    %243 = arith.mulf %242, %241 : vector<128x512xf32>
    %244 = arith.maximumf %241, %243 : vector<128x512xf32>
    %245 = vector.broadcast %225 : vector<128x1xf32> to vector<128x512xf32>
    %246 = arith.mulf %245, %244 : vector<128x512xf32>
    %247 = vector.extract_strided_slice %246 {offsets = [0, 0], sizes = [64, 512], strides = [1, 1]} : vector<128x512xf32> to vector<64x512xf32>
    %cst_90 = arith.constant dense<0.000000e+00> : vector<512xf32>
    %248 = vector.multi_reduction <add>, %247, %cst_90 [0] : vector<64x512xf32> to vector<512xf32>
    %249 = vector.shape_cast %248 : vector<512xf32> to vector<1x512xf32>
    %250 = vector.extract_strided_slice %246 {offsets = [64, 0], sizes = [64, 512], strides = [1, 1]} : vector<128x512xf32> to vector<64x512xf32>
    %cst_91 = arith.constant dense<0.000000e+00> : vector<512xf32>
    %251 = vector.multi_reduction <add>, %250, %cst_91 [0] : vector<64x512xf32> to vector<512xf32>
    %252 = vector.shape_cast %251 : vector<512xf32> to vector<1x512xf32>
    %253 = vector.broadcast %226 : vector<1x1xf32> to vector<1x512xf32>
    %254 = arith.addf %249, %253 : vector<1x512xf32>
    %255 = math.tanh %254 : vector<1x512xf32>
    %256 = vector.broadcast %227 : vector<1x1xf32> to vector<1x512xf32>
    %257 = arith.addf %252, %256 : vector<1x512xf32>
    %258 = arith.subf %178, %257 : vector<1x512xf32>
    %cst_92 = arith.constant 0.000000e+00 : f32
    %259 = vector.broadcast %cst_92 : f32 to vector<1x512xf32>
    %260 = arith.subf %259, %255 : vector<1x512xf32>
    %261 = math.exp %260 : vector<1x512xf32>
    %262 = arith.mulf %258, %261 : vector<1x512xf32>
    %263 = arith.subf %221, %255 : vector<1x512xf32>
    %264 = arith.mulf %262, %262 : vector<1x512xf32>
    %265 = arith.mulf %220, %220 : vector<1x512xf32>
    %266 = arith.addf %264, %265 : vector<1x512xf32>
    %cst_93 = arith.constant -5.000000e-01 : f32
    %267 = vector.broadcast %cst_93 : f32 to vector<1x512xf32>
    %268 = arith.mulf %267, %266 : vector<1x512xf32>
    %cst_94 = arith.constant 1.83787704 : f32
    %269 = vector.broadcast %cst_94 : f32 to vector<1x512xf32>
    %270 = arith.subf %268, %269 : vector<1x512xf32>
    %271 = arith.addf %270, %263 : vector<1x512xf32>
    %272 = math.log %2 : vector<2x512xf32>
    %cst_95 = arith.constant 2.000000e+00 : f32
    %273 = vector.broadcast %cst_95 : f32 to vector<2x512xf32>
    %274 = arith.mulf %273, %272 : vector<2x512xf32>
    %cst_96 = arith.constant 0.693147182 : f32
    %275 = vector.broadcast %cst_96 : f32 to vector<2x512xf32>
    %276 = arith.addf %274, %275 : vector<2x512xf32>
    %277 = math.absf %8 : vector<2x512xf32>
    %278 = arith.addf %276, %277 : vector<2x512xf32>
    %279 = vector.extract_strided_slice %278 {offsets = [0, 0], sizes = [1, 512], strides = [1, 1]} : vector<2x512xf32> to vector<1x512xf32>
    %280 = vector.extract_strided_slice %278 {offsets = [1, 0], sizes = [1, 512], strides = [1, 1]} : vector<2x512xf32> to vector<1x512xf32>
    %281 = arith.addf %279, %280 : vector<1x512xf32>
    %cst_97 = arith.constant 2.000000e+00 : f32
    %282 = vector.broadcast %cst_97 : f32 to vector<1x512xf32>
    %283 = arith.mulf %282, %271 : vector<1x512xf32>
    %284 = arith.subf %281, %283 : vector<1x512xf32>
    %285 = arith.mulf %284, %4 : vector<1x512xf32>
    %cst_98 = arith.constant dense<0.000000e+00> : vector<1xf32>
    %286 = vector.multi_reduction <add>, %285, %cst_98 [1] : vector<1x512xf32> to vector<1xf32>
    %287 = vector.shape_cast %286 : vector<1xf32> to vector<1x1xf32>
    %c0_99 = arith.constant 0 : index
    %c0_100 = arith.constant 0 : index
    %288 = vector.load %arg4[%c0_99, %c0_100] : memref<1x1xf32, #tpu.memory_space<vmem>>, vector<1x1xf32>
    tpu.vector_store %arg4[%c0_99, %c0_100], %287 {strides = array<i32>} : memref<1x1xf32, #tpu.memory_space<vmem>>, vector<1x1xf32>,
    return
  }
  func.func @transform_0(%arg0: i32) -> (i32, i32) {
    %c0_i32 = arith.constant 0 : i32
    %c0_i32_0 = arith.constant 0 : i32
    return %c0_i32, %arg0 : i32, i32
  }
  func.func @transform_1(%arg0: i32) -> (i32, i32, i32) {
    %c0_i32 = arith.constant 0 : i32
    %c0_i32_0 = arith.constant 0 : i32
    %c0_i32_1 = arith.constant 0 : i32
    %c0_i32_2 = arith.constant 0 : i32
    return %c0_i32, %c0_i32_0, %c0_i32_1 : i32, i32, i32
  }
  func.func @transform_2(%arg0: i32) -> (i32, i32) {
    %c0_i32 = arith.constant 0 : i32
    %c0_i32_0 = arith.constant 0 : i32
    %c0_i32_1 = arith.constant 0 : i32
    return %c0_i32, %c0_i32_0 : i32, i32
  }
  func.func @transform_3(%arg0: i32) -> (i32, i32) {
    %c0_i32 = arith.constant 0 : i32
    %c0_i32_0 = arith.constant 0 : i32
    return %arg0, %c0_i32 : i32, i32
  }
}

</mosaic_0001>

<bundles_post_ra>
// kernel: rle_loss_pallas.1
= control target key start
LH: loop header
LB: loop body
LE: loop exit
PB: predicated region body
PF: predicated region fallthrough
CT: control target
= control target key end

     0   :  { %8 = vsyncpa [#allocation3], 0  ;;  %s13478_s0 = inlined_call_operand.vmem [shape: f32[8,512], index: 0, kind: input, shape index: {}]   ;;  %s13479_s1 = inlined_call_operand.hbm [shape: bf16[6,128,128], index: 1, kind: input, shape index: {}]   ;;  %s13480_s2 = inlined_call_operand.vmem [shape: f32[128,128], index: 2, kind: input, shape index: {}]   ;;  %s13481_s3 = inlined_call_operand.hbm [shape: f32[1,1], index: 3, kind: output, shape index: {}]  }
   0x1   :  { %9 = vsyncpa [#allocation4], 0  ;;  %s8075_s12 = smov [#allocation2]  }
   0x2   :  { %s17_s13 = sshll.u32 %s8075_s12, 4  ;;  %s18_s13 = int_to_ptr.vmem [resolvable:$true] %s17_s13 }
   0x3   :  { %s8039_s14 = scalar_lea.vmem %s18_s13, 6144  ;;  %p8044_p1 = scmp.lt.s32.totalorder %s18_s13, %s18_s13 }
   0x4   :  { %p8040_p0 = scmp.ne.s32.totalorder %s18_s13, %s8039_s14  ;;  %p8045_p2 = scmp.lt.s32.totalorder %s8039_s14, %s8039_s14 }
   0x6   :  { %p8046_p3 = por %p8045_p2, %p8044_p1 }
   0x8   :  { %p8047_p4 = pnand %p8046_p3, %p8040_p0 }
   0xa   :  { %8050 = shalt.err (!%p8047_p4)
}
   0xb   :  { %s8076_s15 = smov 64   ;;  %s8077_s16 = smov 4  }
   0xc   :  { %23 = dma.hbm_to_vmem [thread:$0]  %s13479_s1, 6144, %s18_s13, [#allocation3], %s8076_s15, %s8076_s15, %s8077_s16  }
   0xd   :  { %8071 = dma.done.wait [#allocation3], 6144  }
   0xe   :  { %8072 = vsyncadd [#allocation3], 4294961152  ;;  %v8078_v0 = vmov 13   ;;  %v8143_v1 = vld [vmem:[%s13480_s2 + $0x70] sm:$0xff]  ;;  %v8148_v2 = vld [vmem:[%s13480_s2 + $0x60] sm:$0xff]  ;;  %v8079_v7 = vmov 5   ;;  %v171_v33 = vlaneseq }
   0xf   :  { %7554 = vset.pattern.permute.xlu0 %v8078_v0  ;;  %7552 = vset.pattern.permute.xlu1 %v8078_v0  ;;  %v8155_v3 = vld [vmem:[%s13480_s2 + $0x78] sm:$0xff]  ;;  %v8160_v4 = vld [vmem:[%s13480_s2 + $0x40] sm:$0xff]  ;;  %v8170_v6 = vld [vmem:[%s13480_s2 + $0x68] sm:$0xff]  ;;  %v13488_v18 = vmov 21   ;;  %v13490_v19 = vmov 29   ;;  %v13486_v20 = vmov 0  }
  0x10   :  { %308 = vperm.xlu1 %7552, %v8143_v1   ;;  %300 = vperm.xlu0 %7554, %v8148_v2   ;;  %v78_v5 = vld [vmem:[%s13480_s2 + $0x20] sm:$0xff]  ;;  %v8179_v8 = vld [vmem:[%s13480_s2 + $0x50] sm:$0xff]  ;;  %v8186_v9 = vld [vmem:[%s13480_s2 + $0x58] sm:$0xff]  ;;  %v8294_v42 = vshrl.u32 %v171_v33, 7  ;;  %vm7433_vm0 = vcmask 1042434   ;;  %vm7443_vm1 = vcmask 2050  }
  0x11   :  { %v8196_v10 = vld [vmem:[%s13480_s2 + $0x48] sm:$0xff]  ;;  %v8201_v11 = vld [vmem:[%s13480_s2 + $0x38] sm:$0xff]  ;;  %v8216_v13 = vld [vmem:[%s13480_s2 + $0x30] sm:$0xff]  ;;  %700 = vmatprep.mubr.bf16.mxu0 %v13486_v20  ;;  %813 = vmatprep.mubr.bf16.mxu1 %v13486_v20 }
  0x12   :  { %v8209_v12 = vld [vmem:[%s13480_s2 + $0x18] sm:$0xff]  ;;  %v74_v14 = vld [vmem:[%s13480_s2] sm:$0xff]  ;;  %v8230_v15 = vld [vmem:[%s13480_s2 + $0x28] sm:$0xff]  ;;  %13844 = vst [vmem:[#allocation12_spill] sm:$0xff] %v8294_v42  ;;  %v8315_v51 = vsub.s32 0, %v8294_v42 }
  0x13   :  { %v8238_v16 = vld [vmem:[%s13480_s2 + $0x10] sm:$0xff]  ;;  %v75_v17 = vld [vmem:[%s13480_s2 + $0x8] sm:$0xff]  ;;  %v8259_v21 = vld [vmem:[%s13478_s0] sm:$0xff] }
  0x14   :  { %312 = vperm.xlu1 %7552, %v8155_v3   ;;  %284 = vperm.xlu0 %7554, %v8160_v4   ;;  %13840 = vst [vmem:[#allocation8_spill] sm:$0xff] %v8259_v21  ;;  %v8264_v22 = vld [vmem:[%s13478_s0 + $0x8] sm:$0xff]  ;;  %v8269_v23 = vld [vmem:[%s13478_s0 + $0x18] sm:$0xff]  ;;  %v8275_v24 = vld [vmem:[%s13478_s0 + $0x10] sm:$0xff]  ;;  %v50_v25 = vadd.f32 1e-09, %v8259_v21 }
  0x15   :  { %13841 = vst [vmem:[#allocation9_spill] sm:$0xff] %v8264_v22  ;;  %13842 = vst [vmem:[#allocation10_spill] sm:$0xff] %v8269_v23  ;;  %v51_v26 = vadd.f32 1e-09, %v8264_v22  ;;  %v53_v27 = vadd.f32 1e-09, %v8269_v23 }
  0x16   :  { %13843 = vst [vmem:[#allocation11_spill] sm:$0xff] %v8275_v24  ;;  %v52_v28 = vadd.f32 1e-09, %v8275_v24  ;;  %v58_v29 = vrot.slane %v50_v25, 2  ;;  %v13484_v34 = vrot.slane %v8264_v22, 4  ;;  %v13482_v35 = vrot.slane %v8269_v23, 4 }
  0x17   :  { %v59_v30 = vrot.slane %v51_v26, 2  ;;  %v61_v31 = vrot.slane %v53_v27, 2  ;;  %v13485_v38 = vrot.slane %v8259_v21, 4  ;;  %v13483_v39 = vrot.slane %v8275_v24, 4  ;;  %13845 = vst [vmem:[#allocation13_spill] sm:$0xff] %v8315_v51 }
  0x18   :  { %7553 = vset.pattern.permute.xlu1 %v8079_v7  ;;  %268 = vperm.xlu0 %7554, %v78_v5   ;;  %v60_v32 = vrot.slane %v52_v28, 2  ;;  %7808 = vrcp.f32 %v58_v29  ;;  %v47_v43 = vsub.f32 %v8264_v22, %v13484_v34  ;;  %v49_v44 = vsub.f32 %v8269_v23, %v13482_v35 }
  0x19   :  { %158 = vperm.xlu1 %7553, %v8170_v6   ;;  %7810 = vrcp.f32 %v59_v30  ;;  %v46_v48 = vsub.f32 %v8259_v21, %v13485_v38  ;;  %v48_v49 = vsub.f32 %v8275_v24, %v13483_v39 }
  0x1a   :  { %7812 = vrcp.f32 %v61_v31 }
  0x1b   :  { %7814 = vrcp.f32 %v60_v32 }
  0x1c   :  { %7563 = vset.pattern.permute.xlu0 %v8079_v7 }
  0x1d   :  { %7555 = vset.pattern.permute.xlu1 %v8078_v0  ;;  %163 = vperm.xlu0 %7563, %v8143_v1  }
  0x1e   :  { %304 = vperm.xlu1 %7555, %v8170_v6  }
  0x21   :  { %168 = vperm.xlu0 %7563, %v8155_v3  }
  0x22   :  { %7556 = vset.pattern.permute.xlu1 %v8079_v7 }
  0x23   :  { %143 = vperm.xlu1 %7556, %v8179_v8  }
  0x25   :  { %153 = vperm.xlu0 %7563, %v8148_v2   ;;  %v7809_v40 = vpop.eup %7808 }
  0x26   :  { %v7811_v41 = vpop.eup %7810  ;;  %v8321_v54 = vmul.f32 %v7809_v40, %v46_v48 }
  0x27   :  { %7557 = vset.pattern.permute.xlu1 %v8078_v0  ;;  %v7813_v45 = vpop.eup %7812  ;;  %v8317_v52 = vmul.f32 %v7811_v41, %v47_v43 }
  0x28   :  { %292 = vperm.xlu1 %7557, %v8179_v8   ;;  %v7815_v50 = vpop.eup %7814  ;;  %v8319_v53 = vmul.f32 %v7813_v45, %v49_v44  ;;  %13848 = vst [vmem:[#allocation16_spill] sm:$0xff] %v8321_v54  ;;  %v8338_v60 = vrot.slane %v8321_v54, %v8315_v51 }
  0x29   :  { %148 = vperm.xlu0 %7563, %v8186_v9   ;;  %13846 = vst [vmem:[#allocation14_spill] sm:$0xff] %v8317_v52  ;;  %v8323_v55 = vmul.f32 %v7815_v50, %v48_v49  ;;  %v8330_v58 = vrot.slane %v8317_v52, %v8315_v51 }
  0x2a   :  { %13847 = vst [vmem:[#allocation15_spill] sm:$0xff] %v8319_v53  ;;  %v8334_v59 = vrot.slane %v8319_v53, %v8315_v51 }
  0x2b   :  { %13849 = vst [vmem:[#allocation17_spill] sm:$0xff] %v8323_v55  ;;  %v8342_v61 = vrot.slane %v8323_v55, %v8315_v51 }
  0x2c   :  { %296 = vperm.xlu1 %7557, %v8186_v9  }
  0x2d   :  { %133 = vperm.xlu0 %7563, %v8160_v4  }
  0x30   :  { %7558 = vset.pattern.permute.xlu1 %v8079_v7 }
  0x31   :  { %138 = vperm.xlu1 %7558, %v8196_v10   ;;  %128 = vperm.xlu0 %7563, %v8201_v11  }
  0x35   :  { %7559 = vset.pattern.permute.xlu1 %v8078_v0  ;;  %113 = vperm.xlu0 %7563, %v78_v5  }
  0x36   :  { %288 = vperm.xlu1 %7559, %v8196_v10  }
  0x39   :  { %108 = vperm.xlu0 %7563, %v8209_v12  }
  0x3a   :  { %7560 = vset.pattern.permute.xlu1 %v8079_v7 }
  0x3b   :  { %123 = vperm.xlu1 %7560, %v8216_v13  }
  0x3d   :  { %93 = vperm.xlu0 %7563, %v74_v14  }
  0x3f   :  { %7561 = vset.pattern.permute.xlu1 %v8078_v0 }
  0x40   :  { %276 = vperm.xlu1 %7561, %v8216_v13  }
  0x41   :  { %7568 = vset.pattern.permute.xlu0 %v8078_v0 }
  0x42   :  { %252 = vperm.xlu0 %7568, %v74_v14  }
  0x44   :  { %280 = vperm.xlu1 %7561, %v8201_v11  }
  0x46   :  { %7571 = vset.pattern.permute.xlu0 %v13488_v18 }
  0x47   :  { %561 = vperm.xlu0 %7571, %v75_v17  }
  0x48   :  { %7562 = vset.pattern.permute.xlu1 %v8079_v7 }
  0x49   :  { %118 = vperm.xlu1 %7562, %v8230_v15  }
  0x4b   :  { %573 = vperm.xlu0 %7571, %v78_v5  }
  0x4d   :  { %7564 = vset.pattern.permute.xlu1 %v8078_v0 }
  0x4e   :  { %272 = vperm.xlu1 %7564, %v8230_v15  }
  0x4f   :  { %581 = vperm.xlu0 %7571, %v8216_v13  }
  0x52   :  { %7565 = vset.pattern.permute.xlu1 %v8079_v7 }
  0x53   :  { %103 = vperm.xlu1 %7565, %v8238_v16   ;;  %7575 = vset.pattern.permute.xlu0 %v13490_v19 }
  0x54   :  { %1027 = vperm.xlu0 %7575, %v75_v17  }
  0x57   :  { %7566 = vset.pattern.permute.xlu1 %v8078_v0 }
  0x58   :  { %260 = vperm.xlu1 %7566, %v8238_v16   ;;  %1039 = vperm.xlu0 %7575, %v78_v5  }
  0x5c   :  { %264 = vperm.xlu1 %7566, %v8209_v12  }
  0x60   :  { %7567 = vset.pattern.permute.xlu1 %v8079_v7 }
  0x61   :  { %98 = vperm.xlu1 %7567, %v75_v17  }
  0x65   :  { %7569 = vset.pattern.permute.xlu1 %v8078_v0 }
  0x66   :  { %256 = vperm.xlu1 %7569, %v75_v17  }
  0x6a   :  { %7570 = vset.pattern.permute.xlu1 %v13488_v18 }
  0x6b   :  { %557 = vperm.xlu1 %7570, %v74_v14  }
  0x6f   :  { %565 = vperm.xlu1 %7570, %v8238_v16  }
  0x73   :  { %569 = vperm.xlu1 %7570, %v8209_v12  }
  0x77   :  { %7572 = vset.pattern.permute.xlu1 %v13490_v19 }
  0x78   :  { %1023 = vperm.xlu1 %7572, %v74_v14  }
  0x7c   :  { %7573 = vset.pattern.permute.xlu1 %v13488_v18 }
  0x7d   :  { %577 = vperm.xlu1 %7573, %v8230_v15  }
  0x81   :  { %7574 = vset.pattern.permute.xlu1 %v13490_v19 }
  0x82   :  { %1031 = vperm.xlu1 %7574, %v8238_v16  }
  0x86   :  { %1035 = vperm.xlu1 %7574, %v8209_v12  }
  0x8a   :  { %7576 = vset.pattern.permute.xlu1 %v13488_v18 }
  0x8b   :  { %v309_v36 = vpop.permute.xlu1 %308  ;;  %v8289_v37 = vpop.permute.xlu0 %300  ;;  %585 = vperm.xlu1 %7576, %v8201_v11  }
  0x8f   :  { %v8302_v46 = vpop.permute.xlu1 %312  ;;  %v8304_v47 = vpop.permute.xlu0 %284  ;;  %7577 = vset.pattern.permute.xlu1 %v13490_v19 }
  0x90   :  { %1043 = vperm.xlu1 %7577, %v8230_v15  }
  0x93   :  { %v8325_v56 = vpop.permute.xlu0 %268 }
  0x94   :  { %v159_v57 = vpop.permute.xlu1 %158  ;;  %1047 = vperm.xlu1 %7577, %v8216_v13  }
  0x95   :  { %v240_v13 = vmul.f32 %v8330_v58, %v159_v57  ;;  %v242_v14 = vmul.f32 %v8334_v59, %v159_v57  ;;  %v239_v25 = vmul.f32 %v8338_v60, %v159_v57  ;;  %v241_v26 = vmul.f32 %v8342_v61, %v159_v57 }
  0x98   :  { %v164_v62 = vpop.permute.xlu0 %163  ;;  %7578 = vset.pattern.permute.xlu1 %v13488_v18 }
  0x99   :  { %v305_v63 = vpop.permute.xlu1 %304  ;;  %v244_v0 = vmul.f32 %v8330_v58, %v164_v62  ;;  %v246_v5 = vmul.f32 %v8334_v59, %v164_v62  ;;  %v243_v7 = vmul.f32 %v8338_v60, %v164_v62  ;;  %v245_v12 = vmul.f32 %v8342_v61, %v164_v62  ;;  %589 = vperm.xlu1 %7578, %v8160_v4  }
  0x9a   :  { %v8354_v28 = vadd.f32 %v305_v63, %v240_v13  ;;  %v8356_v29 = vadd.f32 %v305_v63, %v242_v14  ;;  %v8365_v48 = vadd.f32 %v305_v63, %v239_v25  ;;  %v8367_v49 = vadd.f32 %v305_v63, %v241_v26 }
  0x9b   :  { %v372_v15 = vadd.f32 %v309_v36, %v244_v0  ;;  %v374_v17 = vadd.f32 %v309_v36, %v246_v5  ;;  %v371_v32 = vadd.f32 %v309_v36, %v243_v7  ;;  %v373_v33 = vadd.f32 %v309_v36, %v245_v12 }
  0x9c   :  { %v169_v27 = vpop.permute.xlu0 %168  ;;  %v432_v36 = vmul.f32 0.01, %v8354_v28  ;;  %v434_v0 = vmul.f32 0.01, %v8356_v29 }
  0x9d   :  { %v248_v30 = vmul.f32 %v8330_v58, %v169_v27  ;;  %v250_v31 = vmul.f32 %v8334_v59, %v169_v27  ;;  %597 = vperm.xlu1 %7578, %v8179_v8   ;;  %v436_v41 = vmul.f32 0.01, %v372_v15  ;;  %v247_v43 = vmul.f32 %v8338_v60, %v169_v27 }
  0x9e   :  { %v8361_v40 = vpop.permute.xlu1 %143  ;;  %v438_v44 = vmul.f32 0.01, %v374_v17  ;;  %v249_v45 = vmul.f32 %v8342_v61, %v169_v27  ;;  %v435_v12 = vmul.f32 0.01, %v371_v32  ;;  %v437_v13 = vmul.f32 0.01, %v373_v33 }
  0x9f   :  { %v376_v57 = vadd.f32 %v8302_v46, %v248_v30  ;;  %v378_v62 = vadd.f32 %v8302_v46, %v250_v31  ;;  %v500_v63 = vmax.f32 %v372_v15, %v436_v41  ;;  %v375_v26 = vadd.f32 %v8302_v46, %v247_v43 }
  0xa0   :  { %v154_v50 = vpop.permute.xlu0 %153  ;;  %v502_v31 = vmax.f32 %v374_v17, %v438_v44  ;;  %v377_v35 = vadd.f32 %v8302_v46, %v249_v45  ;;  %v227_v15 = vmul.f32 %v8338_v60, %v8361_v40  ;;  %v228_v41 = vmul.f32 %v8330_v58, %v8361_v40 }
  0xa1   :  { %v236_v5 = vmul.f32 %v8330_v58, %v154_v50  ;;  %v238_v7 = vmul.f32 %v8334_v59, %v154_v50  ;;  %601 = vperm.xlu1 %7578, %v8186_v9   ;;  %v440_v14 = vmul.f32 0.01, %v376_v57  ;;  %v442_v25 = vmul.f32 0.01, %v378_v62 }
  0xa2   :  { %v235_v27 = vmul.f32 %v8338_v60, %v154_v50  ;;  %v439_v18 = vmul.f32 0.01, %v375_v26  ;;  %v237_v43 = vmul.f32 %v8342_v61, %v154_v50  ;;  %v499_v23 = vmax.f32 %v371_v32, %v435_v12 }
  0xa3   :  { %v8378_v30 = vpop.permute.xlu1 %292  ;;  %v364_v39 = vadd.f32 %v8289_v37, %v236_v5  ;;  %v504_v38 = vmax.f32 %v376_v57, %v440_v14  ;;  %v506_v20 = vmax.f32 %v378_v62, %v442_v25  ;;  %v366_v19 = vadd.f32 %v8289_v37, %v238_v7 }
  0xa4   :  { %v149_v34 = vpop.permute.xlu0 %148  ;;  %v503_v44 = vmax.f32 %v375_v26, %v439_v18  ;;  %v441_v45 = vmul.f32 0.01, %v377_v35  ;;  %v363_v14 = vadd.f32 %v8289_v37, %v235_v27  ;;  %v501_v50 = vmax.f32 %v373_v33, %v437_v13 }
  0xa5   :  { %605 = vperm.xlu1 %7578, %v8148_v2   ;;  %v553_v46 = vpack.c.bf16 %v504_v38, %v500_v63  ;;  %v555_v17 = vpack.c.bf16 %v506_v20, %v502_v31  ;;  %v232_v57 = vmul.f32 %v8330_v58, %v149_v34  ;;  %v428_v5 = vmul.f32 0.01, %v364_v39 }
  0xa6   :  { %v430_v7 = vmul.f32 0.01, %v366_v19  ;;  %v552_v24 = vpack.c.bf16 %v503_v44, %v499_v23  ;;  %v505_v32 = vmax.f32 %v377_v35, %v441_v45  ;;  %v431_v2 = vmul.f32 0.01, %v8365_v48 }
  0xa7   :  { %v8390_v62 = vpop.permute.xlu1 %296  ;;  %668 = vmatprep.subr.bf16.mxu0 %v553_v46  ;;  %781 = vmatprep.subr.bf16.mxu1 %v555_v17  ;;  %v230_v18 = vmul.f32 %v8334_v59, %v8361_v40  ;;  %v234_v20 = vmul.f32 %v8334_v59, %v149_v34  ;;  %v496_v38 = vmax.f32 %v8354_v28, %v432_v36  ;;  %v13850_v63 = vmov 29  }
  0xa8   :  { %v134_v25 = vpop.permute.xlu0 %133  ;;  %v498_v12 = vmax.f32 %v8356_v29, %v434_v0  ;;  %669 = vmatpush1.bf16.msra.mxu0 %v552_v24  ;;  %v554_v26 = vpack.c.bf16 %v505_v32, %v501_v50  ;;  %v492_v27 = vmax.f32 %v364_v39, %v428_v5  ;;  %v494_v31 = vmax.f32 %v366_v19, %v430_v7 }
  0xa9   :  { %7581 = vset.pattern.permute.xlu1 %v13850_v63  ;;  %v427_v23 = vmul.f32 0.01, %v363_v14  ;;  %v365_v35 = vadd.f32 %v8289_v37, %v237_v43  ;;  %v433_v33 = vmul.f32 0.01, %v8367_v49  ;;  %v356_v13 = vadd.f32 %v8378_v30, %v228_v41 }
  0xaa   :  { %1055 = vperm.xlu1 %7581, %v8160_v4   ;;  %v360_v46 = vadd.f32 %v8390_v62, %v232_v57  ;;  %782 = vmatpush1.bf16.msra.mxu1 %v554_v26  ;;  %v549_v28 = vpack.c.bf16 %v496_v38, %v492_v27  ;;  %v551_v29 = vpack.c.bf16 %v498_v12, %v494_v31 }
  0xab   :  { %v491_v0 = vmax.f32 %v363_v14, %v427_v23  ;;  %v358_v24 = vadd.f32 %v8378_v30, %v230_v18  ;;  %v229_v19 = vmul.f32 %v8342_v61, %v8361_v40  ;;  %v231_v4 = vmul.f32 %v8338_v60, %v149_v34 }
  0xac   :  { %v139_v36 = vpop.permute.xlu1 %138  ;;  %v233_v37 = vmul.f32 %v8342_v61, %v149_v34  ;;  %v495_v39 = vmax.f32 %v8365_v48, %v431_v2  ;;  %v8412_v41 = vmul.f32 %v8338_v60, %v134_v25  ;;  %v220_v43 = vmul.f32 %v8330_v58, %v134_v25  ;;  %670 = vmatprep.subr.bf16.mxu0 %v549_v28  ;;  %v129_v44 = vpop.permute.xlu0 %128 }
  0xad   :  { %v8416_v17 = vmul.f32 %v8342_v61, %v134_v25  ;;  %783 = vmatprep.subr.bf16.mxu1 %v551_v29  ;;  %v429_v45 = vmul.f32 0.01, %v365_v35  ;;  %v497_v40 = vmax.f32 %v8367_v49, %v433_v33  ;;  %v420_v5 = vmul.f32 0.01, %v356_v13 }
  0xae   :  { %v548_v57 = vpack.c.bf16 %v495_v39, %v491_v0  ;;  %v424_v7 = vmul.f32 0.01, %v360_v46  ;;  %v13851_v34 = vmov 21   ;;  %v362_v14 = vadd.f32 %v8390_v62, %v234_v20 }
  0xaf   :  { %7583 = vset.pattern.permute.xlu1 %v13851_v34  ;;  %v493_v48 = vmax.f32 %v365_v35, %v429_v45  ;;  %v422_v50 = vmul.f32 0.01, %v358_v24  ;;  %v355_v32 = vadd.f32 %v8378_v30, %v227_v15  ;;  %v222_v2 = vmul.f32 %v8334_v59, %v134_v25 }
  0xb0   :  { %609 = vperm.xlu1 %7583, %v8170_v6   ;;  %v223_v18 = vmul.f32 %v8338_v60, %v139_v36  ;;  %v224_v38 = vmul.f32 %v8330_v58, %v139_v36  ;;  %v225_v49 = vmul.f32 %v8342_v61, %v139_v36  ;;  %671 = vmatpush1.bf16.msra.mxu0 %v548_v57  ;;  %v426_v23 = vmul.f32 0.01, %v362_v14  ;;  %v114_v25 = vpop.permute.xlu0 %113 }
  0xb1   :  { %v289_v12 = vpop.permute.xlu1 %288  ;;  %v550_v26 = vpack.c.bf16 %v497_v40, %v493_v48  ;;  %v484_v27 = vmax.f32 %v356_v13, %v420_v5  ;;  %v488_v31 = vmax.f32 %v360_v46, %v424_v7  ;;  %v226_v20 = vmul.f32 %v8334_v59, %v139_v36 }
  0xb2   :  { %v359_v15 = vadd.f32 %v8390_v62, %v231_v4  ;;  %v419_v35 = vmul.f32 0.01, %v355_v32  ;;  %v357_v33 = vadd.f32 %v8378_v30, %v229_v19  ;;  %v486_v29 = vmax.f32 %v358_v24, %v422_v50 }
  0xb3   :  { %784 = vmatpush1.bf16.msra.mxu1 %v550_v26  ;;  %v545_v28 = vpack.c.bf16 %v488_v31, %v484_v27  ;;  %v490_v0 = vmax.f32 %v362_v14, %v426_v23  ;;  %v361_v39 = vadd.f32 %v8390_v62, %v233_v37  ;;  %v8432_v45 = vmul.f32 %v8338_v60, %v129_v44 }
  0xb4   :  { %v216_v13 = vmul.f32 %v8330_v58, %v129_v44  ;;  %v423_v46 = vmul.f32 0.01, %v359_v15  ;;  %v421_v57 = vmul.f32 0.01, %v357_v33  ;;  %7584 = vset.pattern.permute.xlu1 %v13850_v63  ;;  %v8437_v36 = vmul.f32 %v8342_v61, %v129_v44 }
  0xb5   :  { %672 = vmatprep.subr.bf16.mxu0 %v545_v28  ;;  %v547_v30 = vpack.c.bf16 %v490_v0, %v486_v29  ;;  %v425_v19 = vmul.f32 0.01, %v361_v39  ;;  %v348_v24 = vadd.f32 %v8304_v47, %v220_v43  ;;  %1063 = vperm.xlu1 %7584, %v8179_v8   ;;  %v218_v62 = vmul.f32 %v8334_v59, %v129_v44 }
  0xb6   :  { %v124_v4 = vpop.permute.xlu1 %123  ;;  %v8443_v37 = vmul.f32 %v8338_v60, %v114_v25  ;;  %v483_v40 = vmax.f32 %v355_v32, %v419_v35  ;;  %v487_v5 = vmax.f32 %v359_v15, %v423_v46  ;;  %v8446_v7 = vmul.f32 %v8330_v58, %v114_v25 }
  0xb7   :  { %v8449_v48 = vmul.f32 %v8342_v61, %v114_v25  ;;  %785 = vmatprep.subr.bf16.mxu1 %v547_v30  ;;  %v485_v14 = vmax.f32 %v357_v33, %v421_v57  ;;  %v489_v50 = vmax.f32 %v361_v39, %v425_v19  ;;  %v8452_v43 = vmul.f32 %v8334_v59, %v114_v25 }
  0xb8   :  { %v544_v8 = vpack.c.bf16 %v487_v5, %v483_v40  ;;  %v211_v44 = vmul.f32 %v8338_v60, %v124_v4  ;;  %v212_v26 = vmul.f32 %v8330_v58, %v124_v4  ;;  %v214_v32 = vmul.f32 %v8334_v59, %v124_v4 }
  0xb9   :  { %v546_v27 = vpack.c.bf16 %v489_v50, %v485_v14  ;;  %v352_v31 = vadd.f32 %v289_v12, %v224_v38  ;;  %v412_v23 = vmul.f32 0.01, %v348_v24  ;;  %1067 = vperm.xlu1 %7584, %v8186_v9   ;;  %v350_v15 = vadd.f32 %v8304_v47, %v222_v2 }
  0xba   :  { %673 = vmatpush1.bf16.msra.mxu0 %v544_v8  ;;  %v354_v35 = vadd.f32 %v289_v12, %v226_v20  ;;  %v347_v25 = vadd.f32 %v8304_v47, %v8412_v41  ;;  %v351_v28 = vadd.f32 %v289_v12, %v223_v18  ;;  %v349_v39 = vadd.f32 %v8304_v47, %v8416_v17 }
  0xbb   :  { %v277_v33 = vpop.permute.xlu1 %276  ;;  %786 = vmatpush1.bf16.msra.mxu1 %v546_v27  ;;  %v416_v29 = vmul.f32 0.01, %v352_v31  ;;  %v476_v0 = vmax.f32 %v348_v24, %v412_v23  ;;  %v353_v46 = vadd.f32 %v289_v12, %v225_v49  ;;  %v414_v38 = vmul.f32 0.01, %v350_v15 }
  0xbc   :  { %v418_v57 = vmul.f32 0.01, %v354_v35  ;;  %v411_v30 = vmul.f32 0.01, %v347_v25  ;;  %v340_v9 = vadd.f32 %v277_v33, %v212_v26  ;;  %v415_v40 = vmul.f32 0.01, %v351_v28 }
  0xbd   :  { %v480_v19 = vmax.f32 %v352_v31, %v416_v29  ;;  %v413_v2 = vmul.f32 0.01, %v349_v39  ;;  %v417_v20 = vmul.f32 0.01, %v353_v46  ;;  %7585 = vset.pattern.permute.xlu1 %v13851_v34  ;;  %v478_v5 = vmax.f32 %v350_v15, %v414_v38 }
  0xbe   :  { %v482_v41 = vmax.f32 %v354_v35, %v418_v57  ;;  %v475_v18 = vmax.f32 %v347_v25, %v411_v30  ;;  %v404_v50 = vmul.f32 0.01, %v340_v9  ;;  %617 = vperm.xlu1 %7585, %v8155_v3   ;;  %v479_v47 = vmax.f32 %v351_v28, %v415_v40 }
  0xbf   :  { %v281_v14 = vpop.permute.xlu1 %280  ;;  %v541_v24 = vpack.c.bf16 %v480_v19, %v476_v0  ;;  %v477_v17 = vmax.f32 %v349_v39, %v413_v2  ;;  %v481_v49 = vmax.f32 %v353_v46, %v417_v20  ;;  %v213_v12 = vmul.f32 %v8342_v61, %v124_v4 }
  0xc0   :  { %v543_v8 = vpack.c.bf16 %v482_v41, %v478_v5  ;;  %v344_v26 = vadd.f32 %v281_v14, %v216_v13  ;;  %v342_v27 = vadd.f32 %v277_v33, %v214_v32  ;;  %v540_v31 = vpack.c.bf16 %v479_v47, %v475_v18 }
  0xc1   :  { %674 = vmatprep.subr.bf16.mxu0 %v541_v24  ;;  %v542_v23 = vpack.c.bf16 %v481_v49, %v477_v17  ;;  %v346_v29 = vadd.f32 %v281_v14, %v218_v62  ;;  %v339_v15 = vadd.f32 %v277_v33, %v211_v44  ;;  %v343_v38 = vadd.f32 %v281_v14, %v8432_v45 }
  0xc2   :  { %787 = vmatprep.subr.bf16.mxu1 %v543_v8  ;;  %v408_v35 = vmul.f32 0.01, %v344_v26  ;;  %v406_v25 = vmul.f32 0.01, %v342_v27  ;;  %v341_v3 = vadd.f32 %v277_v33, %v213_v12  ;;  %7587 = vset.pattern.permute.xlu1 %v13850_v63  ;;  %v468_v4 = vmax.f32 %v340_v9, %v404_v50 }
  0xc3   :  { %675 = vmatpush1.bf16.msra.mxu0 %v540_v31  ;;  %788 = vmatpush1.bf16.msra.mxu1 %v542_v23  ;;  %v410_v0 = vmul.f32 0.01, %v346_v29  ;;  %v403_v13 = vmul.f32 0.01, %v339_v15  ;;  %v345_v32 = vadd.f32 %v281_v14, %v8437_v36  ;;  %v332_v45 = vadd.f32 %v8325_v56, %v8446_v7 }
  0xc4   :  { %v119_v28 = vpop.permute.xlu1 %118  ;;  %1075 = vperm.xlu1 %7587, %v8170_v6   ;;  %v472_v33 = vmax.f32 %v344_v26, %v408_v35  ;;  %v470_v46 = vmax.f32 %v342_v27, %v406_v25  ;;  %v407_v30 = vmul.f32 0.01, %v343_v38  ;;  %v405_v40 = vmul.f32 0.01, %v341_v3  ;;  %v109_v26 = vpop.permute.xlu0 %108 }
  0xc5   :  { %v207_v39 = vmul.f32 %v8338_v60, %v119_v28  ;;  %v208_v62 = vmul.f32 %v8330_v58, %v119_v28  ;;  %v209_v44 = vmul.f32 %v8342_v61, %v119_v28  ;;  %v474_v57 = vmax.f32 %v346_v29, %v410_v0 }
  0xc6   :  { %v210_v9 = vmul.f32 %v8334_v59, %v119_v28  ;;  %v467_v19 = vmax.f32 %v339_v15, %v403_v13  ;;  %v409_v36 = vmul.f32 0.01, %v345_v32  ;;  %v537_v2 = vpack.c.bf16 %v472_v33, %v468_v4  ;;  %v90_v33 = vld [vmem:[%s13480_s2] sm:$0x1] }
  0xc7   :  { %v539_v20 = vpack.c.bf16 %v474_v57, %v470_v46  ;;  %v471_v5 = vmax.f32 %v343_v38, %v407_v30  ;;  %v334_v41 = vadd.f32 %v8325_v56, %v8452_v43  ;;  %v469_v14 = vmax.f32 %v341_v3, %v405_v40 }
  0xc8   :  { %v473_v7 = vmax.f32 %v345_v32, %v409_v36  ;;  %v396_v50 = vmul.f32 0.01, %v332_v45  ;;  %v331_v6 = vadd.f32 %v8325_v56, %v8443_v37  ;;  %1079 = vperm.xlu1 %7587, %v8143_v1   ;;  %676 = vmatprep.subr.bf16.mxu0 %v537_v2  ;;  %v333_v43 = vadd.f32 %v8325_v56, %v8449_v48 }
  0xc9   :  { %v273_v18 = vpop.permute.xlu1 %272  ;;  %789 = vmatprep.subr.bf16.mxu1 %v539_v20  ;;  %v536_v24 = vpack.c.bf16 %v471_v5, %v467_v19  ;;  %v398_v49 = vmul.f32 0.01, %v334_v41  ;;  %v8083_v19 = vmov 45   ;;  %v199_v5 = vmul.f32 %v8338_v60, %v109_v26 }
  0xca   :  { %v336_v47 = vadd.f32 %v273_v18, %v208_v62  ;;  %v338_v17 = vadd.f32 %v273_v18, %v210_v9  ;;  %v538_v12 = vpack.c.bf16 %v473_v7, %v469_v14  ;;  %v335_v8 = vadd.f32 %v273_v18, %v207_v39  ;;  %v94_v39 = vpop.permute.xlu0 %93 }
  0xcb   :  { %677 = vmatpush1.bf16.msra.mxu0 %v536_v24  ;;  %v395_v23 = vmul.f32 0.01, %v331_v6  ;;  %v337_v29 = vadd.f32 %v273_v18, %v209_v44  ;;  %v460_v37 = vmax.f32 %v332_v45, %v396_v50  ;;  %v397_v15 = vmul.f32 0.01, %v333_v43 }
  0xcc   :  { %v400_v27 = vmul.f32 0.01, %v336_v47  ;;  %v402_v31 = vmul.f32 0.01, %v338_v17  ;;  %790 = vmatpush1.bf16.msra.mxu1 %v538_v12  ;;  %v399_v1 = vmul.f32 0.01, %v335_v8  ;;  %v462_v38 = vmax.f32 %v334_v41, %v398_v49  ;;  %7588 = vset.pattern.permute.xlu1 %v8083_v19 }
  0xcd   :  { %v401_v28 = vmul.f32 0.01, %v337_v29  ;;  %v459_v13 = vmax.f32 %v331_v6, %v395_v23  ;;  %v461_v56 = vmax.f32 %v333_v43, %v397_v15  ;;  %1268 = vperm.xlu1 %7588, %v90_v33   ;;  %v200_v41 = vmul.f32 %v8330_v58, %v109_v26 }
  0xce   :  { %v104_v35 = vpop.permute.xlu1 %103  ;;  %v464_v25 = vmax.f32 %v336_v47, %v400_v27  ;;  %v466_v3 = vmax.f32 %v338_v17, %v402_v31  ;;  %v463_v32 = vmax.f32 %v335_v8, %v399_v1  ;;  %v202_v18 = vmul.f32 %v8334_v59, %v109_v26  ;;  %v253_v17 = vpop.permute.xlu0 %252 }
  0xcf   :  { %v465_v48 = vmax.f32 %v337_v29, %v401_v28  ;;  %v196_v62 = vmul.f32 %v8330_v58, %v104_v35  ;;  %v198_v44 = vmul.f32 %v8334_v59, %v104_v35  ;;  %v195_v46 = vmul.f32 %v8338_v60, %v104_v35 }
  0xd0   :  { %v533_v4 = vpack.c.bf16 %v464_v25, %v460_v37  ;;  %v535_v0 = vpack.c.bf16 %v466_v3, %v462_v38  ;;  %v532_v45 = vpack.c.bf16 %v463_v32, %v459_v13  ;;  %v197_v57 = vmul.f32 %v8342_v61, %v104_v35  ;;  %v8502_v35 = vld [vmem:[%s13480_s2 + $0x78] sm:$0xff] }
  0xd1   :  { %v534_v9 = vpack.c.bf16 %v465_v48, %v461_v56  ;;  %v8084_v14 = vmov 37   ;;  %v201_v7 = vmul.f32 %v8342_v61, %v109_v26  ;;  %v187_v50 = vmul.f32 %v8338_v60, %v94_v39 }
  0xd2   :  { %678 = vmatprep.subr.bf16.mxu0 %v533_v4  ;;  %791 = vmatprep.subr.bf16.mxu1 %v535_v0  ;;  %v188_v6 = vmul.f32 %v8330_v58, %v94_v39  ;;  %v190_v24 = vmul.f32 %v8334_v59, %v94_v39  ;;  %v8085_v37 = vmov 4   ;;  %v189_v26 = vmul.f32 %v8342_v61, %v94_v39 }
  0xd3   :  { %v261_v30 = vpop.permute.xlu1 %260  ;;  %679 = vmatpush1.bf16.msra.mxu0 %v532_v45  ;;  %792 = vmatpush1.bf16.msra.mxu1 %v534_v9 }
  0xd4   :  { %v324_v40 = vadd.f32 %v261_v30, %v196_v62  ;;  %v326_v36 = vadd.f32 %v261_v30, %v198_v44  ;;  %v323_v2 = vadd.f32 %v261_v30, %v195_v46  ;;  %v325_v20 = vadd.f32 %v261_v30, %v197_v57  ;;  %7579 = vset.pattern.permute.xlu0 %v8084_v14 }
  0xd5   :  { %1256 = vperm.xlu0 %7579, %v90_v33   ;;  %7590 = vset.pattern.permute.xlu1 %v8085_v37  ;;  %v316_v3 = vadd.f32 %v253_v17, %v188_v6  ;;  %v318_v39 = vadd.f32 %v253_v17, %v190_v24  ;;  %v315_v62 = vadd.f32 %v253_v17, %v187_v50  ;;  %v8086_v57 = vmov 12  }
  0xd6   :  { %v388_v12 = vmul.f32 0.01, %v324_v40  ;;  %v390_v43 = vmul.f32 0.01, %v326_v36  ;;  %v387_v31 = vmul.f32 0.01, %v323_v2  ;;  %1380 = vperm.xlu1 %7590, %v8502_v35   ;;  %v317_v19 = vadd.f32 %v253_v17, %v189_v26 }
  0xd7   :  { %v265_v47 = vpop.permute.xlu1 %264  ;;  %v389_v29 = vmul.f32 0.01, %v325_v20 }
  0xd8   :  { %v328_v49 = vadd.f32 %v265_v47, %v200_v41  ;;  %v330_v8 = vadd.f32 %v265_v47, %v202_v18  ;;  %v327_v27 = vadd.f32 %v265_v47, %v199_v5  ;;  %v329_v23 = vadd.f32 %v265_v47, %v201_v7 }
  0xd9   :  { %7580 = vset.pattern.permute.xlu0 %v13850_v63  ;;  %v452_v4 = vmax.f32 %v324_v40, %v388_v12  ;;  %v454_v13 = vmax.f32 %v326_v36, %v390_v43  ;;  %v451_v56 = vmax.f32 %v323_v2, %v387_v31  ;;  %v453_v48 = vmax.f32 %v325_v20, %v389_v29  ;;  %v7923_v31 = vld [vmem:[%s13480_s2 + $0x48] sm:$0xff] }
  0xda   :  { %v392_v1 = vmul.f32 0.01, %v328_v49  ;;  %v394_v15 = vmul.f32 0.01, %v330_v8  ;;  %v391_v25 = vmul.f32 0.01, %v327_v27  ;;  %1051 = vperm.xlu0 %7580, %v8201_v11   ;;  %7591 = vset.pattern.permute.xlu1 %v8086_v57 }
  0xdb   :  { %v393_v38 = vmul.f32 0.01, %v329_v23  ;;  %v8513_v11 = vld [vmem:[%s13480_s2 + $0x70] sm:$0xff]  ;;  %v382_v41 = vmul.f32 0.01, %v318_v39 }
  0xdc   :  { %v99_v28 = vpop.permute.xlu1 %98  ;;  %v456_v0 = vmax.f32 %v328_v49, %v392_v1  ;;  %v458_v32 = vmax.f32 %v330_v8, %v394_v15  ;;  %v455_v33 = vmax.f32 %v327_v27, %v391_v25  ;;  %1520 = vperm.xlu1 %7591, %v8513_v11   ;;  %v379_v7 = vmul.f32 0.01, %v315_v62  ;;  %v7924_v25 = vld [vmem:[%s13480_s2 + $0x68] sm:$0xff] }
  0xdd   :  { %v457_v46 = vmax.f32 %v329_v23, %v393_v38  ;;  %v191_v30 = vmul.f32 %v8338_v60, %v99_v28  ;;  %v192_v9 = vmul.f32 %v8330_v58, %v99_v28  ;;  %v194_v40 = vmul.f32 %v8334_v59, %v99_v28  ;;  %v7760_v38 = vld [vmem:[#allocation2 + $0x140] sm:$0xff]  }
  0xde   :  { %v529_v44 = vpack.c.bf16 %v456_v0, %v452_v4  ;;  %v531_v45 = vpack.c.bf16 %v458_v32, %v454_v13  ;;  %v528_v36 = vpack.c.bf16 %v455_v33, %v451_v56  ;;  %v193_v20 = vmul.f32 %v8342_v61, %v99_v28  ;;  %1059 = vperm.xlu0 %7580, %v8196_v10   ;;  %v8523_v61 = vld [vmem:[%s13480_s2 + $0x60] sm:$0xff]  ;;  %v7761_v28 = vld [vmem:[#allocation2 + $0x148] sm:$0xff]   ;;  %v7925_v4 = vld [vmem:[%s13480_s2 + $0x58] sm:$0xff] }
  0xdf   :  { %v530_v2 = vpack.c.bf16 %v457_v46, %v453_v48  ;;  %v380_v60 = vmul.f32 0.01, %v316_v3  ;;  %v381_v6 = vmul.f32 0.01, %v317_v19  ;;  %v446_v17 = vmax.f32 %v318_v39, %v382_v41  ;;  %v7762_v0 = vld [vmem:[#allocation2 + $0x150] sm:$0xff]   ;;  %v7927_v13 = vld [vmem:[%s13480_s2 + $0x40] sm:$0xff] }
  0xe0   :  { %680 = vmatprep.subr.bf16.mxu0 %v529_v44  ;;  %793 = vmatprep.subr.bf16.mxu1 %v531_v45  ;;  %v443_v43 = vmax.f32 %v315_v62, %v379_v7  ;;  %v7763_v32 = vld [vmem:[#allocation2 + $0x158] sm:$0xff]   ;;  %v7928_v56 = vld [vmem:[%s13480_s2 + $0x30] sm:$0xff]  ;;  %v7764_v48 = vld [vmem:[#allocation2 + $0x160] sm:$0xff]  }
  0xe1   :  { %v257_v5 = vpop.permute.xlu1 %256  ;;  %681 = vmatpush1.bf16.msra.mxu0 %v528_v36  ;;  %794 = vmatpush1.bf16.msra.mxu1 %v530_v2  ;;  %v444_v10 = vmax.f32 %v316_v3, %v380_v60  ;;  %v445_v23 = vmax.f32 %v317_v19, %v381_v6  ;;  %v13852_v3 = vmov 0   ;;  %v7929_v39 = vld [vmem:[%s13480_s2 + $0x38] sm:$0xff]  ;;  %v7930_v62 = vld [vmem:[%s13480_s2 + $0x20] sm:$0xff]  ;;  %v7931_v44 = vld [vmem:[%s13480_s2 + $0x28] sm:$0xff] }
  0xe2   :  { %v320_v58 = vadd.f32 %v257_v5, %v192_v9  ;;  %v322_v18 = vadd.f32 %v257_v5, %v194_v40  ;;  %v319_v14 = vadd.f32 %v257_v5, %v191_v30  ;;  %v321_v50 = vadd.f32 %v257_v5, %v193_v20  ;;  %7592 = vset.pattern.permute.xlu1 %v8085_v37  ;;  %v7767_v45 = vld [vmem:[#allocation2 + $0x178] sm:$0xff]   ;;  %v8599_v46 = vld [vmem:[%s13480_s2] sm:$0xff]  ;;  %v8607_v30 = vld [vmem:[%s13480_s2 + $0x10] sm:$0xff] }
  0xe3   :  { %1368 = vperm.xlu1 %7592, %v8523_v61   ;;  %7582 = vset.pattern.permute.xlu0 %v13851_v34  ;;  %v8590_v33 = vld [vmem:[%s13480_s2 + $0x18] sm:$0xff]  ;;  %v8615_v9 = vld [vmem:[%s13480_s2 + $0x8] sm:$0xff] }
  0xe4   :  { %v384_v59 = vmul.f32 0.01, %v320_v58  ;;  %v386_v24 = vmul.f32 0.01, %v322_v18  ;;  %v383_v47 = vmul.f32 0.01, %v319_v14  ;;  %593 = vperm.xlu0 %7582, %v7923_v31  }
  0xe5   :  { %v385_v49 = vmul.f32 0.01, %v321_v50 }
  0xe6   :  { %v448_v12 = vmax.f32 %v320_v58, %v384_v59  ;;  %v450_v8 = vmax.f32 %v322_v18, %v386_v24  ;;  %v447_v27 = vmax.f32 %v319_v14, %v383_v47  ;;  %v558_v19 = vpop.permute.xlu1 %557  ;;  %v562_v24 = vpop.permute.xlu0 %561 }
  0xe7   :  { %v449_v29 = vmax.f32 %v321_v50, %v385_v49  ;;  %1372 = vperm.xlu1 %7592, %v7924_v25  }
  0xe8   :  { %v525_v26 = vpack.c.bf16 %v448_v12, %v444_v10  ;;  %v527_v1 = vpack.c.bf16 %v450_v8, %v446_v17  ;;  %v524_v15 = vpack.c.bf16 %v447_v27, %v443_v43  ;;  %613 = vperm.xlu0 %7582, %v8513_v11  }
  0xe9   :  { %v526_v34 = vpack.c.bf16 %v449_v29, %v445_v23 }
  0xea   :  { %682 = vmatprep.subr.bf16.mxu0 %v525_v26  ;;  %795 = vmatprep.subr.bf16.mxu1 %v527_v1 }
  0xeb   :  { %683 = vmatpush1.bf16.msra.mxu0 %v524_v15  ;;  %796 = vmatpush1.bf16.msra.mxu1 %v526_v34 }
  0xec   :  { %7593 = vset.pattern.permute.xlu1 %v8086_v57  ;;  %7586 = vset.pattern.permute.xlu0 %v13850_v63  ;;  %v7926_v63 = vld [vmem:[%s13480_s2 + $0x50] sm:$0xff] }
  0xed   :  { %1516 = vperm.xlu1 %7593, %v7924_v25   ;;  %1071 = vperm.xlu0 %7586, %v8523_v61  }
  0xee   :  { %701 = vmatmul.mubr.bf16.vlgmr.msra.gmra.mxu0 %v7760_v38  ;;  %814 = vmatmul.mubr.bf16.vlgmr.msra.gmra.mxu1 %v7760_v38 }
  0xef   :  { %710 = vmatprep.mubr.bf16.mxu0 %v13852_v3  ;;  %823 = vmatprep.mubr.bf16.mxu1 %v13852_v3 }
  0xf1   :  { %7594 = vset.pattern.permute.xlu1 %v8085_v37  ;;  %1083 = vperm.xlu0 %7586, %v8502_v35  }
  0xf2   :  { %1364 = vperm.xlu1 %7594, %v7925_v4  }
  0xf5   :  { %7589 = vset.pattern.permute.xlu0 %v8085_v37 }
  0xf6   :  { %711 = vmatmul.mubr.bf16.gmra.mxu0 %v7761_v28  ;;  %824 = vmatmul.mubr.bf16.gmra.mxu1 %v7761_v28 }
  0xf7   :  { %720 = vmatprep.mubr.bf16.mxu0 %v13852_v3  ;;  %833 = vmatprep.mubr.bf16.mxu1 %v13852_v3 }
  0xf8   :  { %7595 = vset.pattern.permute.xlu1 %v8086_v57  ;;  %1376 = vperm.xlu0 %7589, %v8513_v11   ;;  %v566_v11 = vpop.permute.xlu1 %565 }
  0xf9   :  { %1504 = vperm.xlu1 %7595, %v7926_v63  }
  0xfc   :  { %1360 = vperm.xlu0 %7589, %v7926_v63   ;;  %v8620_v40 = vpop.permute.xlu1 %569 }
  0xfd   :  { %7596 = vset.pattern.permute.xlu1 %v8085_v37 }
  0xfe   :  { %721 = vmatmul.mubr.bf16.gmra.mxu0 %v7762_v0  ;;  %834 = vmatmul.mubr.bf16.gmra.mxu1 %v7762_v0 }
  0xff   :  { %730 = vmatprep.mubr.bf16.mxu0 %v13852_v3  ;;  %843 = vmatprep.mubr.bf16.mxu1 %v13852_v3 }
 0x100   :  { %1352 = vperm.xlu1 %7596, %v7927_v13   ;;  %1344 = vperm.xlu0 %7589, %v7928_v56   ;;  %v8622_v36 = vpop.permute.xlu1 %1023 }
 0x104   :  { %1356 = vperm.xlu1 %7596, %v7923_v31   ;;  %1328 = vperm.xlu0 %7589, %v8238_v16   ;;  %v7765_v16 = vld [vmem:[#allocation2 + $0x168] sm:$0xff]  }
 0x106   :  { %731 = vmatmul.mubr.bf16.gmra.mxu0 %v7763_v32  ;;  %844 = vmatmul.mubr.bf16.gmra.mxu1 %v7763_v32 }
 0x107   :  { %740 = vmatprep.mubr.bf16.mxu0 %v13852_v3  ;;  %853 = vmatprep.mubr.bf16.mxu1 %v13852_v3 }
 0x108   :  { %7597 = vset.pattern.permute.xlu1 %v8086_v57  ;;  %7602 = vset.pattern.permute.xlu0 %v8086_v57 }
 0x109   :  { %1500 = vperm.xlu1 %7597, %v7923_v31   ;;  %1524 = vperm.xlu0 %7602, %v8502_v35   ;;  %v7766_v35 = vld [vmem:[#allocation2 + $0x170] sm:$0xff]  }
 0x10d   :  { %7598 = vset.pattern.permute.xlu1 %v8085_v37  ;;  %1512 = vperm.xlu0 %7602, %v8523_v61   ;;  %v8654_v61 = vpop.permute.xlu0 %573 }
 0x10e   :  { %741 = vmatmul.mubr.bf16.gmra.mxu0 %v7764_v48  ;;  %854 = vmatmul.mubr.bf16.gmra.mxu1 %v7764_v48 }
 0x10f   :  { %750 = vmatprep.mubr.bf16.mxu0 %v13852_v3  ;;  %863 = vmatprep.mubr.bf16.mxu1 %v13852_v3 }
 0x110   :  { %1348 = vperm.xlu1 %7598, %v7929_v39  }
 0x111   :  { %1508 = vperm.xlu0 %7602, %v7925_v4   ;;  %v8658_v26 = vpop.permute.xlu0 %581 }
 0x114   :  { %7599 = vset.pattern.permute.xlu1 %v8086_v57 }
 0x115   :  { %1488 = vperm.xlu1 %7599, %v7928_v56   ;;  %1496 = vperm.xlu0 %7602, %v7927_v13  }
 0x116   :  { %751 = vmatmul.mubr.bf16.gmra.mxu0 %v7765_v16  ;;  %864 = vmatmul.mubr.bf16.gmra.mxu1 %v7765_v16 }
 0x117   :  { %760 = vmatprep.mubr.bf16.mxu0 %v13852_v3  ;;  %873 = vmatprep.mubr.bf16.mxu1 %v13852_v3 }
 0x119   :  { %7600 = vset.pattern.permute.xlu1 %v8085_v37  ;;  %1492 = vperm.xlu0 %7602, %v7929_v39  }
 0x11a   :  { %1336 = vperm.xlu1 %7600, %v7930_v62  }
 0x11d   :  { %1480 = vperm.xlu0 %7602, %v7930_v62  }
 0x11e   :  { %761 = vmatmul.mubr.bf16.gmra.mxu0 %v7766_v35  ;;  %874 = vmatmul.mubr.bf16.gmra.mxu1 %v7766_v35 }
 0x11f   :  { %770 = vmatprep.mubr.bf16.mxu0 %v13852_v3  ;;  %883 = vmatprep.mubr.bf16.mxu1 %v13852_v3 }
 0x120   :  { %1340 = vperm.xlu1 %7600, %v7931_v44  }
 0x121   :  { %1476 = vperm.xlu0 %7602, %v8590_v33  }
 0x124   :  { %7601 = vset.pattern.permute.xlu1 %v8086_v57 }
 0x125   :  { %1484 = vperm.xlu1 %7601, %v7931_v44   ;;  %1464 = vperm.xlu0 %7602, %v8599_v46  }
 0x126   :  { %771 = vmatmul.mubr.bf16.gmra.mxu0 %v7767_v45  ;;  %884 = vmatmul.mubr.bf16.gmra.mxu1 %v7767_v45 }
 0x127   :  { %1912 = vmatprep.mubr.bf16.mxu0 %v13852_v3  ;;  %2025 = vmatprep.mubr.bf16.mxu1 %v13852_v3 }
 0x129   :  { %7603 = vset.pattern.permute.xlu1 %v8085_v37 }
 0x12a   :  { %1332 = vperm.xlu1 %7603, %v8590_v33  }
 0x12e   :  { %7604 = vset.pattern.permute.xlu1 %v8086_v57 }
 0x12f   :  { %1472 = vperm.xlu1 %7604, %v8607_v30  }
 0x133   :  { %7605 = vset.pattern.permute.xlu1 %v8085_v37  ;;  %v8624_v37 = vpop.permute.xlu1 %577 }
 0x134   :  { %1320 = vperm.xlu1 %7605, %v8599_v46  }
 0x137   :  { %v8626_v2 = vpop.permute.xlu1 %1031 }
 0x138   :  { %1324 = vperm.xlu1 %7605, %v8615_v9  }
 0x13b   :  { %v8628_v20 = vpop.permute.xlu1 %1035 }
 0x13c   :  { %7606 = vset.pattern.permute.xlu1 %v8086_v57 }
 0x13d   :  { %1468 = vperm.xlu1 %7606, %v8615_v9  }
 0x13f   :  { %v8630_v5 = vpop.permute.xlu1 %585 }
 0x143   :  { %v8632_v60 = vpop.permute.xlu1 %1043 }
 0x147   :  { %v8634_v41 = vpop.permute.xlu1 %1047 }
 0x14b   :  { %v8636_v57 = vpop.permute.xlu1 %589 }
 0x14f   :  { %v8638_v58 = vpop.permute.xlu1 %597 }
 0x153   :  { %v8640_v18 = vpop.permute.xlu1 %601 }
 0x157   :  { %v8642_v14 = vpop.permute.xlu1 %605 }
 0x15b   :  { %v8644_v7 = vpop.permute.xlu1 %1055 }
 0x15f   :  { %v8646_v50 = vpop.permute.xlu1 %609 }
 0x163   :  { %v8648_v6 = vpop.permute.xlu1 %1063 }
 0x167   :  { %v8650_v59 = vpop.permute.xlu1 %1067 }
 0x16b   :  { %v8652_v47 = vpop.permute.xlu1 %617 }
 0x16f   :  { %v8656_v10 = vpop.permute.xlu1 %1075 }
 0x173   :  { %v8660_v38 = vpop.permute.xlu1 %1079 }
 0x177   :  { %v8662_v53 = vpop.permute.xlu1 %1268 }
 0x1ae   :  { %v702_v17 = vpop.f32.mrf.mxu0  ;;  %v815_v49 = vpop.f32.mrf.mxu1 }
 0x1af   :  { %v703_v12 = vadd.f32 %v702_v17, %v558_v19  ;;  %v816_v8 = vadd.f32 %v815_v49, %v558_v19  ;;  %v1028_v49 = vpop.permute.xlu0 %1027 }
 0x1b0   :  { %v704_v43 = vpop.f32.mrf.mxu0  ;;  %v817_v27 = vpop.f32.mrf.mxu1 }
 0x1b1   :  { %v894_v31 = vmul.f32 0.01, %v703_v12  ;;  %v705_v23 = vadd.f32 %v704_v43, %v558_v19  ;;  %v818_v29 = vadd.f32 %v817_v27, %v558_v19  ;;  %v896_v25 = vmul.f32 0.01, %v816_v8 }
 0x1b2   :  { %v706_v1 = vpop.f32.mrf.mxu0  ;;  %v819_v15 = vpop.f32.mrf.mxu1 }
 0x1b3   :  { %v895_v34 = vmul.f32 0.01, %v705_v23  ;;  %v897_v28 = vmul.f32 0.01, %v818_v29  ;;  %v707_v4 = vadd.f32 %v706_v1, %v562_v24  ;;  %v820_v63 = vadd.f32 %v819_v15, %v562_v24 }
 0x1b4   :  { %v708_v0 = vpop.f32.mrf.mxu0  ;;  %v821_v13 = vpop.f32.mrf.mxu1  ;;  %v958_v32 = vmax.f32 %v703_v12, %v894_v31  ;;  %v960_v44 = vmax.f32 %v816_v8, %v896_v25 }
 0x1b5   :  { %v898_v56 = vmul.f32 0.01, %v707_v4  ;;  %v900_v48 = vmul.f32 0.01, %v820_v63  ;;  %v709_v39 = vadd.f32 %v708_v0, %v562_v24  ;;  %v822_v16 = vadd.f32 %v821_v13, %v562_v24 }
 0x1b6   :  { %v712_v35 = vpop.f32.mrf.mxu0  ;;  %v825_v62 = vpop.f32.mrf.mxu1  ;;  %v959_v45 = vmax.f32 %v705_v23, %v895_v34  ;;  %v961_v43 = vmax.f32 %v818_v29, %v897_v28 }
 0x1b7   :  { %v713_v19 = vadd.f32 %v712_v35, %v566_v11  ;;  %v826_v17 = vadd.f32 %v825_v62, %v566_v11  ;;  %v962_v27 = vmax.f32 %v707_v4, %v898_v56  ;;  %v899_v22 = vmul.f32 0.01, %v709_v39 }
 0x1b8   :  { %v901_v21 = vmul.f32 0.01, %v822_v16  ;;  %v714_v1 = vpop.f32.mrf.mxu0  ;;  %v827_v15 = vpop.f32.mrf.mxu1  ;;  %v964_v24 = vmax.f32 %v820_v63, %v900_v48  ;;  %v1086_v4 = vmul.f32 %v8622_v36, %v958_v32  ;;  %v1088_v56 = vmul.f32 %v8622_v36, %v960_v44 }
 0x1b9   :  { %v902_v51 = vmul.f32 0.01, %v713_v19  ;;  %v904_v3 = vmul.f32 0.01, %v826_v17  ;;  %v715_v12 = vadd.f32 %v714_v1, %v566_v11  ;;  %v828_v31 = vadd.f32 %v827_v15, %v566_v11  ;;  %v8668_v48 = vpop.permute.xlu0 %1039 }
 0x1ba   :  { %v963_v0 = vmax.f32 %v709_v39, %v899_v22  ;;  %v965_v13 = vmax.f32 %v822_v16, %v901_v21  ;;  %v1090_v8 = vmul.f32 %v1028_v49, %v962_v27  ;;  %v716_v23 = vpop.f32.mrf.mxu0  ;;  %v829_v25 = vpop.f32.mrf.mxu1  ;;  %v1087_v15 = vmul.f32 %v8622_v36, %v959_v45 }
 0x1bb   :  { %v966_v34 = vmax.f32 %v713_v19, %v902_v51  ;;  %v968_v35 = vmax.f32 %v826_v17, %v904_v3  ;;  %v903_v29 = vmul.f32 0.01, %v715_v12  ;;  %v905_v28 = vmul.f32 0.01, %v828_v31  ;;  %v8674_v45 = vpop.permute.xlu1 %1380 }
 0x1bc   :  { %v717_v62 = vadd.f32 %v716_v23, %v8620_v40  ;;  %v718_v1 = vpop.f32.mrf.mxu0  ;;  %v831_v11 = vpop.f32.mrf.mxu1  ;;  %v1091_v63 = vmul.f32 %v1028_v49, %v963_v0  ;;  %v1089_v51 = vmul.f32 %v8622_v36, %v961_v43  ;;  %v1092_v3 = vmul.f32 %v1028_v49, %v964_v24  ;;  %13853 = vst [vmem:[#allocation18_spill] sm:$0xff] %v8674_v45 }
 0x1bd   :  { %v967_v22 = vmax.f32 %v715_v12, %v903_v29  ;;  %v969_v21 = vmax.f32 %v828_v31, %v905_v28  ;;  %v830_v16 = vadd.f32 %v829_v25, %v8620_v40  ;;  %v1094_v44 = vmul.f32 %v8626_v2, %v966_v34  ;;  %v8684_v45 = vpop.permute.xlu0 %1256 }
 0x1be   :  { %v906_v39 = vmul.f32 0.01, %v717_v62  ;;  %v722_v32 = vpop.f32.mrf.mxu0  ;;  %v835_v19 = vpop.f32.mrf.mxu1  ;;  %v1096_v17 = vmul.f32 %v8626_v2, %v968_v35  ;;  %v1093_v27 = vmul.f32 %v1028_v49, %v965_v13  ;;  %v1150_v23 = vadd.f32 %v1090_v8, %v1086_v4 }
 0x1bf   :  { %v908_v31 = vmul.f32 0.01, %v830_v16  ;;  %v719_v0 = vadd.f32 %v718_v1, %v8620_v40  ;;  %v832_v36 = vadd.f32 %v831_v11, %v8620_v40  ;;  %v1095_v25 = vmul.f32 %v8626_v2, %v967_v22  ;;  %v8688_v52 = vpop.permute.xlu1 %1520 }
 0x1c0   :  { %v970_v12 = vmax.f32 %v717_v62, %v906_v39  ;;  %v724_v43 = vpop.f32.mrf.mxu0  ;;  %v837_v24 = vpop.f32.mrf.mxu1  ;;  %v1163_v29 = vadd.f32 %v1091_v63, %v1087_v15  ;;  %v1097_v28 = vmul.f32 %v8626_v2, %v969_v21  ;;  %v723_v34 = vadd.f32 %v722_v32, %v8654_v61  ;;  %13854 = vst [vmem:[#allocation19_spill] sm:$0xff] %v8688_v52 }
 0x1c1   :  { %v972_v35 = vmax.f32 %v830_v16, %v908_v31  ;;  %v1176_v49 = vadd.f32 %v1092_v3, %v1088_v56  ;;  %v907_v13 = vmul.f32 0.01, %v719_v0  ;;  %v909_v8 = vmul.f32 0.01, %v832_v36 }
 0x1c2   :  { %v726_v4 = vpop.f32.mrf.mxu0  ;;  %v839_v62 = vpop.f32.mrf.mxu1  ;;  %v910_v39 = vmul.f32 0.01, %v723_v34  ;;  %v836_v1 = vadd.f32 %v835_v19, %v8654_v61  ;;  %v725_v40 = vadd.f32 %v724_v43, %v8654_v61  ;;  %v838_v11 = vadd.f32 %v837_v24, %v8654_v61 }
 0x1c3   :  { %v1098_v15 = vmul.f32 %v8628_v20, %v970_v12  ;;  %v1100_v2 = vmul.f32 %v8628_v20, %v972_v35  ;;  %v971_v63 = vmax.f32 %v719_v0, %v907_v13  ;;  %v973_v22 = vmax.f32 %v832_v36, %v909_v8 }
 0x1c4   :  { %v728_v56 = vpop.f32.mrf.mxu0  ;;  %v841_v21 = vpop.f32.mrf.mxu1  ;;  %v974_v3 = vmax.f32 %v723_v34, %v910_v39  ;;  %v912_v16 = vmul.f32 0.01, %v836_v1  ;;  %v911_v32 = vmul.f32 0.01, %v725_v40  ;;  %v913_v31 = vmul.f32 0.01, %v838_v11 }
 0x1c5   :  { %v1164_v19 = vadd.f32 %v1163_v29, %v1095_v25  ;;  %v1189_v43 = vadd.f32 %v1093_v27, %v1089_v51  ;;  %v1151_v55 = vadd.f32 %v1150_v23, %v1094_v44  ;;  %v727_v61 = vadd.f32 %v726_v4, %v8624_v37  ;;  %v8695_v23 = vpop.permute.xlu0 %1051 }
 0x1c6   :  { %v732_v24 = vpop.f32.mrf.mxu0  ;;  %v845_v54 = vpop.f32.mrf.mxu1  ;;  %v1177_v12 = vadd.f32 %v1176_v49, %v1096_v17  ;;  %v1099_v35 = vmul.f32 %v8628_v20, %v971_v63  ;;  %v1101_v0 = vmul.f32 %v8628_v20, %v973_v22  ;;  %v976_v36 = vmax.f32 %v836_v1, %v912_v16 }
 0x1c7   :  { %v1190_v13 = vadd.f32 %v1189_v43, %v1097_v28  ;;  %v975_v34 = vmax.f32 %v725_v40, %v911_v32  ;;  %v914_v8 = vmul.f32 0.01, %v727_v61  ;;  %v840_v39 = vadd.f32 %v839_v62, %v8624_v37 }
 0x1c8   :  { %v734_v42 = vpop.f32.mrf.mxu0  ;;  %v847_v52 = vpop.f32.mrf.mxu1  ;;  %v1152_v25 = vadd.f32 %v1151_v55, %v1098_v15  ;;  %v1178_v51 = vadd.f32 %v1177_v12, %v1100_v2  ;;  %v1102_v44 = vmul.f32 %v8668_v48, %v974_v3  ;;  %v977_v27 = vmax.f32 %v838_v11, %v913_v31 }
 0x1c9   :  { %v978_v17 = vmax.f32 %v727_v61, %v914_v8  ;;  %v916_v29 = vmul.f32 0.01, %v840_v39  ;;  %v729_v49 = vadd.f32 %v728_v56, %v8624_v37  ;;  %v842_v20 = vadd.f32 %v841_v21, %v8624_v37  ;;  %v8701_v15 = vpop.permute.xlu1 %1368 }
 0x1ca   :  { %v736_v28 = vpop.f32.mrf.mxu0  ;;  %v849_v4 = vpop.f32.mrf.mxu1  ;;  %v1165_v1 = vadd.f32 %v1164_v19, %v1099_v35  ;;  %v1191_v40 = vadd.f32 %v1190_v13, %v1101_v0  ;;  %v1104_v62 = vmul.f32 %v8668_v48, %v976_v36  ;;  %v733_v55 = vadd.f32 %v732_v24, %v8658_v26 }
 0x1cb   :  { %v1103_v11 = vmul.f32 %v8668_v48, %v975_v34  ;;  %v980_v2 = vmax.f32 %v840_v39, %v916_v29  ;;  %v915_v63 = vmul.f32 0.01, %v729_v49  ;;  %v917_v22 = vmul.f32 0.01, %v842_v20  ;;  %v8709_v34 = vpop.permute.xlu0 %1059 }
 0x1cc   :  { %v738_v3 = vpop.f32.mrf.mxu0  ;;  %v851_v16 = vpop.f32.mrf.mxu1  ;;  %v918_v56 = vmul.f32 0.01, %v733_v55  ;;  %v846_v37 = vadd.f32 %v845_v54, %v8658_v26  ;;  %v735_v21 = vadd.f32 %v734_v42, %v8658_v26  ;;  %v848_v32 = vadd.f32 %v847_v52, %v8658_v26 }
 0x1cd   :  { %v1105_v31 = vmul.f32 %v8668_v48, %v977_v27  ;;  %v1106_v19 = vmul.f32 %v8632_v60, %v978_v17  ;;  %v979_v43 = vmax.f32 %v729_v49, %v915_v63  ;;  %v981_v61 = vmax.f32 %v842_v20, %v917_v22  ;;  %v8714_v49 = vpop.permute.xlu1 %1372 }
 0x1ce   :  { %v742_v24 = vpop.f32.mrf.mxu0  ;;  %v855_v12 = vpop.f32.mrf.mxu1  ;;  %v982_v35 = vmax.f32 %v733_v55, %v918_v56  ;;  %v920_v0 = vmul.f32 0.01, %v846_v37  ;;  %v919_v36 = vmul.f32 0.01, %v735_v21  ;;  %v921_v13 = vmul.f32 0.01, %v848_v32 }
 0x1cf   :  { %v1166_v8 = vadd.f32 %v1165_v1, %v1103_v11  ;;  %v1153_v54 = vadd.f32 %v1152_v25, %v1102_v44  ;;  %v1108_v42 = vmul.f32 %v8632_v60, %v980_v2  ;;  %v737_v52 = vadd.f32 %v736_v28, %v8630_v5  ;;  %13855 = vst [vmem:[#allocation20_spill] sm:$0xff] %v8714_v49 }
 0x1d0   :  { %v744_v26 = vpop.f32.mrf.mxu0  ;;  %v857_v48 = vpop.f32.mrf.mxu1  ;;  %v1110_v39 = vmul.f32 %v8634_v41, %v982_v35  ;;  %v984_v27 = vmax.f32 %v846_v37, %v920_v0  ;;  %v983_v17 = vmax.f32 %v735_v21, %v919_v36  ;;  %v985_v29 = vmax.f32 %v848_v32, %v921_v13 }
 0x1d1   :  { %v1192_v20 = vadd.f32 %v1191_v40, %v1105_v31  ;;  %v1179_v55 = vadd.f32 %v1178_v51, %v1104_v62  ;;  %v922_v63 = vmul.f32 0.01, %v737_v52  ;;  %v850_v22 = vadd.f32 %v849_v4, %v8630_v5  ;;  %v594_v0 = vpop.permute.xlu0 %593 }
 0x1d2   :  { %v746_v1 = vpop.f32.mrf.mxu0  ;;  %v859_v25 = vpop.f32.mrf.mxu1  ;;  %v1154_v44 = vadd.f32 %v1153_v54, %v1106_v19  ;;  %v1107_v11 = vmul.f32 %v8632_v60, %v979_v43  ;;  %v1109_v28 = vmul.f32 %v8632_v60, %v981_v61  ;;  %v1112_v2 = vmul.f32 %v8634_v41, %v984_v27 }
 0x1d3   :  { %v986_v56 = vmax.f32 %v737_v52, %v922_v63  ;;  %v924_v37 = vmul.f32 0.01, %v850_v22  ;;  %v739_v21 = vadd.f32 %v738_v3, %v8630_v5  ;;  %v852_v32 = vadd.f32 %v851_v16, %v8630_v5  ;;  %v8728_v16 = vpop.permute.xlu1 %1516 }
 0x1d4   :  { %v748_v40 = vpop.f32.mrf.mxu0  ;;  %v861_v51 = vpop.f32.mrf.mxu1  ;;  %v1180_v62 = vadd.f32 %v1179_v55, %v1108_v42  ;;  %v1155_v31 = vadd.f32 %v1154_v44, %v1110_v39  ;;  %v1111_v4 = vmul.f32 %v8634_v41, %v983_v17  ;;  %v1113_v19 = vmul.f32 %v8634_v41, %v985_v29  ;;  %13856 = vst [vmem:[#allocation21_spill] sm:$0xff] %v8728_v16 }
 0x1d5   :  { %v1114_v43 = vmul.f32 %v8695_v23, %v986_v56  ;;  %v988_v35 = vmax.f32 %v850_v22, %v924_v37  ;;  %v923_v60 = vmul.f32 0.01, %v739_v21  ;;  %v925_v61 = vmul.f32 0.01, %v852_v32 }
 0x1d6   :  { %v8725_v36 = vpop.f32.mrf.mxu0  ;;  %v1167_v13 = vadd.f32 %v1166_v8, %v1107_v11  ;;  %v1193_v3 = vadd.f32 %v1192_v20, %v1109_v28  ;;  %v1181_v54 = vadd.f32 %v1180_v62, %v1112_v2  ;;  %v743_v5 = vadd.f32 %v742_v24, %v8636_v57  ;;  %v8730_v42 = vpop.f32.mrf.mxu1 }
 0x1d7   :  { %v1156_v52 = vadd.f32 %v1155_v31, %v1114_v43  ;;  %v1116_v41 = vmul.f32 %v8695_v23, %v988_v35  ;;  %v987_v39 = vmax.f32 %v739_v21, %v923_v60  ;;  %v989_v27 = vmax.f32 %v852_v32, %v925_v61  ;;  %v8741_v32 = vpop.permute.xlu0 %613 }
 0x1d8   :  { %v1168_v17 = vadd.f32 %v1167_v13, %v1111_v4  ;;  %v1194_v29 = vadd.f32 %v1193_v3, %v1113_v19  ;;  %v856_v55 = vadd.f32 %v855_v12, %v8636_v57  ;;  %v745_v63 = vadd.f32 %v744_v26, %v8636_v57  ;;  %v8737_v44 = vpop.f32.mrf.mxu0  ;;  %v8739_v28 = vpop.f32.mrf.mxu1 }
 0x1d9   :  { %v1157_v8 = vrot.slane %v1156_v52, 4  ;;  %v1182_v20 = vadd.f32 %v1181_v54, %v1116_v41  ;;  %v1115_v22 = vmul.f32 %v8695_v23, %v987_v39  ;;  %v1117_v24 = vmul.f32 %v8695_v23, %v989_v27  ;;  %v8748_v4 = vpop.permute.xlu1 %1364 }
 0x1da   :  { %v926_v11 = vmul.f32 0.01, %v743_v5  ;;  %v928_v12 = vmul.f32 0.01, %v856_v55  ;;  %v927_v62 = vmul.f32 0.01, %v745_v63  ;;  %v8744_v26 = vadd.f32 %v857_v48, %v8636_v57  ;;  %v756_v60 = vpop.f32.mrf.mxu0 }
 0x1db   :  { %v1158_v2 = vadd.f32 %v1157_v8, %v1156_v52  ;;  %v1183_v56 = vrot.slane %v1182_v20, 4  ;;  %v1169_v37 = vadd.f32 %v1168_v17, %v1115_v22  ;;  %v1195_v21 = vadd.f32 %v1194_v29, %v1117_v24  ;;  %v869_v52 = vpop.f32.mrf.mxu1 }
 0x1dc   :  { %v8746_v31 = vadd.f32 %v746_v1, %v594_v0  ;;  %v990_v61 = vmax.f32 %v743_v5, %v926_v11  ;;  %v860_v13 = vadd.f32 %v859_v25, %v594_v0  ;;  %v749_v3 = vadd.f32 %v748_v40, %v594_v0  ;;  %v758_v25 = vpop.f32.mrf.mxu0 }
 0x1dd   :  { %v1159_v23 = vrot.slane %v1158_v2, 2  ;;  %v1184_v19 = vadd.f32 %v1183_v56, %v1182_v20  ;;  %v1170_v43 = vrot.slane %v1169_v37, 4  ;;  %v1196_v35 = vrot.slane %v1195_v21, 4  ;;  %v8752_v56 = vpop.permute.xlu0 %1071  ;;  %v8755_v11 = vpop.permute.xlu1 %1504 }
 0x1de   :  { %v862_v54 = vadd.f32 %v861_v51, %v594_v0  ;;  %v992_v57 = vmax.f32 %v856_v55, %v928_v12  ;;  %v991_v48 = vmax.f32 %v745_v63, %v927_v62  ;;  %v929_v1 = vmul.f32 0.01, %v8744_v26  ;;  %13857 = vst [vmem:[#allocation22_spill] sm:$0xff] %v8755_v11  ;;  %v871_v55 = vpop.f32.mrf.mxu1  ;;  %v762_v16 = vpop.f32.mrf.mxu0 }
 0x1df   :  { %v1160_v41 = vadd.f32 %v1159_v23, %v1158_v2  ;;  %v1185_v39 = vrot.slane %v1184_v19, 2  ;;  %v1171_v27 = vadd.f32 %v1170_v43, %v1169_v37  ;;  %v1197_v17 = vadd.f32 %v1196_v35, %v1195_v21 }
 0x1e0   :  { %v930_v29 = vmul.f32 0.01, %v8746_v31  ;;  %v1118_v40 = vmul.f32 %v8644_v7, %v990_v61  ;;  %v932_v51 = vmul.f32 0.01, %v860_v13  ;;  %v931_v0 = vmul.f32 0.01, %v749_v3 }
 0x1e1   :  { %v1161_v8 = vrot.slane %v1160_v41, 1  ;;  %v1186_v20 = vadd.f32 %v1185_v39, %v1184_v19  ;;  %v1172_v22 = vrot.slane %v1171_v27, 2  ;;  %v1198_v24 = vrot.slane %v1197_v17, 2 }
 0x1e2   :  { %v933_v5 = vmul.f32 0.01, %v862_v54  ;;  %v1120_v12 = vmul.f32 %v8644_v7, %v992_v57  ;;  %v1119_v62 = vmul.f32 %v8644_v7, %v991_v48  ;;  %v993_v23 = vmax.f32 %v8744_v26, %v929_v1  ;;  %v8765_v1 = vpop.permute.xlu0 %1083 }
 0x1e3   :  { %v1162_v63 = vadd.f32 %v1161_v8, %v1160_v41  ;;  %v1187_v2 = vrot.slane %v1186_v20, 1  ;;  %v1173_v37 = vadd.f32 %v1172_v22, %v1171_v27  ;;  %v1199_v21 = vadd.f32 %v1198_v24, %v1197_v17  ;;  %v875_v17 = vpop.f32.mrf.mxu1  ;;  %v764_v22 = vpop.f32.mrf.mxu0 }
 0x1e4   :  { %v994_v19 = vmax.f32 %v8746_v31, %v930_v29  ;;  %v996_v11 = vmax.f32 %v860_v13, %v932_v51  ;;  %v995_v49 = vmax.f32 %v749_v3, %v931_v0  ;;  %v997_v41 = vmax.f32 %v862_v54, %v933_v5  ;;  %v8773_v54 = vpop.permute.xlu1 %1352 }
 0x1e5   :  { %v1259_v43 = vadd.f32 %v8684_v45, %v1162_v63  ;;  %v1188_v35 = vadd.f32 %v1187_v2, %v1186_v20  ;;  %v1174_v61 = vrot.slane %v1173_v37, 1  ;;  %v1200_v39 = vrot.slane %v1199_v21, 1  ;;  %v877_v0 = vpop.f32.mrf.mxu1 }
 0x1e6   :  { %v753_v27 = vadd.f32 %v8725_v36, %v8638_v58  ;;  %v866_v29 = vadd.f32 %v8730_v42, %v8638_v58  ;;  %v755_v13 = vadd.f32 %v8737_v44, %v8638_v58  ;;  %v868_v3 = vadd.f32 %v8739_v28, %v8638_v58 }
 0x1e7   :  { %7816 = vtanh.f32 %v1259_v43  ;;  %v1261_v57 = vadd.f32 %v8684_v45, %v1188_v35  ;;  %v1175_v48 = vadd.f32 %v1174_v61, %v1173_v37  ;;  %v1201_v26 = vadd.f32 %v1200_v39, %v1199_v21  ;;  %v8785_v43 = vpop.permute.xlu0 %1376 }
 0x1e8   :  { %v934_v31 = vmul.f32 0.01, %v753_v27  ;;  %v1122_v8 = vmul.f32 %v8709_v34, %v994_v19  ;;  %v757_v20 = vadd.f32 %v756_v60, %v8640_v18  ;;  %v1124_v24 = vmul.f32 %v8709_v34, %v996_v11 }
 0x1e9   :  { %7818 = vtanh.f32 %v1261_v57  ;;  %v1260_v36 = vadd.f32 %v8684_v45, %v1175_v48  ;;  %v1123_v42 = vmul.f32 %v8709_v34, %v995_v49  ;;  %v1125_v51 = vmul.f32 %v8709_v34, %v997_v41  ;;  %v766_v34 = vpop.f32.mrf.mxu0 }
 0x1ea   :  { %v936_v44 = vmul.f32 0.01, %v866_v29  ;;  %v998_v5 = vmax.f32 %v753_v27, %v934_v31  ;;  %v935_v58 = vmul.f32 0.01, %v755_v13  ;;  %v870_v28 = vadd.f32 %v869_v52, %v8640_v18  ;;  %v8788_v52 = vpop.permute.xlu1 %1356 }
 0x1eb   :  { %v759_v63 = vadd.f32 %v758_v25, %v8640_v18  ;;  %7820 = vtanh.f32 %v1260_v36  ;;  %v1262_v2 = vadd.f32 %v8684_v45, %v1201_v26  ;;  %v1121_v60 = vmul.f32 %v8644_v7, %v993_v23  ;;  %v879_v25 = vpop.f32.mrf.mxu1 }
 0x1ec   :  { %v937_v37 = vmul.f32 0.01, %v868_v3  ;;  %v1000_v21 = vmax.f32 %v866_v29, %v936_v44  ;;  %v938_v11 = vmul.f32 0.01, %v757_v20  ;;  %v940_v19 = vmul.f32 0.01, %v870_v28  ;;  %v768_v29 = vpop.f32.mrf.mxu0 }
 0x1ed   :  { %v939_v49 = vmul.f32 0.01, %v759_v63  ;;  %v1202_v35 = vadd.f32 %v1122_v8, %v1118_v40  ;;  %v1228_v61 = vadd.f32 %v1124_v24, %v1120_v12  ;;  %v872_v39 = vadd.f32 %v871_v55, %v8640_v18  ;;  %v881_v8 = vpop.f32.mrf.mxu1 }
 0x1ee   :  { %v1215_v41 = vadd.f32 %v1123_v42, %v1119_v62  ;;  %v1241_v27 = vadd.f32 %v1125_v51, %v1121_v60  ;;  %v1126_v45 = vmul.f32 %v8648_v6, %v998_v5  ;;  %v999_v7 = vmax.f32 %v755_v13, %v935_v58  ;;  %v8798_v42 = vpop.permute.xlu0 %1360 }
 0x1ef   :  { %7822 = vtanh.f32 %v1262_v2  ;;  %v1001_v23 = vmax.f32 %v868_v3, %v937_v37  ;;  %v941_v57 = vmul.f32 0.01, %v872_v39  ;;  %v763_v48 = vadd.f32 %v762_v16, %v8642_v14 }
 0x1f0   :  { %v1128_v26 = vmul.f32 %v8648_v6, %v1000_v21  ;;  %v1002_v31 = vmax.f32 %v757_v20, %v938_v11  ;;  %v1004_v40 = vmax.f32 %v870_v28, %v940_v19  ;;  %v1003_v12 = vmax.f32 %v759_v63, %v939_v49  ;;  %v885_v11 = vpop.f32.mrf.mxu1 }
 0x1f1   :  { %v1005_v18 = vmax.f32 %v872_v39, %v941_v57  ;;  %v942_v55 = vmul.f32 0.01, %v763_v48  ;;  %v876_v36 = vadd.f32 %v875_v17, %v8642_v14  ;;  %v765_v62 = vadd.f32 %v764_v22, %v8642_v14  ;;  %v8803_v17 = vpop.permute.xlu1 %1500 }
 0x1f2   :  { %v1203_v24 = vadd.f32 %v1202_v35, %v1126_v45  ;;  %v1127_v13 = vmul.f32 %v8648_v6, %v999_v7  ;;  %v878_v3 = vadd.f32 %v877_v0, %v8642_v14  ;;  %v767_v16 = vadd.f32 %v766_v34, %v8646_v50  ;;  %v772_v14 = vpop.f32.mrf.mxu0 }
 0x1f3   :  { %v1129_v51 = vmul.f32 %v8648_v6, %v1001_v23  ;;  %v1006_v44 = vmax.f32 %v763_v48, %v942_v55  ;;  %v944_v5 = vmul.f32 0.01, %v876_v36  ;;  %v943_v58 = vmul.f32 0.01, %v765_v62  ;;  %v8817_v48 = vpop.permute.xlu0 %1344 }
 0x1f4   :  { %v8800_v20 = vpop.eup %7816  ;;  %v1229_v22 = vadd.f32 %v1228_v61, %v1128_v26  ;;  %v1130_v28 = vmul.f32 %v8650_v59, %v1002_v31  ;;  %v945_v63 = vmul.f32 0.01, %v878_v3  ;;  %v880_v2 = vadd.f32 %v879_v25, %v8646_v50 }
 0x1f5   :  { %13858 = vst [vmem:[#allocation23_spill] sm:$0xff] %v8800_v20  ;;  %v1132_v60 = vmul.f32 %v8650_v59, %v1004_v40  ;;  %v1131_v37 = vmul.f32 %v8650_v59, %v1003_v12  ;;  %v1133_v6 = vmul.f32 %v8650_v59, %v1005_v18  ;;  %v946_v21 = vmul.f32 0.01, %v767_v16  ;;  %v774_v59 = vpop.f32.mrf.mxu0  ;;  %v887_v18 = vpop.f32.mrf.mxu1 }
 0x1f6   :  { %v8807_v0 = vpop.eup %7818  ;;  %v13516_v19 = vsub.f32 0.0, %v8800_v20  ;;  %v1216_v49 = vadd.f32 %v1215_v41, %v1127_v13  ;;  %v1134_v34 = vmul.f32 %v8752_v56, %v1006_v44  ;;  %v1008_v35 = vmax.f32 %v876_v36, %v944_v5  ;;  %v8819_v41 = vpop.permute.xlu1 %1348 }
 0x1f7   :  { %13859 = vst [vmem:[#allocation24_spill] sm:$0xff] %v8807_v0  ;;  %v13513_v61 = vsub.f32 0.0, %v8807_v0  ;;  %v1242_v39 = vadd.f32 %v1241_v27, %v1129_v51  ;;  %v1007_v25 = vmax.f32 %v765_v62, %v943_v58  ;;  %v948_v45 = vmul.f32 0.01, %v880_v2 }
 0x1f8   :  { %v8815_v7 = vpop.eup %7820  ;;  %v1204_v23 = vadd.f32 %v1203_v24, %v1130_v28  ;;  %v1009_v57 = vmax.f32 %v878_v3, %v945_v63  ;;  %v1230_v26 = vadd.f32 %v1229_v22, %v1132_v60  ;;  %v1217_v31 = vadd.f32 %v1216_v49, %v1131_v37  ;;  %v776_v28 = vpop.f32.mrf.mxu0 }
 0x1f9   :  { %13860 = vst [vmem:[#allocation25_spill] sm:$0xff] %v8815_v7  ;;  %v1243_v40 = vadd.f32 %v1242_v39, %v1133_v6  ;;  %v1010_v12 = vmax.f32 %v767_v16, %v946_v21  ;;  %v8823_v55 = vmul.f32 1.442695, %v13516_v19  ;;  %v1136_v36 = vmul.f32 %v8752_v56, %v1008_v35  ;;  %v8846_v35 = vpop.permute.xlu0 %1328 }
 0x1fa   :  { %v1205_v27 = vadd.f32 %v1204_v23, %v1134_v34  ;;  %v1012_v62 = vmax.f32 %v880_v2, %v948_v45  ;;  %v8828_v24 = vmul.f32 1.442695, %v13513_v61  ;;  %v1135_v13 = vmul.f32 %v8752_v56, %v1007_v25  ;;  %13862 = vst [vmem:[#allocation27_spill] sm:$0xff] %v8846_v35 }
 0x1fb   :  { %v769_v3 = vadd.f32 %v768_v29, %v8646_v50  ;;  %v882_v16 = vadd.f32 %v881_v8, %v8646_v50  ;;  %v13515_v44 = vsub.f32 0.0, %v8815_v7  ;;  %v1137_v5 = vmul.f32 %v8752_v56, %v1009_v57  ;;  %v889_v29 = vpop.f32.mrf.mxu1  ;;  %v9046_v7 = vld [vmem:[%s13480_s2 + $0x48] sm:$0xff] }
 0x1fc   :  { %v8833_v51 = vpop.eup %7822  ;;  %v773_v58 = vadd.f32 %v772_v14, %v8741_v32  ;;  %v886_v22 = vadd.f32 %v885_v11, %v8741_v32  ;;  %v1138_v63 = vmul.f32 %v8656_v10, %v1010_v12  ;;  %v775_v37 = vadd.f32 %v774_v59, %v8741_v32  ;;  %v8844_v11 = vpop.permute.xlu1 %1488  ;;  %13889 = vst [vmem:[#allocation46_spill] sm:$0xff] %v9046_v7 }
 0x1fd   :  { %13861 = vst [vmem:[#allocation26_spill] sm:$0xff] %v8833_v51  ;;  %v947_v2 = vmul.f32 0.01, %v769_v3  ;;  %v949_v60 = vmul.f32 0.01, %v882_v16  ;;  %v1140_v50 = vmul.f32 %v8656_v10, %v1012_v62  ;;  %v888_v21 = vadd.f32 %v887_v18, %v8741_v32 }
 0x1fe   :  { %v950_v8 = vmul.f32 0.01, %v773_v58  ;;  %v952_v6 = vmul.f32 0.01, %v886_v22  ;;  %v951_v34 = vmul.f32 0.01, %v775_v37  ;;  %v777_v14 = vadd.f32 %v776_v28, %v8652_v47  ;;  %v778_v28 = vpop.f32.mrf.mxu0 }
 0x1ff   :  { %v1011_v49 = vmax.f32 %v769_v3, %v947_v2  ;;  %v1013_v56 = vmax.f32 %v882_v16, %v949_v60  ;;  %v953_v45 = vmul.f32 0.01, %v888_v21  ;;  %v890_v23 = vadd.f32 %v889_v29, %v8652_v47  ;;  %v891_v2 = vpop.f32.mrf.mxu1 }
 0x200   :  { %v1014_v39 = vmax.f32 %v773_v58, %v950_v8  ;;  %v1016_v25 = vmax.f32 %v886_v22, %v952_v6  ;;  %v13514_v57 = vsub.f32 0.0, %v8833_v51  ;;  %v1231_v59 = vadd.f32 %v1230_v26, %v1136_v36 }
 0x201   :  { %v1218_v12 = vadd.f32 %v1217_v31, %v1135_v13  ;;  %v954_v62 = vmul.f32 0.01, %v777_v14  ;;  %v1015_v3 = vmax.f32 %v775_v37, %v951_v34  ;;  %v956_v16 = vmul.f32 0.01, %v890_v23  ;;  %v8857_v34 = vpop.permute.xlu1 %1336 }
 0x202   :  { %v1142_v32 = vmul.f32 %v8660_v38, %v1014_v39  ;;  %v1144_v18 = vmul.f32 %v8660_v38, %v1016_v25  ;;  %v1244_v60 = vadd.f32 %v1243_v40, %v1137_v5  ;;  %v1206_v61 = vadd.f32 %v1205_v27, %v1138_v63  ;;  %v8859_v39 = vpop.permute.xlu0 %1524 }
 0x203   :  { %v1017_v58 = vmax.f32 %v888_v21, %v953_v45  ;;  %v1018_v22 = vmax.f32 %v777_v14, %v954_v62  ;;  %v1232_v8 = vadd.f32 %v1231_v59, %v1140_v50  ;;  %v1139_v29 = vmul.f32 %v8656_v10, %v1011_v49 }
 0x204   :  { %v1141_v6 = vmul.f32 %v8656_v10, %v1013_v56  ;;  %v1020_v26 = vmax.f32 %v890_v23, %v956_v16  ;;  %v1207_v31 = vadd.f32 %v1206_v61, %v1142_v32  ;;  %v779_v13 = vadd.f32 %v778_v28, %v8652_v47 }
 0x205   :  { %v1146_v36 = vmul.f32 %v8765_v1, %v1018_v22  ;;  %v892_v37 = vadd.f32 %v891_v2, %v8652_v47  ;;  %v1233_v40 = vadd.f32 %v1232_v8, %v1144_v18  ;;  %v1143_v27 = vmul.f32 %v8660_v38, %v1015_v3 }
 0x206   :  { %v1148_v5 = vmul.f32 %v8765_v1, %v1020_v26  ;;  %v1145_v63 = vmul.f32 %v8660_v38, %v1017_v58  ;;  %v955_v50 = vmul.f32 0.01, %v779_v13  ;;  %v13517_v21 = vmov 20  }
 0x207   :  { %v1208_v10 = vadd.f32 %v1207_v31, %v1146_v36  ;;  %v957_v61 = vmul.f32 0.01, %v892_v37  ;;  %7608 = vset.pattern.permute.xlu1 %v13517_v21  ;;  %7607 = vset.pattern.permute.xlu0 %v13517_v21  ;;  %7824 = vpow2.f32 %v8823_v55  ;;  %v1297_v47 = vmul.f32 1.442695, %v13515_v44  ;;  %v8896_v36 = vld [vmem:[%s13480_s2] sm:$0xff] }
 0x208   :  { %v1219_v49 = vadd.f32 %v1218_v12, %v1139_v29  ;;  %v1234_v56 = vadd.f32 %v1233_v40, %v1148_v5  ;;  %1773 = vperm.xlu1 %7608, %v8615_v9   ;;  %1769 = vperm.xlu0 %7607, %v8599_v46   ;;  %v1245_v38 = vadd.f32 %v1244_v60, %v1141_v6  ;;  %7826 = vpow2.f32 %v8828_v24  ;;  %v8876_v9 = vpop.permute.xlu1 %1340  ;;  %v8878_v46 = vpop.permute.xlu0 %1512 }
 0x209   :  { %v1209_v14 = vrot.slane %v1208_v10, 4  ;;  %v1019_v25 = vmax.f32 %v779_v13, %v955_v50  ;;  %v1021_v45 = vmax.f32 %v892_v37, %v957_v61  ;;  %v1301_v23 = vmul.f32 1.442695, %v13514_v57  ;;  %13865 = vst [vmem:[#allocation30_spill] sm:$0xff] %v8896_v36 }
 0x20a   :  { %v1220_v59 = vadd.f32 %v1219_v49, %v1143_v27  ;;  %v1235_v55 = vrot.slane %v1234_v56, 4  ;;  %v1246_v62 = vadd.f32 %v1245_v38, %v1145_v63  ;;  %7828 = vpow2.f32 %v1297_v47  ;;  %v8904_v47 = vld [vmem:[%s13480_s2 + $0x8] sm:$0xff]  ;;  %v8910_v49 = vld [vmem:[%s13480_s2 + $0x10] sm:$0xff] }
 0x20b   :  { %v1210_v32 = vadd.f32 %v1209_v14, %v1208_v10  ;;  %v1147_v12 = vmul.f32 %v8765_v1, %v1019_v25  ;;  %v1149_v18 = vmul.f32 %v8765_v1, %v1021_v45  ;;  %7830 = vpow2.f32 %v1301_v23  ;;  %v8885_v1 = vld [vmem:[%s13480_s2 + $0x20] sm:$0xff]  ;;  %13866 = vst [vmem:[#allocation31_spill] sm:$0xff] %v8904_v47  ;;  %13867 = vst [vmem:[#allocation32_spill] sm:$0xff] %v8910_v49 }
 0x20c   :  { %v1236_v3 = vadd.f32 %v1235_v55, %v1234_v56  ;;  %1777 = vperm.xlu1 %7608, %v8607_v30   ;;  %1781 = vperm.xlu0 %7607, %v8590_v33   ;;  %13863 = vst [vmem:[#allocation28_spill] sm:$0xff] %v8885_v1  ;;  %v13519_v30 = vmov 28   ;;  %v8889_v26 = vpop.permute.xlu1 %1484  ;;  %v8891_v31 = vpop.permute.xlu0 %1508  ;;  %v13868_v55 = vld [vmem:[#allocation12_spill] sm:$0xff] }
 0x20d   :  { %v1211_v24 = vrot.slane %v1210_v32, 2  ;;  %v1221_v16 = vadd.f32 %v1220_v59, %v1147_v12  ;;  %v1247_v28 = vadd.f32 %v1246_v62, %v1149_v18  ;;  %13864 = vst [vmem:[#allocation29_spill] sm:$0xff] %v8889_v26  ;;  %v8919_v62 = vsub.s32 1, %v13868_v55  ;;  %v13870_v12 = vld [vmem:[#allocation16_spill] sm:$0xff] }
 0x20e   :  { %v1237_v2 = vrot.slane %v1236_v3, 2 }
 0x20f   :  { %v1212_v60 = vadd.f32 %v1211_v24, %v1210_v32  ;;  %v1222_v58 = vrot.slane %v1221_v16, 4  ;;  %v1248_v22 = vrot.slane %v1247_v28, 4  ;;  %13869 = vst [vmem:[#allocation12_spill] sm:$0xff] %v8919_v62 }
 0x210   :  { %v1238_v8 = vadd.f32 %v1237_v2, %v1236_v3  ;;  %1785 = vperm.xlu1 %7608, %v8885_v1   ;;  %7609 = vset.pattern.permute.xlu0 %v13519_v30  ;;  %v8914_v23 = vpop.permute.xlu1 %1332  ;;  %v8916_v59 = vpop.permute.xlu0 %1496 }
 0x211   :  { %v1213_v33 = vrot.slane %v1212_v60, 1  ;;  %v1223_v29 = vadd.f32 %v1222_v58, %v1221_v16  ;;  %v1249_v6 = vadd.f32 %v1248_v22, %v1247_v28  ;;  %2235 = vperm.xlu0 %7609, %v8896_v36   ;;  %v8926_v28 = vld [vmem:[%s13480_s2 + $0x18] sm:$0xff] }
 0x212   :  { %v1239_v13 = vrot.slane %v1238_v8, 1  ;;  %13871 = vst [vmem:[#allocation33_spill] sm:$0xff] %v8926_v28 }
 0x213   :  { %v1214_v37 = vadd.f32 %v1213_v33, %v1212_v60  ;;  %v1224_v40 = vrot.slane %v1223_v29, 2  ;;  %v1250_v27 = vrot.slane %v1249_v6, 2  ;;  %v13872_v60 = vld [vmem:[#allocation17_spill] sm:$0xff] }
 0x214   :  { %v1240_v5 = vadd.f32 %v1239_v13, %v1238_v8  ;;  %7610 = vset.pattern.permute.xlu1 %v13519_v30  ;;  %v7825_v63 = vpop.eup %7824  ;;  %v8933_v8 = vld [vmem:[%s13480_s2 + $0x28] sm:$0xff] }
 0x215   :  { %v1271_v10 = vadd.f32 %v8662_v53, %v1214_v37  ;;  %v1225_v50 = vadd.f32 %v1224_v40, %v1223_v29  ;;  %v1251_v61 = vadd.f32 %v1250_v27, %v1249_v6  ;;  %2239 = vperm.xlu1 %7610, %v8904_v47   ;;  %2243 = vperm.xlu0 %7609, %v8910_v49   ;;  %v7827_v38 = vpop.eup %7826  ;;  %v1307_v3 = vrot.slane %v7825_v63, 7  ;;  %v8946_v63 = vpop.permute.xlu1 %1472 }
 0x216   :  { %v1273_v56 = vadd.f32 %v8662_v53, %v1240_v5  ;;  %v1309_v22 = vrot.slane %v7827_v38, 7  ;;  %13873 = vst [vmem:[#allocation34_spill] sm:$0xff] %v8933_v8  ;;  %13876 = vst [vmem:[#allocation37_spill] sm:$0xff] %v8946_v63  ;;  %v13878_v38 = vld [vmem:[#allocation14_spill] sm:$0xff] }
 0x217   :  { %v1279_v14 = vrot.slane %v1271_v10, 7  ;;  %v1226_v25 = vrot.slane %v1225_v50, 1  ;;  %v1252_v45 = vrot.slane %v1251_v61, 1  ;;  %v7829_v2 = vpop.eup %7828  ;;  %v8948_v10 = vpop.permute.xlu0 %1492 }
 0x218   :  { %v1281_v32 = vrot.slane %v1273_v56, 7  ;;  %v7831_v33 = vpop.eup %7830 }
 0x219   :  { %v1287_v18 = vsub.f32 %v13870_v12, %v1279_v14  ;;  %v1227_v24 = vadd.f32 %v1226_v25, %v1225_v50  ;;  %v1253_v16 = vadd.f32 %v1252_v45, %v1251_v61  ;;  %7611 = vset.pattern.permute.xlu1 %v13517_v21  ;;  %2247 = vperm.xlu0 %7609, %v8926_v28   ;;  %v1308_v61 = vrot.slane %v7829_v2, 7  ;;  %v13879_v25 = vld [vmem:[#allocation15_spill] sm:$0xff] }
 0x21a   :  { %v1289_v58 = vsub.f32 %v13872_v60, %v1281_v32  ;;  %1789 = vperm.xlu1 %7611, %v8933_v8   ;;  %v1310_v55 = vrot.slane %v7831_v33, 7  ;;  %v13898_v28 = vmov 20  }
 0x21b   :  { %v8936_v29 = vmul.f32 %v1307_v3, %v1287_v18  ;;  %v1272_v6 = vadd.f32 %v8662_v53, %v1227_v24  ;;  %v1274_v13 = vadd.f32 %v8662_v53, %v1253_v16  ;;  %v8958_v53 = vld [vmem:[%s13480_s2 + $0x30] sm:$0xff]  ;;  %v9017_v57 = vpop.permute.xlu0 %1480 }
 0x21c   :  { %v8940_v37 = vmul.f32 %v1309_v22, %v1289_v58  ;;  %13877 = vst [vmem:[#allocation38_spill] sm:$0xff] %v8958_v53  ;;  %v13882_v22 = vld [vmem:[#allocation18_spill] sm:$0xff]  ;;  %13885 = vst [vmem:[#allocation42_spill] sm:$0xff] %v9017_v57 }
 0x21d   :  { %13874 = vst [vmem:[#allocation35_spill] sm:$0xff] %v8936_v29  ;;  %v8944_v40 = vrot.slane %v8936_v29, %v8919_v62  ;;  %v1280_v27 = vrot.slane %v1272_v6, 7  ;;  %v1282_v5 = vrot.slane %v1274_v13, 7  ;;  %2251 = vperm.xlu0 %7609, %v8885_v1  }
 0x21e   :  { %13875 = vst [vmem:[#allocation36_spill] sm:$0xff] %v8940_v37  ;;  %v8953_v50 = vrot.slane %v8940_v37, %v8919_v62  ;;  %1793 = vperm.xlu1 %7611, %v8958_v53  }
 0x21f   :  { %v1423_v56 = vmul.f32 %v8944_v40, %v8817_v48  ;;  %v1288_v14 = vsub.f32 %v13878_v38, %v1280_v27  ;;  %v1290_v45 = vsub.f32 %v13879_v25, %v1282_v5  ;;  %v1407_v18 = vmul.f32 %v8944_v40, %v8846_v35  ;;  %v9099_v36 = vpop.permute.xlu0 %1476 }
 0x220   :  { %v1425_v32 = vmul.f32 %v8953_v50, %v8817_v48  ;;  %v1409_v3 = vmul.f32 %v8953_v50, %v8846_v35  ;;  %v8973_v24 = vmul.f32 %v8944_v40, %v8857_v34  ;;  %v1459_v33 = vmul.f32 %v8944_v40, %v13882_v22  ;;  %13897 = vst [vmem:[#allocation53_spill] sm:$0xff] %v9099_v36 }
 0x221   :  { %v8976_v16 = vadd.f32 %v8844_v11, %v1423_v56  ;;  %v8978_v2 = vmul.f32 %v1308_v61, %v1288_v14  ;;  %v8980_v58 = vmul.f32 %v1310_v55, %v1290_v45  ;;  %2259 = vperm.xlu0 %7609, %v8958_v53   ;;  %v8990_v13 = vmul.f32 %v8953_v50, %v8857_v34  ;;  %v8999_v61 = vld [vmem:[%s13480_s2 + $0x38] sm:$0xff]  ;;  %v9114_v53 = vld [vmem:[%s13480_s2 + $0x40] sm:$0xff] }
 0x222   :  { %v8986_v6 = vadd.f32 %v8844_v11, %v1425_v32  ;;  %v1461_v27 = vmul.f32 %v8953_v50, %v13882_v22  ;;  %v1419_v5 = vmul.f32 %v8944_v40, %v8876_v9  ;;  %13884 = vst [vmem:[#allocation41_spill] sm:$0xff] %v8999_v61  ;;  %1797 = vperm.xlu1 %7611, %v8999_v61   ;;  %v9015_v32 = vpop.permute.xlu1 %1320 }
 0x223   :  { %13880 = vst [vmem:[#allocation39_spill] sm:$0xff] %v8978_v2  ;;  %13881 = vst [vmem:[#allocation40_spill] sm:$0xff] %v8980_v58  ;;  %v9004_v56 = vrot.slane %v8978_v2, %v8919_v62  ;;  %v9008_v14 = vrot.slane %v8980_v58, %v8919_v62  ;;  %v9011_v45 = vadd.f32 %v8859_v39, %v1459_v33  ;;  %v9020_v44 = vmul.f32 0.01, %v8976_v16 }
 0x224   :  { %13883 = vst [vmem:[#allocation18_spill] sm:$0xff] %v8986_v6  ;;  %v1421_v55 = vmul.f32 %v8953_v50, %v8876_v9  ;;  %v9023_v19 = vadd.f32 %v8859_v39, %v1461_v27  ;;  %v1447_v21 = vmul.f32 %v8944_v40, %v8701_v15  ;;  %v1449_v33 = vmul.f32 %v8953_v50, %v8701_v15 }
 0x225   :  { %v9030_v30 = vmul.f32 0.01, %v8986_v6  ;;  %v9034_v51 = vmul.f32 %v9004_v56, %v8857_v34  ;;  %v9038_v0 = vmul.f32 %v9008_v14, %v8857_v34  ;;  %v9041_v27 = vmul.f32 0.01, %v9011_v45  ;;  %2271 = vperm.xlu0 %7609, %v9046_v7  }
 0x226   :  { %v9050_v20 = vmul.f32 0.01, %v9023_v19  ;;  %v9054_v58 = vmul.f32 %v9004_v56, %v8876_v9  ;;  %v9057_v34 = vadd.f32 %v8878_v46, %v1447_v21  ;;  %v9060_v2 = vadd.f32 %v8878_v46, %v1449_v33 }
 0x227   :  { %13886 = vst [vmem:[#allocation43_spill] sm:$0xff] %v9030_v30  ;;  %13887 = vst [vmem:[#allocation44_spill] sm:$0xff] %v9034_v51  ;;  %v13891_v62 = vmov 28   ;;  %v9064_v37 = vadd.f32 %v8889_v26, %v1419_v5  ;;  %v9067_v29 = vadd.f32 %v8889_v26, %v1421_v55  ;;  %v1443_v25 = vmul.f32 %v8944_v40, %v8748_v4 }
 0x228   :  { %13888 = vst [vmem:[#allocation45_spill] sm:$0xff] %v9038_v0  ;;  %13890 = vst [vmem:[#allocation47_spill] sm:$0xff] %v9054_v58  ;;  %7612 = vset.pattern.permute.xlu1 %v13891_v62  ;;  %v1445_v38 = vmul.f32 %v8953_v50, %v8748_v4  ;;  %v9076_v21 = vmul.f32 %v9008_v14, %v8876_v9  ;;  %v9079_v33 = vmul.f32 0.01, %v9057_v34  ;;  %v9082_v5 = vmul.f32 0.01, %v9060_v2 }
 0x229   :  { %13892 = vst [vmem:[#allocation48_spill] sm:$0xff] %v9064_v37  ;;  %13893 = vst [vmem:[#allocation49_spill] sm:$0xff] %v9067_v29  ;;  %2255 = vperm.xlu1 %7612, %v8933_v8   ;;  %v1411_v55 = vmul.f32 %v8944_v40, %v8914_v23  ;;  %v9087_v60 = vmul.f32 0.01, %v9064_v37  ;;  %v9090_v12 = vadd.f32 %v8891_v31, %v1443_v25  ;;  %v1325_v8 = vpop.permute.xlu1 %1324  ;;  %7616 = vset.pattern.permute.xlu0 %v13898_v28 }
 0x22a   :  { %13894 = vst [vmem:[#allocation50_spill] sm:$0xff] %v9076_v21  ;;  %v9093_v47 = vadd.f32 %v8891_v31, %v1445_v38  ;;  %v9097_v9 = vmul.f32 %v9004_v56, %v8914_v23  ;;  %v9103_v1 = vmul.f32 0.01, %v9067_v29  ;;  %v1413_v49 = vmul.f32 %v8953_v50, %v8914_v23  ;;  %1801 = vperm.xlu0 %7616, %v9114_v53  }
 0x22b   :  { %13895 = vst [vmem:[#allocation51_spill] sm:$0xff] %v9087_v60  ;;  %v1431_v25 = vmul.f32 %v8944_v40, %v8773_v54  ;;  %v1433_v38 = vmul.f32 %v8953_v50, %v8773_v54  ;;  %v9122_v35 = vmul.f32 %v9008_v14, %v8914_v23  ;;  %v9125_v29 = vadd.f32 %v8946_v63, %v1407_v18 }
 0x22c   :  { %13896 = vst [vmem:[#allocation52_spill] sm:$0xff] %v9097_v9  ;;  %13899 = vst [vmem:[#allocation54_spill] sm:$0xff] %v9103_v1  ;;  %v9118_v9 = vmul.f32 0.01, %v9090_v12  ;;  %v9128_v1 = vadd.f32 %v8946_v63, %v1409_v3  ;;  %v1427_v21 = vmul.f32 %v8944_v40, %v8819_v41  ;;  %v1429_v23 = vmul.f32 %v8953_v50, %v8819_v41 }
 0x22d   :  { %13900 = vst [vmem:[#allocation55_spill] sm:$0xff] %v9122_v35  ;;  %13901 = vst [vmem:[#allocation56_spill] sm:$0xff] %v9125_v29  ;;  %2263 = vperm.xlu1 %7612, %v8999_v61   ;;  %v9132_v37 = vadd.f32 %v8916_v59, %v1431_v25  ;;  %v9135_v60 = vadd.f32 %v8916_v59, %v1433_v38  ;;  %v9142_v18 = vmul.f32 0.01, %v9093_v47  ;;  %v9145_v3 = vmul.f32 0.01, %v9125_v29  ;;  %v9184_v29 = vpop.permute.xlu1 %1468 }
 0x22e   :  { %13902 = vst [vmem:[#allocation57_spill] sm:$0xff] %v9128_v1  ;;  %v9148_v61 = vmul.f32 0.01, %v9128_v1  ;;  %v1399_v25 = vmul.f32 %v8944_v40, %v9015_v32  ;;  %v9156_v63 = vadd.f32 %v8948_v10, %v1427_v21  ;;  %v9159_v35 = vadd.f32 %v8948_v10, %v1429_v23  ;;  %v9168_v1 = vld [vmem:[%s13480_s2 + $0x58] sm:$0xff]  ;;  %13910 = vst [vmem:[#allocation65_spill] sm:$0xff] %v9184_v29 }
 0x22f   :  { %13903 = vst [vmem:[#allocation58_spill] sm:$0xff] %v9145_v3  ;;  %v9153_v38 = vmul.f32 0.01, %v9132_v37  ;;  %v9163_v0 = vmul.f32 %v9004_v56, %v9015_v32  ;;  %1813 = vperm.xlu0 %7616, %v9168_v1   ;;  %v1401_v21 = vmul.f32 %v8953_v50, %v9015_v32  ;;  %v9178_v23 = vadd.f32 %v9017_v57, %v8973_v24  ;;  %v9186_v3 = vpop.permute.xlu0 %1464 }
 0x230   :  { %13904 = vst [vmem:[#allocation59_spill] sm:$0xff] %v9148_v61  ;;  %13905 = vst [vmem:[#allocation60_spill] sm:$0xff] %v9156_v63  ;;  %v9172_v61 = vmul.f32 0.01, %v9135_v60  ;;  %v9190_v26 = vmul.f32 0.01, %v9156_v63  ;;  %v9197_v24 = vmul.f32 %v9008_v14, %v9015_v32  ;;  %v1403_v51 = vmul.f32 %v8944_v40, %v1325_v8 }
 0x231   :  { %13906 = vst [vmem:[#allocation61_spill] sm:$0xff] %v9159_v35  ;;  %13907 = vst [vmem:[#allocation62_spill] sm:$0xff] %v9163_v0  ;;  %v9182_v0 = vadd.f32 %v9017_v57, %v8990_v13  ;;  %7613 = vset.pattern.permute.xlu1 %v13898_v28  ;;  %v9193_v58 = vmul.f32 0.01, %v9159_v35  ;;  %v9202_v13 = vmul.f32 0.01, %v9178_v23  ;;  %v9208_v6 = vmul.f32 %v9004_v56, %v1325_v8 }
 0x232   :  { %13908 = vst [vmem:[#allocation63_spill] sm:$0xff] %v9178_v23  ;;  %13911 = vst [vmem:[#allocation66_spill] sm:$0xff] %v9186_v3  ;;  %1805 = vperm.xlu1 %7613, %v9046_v7   ;;  %v1405_v35 = vmul.f32 %v8953_v50, %v1325_v8  ;;  %v9215_v32 = vadd.f32 %v9099_v36, %v1413_v49  ;;  %v9221_v7 = vadd.f32 %v9186_v3, %v1399_v25 }
 0x233   :  { %13909 = vst [vmem:[#allocation64_spill] sm:$0xff] %v9182_v0  ;;  %13912 = vst [vmem:[#allocation67_spill] sm:$0xff] %v9193_v58  ;;  %v9205_v57 = vmul.f32 0.01, %v9182_v0  ;;  %v9212_v58 = vadd.f32 %v9099_v36, %v1411_v55  ;;  %v9226_v0 = vld [vmem:[%s13480_s2 + $0x60] sm:$0xff]  ;;  %v1460_v49 = vmul.f32 %v9004_v56, %v13882_v22 }
 0x234   :  { %13913 = vst [vmem:[#allocation68_spill] sm:$0xff] %v9197_v24  ;;  %13914 = vst [vmem:[#allocation69_spill] sm:$0xff] %v9202_v13  ;;  %v9218_v24 = vadd.f32 %v9184_v29, %v1403_v51  ;;  %1817 = vperm.xlu0 %7616, %v9226_v0   ;;  %v9233_v55 = vadd.f32 %v9184_v29, %v1405_v35  ;;  %v1456_v51 = vmul.f32 %v9004_v56, %v8785_v43  ;;  %v9253_v35 = vld [vmem:[%s13480_s2 + $0x50] sm:$0xff] }
 0x235   :  { %13915 = vst [vmem:[#allocation70_spill] sm:$0xff] %v9205_v57  ;;  %13916 = vst [vmem:[#allocation71_spill] sm:$0xff] %v9208_v6  ;;  %v9230_v6 = vmul.f32 %v9008_v14, %v1325_v8  ;;  %v9240_v25 = vmul.f32 0.01, %v9212_v58  ;;  %v9243_v36 = vmul.f32 0.01, %v9215_v32  ;;  %v9246_v57 = vadd.f32 %v9186_v3, %v1401_v21 }
 0x236   :  { %13917 = vst [vmem:[#allocation72_spill] sm:$0xff] %v9212_v58  ;;  %13918 = vst [vmem:[#allocation73_spill] sm:$0xff] %v9215_v32  ;;  %v1458_v8 = vmul.f32 %v9008_v14, %v8785_v43  ;;  %1809 = vperm.xlu1 %7613, %v9253_v35   ;;  %v9260_v29 = vmul.f32 0.01, %v9233_v55  ;;  %v9263_v32 = vmul.f32 0.01, %v9221_v7  ;;  %v1588_v3 = vadd.f32 %v8859_v39, %v1460_v49 }
 0x237   :  { %13919 = vst [vmem:[#allocation74_spill] sm:$0xff] %v9218_v24  ;;  %13920 = vst [vmem:[#allocation75_spill] sm:$0xff] %v9221_v7  ;;  %v13929_v21 = vld [vmem:[#allocation19_spill] sm:$0xff]  ;;  %v1457_v49 = vmul.f32 %v8953_v50, %v8785_v43 }
 0x238   :  { %13921 = vst [vmem:[#allocation76_spill] sm:$0xff] %v9230_v6  ;;  %13922 = vst [vmem:[#allocation77_spill] sm:$0xff] %v9233_v55  ;;  %v9257_v6 = vmul.f32 0.01, %v9218_v24  ;;  %v1586_v58 = vadd.f32 %v13929_v21, %v1458_v8  ;;  %v9275_v55 = vld [vmem:[%s13480_s2 + $0x70] sm:$0xff] }
 0x239   :  { %13923 = vst [vmem:[#allocation78_spill] sm:$0xff] %v9240_v25  ;;  %13924 = vst [vmem:[#allocation79_spill] sm:$0xff] %v9243_v36  ;;  %v1462_v36 = vmul.f32 %v9008_v14, %v13882_v22  ;;  %v1455_v25 = vmul.f32 %v8944_v40, %v8785_v43  ;;  %1825 = vperm.xlu0 %7616, %v9275_v55   ;;  %v1717_v22 = vmax.f32 %v9023_v19, %v9050_v20  ;;  %v9294_v20 = vld [vmem:[%s13480_s2] sm:$0x1] }
 0x23a   :  { %13925 = vst [vmem:[#allocation80_spill] sm:$0xff] %v9246_v57  ;;  %13926 = vst [vmem:[#allocation81_spill] sm:$0xff] %v9257_v6  ;;  %v1584_v57 = vadd.f32 %v13929_v21, %v1456_v51  ;;  %v1715_v51 = vmax.f32 %v9011_v45, %v9041_v27  ;;  %v1652_v8 = vmul.f32 0.01, %v1588_v3  ;;  %v1650_v6 = vmul.f32 0.01, %v1586_v58 }
 0x23b   :  { %13927 = vst [vmem:[#allocation82_spill] sm:$0xff] %v9260_v29  ;;  %13928 = vst [vmem:[#allocation83_spill] sm:$0xff] %v9263_v32  ;;  %v1590_v24 = vadd.f32 %v8859_v39, %v1462_v36  ;;  %v1583_v7 = vadd.f32 %v13929_v21, %v1455_v25  ;;  %v8089_v32 = vmov 36   ;;  %v1448_v45 = vmul.f32 %v9004_v56, %v8701_v15  ;;  %v13931_v27 = vld [vmem:[#allocation20_spill] sm:$0xff]  ;;  %v13933_v25 = vld [vmem:[#allocation21_spill] sm:$0xff] }
 0x23c   :  { %13930 = vst [vmem:[#allocation19_spill] sm:$0xff] %v9275_v55  ;;  %v1648_v29 = vmul.f32 0.01, %v1584_v57  ;;  %7614 = vset.pattern.permute.xlu1 %v8089_v32  ;;  %v1585_v55 = vadd.f32 %v13929_v21, %v1457_v49  ;;  %v1452_v43 = vmul.f32 %v9004_v56, %v13931_v27  ;;  %13932 = vst [vmem:[#allocation20_spill] sm:$0xff] %v9294_v20 }
 0x23d   :  { %2467 = vperm.xlu1 %7614, %v9294_v20   ;;  %v1716_v19 = vmax.f32 %v1588_v3, %v1652_v8  ;;  %v1654_v39 = vmul.f32 0.01, %v1590_v24  ;;  %v1714_v36 = vmax.f32 %v1586_v58, %v1650_v6  ;;  %v1647_v32 = vmul.f32 0.01, %v1583_v7  ;;  %7620 = vset.pattern.permute.xlu0 %v13891_v62 }
 0x23e   :  { %v1712_v23 = vmax.f32 %v1584_v57, %v1648_v29  ;;  %v1649_v57 = vmul.f32 0.01, %v1585_v55  ;;  %v1576_v29 = vadd.f32 %v8878_v46, %v1448_v45  ;;  %v1580_v21 = vadd.f32 %v13933_v25, %v1452_v43  ;;  %2283 = vperm.xlu0 %7620, %v9226_v0  }
 0x23f   :  { %v1450_v49 = vmul.f32 %v9008_v14, %v8701_v15  ;;  %v1718_v30 = vmax.f32 %v1590_v24, %v1654_v39  ;;  %v1711_v63 = vmax.f32 %v1583_v7, %v1647_v32  ;;  %v1454_v3 = vmul.f32 %v9008_v14, %v13931_v27 }
 0x240   :  { %v1765_v13 = vpack.c.bf16 %v1716_v19, %v1712_v23  ;;  %v1713_v58 = vmax.f32 %v1585_v55, %v1649_v57  ;;  %v1640_v6 = vmul.f32 0.01, %v1576_v29  ;;  %v1644_v8 = vmul.f32 0.01, %v1580_v21 }
 0x241   :  { %v1578_v20 = vadd.f32 %v8878_v46, %v1450_v49  ;;  %7615 = vset.pattern.permute.xlu1 %v13891_v62  ;;  %v1767_v45 = vpack.c.bf16 %v1718_v30, %v1714_v36  ;;  %v1764_v43 = vpack.c.bf16 %v1715_v51, %v1711_v63  ;;  %v1582_v15 = vadd.f32 %v13933_v25, %v1454_v3  ;;  %v9314_v46 = vld [vmem:[%s13480_s2 + $0x78] sm:$0xff] }
 0x242   :  { %1880 = vmatprep.subr.bf16.mxu0 %v1765_v13  ;;  %v1451_v23 = vmul.f32 %v8944_v40, %v13931_v27  ;;  %v1766_v24 = vpack.c.bf16 %v1717_v22, %v1713_v58  ;;  %v1704_v7 = vmax.f32 %v1576_v29, %v1640_v6  ;;  %v1708_v19 = vmax.f32 %v1580_v21, %v1644_v8 }
 0x243   :  { %v1642_v39 = vmul.f32 0.01, %v1578_v20  ;;  %2267 = vperm.xlu1 %7615, %v9114_v53   ;;  %2295 = vperm.xlu0 %7620, %v9314_v46   ;;  %v1646_v30 = vmul.f32 0.01, %v1582_v15  ;;  %v1703_v13 = vmax.f32 %v9057_v34, %v9079_v33  ;;  %v1453_v55 = vmul.f32 %v8953_v50, %v13931_v27  ;;  %v13934_v34 = vld [vmem:[#allocation22_spill] sm:$0xff] }
 0x244   :  { %1993 = vmatprep.subr.bf16.mxu1 %v1767_v45  ;;  %1881 = vmatpush1.bf16.msra.mxu0 %v1764_v43  ;;  %v1579_v63 = vadd.f32 %v13933_v25, %v1451_v23  ;;  %v1761_v51 = vpack.c.bf16 %v1708_v19, %v1704_v7  ;;  %v1705_v36 = vmax.f32 %v9060_v2, %v9082_v5 }
 0x245   :  { %1994 = vmatpush1.bf16.msra.mxu1 %v1766_v24  ;;  %v1706_v22 = vmax.f32 %v1578_v20, %v1642_v39  ;;  %v1440_v32 = vmul.f32 %v9004_v56, %v8798_v42  ;;  %v1710_v57 = vmax.f32 %v1582_v15, %v1646_v30  ;;  %v1581_v21 = vadd.f32 %v13933_v25, %v1453_v55 }
 0x246   :  { %v1643_v29 = vmul.f32 0.01, %v1579_v63  ;;  %v1444_v49 = vmul.f32 %v9004_v56, %v8748_v4  ;;  %1882 = vmatprep.subr.bf16.mxu0 %v1761_v51  ;;  %v1442_v27 = vmul.f32 %v9008_v14, %v8798_v42  ;;  %v1446_v20 = vmul.f32 %v9008_v14, %v8748_v4  ;;  %v9344_v4 = vld [vmem:[%s13480_s2 + $0x68] sm:$0xff] }
 0x247   :  { %v1568_v33 = vadd.f32 %v13934_v34, %v1440_v32  ;;  %v1439_v2 = vmul.f32 %v8944_v40, %v8798_v42  ;;  %v1763_v5 = vpack.c.bf16 %v1710_v57, %v1706_v22  ;;  %v1645_v58 = vmul.f32 0.01, %v1581_v21  ;;  %7617 = vset.pattern.permute.xlu1 %v13898_v28 }
 0x248   :  { %v1707_v3 = vmax.f32 %v1579_v63, %v1643_v29  ;;  %v1572_v25 = vadd.f32 %v8891_v31, %v1444_v49  ;;  %v1570_v8 = vadd.f32 %v13934_v34, %v1442_v27  ;;  %v1574_v45 = vadd.f32 %v8891_v31, %v1446_v20  ;;  %1821 = vperm.xlu1 %7617, %v9344_v4  }
 0x249   :  { %v1632_v6 = vmul.f32 0.01, %v1568_v33  ;;  %v1567_v43 = vadd.f32 %v13934_v34, %v1439_v2  ;;  %1995 = vmatprep.subr.bf16.mxu1 %v1763_v5  ;;  %v1709_v23 = vmax.f32 %v1581_v21, %v1645_v58  ;;  %v1699_v7 = vmax.f32 %v9090_v12, %v9118_v9 }
 0x24a   :  { %v1760_v15 = vpack.c.bf16 %v1707_v3, %v1703_v13  ;;  %v1636_v24 = vmul.f32 0.01, %v1572_v25  ;;  %v1634_v39 = vmul.f32 0.01, %v1570_v8  ;;  %v1638_v30 = vmul.f32 0.01, %v1574_v45 }
 0x24b   :  { %v1696_v19 = vmax.f32 %v1568_v33, %v1632_v6  ;;  %v1631_v31 = vmul.f32 0.01, %v1567_v43  ;;  %v1762_v63 = vpack.c.bf16 %v1709_v23, %v1705_v36  ;;  %v1441_v51 = vmul.f32 %v8953_v50, %v8798_v42 }
 0x24c   :  { %1883 = vmatpush1.bf16.msra.mxu0 %v1760_v15  ;;  %v1700_v55 = vmax.f32 %v1572_v25, %v1636_v24  ;;  %v1701_v22 = vmax.f32 %v9093_v47, %v9142_v18  ;;  %v1698_v32 = vmax.f32 %v1570_v8, %v1634_v39  ;;  %v1702_v13 = vmax.f32 %v1574_v45, %v1638_v30 }
 0x24d   :  { %v1695_v57 = vmax.f32 %v1567_v43, %v1631_v31  ;;  %v1432_v29 = vmul.f32 %v9004_v56, %v8773_v54  ;;  %7618 = vset.pattern.permute.xlu1 %v13891_v62  ;;  %1996 = vmatpush1.bf16.msra.mxu1 %v1762_v63  ;;  %v1569_v9 = vadd.f32 %v13934_v34, %v1441_v51 }
 0x24e   :  { %v1757_v12 = vpack.c.bf16 %v1700_v55, %v1696_v19  ;;  %v1436_v36 = vmul.f32 %v9004_v56, %v8788_v52  ;;  %v1434_v42 = vmul.f32 %v9008_v14, %v8773_v54  ;;  %v1759_v21 = vpack.c.bf16 %v1702_v13, %v1698_v32  ;;  %2275 = vperm.xlu1 %7618, %v9253_v35  }
 0x24f   :  { %v1756_v47 = vpack.c.bf16 %v1699_v7, %v1695_v57  ;;  %v1560_v18 = vadd.f32 %v8916_v59, %v1432_v29  ;;  %v1438_v49 = vmul.f32 %v9008_v14, %v8788_v52  ;;  %v1633_v33 = vmul.f32 0.01, %v1569_v9  ;;  %v13935_v57 = vld [vmem:[#allocation60_spill] sm:$0xff] }
 0x250   :  { %1884 = vmatprep.subr.bf16.mxu0 %v1757_v12  ;;  %v1564_v27 = vadd.f32 %v8803_v17, %v1436_v36  ;;  %v1562_v34 = vadd.f32 %v8916_v59, %v1434_v42  ;;  %v1435_v20 = vmul.f32 %v8944_v40, %v8788_v52  ;;  %1997 = vmatprep.subr.bf16.mxu1 %v1759_v21  ;;  %v13937_v36 = vld [vmem:[#allocation18_spill] sm:$0xff]  ;;  %v13938_v42 = vld [vmem:[#allocation67_spill] sm:$0xff] }
 0x251   :  { %1885 = vmatpush1.bf16.msra.mxu0 %v1756_v47  ;;  %v1624_v54 = vmul.f32 0.01, %v1560_v18  ;;  %v1566_v2 = vadd.f32 %v8803_v17, %v1438_v49  ;;  %v1687_v5 = vmax.f32 %v9132_v37, %v9153_v38  ;;  %v1437_v3 = vmul.f32 %v8953_v50, %v8788_v52  ;;  %v13941_v49 = vld [vmem:[#allocation42_spill] sm:$0xff] }
 0x252   :  { %v1697_v58 = vmax.f32 %v1569_v9, %v1633_v33  ;;  %v1628_v25 = vmul.f32 0.01, %v1564_v27  ;;  %v1626_v6 = vmul.f32 0.01, %v1562_v34  ;;  %v1563_v8 = vadd.f32 %v8803_v17, %v1435_v20  ;;  %2279 = vperm.xlu1 %7618, %v9168_v1   ;;  %v13936_v9 = vld [vmem:[#allocation43_spill] sm:$0xff] }
 0x253   :  { %v1688_v59 = vmax.f32 %v1560_v18, %v1624_v54  ;;  %v1630_v45 = vmul.f32 0.01, %v1566_v2  ;;  %v1565_v40 = vadd.f32 %v8803_v17, %v1437_v3  ;;  %v1689_v43 = vmax.f32 %v9135_v60, %v9172_v61  ;;  %v13940_v18 = vld [vmem:[#allocation44_spill] sm:$0xff]  ;;  %v13942_v20 = vld [vmem:[#allocation47_spill] sm:$0xff]  ;;  %v13943_v54 = vld [vmem:[#allocation29_spill] sm:$0xff] }
 0x254   :  { %v1758_v15 = vpack.c.bf16 %v1701_v22, %v1697_v58  ;;  %v1692_v23 = vmax.f32 %v1564_v27, %v1628_v25  ;;  %v1690_v37 = vmax.f32 %v1562_v34, %v1626_v6  ;;  %v1627_v38 = vmul.f32 0.01, %v1563_v8  ;;  %v13944_v58 = vld [vmem:[#allocation45_spill] sm:$0xff]  ;;  %v13945_v6 = vld [vmem:[#allocation50_spill] sm:$0xff] }
 0x255   :  { %v1694_v24 = vmax.f32 %v1566_v2, %v1630_v45  ;;  %v1629_v52 = vmul.f32 0.01, %v1565_v40  ;;  %v1424_v50 = vmul.f32 %v9004_v56, %v8817_v48  ;;  %v1428_v7 = vmul.f32 %v9004_v56, %v8819_v41 }
 0x256   :  { %1998 = vmatpush1.bf16.msra.mxu1 %v1758_v15  ;;  %v1753_v19 = vpack.c.bf16 %v1692_v23, %v1688_v59  ;;  %v1691_v17 = vmax.f32 %v1563_v8, %v1627_v38  ;;  %v1426_v60 = vmul.f32 %v9008_v14, %v8817_v48  ;;  %v1430_v61 = vmul.f32 %v9008_v14, %v8819_v41  ;;  %v13948_v23 = vld [vmem:[#allocation51_spill] sm:$0xff] }
 0x257   :  { %v1755_v39 = vpack.c.bf16 %v1694_v24, %v1690_v37  ;;  %v1693_v30 = vmax.f32 %v1565_v40, %v1629_v52  ;;  %v1552_v31 = vadd.f32 %v8844_v11, %v1424_v50  ;;  %v1556_v63 = vadd.f32 %v8948_v10, %v1428_v7  ;;  %7619 = vset.pattern.permute.xlu1 %v13898_v28  ;;  %v13946_v40 = vld [vmem:[#allocation69_spill] sm:$0xff]  ;;  %v13949_v37 = vld [vmem:[#allocation48_spill] sm:$0xff]  ;;  %v13950_v7 = vld [vmem:[#allocation70_spill] sm:$0xff] }
 0x258   :  { %1886 = vmatprep.subr.bf16.mxu0 %v1753_v19  ;;  %v1752_v55 = vpack.c.bf16 %v1691_v17, %v1687_v5  ;;  %v1554_v51 = vadd.f32 %v8844_v11, %v1426_v60  ;;  %v1558_v22 = vadd.f32 %v8948_v10, %v1430_v61  ;;  %v1679_v48 = vmax.f32 %v8976_v16, %v9020_v44  ;;  %v13939_v10 = vld [vmem:[#allocation61_spill] sm:$0xff]  ;;  %v13951_v19 = vld [vmem:[#allocation64_spill] sm:$0xff]  ;;  %v13952_v61 = vld [vmem:[#allocation54_spill] sm:$0xff] }
 0x259   :  { %1999 = vmatprep.subr.bf16.mxu1 %v1755_v39  ;;  %v1754_v32 = vpack.c.bf16 %v1693_v30, %v1689_v43  ;;  %v1616_v41 = vmul.f32 0.01, %v1552_v31  ;;  %v1620_v13 = vmul.f32 0.01, %v1556_v63  ;;  %v1683_v29 = vmax.f32 %v13935_v57, %v9190_v26  ;;  %1829 = vperm.xlu1 %7619, %v9314_v46   ;;  %v13947_v43 = vld [vmem:[#allocation63_spill] sm:$0xff]  ;;  %v13953_v39 = vld [vmem:[#allocation49_spill] sm:$0xff] }
 0x25a   :  { %1887 = vmatpush1.bf16.msra.mxu0 %v1752_v55  ;;  %v1618_v28 = vmul.f32 0.01, %v1554_v51  ;;  %v1622_v12 = vmul.f32 0.01, %v1558_v22  ;;  %v1681_v11 = vmax.f32 %v13937_v36, %v13936_v9  ;;  %v1685_v21 = vmax.f32 %v13939_v10, %v13938_v42  ;;  %v13954_v55 = vld [vmem:[#allocation27_spill] sm:$0xff]  ;;  %v13959_v36 = vld [vmem:[#allocation37_spill] sm:$0xff] }
 0x25b   :  { %2000 = vmatpush1.bf16.msra.mxu1 %v1754_v32  ;;  %v1680_v44 = vmax.f32 %v1552_v31, %v1616_v41  ;;  %v1684_v16 = vmax.f32 %v1556_v63, %v1620_v13  ;;  %v1748_v47 = vpack.c.bf16 %v1683_v29, %v1679_v48  ;;  %v1544_v33 = vadd.f32 %v13941_v49, %v13940_v18  ;;  %v13956_v48 = vld [vmem:[#allocation53_spill] sm:$0xff]  ;;  %v13957_v29 = vld [vmem:[#allocation55_spill] sm:$0xff]  ;;  %v13960_v10 = vld [vmem:[#allocation58_spill] sm:$0xff] }
 0x25c   :  { %v1682_v27 = vmax.f32 %v1554_v51, %v1618_v28  ;;  %v1686_v26 = vmax.f32 %v1558_v22, %v1622_v12  ;;  %v1750_v34 = vpack.c.bf16 %v1685_v21, %v1681_v11  ;;  %v1548_v2 = vadd.f32 %v13943_v54, %v13942_v20  ;;  %v13955_v22 = vld [vmem:[#allocation52_spill] sm:$0xff]  ;;  %v13958_v12 = vld [vmem:[#allocation19_spill] sm:$0xff] }
 0x25d   :  { %v1749_v5 = vpack.c.bf16 %v1684_v16, %v1680_v44  ;;  %v1608_v3 = vmul.f32 0.01, %v1544_v33  ;;  %v1546_v25 = vadd.f32 %v13941_v49, %v13944_v58  ;;  %v1550_v8 = vadd.f32 %v13943_v54, %v13945_v6  ;;  %7621 = vset.pattern.permute.xlu1 %v13891_v62  ;;  %v13961_v21 = vld [vmem:[#allocation56_spill] sm:$0xff]  ;;  %v13966_v20 = vld [vmem:[#allocation79_spill] sm:$0xff]  ;;  %v13967_v54 = vld [vmem:[#allocation73_spill] sm:$0xff] }
 0x25e   :  { %v1751_v59 = vpack.c.bf16 %v1686_v26, %v1682_v27  ;;  %v1612_v45 = vmul.f32 0.01, %v1548_v2  ;;  %v1671_v15 = vmax.f32 %v13947_v43, %v13946_v40  ;;  %v1675_v38 = vmax.f32 %v13949_v37, %v13948_v23  ;;  %2287 = vperm.xlu1 %7621, %v9344_v4   ;;  %v13963_v18 = vld [vmem:[#allocation72_spill] sm:$0xff]  ;;  %v13972_v40 = vld [vmem:[#allocation65_spill] sm:$0xff] }
 0x25f   :  { %1888 = vmatprep.subr.bf16.mxu0 %v1749_v5  ;;  %v1672_v24 = vmax.f32 %v1544_v33, %v1608_v3  ;;  %v1610_v52 = vmul.f32 0.01, %v1546_v25  ;;  %v1614_v50 = vmul.f32 0.01, %v1550_v8  ;;  %v1673_v17 = vmax.f32 %v13951_v19, %v13950_v7  ;;  %v13965_v33 = vld [vmem:[#allocation57_spill] sm:$0xff]  ;;  %v13968_v5 = vld [vmem:[#allocation62_spill] sm:$0xff] }
 0x260   :  { %2001 = vmatprep.subr.bf16.mxu1 %v1751_v59  ;;  %1889 = vmatpush1.bf16.msra.mxu0 %v1748_v47  ;;  %v1676_v62 = vmax.f32 %v1548_v2, %v1612_v45  ;;  %v1744_v60 = vpack.c.bf16 %v1675_v38, %v1671_v15  ;;  %v1677_v30 = vmax.f32 %v13953_v39, %v13952_v61  ;;  %v13962_v47 = vld [vmem:[#allocation78_spill] sm:$0xff]  ;;  %v13971_v45 = vld [vmem:[#allocation71_spill] sm:$0xff]  ;;  %v8090_v15 = vmov 44  }
 0x261   :  { %2002 = vmatpush1.bf16.msra.mxu1 %v1750_v34  ;;  %v1674_v31 = vmax.f32 %v1546_v25, %v1610_v52  ;;  %v1678_v63 = vmax.f32 %v1550_v8, %v1614_v50  ;;  %v1408_v51 = vmul.f32 %v9004_v56, %v13954_v55  ;;  %v1540_v32 = vadd.f32 %v13956_v48, %v13955_v22  ;;  %v13969_v3 = vld [vmem:[#allocation66_spill] sm:$0xff]  ;;  %v13970_v25 = vld [vmem:[#allocation80_spill] sm:$0xff] }
 0x262   :  { %v1745_v41 = vpack.c.bf16 %v1676_v62, %v1672_v24  ;;  %v1746_v13 = vpack.c.bf16 %v1677_v30, %v1673_v17  ;;  %v1410_v57 = vmul.f32 %v9008_v14, %v13954_v55  ;;  %v1542_v28 = vadd.f32 %v13956_v48, %v13957_v29  ;;  %2291 = vperm.xlu1 %7621, %v13958_v12   ;;  %v13964_v14 = vld [vmem:[#allocation59_spill] sm:$0xff]  ;;  %v13973_v24 = vld [vmem:[#allocation68_spill] sm:$0xff] }
 0x263   :  { %v1747_v9 = vpack.c.bf16 %v1678_v63, %v1674_v31  ;;  %v1536_v11 = vadd.f32 %v13959_v36, %v1408_v51  ;;  %v1604_v42 = vmul.f32 0.01, %v1540_v32  ;;  %v1663_v56 = vmax.f32 %v13961_v21, %v13960_v10  ;;  %v13974_v50 = vld [vmem:[#allocation20_spill] sm:$0xff]  ;;  %v13976_v31 = vld [vmem:[#allocation83_spill] sm:$0xff] }
 0x264   :  { %1890 = vmatprep.subr.bf16.mxu0 %v1745_v41  ;;  %v1538_v44 = vadd.f32 %v13959_v36, %v1410_v57  ;;  %v1606_v16 = vmul.f32 0.01, %v1542_v28  ;;  %v1667_v49 = vmax.f32 %v13963_v18, %v13962_v47  ;;  %v1665_v27 = vmax.f32 %v13965_v33, %v13964_v14  ;;  %v13975_v62 = vld [vmem:[#allocation76_spill] sm:$0xff]  ;;  %v13977_v63 = vld [vmem:[#allocation75_spill] sm:$0xff]  ;;  %v13979_v41 = vld [vmem:[#allocation74_spill] sm:$0xff] }
 0x265   :  { %2003 = vmatprep.subr.bf16.mxu1 %v1747_v9  ;;  %1891 = vmatpush1.bf16.msra.mxu0 %v1744_v60  ;;  %v1600_v26 = vmul.f32 0.01, %v1536_v11  ;;  %v1668_v34 = vmax.f32 %v1540_v32, %v1604_v42  ;;  %v1669_v2 = vmax.f32 %v13967_v54, %v13966_v20  ;;  %v1528_v58 = vadd.f32 %v13969_v3, %v13968_v5  ;;  %v13978_v32 = vld [vmem:[#allocation81_spill] sm:$0xff]  ;;  %v13983_v14 = vld [vmem:[#allocation38_spill] sm:$0xff] }
 0x266   :  { %v1593_v6 = vmul.f32 0.01, %v13970_v25  ;;  %2004 = vmatpush1.bf16.msra.mxu1 %v1746_v13  ;;  %v1602_v8 = vmul.f32 0.01, %v1538_v44  ;;  %v1670_v59 = vmax.f32 %v1542_v28, %v1606_v16  ;;  %v1532_v43 = vadd.f32 %v13972_v40, %v13971_v45  ;;  %7622 = vset.pattern.permute.xlu1 %v8090_v15  ;;  %v13980_v28 = vld [vmem:[#allocation82_spill] sm:$0xff]  ;;  %v13981_v9 = vld [vmem:[#allocation77_spill] sm:$0xff] }
 0x267   :  { %v1664_v23 = vmax.f32 %v1536_v11, %v1600_v26  ;;  %v1740_v37 = vpack.c.bf16 %v1667_v49, %v1663_v56  ;;  %v1592_v38 = vmul.f32 0.01, %v1528_v58  ;;  %v1530_v52 = vadd.f32 %v13969_v3, %v13973_v24  ;;  %2479 = vperm.xlu1 %7622, %v13974_v50   ;;  %v7768_v16 = vld [vmem:[#allocation2 + $0x100] sm:$0xff]   ;;  %v7769_v49 = vld [vmem:[#allocation2 + $0x108] sm:$0xff]   ;;  %v7770_v33 = vld [vmem:[#allocation2 + $0x110] sm:$0xff]  }
 0x268   :  { %v1666_v7 = vmax.f32 %v1538_v44, %v1602_v8  ;;  %v1742_v19 = vpack.c.bf16 %v1669_v2, %v1665_v27  ;;  %v1596_v17 = vmul.f32 0.01, %v1532_v43  ;;  %v1534_v60 = vadd.f32 %v13972_v40, %v13975_v62  ;;  %v7771_v27 = vld [vmem:[#allocation2 + $0x118] sm:$0xff]   ;;  %v7774_v26 = vld [vmem:[#allocation2 + $0x130] sm:$0xff]  }
 0x269   :  { %v1741_v61 = vpack.c.bf16 %v1668_v34, %v1664_v23  ;;  %v1656_v39 = vmax.f32 %v1528_v58, %v1592_v38  ;;  %v1594_v30 = vmul.f32 0.01, %v1530_v52  ;;  %v1655_v55 = vmax.f32 %v13977_v63, %v13976_v31  ;;  %v13989_v34 = vld [vmem:[#allocation30_spill] sm:$0xff]  ;;  %v13991_v2 = vld [vmem:[#allocation31_spill] sm:$0xff] }
 0x26a   :  { %v1743_v51 = vpack.c.bf16 %v1670_v59, %v1666_v7  ;;  %v1660_v22 = vmax.f32 %v1532_v43, %v1596_v17  ;;  %v1598_v48 = vmul.f32 0.01, %v1534_v60  ;;  %v1659_v13 = vmax.f32 %v13979_v41, %v13978_v32  ;;  %v7775_v20 = vld [vmem:[#allocation2 + $0x138] sm:$0xff]  }
 0x26b   :  { %1892 = vmatprep.subr.bf16.mxu0 %v1741_v61  ;;  %v1658_v57 = vmax.f32 %v1530_v52, %v1594_v30  ;;  %v1657_v29 = vmax.f32 %v13970_v25, %v1593_v6  ;;  %v1661_v36 = vmax.f32 %v13981_v9, %v13980_v28  ;;  %v8091_v10 = vmov 3   ;;  %v13990_v54 = vld [vmem:[#allocation34_spill] sm:$0xff] }
 0x26c   :  { %2005 = vmatprep.subr.bf16.mxu1 %v1743_v51  ;;  %1893 = vmatpush1.bf16.msra.mxu0 %v1740_v37  ;;  %v1737_v11 = vpack.c.bf16 %v1660_v22, %v1656_v39  ;;  %v1662_v42 = vmax.f32 %v1534_v60, %v1598_v48  ;;  %v1736_v56 = vpack.c.bf16 %v1659_v13, %v1655_v55  ;;  %v8092_v47 = vmov 11  }
 0x26d   :  { %2006 = vmatpush1.bf16.msra.mxu1 %v1742_v19  ;;  %7624 = vset.pattern.permute.xlu1 %v8091_v10  ;;  %v1738_v44 = vpack.c.bf16 %v1661_v36, %v1657_v29  ;;  %v13982_v18 = vmov 0  }
 0x26e   :  { %1894 = vmatprep.subr.bf16.mxu0 %v1737_v11  ;;  %v1739_v21 = vpack.c.bf16 %v1662_v42, %v1658_v57  ;;  %2571 = vperm.xlu1 %7624, %v9314_v46  }
 0x26f   :  { %7623 = vset.pattern.permute.xlu0 %v8091_v10 }
 0x270   :  { %2007 = vmatprep.subr.bf16.mxu1 %v1739_v21  ;;  %1895 = vmatpush1.bf16.msra.mxu0 %v1736_v56 }
 0x271   :  { %2008 = vmatpush1.bf16.msra.mxu1 %v1738_v44  ;;  %2567 = vperm.xlu0 %7623, %v13958_v12  }
 0x272   :  { %7625 = vset.pattern.permute.xlu1 %v8092_v47 }
 0x273   :  { %1913 = vmatmul.mubr.bf16.vlgmr.msra.gmra.mxu0 %v7768_v16  ;;  %2711 = vperm.xlu1 %7625, %v13958_v12   ;;  %v13984_v12 = vld [vmem:[#allocation32_spill] sm:$0xff] }
 0x274   :  { %2026 = vmatmul.mubr.bf16.vlgmr.msra.gmra.mxu1 %v7768_v16  ;;  %1922 = vmatprep.mubr.bf16.mxu0 %v13982_v18 }
 0x275   :  { %2035 = vmatprep.mubr.bf16.mxu1 %v13982_v18  ;;  %2551 = vperm.xlu0 %7623, %v9253_v35  }
 0x277   :  { %7626 = vset.pattern.permute.xlu1 %v8091_v10 }
 0x278   :  { %2559 = vperm.xlu1 %7626, %v9226_v0  }
 0x279   :  { %2535 = vperm.xlu0 %7623, %v13983_v14  }
 0x27b   :  { %1923 = vmatmul.mubr.bf16.gmra.mxu0 %v7769_v49 }
 0x27c   :  { %2036 = vmatmul.mubr.bf16.gmra.mxu1 %v7769_v49  ;;  %1932 = vmatprep.mubr.bf16.mxu0 %v13982_v18 }
 0x27d   :  { %2045 = vmatprep.mubr.bf16.mxu1 %v13982_v18  ;;  %2563 = vperm.xlu1 %7626, %v9344_v4  }
 0x27e   :  { %2519 = vperm.xlu0 %7623, %v13984_v12  }
 0x281   :  { %7627 = vset.pattern.permute.xlu1 %v8092_v47 }
 0x282   :  { %2707 = vperm.xlu1 %7627, %v9344_v4   ;;  %7636 = vset.pattern.permute.xlu0 %v8092_v47  ;;  %v13986_v4 = vld [vmem:[#allocation41_spill] sm:$0xff] }
 0x283   :  { %1933 = vmatmul.mubr.bf16.gmra.mxu0 %v7770_v33  ;;  %2715 = vperm.xlu0 %7636, %v9314_v46   ;;  %v7772_v46 = vld [vmem:[#allocation2 + $0x120] sm:$0xff]   ;;  %v1774_v5 = vpop.permute.xlu1 %1773  ;;  %v1770_v24 = vpop.permute.xlu0 %1769 }
 0x284   :  { %2046 = vmatmul.mubr.bf16.gmra.mxu1 %v7770_v33  ;;  %1942 = vmatprep.mubr.bf16.mxu0 %v13982_v18 }
 0x285   :  { %2055 = vmatprep.mubr.bf16.mxu1 %v13982_v18 }
 0x286   :  { %7628 = vset.pattern.permute.xlu1 %v8091_v10 }
 0x287   :  { %2555 = vperm.xlu1 %7628, %v9168_v1   ;;  %2703 = vperm.xlu0 %7636, %v9226_v0   ;;  %v13985_v0 = vld [vmem:[#allocation46_spill] sm:$0xff]  ;;  %v9521_v3 = vpop.permute.xlu1 %1777  ;;  %v9549_v50 = vpop.permute.xlu0 %1781 }
 0x28b   :  { %1943 = vmatmul.mubr.bf16.gmra.mxu0 %v7771_v27  ;;  %7629 = vset.pattern.permute.xlu1 %v8092_v47  ;;  %v9523_v58 = vpop.permute.xlu1 %1785 }
 0x28c   :  { %2056 = vmatmul.mubr.bf16.gmra.mxu1 %v7771_v27  ;;  %1952 = vmatprep.mubr.bf16.mxu0 %v13982_v18  ;;  %v2236_v19 = vpop.permute.xlu0 %2235 }
 0x28d   :  { %2065 = vmatprep.mubr.bf16.mxu1 %v13982_v18  ;;  %2695 = vperm.xlu1 %7629, %v9253_v35   ;;  %v7773_v35 = vld [vmem:[#allocation2 + $0x128] sm:$0xff]  }
 0x28e   :  { %2699 = vperm.xlu0 %7636, %v9168_v1   ;;  %v13987_v1 = vld [vmem:[#allocation28_spill] sm:$0xff] }
 0x290   :  { %v9525_v25 = vpop.permute.xlu1 %2239  ;;  %v9555_v62 = vpop.permute.xlu0 %2243 }
 0x291   :  { %7630 = vset.pattern.permute.xlu1 %v8091_v10 }
 0x292   :  { %2543 = vperm.xlu1 %7630, %v9114_v53   ;;  %2687 = vperm.xlu0 %7636, %v9114_v53   ;;  %v13988_v53 = vld [vmem:[#allocation33_spill] sm:$0xff] }
 0x293   :  { %1953 = vmatmul.mubr.bf16.gmra.mxu0 %v7772_v46 }
 0x294   :  { %2066 = vmatmul.mubr.bf16.gmra.mxu1 %v7772_v46  ;;  %1962 = vmatprep.mubr.bf16.mxu0 %v13982_v18  ;;  %v9559_v39 = vpop.permute.xlu0 %2247 }
 0x295   :  { %2075 = vmatprep.mubr.bf16.mxu1 %v13982_v18  ;;  %v9527_v6 = vpop.permute.xlu1 %1789 }
 0x296   :  { %2547 = vperm.xlu1 %7630, %v13985_v0   ;;  %2683 = vperm.xlu0 %7636, %v13986_v4  }
 0x298   :  { %v9563_v11 = vpop.permute.xlu0 %2251 }
 0x299   :  { %v9529_v8 = vpop.permute.xlu1 %1793 }
 0x29a   :  { %7631 = vset.pattern.permute.xlu1 %v8092_v47  ;;  %2671 = vperm.xlu0 %7636, %v13987_v1  }
 0x29b   :  { %1963 = vmatmul.mubr.bf16.gmra.mxu0 %v7773_v35  ;;  %2691 = vperm.xlu1 %7631, %v13985_v0  }
 0x29c   :  { %2076 = vmatmul.mubr.bf16.gmra.mxu1 %v7773_v35  ;;  %1972 = vmatprep.mubr.bf16.mxu0 %v13982_v18 }
 0x29d   :  { %2085 = vmatprep.mubr.bf16.mxu1 %v13982_v18  ;;  %v9531_v59 = vpop.permute.xlu1 %1797 }
 0x29e   :  { %2667 = vperm.xlu0 %7636, %v13988_v53  }
 0x29f   :  { %7632 = vset.pattern.permute.xlu1 %v8091_v10 }
 0x2a0   :  { %2539 = vperm.xlu1 %7632, %v13986_v4  }
 0x2a2   :  { %2655 = vperm.xlu0 %7636, %v13989_v34  }
 0x2a3   :  { %1973 = vmatmul.mubr.bf16.gmra.mxu0 %v7774_v26 }
 0x2a4   :  { %2086 = vmatmul.mubr.bf16.gmra.mxu1 %v7774_v26  ;;  %1982 = vmatprep.mubr.bf16.mxu0 %v13982_v18  ;;  %v9533_v45 = vpop.permute.xlu1 %2255 }
 0x2a5   :  { %2095 = vmatprep.mubr.bf16.mxu1 %v13982_v18  ;;  %7633 = vset.pattern.permute.xlu1 %v8092_v47 }
 0x2a6   :  { %2679 = vperm.xlu1 %7633, %v13983_v14  }
 0x2a8   :  { %v9535_v40 = vpop.permute.xlu1 %2263 }
 0x2aa   :  { %7634 = vset.pattern.permute.xlu1 %v8091_v10 }
 0x2ab   :  { %1983 = vmatmul.mubr.bf16.gmra.mxu0 %v7775_v20  ;;  %2527 = vperm.xlu1 %7634, %v13987_v1  }
 0x2ac   :  { %2096 = vmatmul.mubr.bf16.gmra.mxu1 %v7775_v20  ;;  %3103 = vmatprep.mubr.bf16.mxu0 %v13982_v18 }
 0x2ad   :  { %3216 = vmatprep.mubr.bf16.mxu1 %v13982_v18  ;;  %v9537_v43 = vpop.permute.xlu1 %1805 }
 0x2af   :  { %2531 = vperm.xlu1 %7634, %v13990_v54  }
 0x2b1   :  { %v9539_v15 = vpop.permute.xlu1 %1809 }
 0x2b3   :  { %7635 = vset.pattern.permute.xlu1 %v8092_v47 }
 0x2b4   :  { %2675 = vperm.xlu1 %7635, %v13990_v54  }
 0x2b8   :  { %7637 = vset.pattern.permute.xlu1 %v8091_v10  ;;  %v9541_v23 = vpop.permute.xlu1 %2467 }
 0x2b9   :  { %2523 = vperm.xlu1 %7637, %v13988_v53  }
 0x2bd   :  { %7638 = vset.pattern.permute.xlu1 %v8092_v47 }
 0x2be   :  { %2663 = vperm.xlu1 %7638, %v13984_v12   ;;  %v9543_v37 = vpop.permute.xlu1 %2267 }
 0x2c2   :  { %7639 = vset.pattern.permute.xlu1 %v8091_v10 }
 0x2c3   :  { %2511 = vperm.xlu1 %7639, %v13989_v34   ;;  %v9545_v38 = vpop.permute.xlu1 %1821 }
 0x2c7   :  { %2515 = vperm.xlu1 %7639, %v13991_v2  }
 0x2c9   :  { %v9547_v52 = vpop.permute.xlu1 %2275 }
 0x2cb   :  { %7640 = vset.pattern.permute.xlu1 %v8092_v47 }
 0x2cc   :  { %2659 = vperm.xlu1 %7640, %v13991_v2  }
 0x2cd   :  { %v9551_v7 = vpop.permute.xlu1 %2279 }
 0x2d4   :  { %v9553_v17 = vpop.permute.xlu1 %1829 }
 0x2d9   :  { %v9557_v60 = vpop.permute.xlu1 %2287 }
 0x2dd   :  { %v9561_v63 = vpop.permute.xlu1 %2291 }
 0x2e2   :  { %v9565_v16 = vpop.permute.xlu1 %2479 }
 0x333   :  { %v1914_v61 = vpop.f32.mrf.mxu0 }
 0x334   :  { %v1915_v30 = vadd.f32 %v1914_v61, %v1770_v24  ;;  %v2027_v31 = vpop.f32.mrf.mxu1 }
 0x335   :  { %v2028_v55 = vadd.f32 %v2027_v31, %v1770_v24  ;;  %v1916_v51 = vpop.f32.mrf.mxu0 }
 0x336   :  { %v1917_v22 = vadd.f32 %v1916_v51, %v1770_v24  ;;  %v2029_v48 = vpop.f32.mrf.mxu1  ;;  %v2106_v13 = vmul.f32 0.01, %v1915_v30 }
 0x337   :  { %v2030_v32 = vadd.f32 %v2029_v48, %v1770_v24  ;;  %v1918_v41 = vpop.f32.mrf.mxu0  ;;  %v2108_v28 = vmul.f32 0.01, %v2028_v55  ;;  %v9572_v48 = vpop.permute.xlu0 %2259 }
 0x338   :  { %v1919_v57 = vadd.f32 %v1918_v41, %v1774_v5  ;;  %v2031_v29 = vpop.f32.mrf.mxu1  ;;  %v2107_v42 = vmul.f32 0.01, %v1917_v22  ;;  %v2170_v12 = vmax.f32 %v1915_v30, %v2106_v13 }
 0x339   :  { %v2032_v9 = vadd.f32 %v2031_v29, %v1774_v5  ;;  %v1920_v36 = vpop.f32.mrf.mxu0  ;;  %v2109_v10 = vmul.f32 0.01, %v2030_v32  ;;  %v2172_v4 = vmax.f32 %v2028_v55, %v2108_v28 }
 0x33a   :  { %v2110_v21 = vmul.f32 0.01, %v1919_v57  ;;  %v1921_v56 = vadd.f32 %v1920_v36, %v1774_v5  ;;  %v2033_v44 = vpop.f32.mrf.mxu1  ;;  %v2171_v34 = vmax.f32 %v1917_v22, %v2107_v42  ;;  %v2298_v22 = vmul.f32 %v2236_v19, %v2170_v12 }
 0x33b   :  { %v2112_v47 = vmul.f32 0.01, %v2032_v9  ;;  %v2034_v49 = vadd.f32 %v2033_v44, %v1774_v5  ;;  %v1924_v14 = vpop.f32.mrf.mxu0  ;;  %v2173_v20 = vmax.f32 %v2030_v32, %v2109_v10  ;;  %v2300_v32 = vmul.f32 %v2236_v19, %v2172_v4 }
 0x33c   :  { %v2174_v33 = vmax.f32 %v1919_v57, %v2110_v21  ;;  %v2111_v27 = vmul.f32 0.01, %v1921_v56  ;;  %v1925_v46 = vadd.f32 %v1924_v14, %v9521_v3  ;;  %v2037_v0 = vpop.f32.mrf.mxu1  ;;  %v9575_v57 = vpop.permute.xlu1 %2571  ;;  %v2299_v36 = vmul.f32 %v2236_v19, %v2171_v34 }
 0x33d   :  { %v2176_v35 = vmax.f32 %v2032_v9, %v2112_v47  ;;  %v2113_v1 = vmul.f32 0.01, %v2034_v49  ;;  %v2038_v53 = vadd.f32 %v2037_v0, %v9521_v3  ;;  %v1926_v26 = vpop.f32.mrf.mxu0  ;;  %v2301_v42 = vmul.f32 %v2236_v19, %v2173_v20  ;;  %v9583_v34 = vpop.permute.xlu0 %2271 }
 0x33e   :  { %v2114_v54 = vmul.f32 0.01, %v1925_v46  ;;  %v1927_v2 = vadd.f32 %v1926_v26, %v9521_v3  ;;  %v2039_v24 = vpop.f32.mrf.mxu1  ;;  %v2302_v5 = vmul.f32 %v9525_v25, %v2174_v33  ;;  %v2175_v61 = vmax.f32 %v1921_v56, %v2111_v27 }
 0x33f   :  { %v2116_v30 = vmul.f32 0.01, %v2038_v53  ;;  %v2040_v31 = vadd.f32 %v2039_v24, %v9521_v3  ;;  %v1928_v51 = vpop.f32.mrf.mxu0  ;;  %v2304_v55 = vmul.f32 %v9525_v25, %v2176_v35  ;;  %v2177_v29 = vmax.f32 %v2034_v49, %v2113_v1 }
 0x340   :  { %v2115_v41 = vmul.f32 0.01, %v1927_v2  ;;  %v2041_v13 = vpop.f32.mrf.mxu1  ;;  %v2178_v10 = vmax.f32 %v1925_v46, %v2114_v54  ;;  %v1929_v21 = vadd.f32 %v1928_v51, %v9549_v50  ;;  %v2362_v56 = vadd.f32 %v2302_v5, %v2298_v22  ;;  %v9587_v5 = vpop.permute.xlu1 %2711 }
 0x341   :  { %v2117_v28 = vmul.f32 0.01, %v2040_v31  ;;  %v1930_v9 = vpop.f32.mrf.mxu0  ;;  %v2303_v44 = vmul.f32 %v9525_v25, %v2175_v61  ;;  %v2180_v47 = vmax.f32 %v2038_v53, %v2116_v30  ;;  %v2042_v14 = vadd.f32 %v2041_v13, %v9549_v50  ;;  %13992 = vst [vmem:[#allocation21_spill] sm:$0xff] %v9587_v5 }
 0x342   :  { %v2043_v3 = vpop.f32.mrf.mxu1  ;;  %v2388_v27 = vadd.f32 %v2304_v55, %v2300_v32  ;;  %v2179_v0 = vmax.f32 %v1927_v2, %v2115_v41  ;;  %v2118_v12 = vmul.f32 0.01, %v1929_v21  ;;  %v1931_v49 = vadd.f32 %v1930_v9, %v9549_v50 }
 0x343   :  { %v1934_v33 = vpop.f32.mrf.mxu0  ;;  %v2305_v35 = vmul.f32 %v9525_v25, %v2177_v29  ;;  %v2181_v19 = vmax.f32 %v2040_v31, %v2117_v28  ;;  %v2120_v46 = vmul.f32 0.01, %v2042_v14  ;;  %v2044_v1 = vadd.f32 %v2043_v3, %v9549_v50 }
 0x344   :  { %v2047_v4 = vpop.f32.mrf.mxu1  ;;  %v2306_v53 = vmul.f32 %v9555_v62, %v2178_v10  ;;  %v2182_v20 = vmax.f32 %v1929_v21, %v2118_v12  ;;  %v2119_v54 = vmul.f32 0.01, %v1931_v49  ;;  %v1935_v24 = vadd.f32 %v1934_v33, %v9523_v58 }
 0x345   :  { %v1936_v26 = vpop.f32.mrf.mxu0  ;;  %v2308_v61 = vmul.f32 %v9555_v62, %v2180_v47  ;;  %v2184_v30 = vmax.f32 %v2042_v14, %v2120_v46  ;;  %v2121_v25 = vmul.f32 0.01, %v2044_v1  ;;  %v2048_v31 = vadd.f32 %v2047_v4, %v9523_v58  ;;  %v9597_v46 = vpop.permute.xlu0 %1801 }
 0x346   :  { %v2049_v2 = vpop.f32.mrf.mxu1  ;;  %v2307_v50 = vmul.f32 %v9555_v62, %v2179_v0  ;;  %v2183_v55 = vmax.f32 %v1931_v49, %v2119_v54  ;;  %v2122_v41 = vmul.f32 0.01, %v1935_v24  ;;  %v1937_v13 = vadd.f32 %v1936_v26, %v9523_v58 }
 0x347   :  { %v1938_v51 = vpop.f32.mrf.mxu0  ;;  %v2309_v32 = vmul.f32 %v9555_v62, %v2181_v19  ;;  %v2185_v29 = vmax.f32 %v2044_v1, %v2121_v25  ;;  %v2124_v28 = vmul.f32 0.01, %v2048_v31  ;;  %v2050_v9 = vadd.f32 %v2049_v2, %v9523_v58 }
 0x348   :  { %v2051_v22 = vpop.f32.mrf.mxu1  ;;  %v2375_v21 = vadd.f32 %v2303_v44, %v2299_v36  ;;  %v2401_v3 = vadd.f32 %v2305_v35, %v2301_v42  ;;  %v2310_v47 = vmul.f32 %v9559_v39, %v2182_v20  ;;  %v2123_v14 = vmul.f32 0.01, %v1937_v13  ;;  %v9601_v36 = vpop.permute.xlu1 %2559 }
 0x349   :  { %v1940_v10 = vpop.f32.mrf.mxu0  ;;  %v2363_v12 = vadd.f32 %v2362_v56, %v2306_v53  ;;  %v2389_v0 = vadd.f32 %v2388_v27, %v2308_v61  ;;  %v2312_v49 = vmul.f32 %v9559_v39, %v2184_v30  ;;  %v2125_v4 = vmul.f32 0.01, %v2050_v9 }
 0x34a   :  { %v2053_v33 = vpop.f32.mrf.mxu1  ;;  %v2376_v62 = vadd.f32 %v2375_v21, %v2307_v50  ;;  %v2311_v19 = vmul.f32 %v9559_v39, %v2183_v55  ;;  %v2186_v1 = vmax.f32 %v1935_v24, %v2122_v41  ;;  %v1939_v58 = vadd.f32 %v1938_v51, %v9527_v6  ;;  %v9611_v21 = vpop.permute.xlu0 %1813 }
 0x34b   :  { %v1944_v26 = vpop.f32.mrf.mxu0  ;;  %v2402_v44 = vadd.f32 %v2401_v3, %v2309_v32  ;;  %v2313_v35 = vmul.f32 %v9559_v39, %v2185_v29  ;;  %v2188_v56 = vmax.f32 %v2048_v31, %v2124_v28  ;;  %v2052_v27 = vadd.f32 %v2051_v22, %v9527_v6 }
 0x34c   :  { %v2057_v42 = vpop.f32.mrf.mxu1  ;;  %v2364_v20 = vadd.f32 %v2363_v12, %v2310_v47  ;;  %v2187_v54 = vmax.f32 %v1937_v13, %v2123_v14  ;;  %v2126_v2 = vmul.f32 0.01, %v1939_v58  ;;  %v1941_v61 = vadd.f32 %v1940_v10, %v9527_v6 }
 0x34d   :  { %v1946_v53 = vpop.f32.mrf.mxu0  ;;  %v2390_v25 = vadd.f32 %v2389_v0, %v2312_v49  ;;  %v2189_v24 = vmax.f32 %v2050_v9, %v2125_v4  ;;  %v2128_v50 = vmul.f32 0.01, %v2052_v27  ;;  %v2054_v51 = vadd.f32 %v2053_v33, %v9527_v6  ;;  %v9615_v33 = vpop.permute.xlu1 %2563 }
 0x34e   :  { %v2059_v30 = vpop.f32.mrf.mxu1  ;;  %v2377_v41 = vadd.f32 %v2376_v62, %v2311_v19  ;;  %v2314_v32 = vmul.f32 %v9563_v11, %v2186_v1  ;;  %v2127_v39 = vmul.f32 0.01, %v1941_v61  ;;  %v1945_v31 = vadd.f32 %v1944_v26, %v9529_v8  ;;  %13993 = vst [vmem:[#allocation22_spill] sm:$0xff] %v9615_v33 }
 0x34f   :  { %v1948_v55 = vpop.f32.mrf.mxu0  ;;  %v2403_v29 = vadd.f32 %v2402_v44, %v2313_v35  ;;  %v2316_v13 = vmul.f32 %v9563_v11, %v2188_v56  ;;  %v2129_v28 = vmul.f32 0.01, %v2054_v51  ;;  %v2058_v10 = vadd.f32 %v2057_v42, %v9529_v8 }
 0x350   :  { %v2061_v22 = vpop.f32.mrf.mxu1  ;;  %v2315_v3 = vmul.f32 %v9563_v11, %v2187_v54  ;;  %v2190_v6 = vmax.f32 %v1939_v58, %v2126_v2  ;;  %v2130_v47 = vmul.f32 0.01, %v1945_v31  ;;  %v1947_v14 = vadd.f32 %v1946_v53, %v9529_v8 }
 0x351   :  { %v1950_v9 = vpop.f32.mrf.mxu0  ;;  %v2317_v0 = vmul.f32 %v9563_v11, %v2189_v24  ;;  %v2192_v49 = vmax.f32 %v2052_v27, %v2128_v50  ;;  %v2132_v4 = vmul.f32 0.01, %v2058_v10  ;;  %v2060_v26 = vadd.f32 %v2059_v30, %v9529_v8  ;;  %v9625_v24 = vpop.permute.xlu0 %1817 }
 0x352   :  { %v2063_v12 = vpop.f32.mrf.mxu1  ;;  %v2365_v19 = vadd.f32 %v2364_v20, %v2314_v32  ;;  %v2191_v1 = vmax.f32 %v1941_v61, %v2127_v39  ;;  %v2194_v42 = vmax.f32 %v1945_v31, %v2130_v47  ;;  %v2131_v44 = vmul.f32 0.01, %v1947_v14  ;;  %v9630_v39 = vpop.permute.xlu1 %2707 }
 0x353   :  { %v1954_v62 = vpop.f32.mrf.mxu0  ;;  %v2391_v56 = vadd.f32 %v2390_v25, %v2316_v13  ;;  %v2193_v58 = vmax.f32 %v2054_v51, %v2129_v28  ;;  %v2196_v54 = vmax.f32 %v2058_v10, %v2132_v4  ;;  %v2133_v2 = vmul.f32 0.01, %v2060_v26 }
 0x354   :  { %v2067_v35 = vpop.f32.mrf.mxu1  ;;  %v2378_v18 = vadd.f32 %v2377_v41, %v2315_v3  ;;  %v2318_v33 = vmul.f32 %v9533_v45, %v2190_v6  ;;  %v2195_v5 = vmax.f32 %v1947_v14, %v2131_v44  ;;  %v1949_v11 = vadd.f32 %v1948_v55, %v9531_v59 }
 0x355   :  { %v1956_v53 = vpop.f32.mrf.mxu0  ;;  %v2404_v8 = vadd.f32 %v2403_v29, %v2317_v0  ;;  %v2320_v20 = vmul.f32 %v9533_v45, %v2192_v49  ;;  %v2197_v61 = vmax.f32 %v2060_v26, %v2133_v2  ;;  %v2062_v30 = vadd.f32 %v2061_v22, %v9531_v59 }
 0x356   :  { %v9621_v27 = vpop.f32.mrf.mxu1  ;;  %v2319_v50 = vmul.f32 %v9533_v45, %v2191_v1  ;;  %v2322_v51 = vmul.f32 %v9572_v48, %v2194_v42  ;;  %v2134_v41 = vmul.f32 0.01, %v1949_v11  ;;  %v1951_v32 = vadd.f32 %v1950_v9, %v9531_v59 }
 0x357   :  { %v1958_v25 = vpop.f32.mrf.mxu0  ;;  %v2321_v31 = vmul.f32 %v9533_v45, %v2193_v58  ;;  %v2324_v29 = vmul.f32 %v9572_v48, %v2196_v54  ;;  %v2136_v13 = vmul.f32 0.01, %v2062_v30  ;;  %v2064_v22 = vadd.f32 %v2063_v12, %v9531_v59  ;;  %v9643_v58 = vpop.permute.xlu0 %1825 }
 0x358   :  { %v2071_v55 = vpop.f32.mrf.mxu1  ;;  %v2366_v10 = vadd.f32 %v2365_v19, %v2318_v33  ;;  %v2323_v3 = vmul.f32 %v9572_v48, %v2195_v5  ;;  %v2198_v6 = vmax.f32 %v1949_v11, %v2134_v41  ;;  %v2135_v47 = vmul.f32 0.01, %v1951_v32 }
 0x359   :  { %v1960_v28 = vpop.f32.mrf.mxu0  ;;  %v2392_v0 = vadd.f32 %v2391_v56, %v2320_v20  ;;  %v2325_v9 = vmul.f32 %v9572_v48, %v2197_v61  ;;  %v2200_v49 = vmax.f32 %v2062_v30, %v2136_v13  ;;  %v2137_v4 = vmul.f32 0.01, %v2064_v22 }
 0x35a   :  { %v2073_v14 = vpop.f32.mrf.mxu1  ;;  %v2379_v45 = vadd.f32 %v2378_v18, %v2319_v50  ;;  %v2367_v1 = vadd.f32 %v2366_v10, %v2322_v51  ;;  %v2326_v42 = vmul.f32 %v9535_v40, %v2198_v6  ;;  %v2199_v44 = vmax.f32 %v1951_v32, %v2135_v47  ;;  %v9647_v18 = vpop.permute.xlu1 %2555 }
 0x35b   :  { %v9637_v26 = vpop.f32.mrf.mxu0  ;;  %v2405_v33 = vadd.f32 %v2404_v8, %v2321_v31  ;;  %v2393_v12 = vadd.f32 %v2392_v0, %v2324_v29  ;;  %v2328_v5 = vmul.f32 %v9535_v40, %v2200_v49  ;;  %v2201_v19 = vmax.f32 %v2064_v22, %v2137_v4 }
 0x35c   :  { %v9640_v59 = vpop.f32.mrf.mxu1  ;;  %v2380_v56 = vadd.f32 %v2379_v45, %v2323_v3  ;;  %v2368_v48 = vadd.f32 %v2367_v1, %v2326_v42  ;;  %v2327_v54 = vmul.f32 %v9535_v40, %v2199_v44  ;;  %v1955_v2 = vadd.f32 %v1954_v62, %v9597_v46 }
 0x35d   :  { %v2406_v11 = vadd.f32 %v2405_v33, %v2325_v9  ;;  %v2394_v20 = vadd.f32 %v2393_v12, %v2328_v5  ;;  %v2329_v61 = vmul.f32 %v9535_v40, %v2201_v19  ;;  %v9650_v30 = vpop.f32.mrf.mxu0  ;;  %v2068_v31 = vadd.f32 %v2067_v35, %v9597_v46  ;;  %v9657_v40 = vpop.permute.xlu0 %2283 }
 0x35e   :  { %v2369_v8 = vrot.slane %v2368_v48, 4  ;;  %v2381_v50 = vadd.f32 %v2380_v56, %v2327_v54  ;;  %v9652_v51 = vpop.f32.mrf.mxu1  ;;  %v2138_v22 = vmul.f32 0.01, %v1955_v2  ;;  %v1957_v62 = vadd.f32 %v1956_v53, %v9597_v46  ;;  %v9661_v45 = vpop.permute.xlu1 %2695 }
 0x35f   :  { %v2395_v41 = vrot.slane %v2394_v20, 4  ;;  %v2407_v32 = vadd.f32 %v2406_v11, %v2329_v61  ;;  %v1959_v6 = vadd.f32 %v1958_v25, %v9537_v43  ;;  %v1968_v47 = vpop.f32.mrf.mxu0  ;;  %v2072_v49 = vadd.f32 %v2071_v55, %v9537_v43  ;;  %13994 = vst [vmem:[#allocation60_spill] sm:$0xff] %v9661_v45 }
 0x360   :  { %v2370_v29 = vadd.f32 %v2369_v8, %v2368_v48  ;;  %v2382_v13 = vrot.slane %v2381_v50, 4  ;;  %v1961_v4 = vadd.f32 %v1960_v28, %v9537_v43  ;;  %v2081_v35 = vpop.f32.mrf.mxu1  ;;  %v2140_v44 = vmul.f32 0.01, %v2068_v31 }
 0x361   :  { %v2396_v10 = vadd.f32 %v2395_v41, %v2394_v20  ;;  %v2408_v3 = vrot.slane %v2407_v32, 4  ;;  %v9665_v53 = vadd.f32 %v9621_v27, %v9597_v46  ;;  %v2202_v12 = vmax.f32 %v1955_v2, %v2138_v22  ;;  %v1970_v28 = vpop.f32.mrf.mxu0  ;;  %v9669_v27 = vpop.permute.xlu0 %2295 }
 0x362   :  { %v2371_v0 = vrot.slane %v2370_v29, 2  ;;  %v2383_v9 = vadd.f32 %v2382_v13, %v2381_v50  ;;  %v2139_v5 = vmul.f32 0.01, %v1957_v62  ;;  %v2142_v48 = vmul.f32 0.01, %v1959_v6  ;;  %v2083_v8 = vpop.f32.mrf.mxu1  ;;  %v9672_v22 = vpop.permute.xlu1 %2543 }
 0x363   :  { %v2397_v1 = vrot.slane %v2396_v10, 2  ;;  %v2409_v42 = vadd.f32 %v2408_v3, %v2407_v32  ;;  %v2074_v55 = vadd.f32 %v2073_v14, %v9537_v43  ;;  %v2144_v20 = vmul.f32 0.01, %v2072_v49 }
 0x364   :  { %v2372_v25 = vadd.f32 %v2371_v0, %v2370_v29  ;;  %v2384_v33 = vrot.slane %v2383_v9, 2  ;;  %v2143_v61 = vmul.f32 0.01, %v1961_v4  ;;  %v2204_v41 = vmax.f32 %v2068_v31, %v2140_v44  ;;  %v1974_v0 = vpop.f32.mrf.mxu0 }
 0x365   :  { %v2398_v19 = vadd.f32 %v2397_v1, %v2396_v10  ;;  %v2410_v56 = vrot.slane %v2409_v42, 2  ;;  %v2141_v46 = vmul.f32 0.01, %v9665_v53  ;;  %v2330_v29 = vmul.f32 %v9543_v37, %v2202_v12 }
 0x366   :  { %v2373_v54 = vrot.slane %v2372_v25, 1  ;;  %v2385_v11 = vadd.f32 %v2384_v33, %v2383_v9  ;;  %v2203_v13 = vmax.f32 %v1957_v62, %v2139_v5  ;;  %v2206_v10 = vmax.f32 %v1959_v6, %v2142_v48  ;;  %v2087_v33 = vpop.f32.mrf.mxu1  ;;  %v9688_v48 = vpop.permute.xlu0 %2567 }
 0x367   :  { %v2399_v50 = vrot.slane %v2398_v19, 1  ;;  %v2411_v14 = vadd.f32 %v2410_v56, %v2409_v42  ;;  %v2145_v3 = vmul.f32 0.01, %v2074_v55  ;;  %v2208_v31 = vmax.f32 %v2072_v49, %v2144_v20  ;;  %v9694_v20 = vpop.permute.xlu1 %2547 }
 0x368   :  { %v2374_v32 = vadd.f32 %v2373_v54, %v2372_v25  ;;  %v2386_v2 = vrot.slane %v2385_v11, 1  ;;  %v2207_v44 = vmax.f32 %v1961_v4, %v2143_v61  ;;  %v2332_v25 = vmul.f32 %v9543_v37, %v2204_v41 }
 0x369   :  { %v2400_v43 = vadd.f32 %v2399_v50, %v2398_v19  ;;  %v1965_v62 = vadd.f32 %v9637_v26, %v9539_v15  ;;  %v2078_v12 = vadd.f32 %v9640_v59, %v9539_v15  ;;  %v2205_v42 = vmax.f32 %v9665_v53, %v2141_v46  ;;  %v1976_v26 = vpop.f32.mrf.mxu0 }
 0x36a   :  { %v2470_v9 = vadd.f32 %v9541_v23, %v2374_v32  ;;  %v2387_v1 = vadd.f32 %v2386_v2, %v2385_v11  ;;  %v1967_v49 = vadd.f32 %v9650_v30, %v9539_v15  ;;  %v2412_v4 = vrot.slane %v2411_v14, 1  ;;  %v2089_v30 = vpop.f32.mrf.mxu1 }
 0x36b   :  { %v2472_v45 = vadd.f32 %v9541_v23, %v2400_v43  ;;  %v2331_v5 = vmul.f32 %v9543_v37, %v2203_v13  ;;  %v2209_v19 = vmax.f32 %v2074_v55, %v2145_v3  ;;  %v2080_v56 = vadd.f32 %v9652_v51, %v9539_v15 }
 0x36c   :  { %7832 = vtanh.f32 %v2470_v9  ;;  %v2471_v6 = vadd.f32 %v9541_v23, %v2387_v1  ;;  %v2334_v59 = vmul.f32 %v9583_v34, %v2206_v10  ;;  %v2336_v54 = vmul.f32 %v9583_v34, %v2208_v31  ;;  %v2091_v9 = vpop.f32.mrf.mxu1 }
 0x36d   :  { %v2335_v11 = vmul.f32 %v9583_v34, %v2207_v44  ;;  %v1969_v53 = vadd.f32 %v1968_v47, %v9611_v21  ;;  %7834 = vtanh.f32 %v2472_v45  ;;  %v2146_v61 = vmul.f32 0.01, %v1965_v62  ;;  %v1978_v47 = vpop.f32.mrf.mxu0 }
 0x36e   :  { %v2148_v55 = vmul.f32 0.01, %v2078_v12  ;;  %v2082_v50 = vadd.f32 %v2081_v35, %v9611_v21  ;;  %7836 = vtanh.f32 %v2471_v6  ;;  %v2147_v15 = vmul.f32 0.01, %v1967_v49  ;;  %v9701_v6 = vpop.permute.xlu0 %2551 }
 0x36f   :  { %v2149_v51 = vmul.f32 0.01, %v2080_v56  ;;  %v1971_v41 = vadd.f32 %v1970_v28, %v9611_v21  ;;  %v2413_v46 = vadd.f32 %v2412_v4, %v2411_v14  ;;  %v2337_v32 = vmul.f32 %v9583_v34, %v2209_v19  ;;  %v9704_v19 = vpop.permute.xlu1 %2691 }
 0x370   :  { %v2150_v2 = vmul.f32 0.01, %v1969_v53  ;;  %v2084_v13 = vadd.f32 %v2083_v8, %v9611_v21  ;;  %v2333_v43 = vmul.f32 %v9543_v37, %v2205_v42  ;;  %v2414_v10 = vadd.f32 %v2334_v59, %v2330_v29  ;;  %v1980_v42 = vpop.f32.mrf.mxu0 }
 0x371   :  { %v2152_v45 = vmul.f32 0.01, %v2082_v50  ;;  %v2151_v3 = vmul.f32 0.01, %v1971_v41  ;;  %v2440_v1 = vadd.f32 %v2336_v54, %v2332_v25  ;;  %v2427_v35 = vadd.f32 %v2335_v11, %v2331_v5  ;;  %v2093_v54 = vpop.f32.mrf.mxu1 }
 0x372   :  { %v2210_v31 = vmax.f32 %v1965_v62, %v2146_v61  ;;  %v2153_v44 = vmul.f32 0.01, %v2084_v13  ;;  %v2212_v28 = vmax.f32 %v2078_v12, %v2148_v55  ;;  %v2211_v14 = vmax.f32 %v1967_v49, %v2147_v15 }
 0x373   :  { %v2213_v4 = vmax.f32 %v2080_v56, %v2149_v51  ;;  %v1975_v34 = vadd.f32 %v1974_v0, %v9625_v24  ;;  %v2473_v21 = vadd.f32 %v9541_v23, %v2413_v46  ;;  %v2453_v37 = vadd.f32 %v2337_v32, %v2333_v43  ;;  %v9719_v51 = vpop.permute.xlu0 %2535  ;;  %v9724_v32 = vpop.permute.xlu1 %2539 }
 0x374   :  { %v2214_v8 = vmax.f32 %v1969_v53, %v2150_v2  ;;  %v2088_v29 = vadd.f32 %v2087_v33, %v9625_v24  ;;  %v2216_v25 = vmax.f32 %v2082_v50, %v2152_v45  ;;  %v2215_v5 = vmax.f32 %v1971_v41, %v2151_v3  ;;  %v1984_v41 = vpop.f32.mrf.mxu0  ;;  %v2097_v2 = vpop.f32.mrf.mxu1 }
 0x375   :  { %v2217_v62 = vmax.f32 %v2084_v13, %v2153_v44  ;;  %v1977_v59 = vadd.f32 %v1976_v26, %v9625_v24  ;;  %v2338_v12 = vmul.f32 %v9547_v52, %v2210_v31  ;;  %v2154_v49 = vmul.f32 0.01, %v1975_v34 }
 0x376   :  { %v2156_v56 = vmul.f32 0.01, %v2088_v29  ;;  %v2090_v0 = vadd.f32 %v2089_v30, %v9625_v24  ;;  %v2340_v11 = vmul.f32 %v9547_v52, %v2212_v28  ;;  %v2339_v23 = vmul.f32 %v9547_v52, %v2211_v14 }
 0x377   :  { %v2341_v53 = vmul.f32 %v9547_v52, %v2213_v4  ;;  %v1979_v33 = vadd.f32 %v1978_v47, %v9545_v38  ;;  %v2342_v55 = vmul.f32 %v9551_v7, %v2214_v8  ;;  %v2155_v26 = vmul.f32 0.01, %v1977_v59 }
 0x378   :  { %v2157_v50 = vmul.f32 0.01, %v2090_v0  ;;  %v2092_v15 = vadd.f32 %v2091_v9, %v9545_v38  ;;  %v2344_v24 = vmul.f32 %v9551_v7, %v2216_v25  ;;  %v2343_v30 = vmul.f32 %v9551_v7, %v2215_v5  ;;  %v1986_v25 = vpop.f32.mrf.mxu0 }
 0x379   :  { %v9715_v61 = vpop.eup %7832  ;;  %v2345_v46 = vmul.f32 %v9551_v7, %v2217_v62  ;;  %v2158_v52 = vmul.f32 0.01, %v1979_v33  ;;  %v2415_v13 = vadd.f32 %v2414_v10, %v2338_v12  ;;  %v2218_v47 = vmax.f32 %v1975_v34, %v2154_v49 }
 0x37a   :  { %13995 = vst [vmem:[#allocation43_spill] sm:$0xff] %v9715_v61  ;;  %v2220_v43 = vmax.f32 %v2088_v29, %v2156_v56  ;;  %v2160_v45 = vmul.f32 0.01, %v2092_v15  ;;  %v9726_v3 = vpop.eup %7834  ;;  %v2490_v9 = vsub.f32 0.0, %v9715_v61  ;;  %v2441_v31 = vadd.f32 %v2440_v1, %v2340_v11  ;;  %v2099_v29 = vpop.f32.mrf.mxu1 }
 0x37b   :  { %13996 = vst [vmem:[#allocation18_spill] sm:$0xff] %v9726_v3  ;;  %v2428_v44 = vadd.f32 %v2427_v35, %v2339_v23  ;;  %v2454_v28 = vadd.f32 %v2453_v37, %v2341_v53  ;;  %v9729_v14 = vpop.eup %7836  ;;  %7838 = vtanh.f32 %v2473_v21  ;;  %v2416_v4 = vadd.f32 %v2415_v13, %v2342_v55  ;;  %v9741_v11 = vpop.permute.xlu0 %2519 }
 0x37c   :  { %13997 = vst [vmem:[#allocation67_spill] sm:$0xff] %v9729_v14  ;;  %v2219_v7 = vmax.f32 %v1977_v59, %v2155_v26  ;;  %v2221_v8 = vmax.f32 %v2090_v0, %v2157_v50  ;;  %v2442_v5 = vadd.f32 %v2441_v31, %v2344_v24  ;;  %v2222_v34 = vmax.f32 %v1979_v33, %v2158_v52  ;;  %v9739_v0 = vpop.permute.xlu1 %2679  ;;  %v1988_v26 = vpop.f32.mrf.mxu0 }
 0x37d   :  { %v2429_v62 = vadd.f32 %v2428_v44, %v2343_v30  ;;  %v2455_v10 = vadd.f32 %v2454_v28, %v2345_v46  ;;  %v2492_v12 = vsub.f32 0.0, %v9726_v3  ;;  %v2346_v49 = vmul.f32 %v9657_v40, %v2218_v47  ;;  %13998 = vst [vmem:[#allocation61_spill] sm:$0xff] %v9741_v11 }
 0x37e   :  { %v2348_v1 = vmul.f32 %v9657_v40, %v2220_v43  ;;  %v2224_v35 = vmax.f32 %v2092_v15, %v2160_v45  ;;  %v9734_v37 = vmul.f32 1.442695, %v2490_v9  ;;  %v2491_v21 = vsub.f32 0.0, %v9729_v14  ;;  %v9969_v14 = vld [vmem:[%s13480_s2 + $0x48] sm:$0xff] }
 0x37f   :  { %v1981_v59 = vadd.f32 %v1980_v42, %v9545_v38  ;;  %v2094_v56 = vadd.f32 %v2093_v54, %v9545_v38  ;;  %v2347_v23 = vmul.f32 %v9657_v40, %v2219_v7  ;;  %v2349_v53 = vmul.f32 %v9657_v40, %v2221_v8  ;;  %v2101_v38 = vpop.f32.mrf.mxu1  ;;  %14028 = vst [vmem:[#allocation59_spill] sm:$0xff] %v9969_v14 }
 0x380   :  { %v1985_v33 = vadd.f32 %v1984_v41, %v9643_v58  ;;  %v2098_v55 = vadd.f32 %v2097_v2, %v9643_v58  ;;  %v2350_v50 = vmul.f32 %v9557_v60, %v2222_v34  ;;  %v1987_v42 = vadd.f32 %v1986_v25, %v9643_v58  ;;  %v9753_v8 = vpop.permute.xlu1 %2527  ;;  %v9755_v25 = vpop.permute.xlu0 %2715 }
 0x381   :  { %v2159_v15 = vmul.f32 0.01, %v1981_v59  ;;  %v2161_v24 = vmul.f32 0.01, %v2094_v56  ;;  %v2352_v54 = vmul.f32 %v9557_v60, %v2224_v35  ;;  %v2100_v52 = vadd.f32 %v2099_v29, %v9643_v58 }
 0x382   :  { %v2162_v30 = vmul.f32 0.01, %v1985_v33  ;;  %v2164_v46 = vmul.f32 0.01, %v2098_v55  ;;  %v2163_v47 = vmul.f32 0.01, %v1987_v42  ;;  %v1989_v41 = vadd.f32 %v1988_v26, %v9553_v17 }
 0x383   :  { %v2223_v13 = vmax.f32 %v1981_v59, %v2159_v15  ;;  %v2225_v40 = vmax.f32 %v2094_v56, %v2161_v24  ;;  %v2165_v45 = vmul.f32 0.01, %v2100_v52  ;;  %v2102_v9 = vadd.f32 %v2101_v38, %v9553_v17  ;;  %v1990_v59 = vpop.f32.mrf.mxu0  ;;  %v2103_v56 = vpop.f32.mrf.mxu1 }
 0x384   :  { %v2226_v2 = vmax.f32 %v1985_v33, %v2162_v30  ;;  %v2228_v43 = vmax.f32 %v2098_v55, %v2164_v46  ;;  %v2417_v31 = vadd.f32 %v2416_v4, %v2346_v49  ;;  %v2443_v44 = vadd.f32 %v2442_v5, %v2348_v1 }
 0x385   :  { %v2430_v28 = vadd.f32 %v2429_v62, %v2347_v23  ;;  %v2166_v7 = vmul.f32 0.01, %v1989_v41  ;;  %v2227_v29 = vmax.f32 %v1987_v42, %v2163_v47  ;;  %v2168_v35 = vmul.f32 0.01, %v2102_v9 }
 0x386   :  { %v2354_v58 = vmul.f32 %v9561_v63, %v2226_v2  ;;  %v2356_v34 = vmul.f32 %v9561_v63, %v2228_v43  ;;  %v2456_v33 = vadd.f32 %v2455_v10, %v2349_v53  ;;  %v2418_v55 = vadd.f32 %v2417_v31, %v2350_v50  ;;  %v9776_v2 = vpop.permute.xlu0 %2703  ;;  %v9784_v43 = vld [vmem:[%s13480_s2] sm:$0xff] }
 0x387   :  { %v2229_v26 = vmax.f32 %v2100_v52, %v2165_v45  ;;  %v2230_v15 = vmax.f32 %v1989_v41, %v2166_v7  ;;  %v2444_v4 = vadd.f32 %v2443_v44, %v2352_v54  ;;  %v2351_v5 = vmul.f32 %v9557_v60, %v2223_v13  ;;  %v9774_v41 = vpop.permute.xlu1 %2531  ;;  %14000 = vst [vmem:[#allocation42_spill] sm:$0xff] %v9784_v43 }
 0x388   :  { %v2353_v62 = vmul.f32 %v9557_v60, %v2225_v40  ;;  %v2232_v49 = vmax.f32 %v2102_v9, %v2168_v35  ;;  %v9761_v1 = vpop.eup %7838  ;;  %v2419_v23 = vadd.f32 %v2418_v55, %v2354_v58  ;;  %v1991_v42 = vadd.f32 %v1990_v59, %v9553_v17 }
 0x389   :  { %13999 = vst [vmem:[#allocation44_spill] sm:$0xff] %v9761_v1  ;;  %v2358_v24 = vmul.f32 %v9669_v27, %v2230_v15  ;;  %v2104_v38 = vadd.f32 %v2103_v56, %v9553_v17  ;;  %v2445_v30 = vadd.f32 %v2444_v4, %v2356_v34  ;;  %v2355_v10 = vmul.f32 %v9561_v63, %v2227_v29  ;;  %v9795_v56 = vld [vmem:[%s13480_s2 + $0x10] sm:$0xff] }
 0x38a   :  { %v2360_v53 = vmul.f32 %v9669_v27, %v2232_v49  ;;  %v2357_v50 = vmul.f32 %v9561_v63, %v2229_v26  ;;  %v2167_v46 = vmul.f32 0.01, %v1991_v42  ;;  %v13585_v52 = vmov 19   ;;  %v7953_v63 = vld [vmem:[%s13480_s2 + $0x8] sm:$0xff]  ;;  %14001 = vst [vmem:[#allocation47_spill] sm:$0xff] %v9795_v56  ;;  %v9806_v4 = vpop.permute.xlu0 %2699 }
 0x38b   :  { %v2420_v54 = vadd.f32 %v2419_v23, %v2358_v24  ;;  %v2169_v60 = vmul.f32 0.01, %v2104_v38  ;;  %7642 = vset.pattern.permute.xlu1 %v13585_v52  ;;  %7641 = vset.pattern.permute.xlu0 %v13585_v52  ;;  %v2498_v13 = vmul.f32 1.442695, %v2492_v12  ;;  %v2493_v17 = vsub.f32 0.0, %v9761_v1  ;;  %v9804_v15 = vpop.permute.xlu1 %2675  ;;  %v9811_v24 = vld [vmem:[%s13480_s2 + $0x20] sm:$0xff] }
 0x38c   :  { %v2431_v40 = vadd.f32 %v2430_v28, %v2351_v5  ;;  %v2446_v47 = vadd.f32 %v2445_v30, %v2360_v53  ;;  %2964 = vperm.xlu1 %7642, %v7953_v63   ;;  %2960 = vperm.xlu0 %7641, %v9784_v43   ;;  %v2457_v12 = vadd.f32 %v2456_v33, %v2353_v62  ;;  %7840 = vpow2.f32 %v9734_v37  ;;  %v9801_v37 = vld [vmem:[%s13480_s2 + $0x18] sm:$0xff] }
 0x38d   :  { %v2421_v45 = vrot.slane %v2420_v54, 4  ;;  %v2231_v9 = vmax.f32 %v1991_v42, %v2167_v46  ;;  %v2233_v31 = vmax.f32 %v2104_v38, %v2169_v60  ;;  %7842 = vpow2.f32 %v2498_v13  ;;  %14002 = vst [vmem:[#allocation29_spill] sm:$0xff] %v9801_v37  ;;  %14003 = vst [vmem:[#allocation45_spill] sm:$0xff] %v9804_v15 }
 0x38e   :  { %v2432_v44 = vadd.f32 %v2431_v40, %v2355_v10  ;;  %v2447_v28 = vrot.slane %v2446_v47, 4  ;;  %v2458_v7 = vadd.f32 %v2457_v12, %v2357_v50  ;;  %v2496_v35 = vmul.f32 1.442695, %v2491_v21  ;;  %14004 = vst [vmem:[#allocation50_spill] sm:$0xff] %v9811_v24 }
 0x38f   :  { %v2422_v58 = vadd.f32 %v2421_v45, %v2420_v54  ;;  %v2359_v34 = vmul.f32 %v9669_v27, %v2231_v9  ;;  %v2361_v29 = vmul.f32 %v9669_v27, %v2233_v31  ;;  %v2500_v27 = vmul.f32 1.442695, %v2493_v17  ;;  %v9816_v13 = vpop.permute.xlu1 %2523  ;;  %v9818_v17 = vpop.permute.xlu0 %2687  ;;  %v14005_v31 = vld [vmem:[#allocation16_spill] sm:$0xff] }
 0x390   :  { %v2448_v59 = vadd.f32 %v2447_v28, %v2446_v47  ;;  %2968 = vperm.xlu1 %7642, %v9795_v56   ;;  %2972 = vperm.xlu0 %7641, %v9801_v37   ;;  %7844 = vpow2.f32 %v2496_v35  ;;  %v13587_v42 = vmov 27  }
 0x391   :  { %v2423_v33 = vrot.slane %v2422_v58, 2  ;;  %v2433_v55 = vadd.f32 %v2432_v44, %v2359_v34  ;;  %v2459_v26 = vadd.f32 %v2458_v7, %v2361_v29  ;;  %7846 = vpow2.f32 %v2500_v27 }
 0x392   :  { %v2449_v21 = vrot.slane %v2448_v59, 2 }
 0x393   :  { %v2424_v5 = vadd.f32 %v2423_v33, %v2422_v58  ;;  %v2434_v62 = vrot.slane %v2433_v55, 4  ;;  %v2460_v49 = vrot.slane %v2459_v26, 4  ;;  %v14006_v58 = vld [vmem:[#allocation17_spill] sm:$0xff]  ;;  %v9832_v33 = vpop.permute.xlu1 %2663 }
 0x394   :  { %v2450_v23 = vadd.f32 %v2449_v21, %v2448_v59  ;;  %2976 = vperm.xlu1 %7642, %v9811_v24   ;;  %7643 = vset.pattern.permute.xlu0 %v13587_v42  ;;  %14009 = vst [vmem:[#allocation51_spill] sm:$0xff] %v9832_v33  ;;  %v14011_v21 = vld [vmem:[#allocation13_spill] sm:$0xff] }
 0x395   :  { %v2425_v38 = vrot.slane %v2424_v5, 1  ;;  %v2435_v30 = vadd.f32 %v2434_v62, %v2433_v55  ;;  %v2461_v10 = vadd.f32 %v2460_v49, %v2459_v26  ;;  %3426 = vperm.xlu0 %7643, %v9784_v43   ;;  %v9834_v55 = vpop.permute.xlu0 %2683  ;;  %v9839_v26 = vld [vmem:[%s13480_s2 + $0x28] sm:$0xff]  ;;  %v14030_v43 = vmov 27  }
 0x396   :  { %v2451_v53 = vrot.slane %v2450_v23, 1  ;;  %14010 = vst [vmem:[#allocation48_spill] sm:$0xff] %v9839_v26 }
 0x397   :  { %v2426_v50 = vadd.f32 %v2425_v38, %v2424_v5  ;;  %v2436_v54 = vrot.slane %v2435_v30, 2  ;;  %v2462_v46 = vrot.slane %v2461_v10, 2 }
 0x398   :  { %v2452_v60 = vadd.f32 %v2451_v53, %v2450_v23  ;;  %7644 = vset.pattern.permute.xlu1 %v13587_v42  ;;  %v14013_v53 = vld [vmem:[#allocation15_spill] sm:$0xff] }
 0x399   :  { %v2482_v40 = vadd.f32 %v9565_v16, %v2426_v50  ;;  %v2437_v47 = vadd.f32 %v2436_v54, %v2435_v30  ;;  %v2463_v12 = vadd.f32 %v2462_v46, %v2461_v10  ;;  %3430 = vperm.xlu1 %7644, %v7953_v63   ;;  %3434 = vperm.xlu0 %7643, %v9795_v56   ;;  %v7841_v9 = vpop.eup %7840  ;;  %v14012_v30 = vld [vmem:[#allocation14_spill] sm:$0xff] }
 0x39a   :  { %v2484_v45 = vadd.f32 %v9565_v16, %v2452_v60  ;;  %v7843_v29 = vpop.eup %7842 }
 0x39b   :  { %v2486_v44 = vsub.f32 %v14005_v31, %v2482_v40  ;;  %v2438_v28 = vrot.slane %v2437_v47, 1  ;;  %v2464_v7 = vrot.slane %v2463_v12, 1 }
 0x39c   :  { %v2488_v34 = vsub.f32 %v14006_v58, %v2484_v45 }
 0x39d   :  { %v9826_v35 = vmul.f32 %v7841_v9, %v2486_v44  ;;  %v2439_v59 = vadd.f32 %v2438_v28, %v2437_v47  ;;  %v2465_v27 = vadd.f32 %v2464_v7, %v2463_v12  ;;  %7645 = vset.pattern.permute.xlu1 %v13585_v52  ;;  %3438 = vperm.xlu0 %7643, %v9801_v37   ;;  %v7845_v38 = vpop.eup %7844  ;;  %v9870_v12 = vld [vmem:[%s13480_s2 + $0x30] sm:$0xff] }
 0x39e   :  { %v9830_v63 = vmul.f32 %v7843_v29, %v2488_v34  ;;  %2980 = vperm.xlu1 %7645, %v9839_v26   ;;  %v7847_v46 = vpop.eup %7846  ;;  %14014 = vst [vmem:[#allocation70_spill] sm:$0xff] %v9870_v12 }
 0x39f   :  { %14007 = vst [vmem:[#allocation69_spill] sm:$0xff] %v9826_v35  ;;  %v9844_v5 = vrot.slane %v9826_v35, %v14011_v21  ;;  %v2483_v62 = vadd.f32 %v9565_v16, %v2439_v59  ;;  %v2485_v49 = vadd.f32 %v9565_v16, %v2465_v27  ;;  %v9893_v27 = vpop.permute.xlu1 %2511 }
 0x3a0   :  { %14008 = vst [vmem:[#allocation63_spill] sm:$0xff] %v9830_v63  ;;  %v9850_v23 = vrot.slane %v9830_v63, %v14011_v21 }
 0x3a1   :  { %v2487_v10 = vsub.f32 %v14012_v30, %v2483_v62  ;;  %v2489_v50 = vsub.f32 %v14013_v53, %v2485_v49  ;;  %v2650_v54 = vmul.f32 %v9844_v5, %v9575_v57  ;;  %3442 = vperm.xlu0 %7643, %v9811_v24   ;;  %v9859_v60 = vmul.f32 %v9844_v5, %v9753_v8  ;;  %v9895_v62 = vpop.permute.xlu0 %2671 }
 0x3a2   :  { %v2652_v16 = vmul.f32 %v9850_v23, %v9575_v57  ;;  %v2610_v40 = vmul.f32 %v9844_v5, %v9774_v41  ;;  %v2612_v47 = vmul.f32 %v9850_v23, %v9774_v41  ;;  %2984 = vperm.xlu1 %7645, %v9870_v12   ;;  %v2638_v28 = vmul.f32 %v9844_v5, %v9601_v36 }
 0x3a3   :  { %v9873_v45 = vmul.f32 %v7845_v38, %v2487_v10  ;;  %v9875_v9 = vmul.f32 %v7847_v46, %v2489_v50  ;;  %v9878_v44 = vadd.f32 %v9755_v25, %v2650_v54  ;;  %v2640_v34 = vmul.f32 %v9850_v23, %v9601_v36  ;;  %14019 = vst [vmem:[#allocation52_spill] sm:$0xff] %v9895_v62  ;;  %v2516_v63 = vpop.permute.xlu1 %2515 }
 0x3a4   :  { %v9883_v7 = vadd.f32 %v9755_v25, %v2652_v16  ;;  %v9888_v29 = vadd.f32 %v9804_v15, %v2610_v40  ;;  %v9891_v59 = vadd.f32 %v9804_v15, %v2612_v47  ;;  %v2608_v10 = vmul.f32 %v9850_v23, %v9753_v8  ;;  %v9926_v47 = vld [vmem:[%s13480_s2 + $0x38] sm:$0xff] }
 0x3a5   :  { %14015 = vst [vmem:[#allocation64_spill] sm:$0xff] %v9873_v45  ;;  %14016 = vst [vmem:[#allocation54_spill] sm:$0xff] %v9875_v9  ;;  %v9899_v49 = vrot.slane %v9873_v45, %v14011_v21  ;;  %v9903_v38 = vrot.slane %v9875_v9, %v14011_v21  ;;  %v9908_v50 = vadd.f32 %v9776_v2, %v2638_v28  ;;  %3450 = vperm.xlu0 %7643, %v9870_v12   ;;  %v9982_v35 = vpop.permute.xlu0 %2667 }
 0x3a6   :  { %14017 = vst [vmem:[#allocation49_spill] sm:$0xff] %v9888_v29  ;;  %14018 = vst [vmem:[#allocation27_spill] sm:$0xff] %v9891_v59  ;;  %v9912_v54 = vmul.f32 0.01, %v9878_v44  ;;  %v9915_v46 = vmul.f32 0.01, %v9883_v7  ;;  %v9918_v16 = vadd.f32 %v9776_v2, %v2640_v34  ;;  %2988 = vperm.xlu1 %7645, %v9926_v47   ;;  %v2634_v30 = vmul.f32 %v9844_v5, %v9647_v18 }
 0x3a7   :  { %v9921_v40 = vmul.f32 0.01, %v9888_v29  ;;  %14021 = vst [vmem:[#allocation55_spill] sm:$0xff] %v9926_v47  ;;  %v9931_v28 = vmul.f32 %v9899_v49, %v9753_v8  ;;  %v9935_v52 = vmul.f32 %v9903_v38, %v9753_v8  ;;  %v9939_v34 = vmul.f32 %v9899_v49, %v9774_v41  ;;  %14029 = vst [vmem:[#allocation57_spill] sm:$0xff] %v9982_v35 }
 0x3a8   :  { %v9942_v42 = vmul.f32 0.01, %v9891_v59  ;;  %v9946_v53 = vmul.f32 %v9903_v38, %v9774_v41  ;;  %v9949_v58 = vmul.f32 0.01, %v9908_v50  ;;  %v2636_v8 = vmul.f32 %v9850_v23, %v9647_v18 }
 0x3a9   :  { %14020 = vst [vmem:[#allocation53_spill] sm:$0xff] %v9921_v40  ;;  %14022 = vst [vmem:[#allocation19_spill] sm:$0xff] %v9931_v28  ;;  %v9956_v31 = vmul.f32 0.01, %v9918_v16  ;;  %v2602_v1 = vmul.f32 %v9844_v5, %v9816_v13  ;;  %v9962_v3 = vmul.f32 %v9899_v49, %v9816_v13  ;;  %v2604_v41 = vmul.f32 %v9850_v23, %v9816_v13 }
 0x3aa   :  { %14023 = vst [vmem:[#allocation37_spill] sm:$0xff] %v9935_v52  ;;  %14024 = vst [vmem:[#allocation58_spill] sm:$0xff] %v9939_v34  ;;  %3462 = vperm.xlu0 %7643, %v9969_v14   ;;  %v9973_v61 = vadd.f32 %v9806_v4, %v2634_v30  ;;  %v9976_v9 = vadd.f32 %v9806_v4, %v2636_v8  ;;  %v2622_v45 = vmul.f32 %v9844_v5, %v9672_v22 }
 0x3ab   :  { %14025 = vst [vmem:[#allocation56_spill] sm:$0xff] %v9942_v42  ;;  %14026 = vst [vmem:[#allocation78_spill] sm:$0xff] %v9946_v53  ;;  %v2624_v21 = vmul.f32 %v9850_v23, %v9672_v22  ;;  %7646 = vset.pattern.permute.xlu1 %v14030_v43  ;;  %v2598_v37 = vmul.f32 %v9844_v5, %v9741_v11  ;;  %v2600_v30 = vmul.f32 %v9850_v23, %v9741_v11 }
 0x3ac   :  { %14027 = vst [vmem:[#allocation72_spill] sm:$0xff] %v9962_v3  ;;  %v2618_v8 = vmul.f32 %v9844_v5, %v9724_v32  ;;  %v2620_v24 = vmul.f32 %v9850_v23, %v9724_v32  ;;  %3446 = vperm.xlu1 %7646, %v9839_v26   ;;  %v9995_v56 = vmul.f32 0.01, %v9973_v61  ;;  %v9999_v12 = vmul.f32 %v9903_v38, %v9816_v13 }
 0x3ad   :  { %v10002_v3 = vadd.f32 %v9818_v17, %v2622_v45  ;;  %v10005_v11 = vadd.f32 %v9818_v17, %v2624_v21  ;;  %v10008_v59 = vadd.f32 %v9832_v33, %v2598_v37  ;;  %v10011_v42 = vadd.f32 %v9832_v33, %v2600_v30 }
 0x3ae   :  { %14031 = vst [vmem:[#allocation79_spill] sm:$0xff] %v9999_v12  ;;  %v10014_v26 = vadd.f32 %v9834_v55, %v2618_v8  ;;  %v10017_v29 = vadd.f32 %v9834_v55, %v2620_v24  ;;  %v14036_v13 = vmov 19   ;;  %v10021_v45 = vmul.f32 0.01, %v9976_v9  ;;  %v10034_v8 = vld [vmem:[%s13480_s2 + $0x40] sm:$0xff] }
 0x3af   :  { %14032 = vst [vmem:[#allocation73_spill] sm:$0xff] %v10008_v59  ;;  %14033 = vst [vmem:[#allocation62_spill] sm:$0xff] %v10011_v42  ;;  %7650 = vset.pattern.permute.xlu0 %v14036_v13  ;;  %v10024_v21 = vmul.f32 0.01, %v10002_v3  ;;  %v10027_v37 = vmul.f32 0.01, %v10005_v11  ;;  %v2590_v30 = vmul.f32 %v9844_v5, %v9893_v27  ;;  %v10048_v40 = vmul.f32 %v9899_v49, %v9893_v27 }
 0x3b0   :  { %14034 = vst [vmem:[#allocation66_spill] sm:$0xff] %v10014_v26  ;;  %14035 = vst [vmem:[#allocation80_spill] sm:$0xff] %v10017_v29  ;;  %2992 = vperm.xlu0 %7650, %v10034_v8   ;;  %v10038_v24 = vmul.f32 0.01, %v10008_v59  ;;  %v10041_v33 = vmul.f32 0.01, %v10011_v42  ;;  %3454 = vperm.xlu1 %7646, %v9926_v47   ;;  %v2592_v52 = vmul.f32 %v9850_v23, %v9893_v27 }
 0x3b1   :  { %v10044_v12 = vmul.f32 0.01, %v10014_v26  ;;  %14039 = vst [vmem:[#allocation68_spill] sm:$0xff] %v10048_v40  ;;  %v10052_v53 = vmul.f32 0.01, %v10017_v29  ;;  %v10058_v59 = vadd.f32 %v9895_v62, %v9859_v60  ;;  %v10061_v42 = vadd.f32 %v9895_v62, %v2608_v10 }
 0x3b2   :  { %14037 = vst [vmem:[#allocation71_spill] sm:$0xff] %v10038_v24  ;;  %14038 = vst [vmem:[#allocation65_spill] sm:$0xff] %v10041_v33  ;;  %v10063_v33 = vpop.permute.xlu1 %2659  ;;  %v10065_v24 = vpop.permute.xlu0 %2655  ;;  %v10069_v47 = vmul.f32 %v9903_v38, %v9893_v27  ;;  %v2594_v40 = vmul.f32 %v9844_v5, %v2516_v63  ;;  %v10073_v15 = vmul.f32 %v9899_v49, %v2516_v63  ;;  %v10091_v27 = vld [vmem:[%s13480_s2 + $0x58] sm:$0xff] }
 0x3b3   :  { %14040 = vst [vmem:[#allocation20_spill] sm:$0xff] %v10052_v53  ;;  %14041 = vst [vmem:[#allocation76_spill] sm:$0xff] %v10058_v59  ;;  %v2596_v34 = vmul.f32 %v9850_v23, %v2516_v63  ;;  %v10077_v60 = vmul.f32 0.01, %v10058_v59  ;;  %v10080_v10 = vmul.f32 %v9903_v38, %v2516_v63  ;;  %v10083_v62 = vadd.f32 %v9982_v35, %v2602_v1 }
 0x3b4   :  { %14042 = vst [vmem:[#allocation83_spill] sm:$0xff] %v10061_v42  ;;  %14043 = vst [vmem:[#allocation75_spill] sm:$0xff] %v10063_v33  ;;  %v10086_v28 = vadd.f32 %v9982_v35, %v2604_v41  ;;  %3004 = vperm.xlu0 %7650, %v10091_v27   ;;  %v10104_v1 = vadd.f32 %v10065_v24, %v2590_v30  ;;  %7647 = vset.pattern.permute.xlu1 %v14036_v13 }
 0x3b5   :  { %14044 = vst [vmem:[#allocation81_spill] sm:$0xff] %v10065_v24  ;;  %14045 = vst [vmem:[#allocation74_spill] sm:$0xff] %v10069_v47  ;;  %v10095_v47 = vmul.f32 0.01, %v10061_v42  ;;  %v10101_v63 = vadd.f32 %v10063_v33, %v2596_v34  ;;  %v10108_v41 = vmul.f32 0.01, %v10083_v62  ;;  %v2647_v35 = vmul.f32 %v9899_v49, %v9688_v48  ;;  %2996 = vperm.xlu1 %7647, %v9969_v14  }
 0x3b6   :  { %14046 = vst [vmem:[#allocation82_spill] sm:$0xff] %v10073_v15  ;;  %14047 = vst [vmem:[#allocation77_spill] sm:$0xff] %v10077_v60  ;;  %v10098_v15 = vadd.f32 %v10063_v33, %v2594_v40  ;;  %v2651_v40 = vmul.f32 %v9899_v49, %v9575_v57  ;;  %v10119_v34 = vmul.f32 0.01, %v10086_v28  ;;  %v2653_v14 = vmul.f32 %v9903_v38, %v9575_v57 }
 0x3b7   :  { %14048 = vst [vmem:[#allocation38_spill] sm:$0xff] %v10080_v10  ;;  %14049 = vst [vmem:[#allocation32_spill] sm:$0xff] %v10083_v62  ;;  %v10111_v10 = vadd.f32 %v10065_v24, %v2592_v52  ;;  %v10125_v33 = vmul.f32 0.01, %v10101_v63  ;;  %v2649_v52 = vmul.f32 %v9903_v38, %v9688_v48  ;;  %v10130_v24 = vmul.f32 0.01, %v10104_v1 }
 0x3b8   :  { %14050 = vst [vmem:[#allocation46_spill] sm:$0xff] %v10086_v28  ;;  %14051 = vst [vmem:[#allocation41_spill] sm:$0xff] %v10095_v47  ;;  %v10122_v30 = vmul.f32 0.01, %v10098_v15  ;;  %v14060_v62 = vld [vmem:[#allocation21_spill] sm:$0xff]  ;;  %v2779_v42 = vadd.f32 %v9755_v25, %v2651_v40  ;;  %v2648_v40 = vmul.f32 %v9850_v23, %v9688_v48  ;;  %v14061_v47 = vld [vmem:[#allocation22_spill] sm:$0xff] }
 0x3b9   :  { %14052 = vst [vmem:[#allocation28_spill] sm:$0xff] %v10098_v15  ;;  %14053 = vst [vmem:[#allocation33_spill] sm:$0xff] %v10101_v63  ;;  %v10139_v15 = vld [vmem:[%s13480_s2 + $0x60] sm:$0xff]  ;;  %v2777_v63 = vadd.f32 %v14060_v62, %v2649_v52  ;;  %v10155_v52 = vld [vmem:[%s13480_s2 + $0x50] sm:$0xff] }
 0x3ba   :  { %14054 = vst [vmem:[#allocation30_spill] sm:$0xff] %v10104_v1  ;;  %14055 = vst [vmem:[#allocation34_spill] sm:$0xff] %v10108_v41  ;;  %v2775_v41 = vadd.f32 %v14060_v62, %v2647_v35  ;;  %3008 = vperm.xlu0 %7650, %v10139_v15   ;;  %v2906_v35 = vmax.f32 %v9878_v44, %v9912_v54  ;;  %v2843_v57 = vmul.f32 0.01, %v2779_v42  ;;  %3000 = vperm.xlu1 %7647, %v10155_v52  }
 0x3bb   :  { %14056 = vst [vmem:[#allocation31_spill] sm:$0xff] %v10119_v34  ;;  %14057 = vst [vmem:[#allocation84_spill] sm:$0xff] %v10122_v30  ;;  %v2781_v1 = vadd.f32 %v9755_v25, %v2653_v14  ;;  %v2841_v28 = vmul.f32 0.01, %v2777_v63  ;;  %v2776_v54 = vadd.f32 %v14060_v62, %v2648_v40 }
 0x3bc   :  { %14058 = vst [vmem:[#allocation85_spill] sm:$0xff] %v10125_v33  ;;  %14059 = vst [vmem:[#allocation86_spill] sm:$0xff] %v10130_v24  ;;  %v2646_v33 = vmul.f32 %v9844_v5, %v9688_v48  ;;  %v2839_v30 = vmul.f32 0.01, %v2775_v41  ;;  %v2908_v24 = vmax.f32 %v9883_v7, %v9915_v46  ;;  %v2639_v48 = vmul.f32 %v9899_v49, %v9601_v36  ;;  %v10167_v46 = vld [vmem:[%s13480_s2 + $0x70] sm:$0xff] }
 0x3bd   :  { %v2907_v14 = vmax.f32 %v2779_v42, %v2843_v57  ;;  %v2845_v25 = vmul.f32 0.01, %v2781_v1  ;;  %v2643_v7 = vmul.f32 %v9899_v49, %v14061_v47  ;;  %14062 = vst [vmem:[#allocation21_spill] sm:$0xff] %v10167_v46  ;;  %v2905_v59 = vmax.f32 %v2777_v63, %v2841_v28  ;;  %v10179_v28 = vld [vmem:[%s13480_s2] sm:$0x1] }
 0x3be   :  { %v2774_v44 = vadd.f32 %v14060_v62, %v2646_v33  ;;  %v2903_v34 = vmax.f32 %v2775_v41, %v2839_v30  ;;  %3016 = vperm.xlu0 %7650, %v10167_v46   ;;  %v2840_v60 = vmul.f32 0.01, %v2776_v54  ;;  %v2767_v62 = vadd.f32 %v9776_v2, %v2639_v48 }
 0x3bf   :  { %v2909_v29 = vmax.f32 %v2781_v1, %v2845_v25  ;;  %v2771_v42 = vadd.f32 %v9630_v39, %v2643_v7  ;;  %v2641_v41 = vmul.f32 %v9903_v38, %v9601_v36  ;;  %v8095_v30 = vmov 35  }
 0x3c0   :  { %v2838_v33 = vmul.f32 0.01, %v2774_v44  ;;  %v2956_v40 = vpack.c.bf16 %v2907_v14, %v2903_v34  ;;  %7648 = vset.pattern.permute.xlu1 %v8095_v30  ;;  %v2904_v53 = vmax.f32 %v2776_v54, %v2840_v60  ;;  %v2831_v26 = vmul.f32 0.01, %v2767_v62 }
 0x3c1   :  { %v2645_v46 = vmul.f32 %v9903_v38, %v14061_v47  ;;  %3658 = vperm.xlu1 %7648, %v10179_v28   ;;  %v2958_v63 = vpack.c.bf16 %v2909_v29, %v2905_v59  ;;  %v2835_v1 = vmul.f32 0.01, %v2771_v42  ;;  %v2769_v36 = vadd.f32 %v9776_v2, %v2641_v41 }
 0x3c2   :  { %v2902_v57 = vmax.f32 %v2774_v44, %v2838_v33  ;;  %3071 = vmatprep.subr.bf16.mxu0 %v2956_v40  ;;  %v2642_v34 = vmul.f32 %v9844_v5, %v14061_v47  ;;  %7654 = vset.pattern.permute.xlu0 %v14030_v43  ;;  %v2957_v44 = vpack.c.bf16 %v2908_v24, %v2904_v53 }
 0x3c3   :  { %v2895_v54 = vmax.f32 %v2767_v62, %v2831_v26  ;;  %v2773_v48 = vadd.f32 %v9630_v39, %v2645_v46  ;;  %3474 = vperm.xlu0 %7654, %v10139_v15   ;;  %3184 = vmatprep.subr.bf16.mxu1 %v2958_v63  ;;  %v2899_v14 = vmax.f32 %v2771_v42, %v2835_v1  ;;  %v2833_v25 = vmul.f32 0.01, %v2769_v36  ;;  %v14063_v62 = vld [vmem:[#allocation60_spill] sm:$0xff]  ;;  %v10214_v1 = vld [vmem:[%s13480_s2 + $0x78] sm:$0xff] }
 0x3c4   :  { %v2955_v60 = vpack.c.bf16 %v2906_v35, %v2902_v57  ;;  %v2770_v29 = vadd.f32 %v9630_v39, %v2642_v34  ;;  %v2894_v2 = vmax.f32 %v9908_v50, %v9949_v58  ;;  %3185 = vmatpush1.bf16.msra.mxu1 %v2957_v44  ;;  %v2644_v35 = vmul.f32 %v9850_v23, %v14061_v47 }
 0x3c5   :  { %v2837_v59 = vmul.f32 0.01, %v2773_v48  ;;  %v2896_v26 = vmax.f32 %v9918_v16, %v9956_v31  ;;  %v2631_v53 = vmul.f32 %v9899_v49, %v9701_v6  ;;  %v2952_v24 = vpack.c.bf16 %v2899_v14, %v2895_v54  ;;  %7649 = vset.pattern.permute.xlu1 %v14030_v43 }
 0x3c6   :  { %3072 = vmatpush1.bf16.msra.mxu0 %v2955_v60  ;;  %v2897_v7 = vmax.f32 %v2769_v36, %v2833_v25  ;;  %v2834_v46 = vmul.f32 0.01, %v2770_v29  ;;  %v2635_v33 = vmul.f32 %v9899_v49, %v9647_v18  ;;  %v2772_v50 = vadd.f32 %v9630_v39, %v2644_v35  ;;  %3458 = vperm.xlu1 %7649, %v10034_v8  }
 0x3c7   :  { %v2901_v58 = vmax.f32 %v2773_v48, %v2837_v59  ;;  %v2759_v40 = vadd.f32 %v14063_v62, %v2631_v53  ;;  %v2633_v47 = vmul.f32 %v9903_v38, %v9701_v6  ;;  %3073 = vmatprep.subr.bf16.mxu0 %v2952_v24  ;;  %v2637_v42 = vmul.f32 %v9903_v38, %v9647_v18 }
 0x3c8   :  { %v2898_v31 = vmax.f32 %v2770_v29, %v2834_v46  ;;  %v2763_v16 = vadd.f32 %v9806_v4, %v2635_v33  ;;  %v2630_v41 = vmul.f32 %v9844_v5, %v9701_v6  ;;  %v2836_v57 = vmul.f32 0.01, %v2772_v50  ;;  %3486 = vperm.xlu0 %7654, %v10214_v1  }
 0x3c9   :  { %v2954_v30 = vpack.c.bf16 %v2901_v58, %v2897_v7  ;;  %v2823_v39 = vmul.f32 0.01, %v2759_v40  ;;  %v2761_v63 = vadd.f32 %v14063_v62, %v2633_v47  ;;  %v2765_v60 = vadd.f32 %v9806_v4, %v2637_v42  ;;  %v10227_v4 = vld [vmem:[%s13480_s2 + $0x68] sm:$0xff] }
 0x3ca   :  { %v2951_v36 = vpack.c.bf16 %v2898_v31, %v2894_v2  ;;  %v2827_v34 = vmul.f32 0.01, %v2763_v16  ;;  %v2758_v18 = vadd.f32 %v14063_v62, %v2630_v41  ;;  %v2900_v44 = vmax.f32 %v2772_v50, %v2836_v57  ;;  %7651 = vset.pattern.permute.xlu1 %v14036_v13 }
 0x3cb   :  { %3186 = vmatprep.subr.bf16.mxu1 %v2954_v30  ;;  %v2887_v54 = vmax.f32 %v2759_v40, %v2823_v39  ;;  %v2825_v48 = vmul.f32 0.01, %v2761_v63  ;;  %v2890_v14 = vmax.f32 %v9973_v61, %v9995_v56  ;;  %v2829_v29 = vmul.f32 0.01, %v2765_v60  ;;  %3012 = vperm.xlu1 %7651, %v10227_v4  }
 0x3cc   :  { %3074 = vmatpush1.bf16.msra.mxu0 %v2951_v36  ;;  %v2891_v25 = vmax.f32 %v2763_v16, %v2827_v34  ;;  %v2822_v59 = vmul.f32 0.01, %v2758_v18  ;;  %v2632_v2 = vmul.f32 %v9850_v23, %v9701_v6  ;;  %v2953_v35 = vpack.c.bf16 %v2900_v44, %v2896_v26 }
 0x3cd   :  { %v2889_v53 = vmax.f32 %v2761_v63, %v2825_v48  ;;  %v2892_v61 = vmax.f32 %v9976_v9, %v10021_v45  ;;  %v2623_v56 = vmul.f32 %v9899_v49, %v9672_v22  ;;  %v2893_v7 = vmax.f32 %v2765_v60, %v2829_v29 }
 0x3ce   :  { %v2948_v24 = vpack.c.bf16 %v2891_v25, %v2887_v54  ;;  %v2886_v46 = vmax.f32 %v2758_v18, %v2822_v59  ;;  %v2760_v6 = vadd.f32 %v14063_v62, %v2632_v2  ;;  %3187 = vmatpush1.bf16.msra.mxu1 %v2953_v35  ;;  %v2627_v33 = vmul.f32 %v9899_v49, %v9694_v20 }
 0x3cf   :  { %v2751_v58 = vadd.f32 %v9818_v17, %v2623_v56  ;;  %v2625_v26 = vmul.f32 %v9903_v38, %v9672_v22  ;;  %v2629_v9 = vmul.f32 %v9903_v38, %v9694_v20  ;;  %v2950_v45 = vpack.c.bf16 %v2893_v7, %v2889_v53  ;;  %7652 = vset.pattern.permute.xlu1 %v14030_v43 }
 0x3d0   :  { %3075 = vmatprep.subr.bf16.mxu0 %v2948_v24  ;;  %v2947_v50 = vpack.c.bf16 %v2890_v14, %v2886_v46  ;;  %v2824_v40 = vmul.f32 0.01, %v2760_v6  ;;  %v2626_v47 = vmul.f32 %v9844_v5, %v9694_v20  ;;  %v2755_v62 = vadd.f32 %v9704_v19, %v2627_v33  ;;  %3466 = vperm.xlu1 %7652, %v10155_v52   ;;  %v14064_v46 = vld [vmem:[#allocation66_spill] sm:$0xff] }
 0x3d1   :  { %v2815_v31 = vmul.f32 0.01, %v2751_v58  ;;  %v2753_v16 = vadd.f32 %v9818_v17, %v2625_v26  ;;  %v2757_v42 = vadd.f32 %v9704_v19, %v2629_v9  ;;  %v10250_v22 = vmul.f32 0.01, %v10111_v10  ;;  %3188 = vmatprep.subr.bf16.mxu1 %v2950_v45 }
 0x3d2   :  { %3076 = vmatpush1.bf16.msra.mxu0 %v2947_v50  ;;  %v2888_v41 = vmax.f32 %v2760_v6, %v2824_v40  ;;  %v2754_v30 = vadd.f32 %v9704_v19, %v2626_v47  ;;  %v2878_v57 = vmax.f32 %v10002_v3, %v10024_v21  ;;  %v2819_v39 = vmul.f32 0.01, %v2755_v62  ;;  %v14066_v40 = vld [vmem:[#allocation80_spill] sm:$0xff] }
 0x3d3   :  { %v2879_v63 = vmax.f32 %v2751_v58, %v2815_v31  ;;  %v2817_v36 = vmul.f32 0.01, %v2753_v16  ;;  %v2821_v34 = vmul.f32 0.01, %v2757_v42  ;;  %v2628_v18 = vmul.f32 %v9850_v23, %v9694_v20 }
 0x3d4   :  { %v2949_v17 = vpack.c.bf16 %v2892_v61, %v2888_v41  ;;  %v2818_v60 = vmul.f32 0.01, %v2754_v30  ;;  %v2880_v44 = vmax.f32 %v10005_v11, %v10027_v37  ;;  %v2883_v54 = vmax.f32 %v2755_v62, %v2819_v39  ;;  %3470 = vperm.xlu1 %7652, %v10091_v27   ;;  %v14067_v41 = vld [vmem:[#allocation19_spill] sm:$0xff] }
 0x3d5   :  { %v2881_v48 = vmax.f32 %v2753_v16, %v2817_v36  ;;  %v2885_v14 = vmax.f32 %v2757_v42, %v2821_v34  ;;  %v2615_v25 = vmul.f32 %v9899_v49, %v9719_v51  ;;  %v2756_v21 = vadd.f32 %v9704_v19, %v2628_v18  ;;  %v14071_v36 = vld [vmem:[#allocation37_spill] sm:$0xff] }
 0x3d6   :  { %3189 = vmatpush1.bf16.msra.mxu1 %v2949_v17  ;;  %v2882_v3 = vmax.f32 %v2754_v30, %v2818_v60  ;;  %v2619_v29 = vmul.f32 %v9899_v49, %v9724_v32  ;;  %v2617_v20 = vmul.f32 %v9903_v38, %v9719_v51  ;;  %v2944_v59 = vpack.c.bf16 %v2883_v54, %v2879_v63  ;;  %v14070_v30 = vld [vmem:[#allocation45_spill] sm:$0xff]  ;;  %v14072_v17 = vld [vmem:[#allocation78_spill] sm:$0xff] }
 0x3d7   :  { %v2946_v11 = vpack.c.bf16 %v2885_v14, %v2881_v48  ;;  %v2743_v37 = vadd.f32 %v9739_v0, %v2615_v25  ;;  %v2621_v2 = vmul.f32 %v9903_v38, %v9724_v32  ;;  %v2820_v53 = vmul.f32 0.01, %v2756_v21 }
 0x3d8   :  { %v2943_v35 = vpack.c.bf16 %v2882_v3, %v2878_v57  ;;  %v2747_v61 = vadd.f32 %v9834_v55, %v2619_v29  ;;  %v2745_v56 = vadd.f32 %v9739_v0, %v2617_v20  ;;  %3077 = vmatprep.subr.bf16.mxu0 %v2944_v59  ;;  %v2614_v7 = vmul.f32 %v9844_v5, %v9719_v51  ;;  %v14073_v3 = vld [vmem:[#allocation77_spill] sm:$0xff] }
 0x3d9   :  { %3190 = vmatprep.subr.bf16.mxu1 %v2946_v11  ;;  %v2807_v19 = vmul.f32 0.01, %v2743_v37  ;;  %v2749_v24 = vadd.f32 %v9834_v55, %v2621_v2  ;;  %v2874_v6 = vmax.f32 %v14064_v46, %v10044_v12  ;;  %v2884_v33 = vmax.f32 %v2756_v21, %v2820_v53  ;;  %7653 = vset.pattern.permute.xlu1 %v14036_v13  ;;  %v14065_v55 = vld [vmem:[#allocation20_spill] sm:$0xff]  ;;  %v14069_v13 = vld [vmem:[#allocation58_spill] sm:$0xff]  ;;  %v14076_v2 = vld [vmem:[#allocation49_spill] sm:$0xff] }
 0x3da   :  { %3078 = vmatpush1.bf16.msra.mxu0 %v2943_v35  ;;  %v2811_v32 = vmul.f32 0.01, %v2747_v61  ;;  %v2809_v58 = vmul.f32 0.01, %v2745_v56  ;;  %v2616_v26 = vmul.f32 %v9850_v23, %v9719_v51  ;;  %v2742_v50 = vadd.f32 %v9739_v0, %v2614_v7  ;;  %3020 = vperm.xlu1 %7653, %v10214_v1   ;;  %v14068_v51 = vld [vmem:[#allocation52_spill] sm:$0xff] }
 0x3db   :  { %v2871_v9 = vmax.f32 %v2743_v37, %v2807_v19  ;;  %v2813_v45 = vmul.f32 0.01, %v2749_v24  ;;  %v2876_v47 = vmax.f32 %v14066_v40, %v14065_v55  ;;  %v2945_v5 = vpack.c.bf16 %v2884_v33, %v2880_v44  ;;  %v14074_v21 = vld [vmem:[#allocation76_spill] sm:$0xff]  ;;  %v14075_v37 = vld [vmem:[#allocation53_spill] sm:$0xff]  ;;  %v14078_v19 = vld [vmem:[#allocation83_spill] sm:$0xff] }
 0x3dc   :  { %v2875_v12 = vmax.f32 %v2747_v61, %v2811_v32  ;;  %v2873_v62 = vmax.f32 %v2745_v56, %v2809_v58  ;;  %v2744_v31 = vadd.f32 %v9739_v0, %v2616_v26  ;;  %v2806_v42 = vmul.f32 0.01, %v2742_v50  ;;  %v14079_v33 = vld [vmem:[#allocation56_spill] sm:$0xff]  ;;  %v14080_v32 = vld [vmem:[#allocation27_spill] sm:$0xff]  ;;  %v14081_v26 = vld [vmem:[#allocation61_spill] sm:$0xff] }
 0x3dd   :  { %v2877_v16 = vmax.f32 %v2749_v24, %v2813_v45  ;;  %v2735_v23 = vadd.f32 %v14068_v51, %v14067_v41  ;;  %v2739_v57 = vadd.f32 %v14070_v30, %v14069_v13  ;;  %3191 = vmatpush1.bf16.msra.mxu1 %v2945_v5  ;;  %v2737_v34 = vadd.f32 %v14068_v51, %v14071_v36  ;;  %v14082_v45 = vld [vmem:[#allocation72_spill] sm:$0xff]  ;;  %v14088_v51 = vld [vmem:[#allocation34_spill] sm:$0xff]  ;;  %v14092_v36 = vld [vmem:[#allocation21_spill] sm:$0xff] }
 0x3de   :  { %v2940_v39 = vpack.c.bf16 %v2875_v12, %v2871_v9  ;;  %v2808_v63 = vmul.f32 0.01, %v2744_v31  ;;  %v2741_v60 = vadd.f32 %v14070_v30, %v14072_v17  ;;  %v2870_v44 = vmax.f32 %v2742_v50, %v2806_v42  ;;  %7655 = vset.pattern.permute.xlu1 %v14030_v43  ;;  %v14077_v43 = vld [vmem:[#allocation41_spill] sm:$0xff]  ;;  %v14093_v17 = vld [vmem:[#allocation31_spill] sm:$0xff] }
 0x3df   :  { %v2942_v18 = vpack.c.bf16 %v2877_v16, %v2873_v62  ;;  %v2799_v0 = vmul.f32 0.01, %v2735_v23  ;;  %v2803_v54 = vmul.f32 0.01, %v2739_v57  ;;  %v2801_v14 = vmul.f32 0.01, %v2737_v34  ;;  %3478 = vperm.xlu1 %7655, %v10227_v4  }
 0x3e0   :  { %3079 = vmatprep.subr.bf16.mxu0 %v2940_v39  ;;  %v2872_v48 = vmax.f32 %v2744_v31, %v2808_v63  ;;  %v2805_v25 = vmul.f32 0.01, %v2741_v60  ;;  %v2862_v29 = vmax.f32 %v14074_v21, %v14073_v3  ;;  %v2939_v20 = vpack.c.bf16 %v2874_v6, %v2870_v44  ;;  %v14083_v50 = vld [vmem:[#allocation57_spill] sm:$0xff]  ;;  %v14085_v62 = vld [vmem:[#allocation51_spill] sm:$0xff]  ;;  %v14095_v44 = vld [vmem:[#allocation68_spill] sm:$0xff] }
 0x3e1   :  { %3192 = vmatprep.subr.bf16.mxu1 %v2942_v18  ;;  %v2863_v59 = vmax.f32 %v2735_v23, %v2799_v0  ;;  %v2867_v11 = vmax.f32 %v2739_v57, %v2803_v54  ;;  %v2866_v35 = vmax.f32 %v14076_v2, %v14075_v37  ;;  %v2865_v61 = vmax.f32 %v2737_v34, %v2801_v14  ;;  %v14086_v16 = vld [vmem:[#allocation71_spill] sm:$0xff]  ;;  %v14087_v42 = vld [vmem:[#allocation73_spill] sm:$0xff]  ;;  %v14097_v3 = vld [vmem:[#allocation82_spill] sm:$0xff] }
 0x3e2   :  { %v2941_v53 = vpack.c.bf16 %v2876_v47, %v2872_v48  ;;  %v2869_v56 = vmax.f32 %v2741_v60, %v2805_v25  ;;  %v2864_v24 = vmax.f32 %v14078_v19, %v14077_v43  ;;  %3080 = vmatpush1.bf16.msra.mxu0 %v2939_v20  ;;  %v2868_v58 = vmax.f32 %v14080_v32, %v14079_v33  ;;  %v14084_v47 = vld [vmem:[#allocation79_spill] sm:$0xff]  ;;  %v14090_v39 = vld [vmem:[#allocation65_spill] sm:$0xff]  ;;  %v14094_v60 = vld [vmem:[#allocation46_spill] sm:$0xff] }
 0x3e3   :  { %v2936_v7 = vpack.c.bf16 %v2867_v11, %v2863_v59  ;;  %v2935_v46 = vpack.c.bf16 %v2866_v35, %v2862_v29  ;;  %v2599_v6 = vmul.f32 %v9899_v49, %v14081_v26  ;;  %v2731_v55 = vadd.f32 %v14083_v50, %v14082_v45  ;;  %v14089_v49 = vld [vmem:[#allocation32_spill] sm:$0xff]  ;;  %3482 = vperm.xlu1 %7655, %v14092_v36   ;;  %v14096_v0 = vld [vmem:[#allocation81_spill] sm:$0xff]  ;;  %v14098_v21 = vld [vmem:[#allocation75_spill] sm:$0xff] }
 0x3e4   :  { %3193 = vmatpush1.bf16.msra.mxu1 %v2941_v53  ;;  %v2938_v9 = vpack.c.bf16 %v2869_v56, %v2865_v61  ;;  %v2601_v40 = vmul.f32 %v9903_v38, %v14081_v26  ;;  %v2733_v5 = vadd.f32 %v14083_v50, %v14084_v47  ;;  %v2937_v12 = vpack.c.bf16 %v2868_v58, %v2864_v24  ;;  %v14091_v38 = vld [vmem:[#allocation62_spill] sm:$0xff]  ;;  %v14103_v45 = vld [vmem:[#allocation84_spill] sm:$0xff] }
 0x3e5   :  { %3081 = vmatprep.subr.bf16.mxu0 %v2936_v7  ;;  %v2727_v31 = vadd.f32 %v14085_v62, %v2599_v6  ;;  %v2854_v41 = vmax.f32 %v14087_v42, %v14086_v16  ;;  %v2858_v23 = vmax.f32 %v14089_v49, %v14088_v51  ;;  %v2795_v13 = vmul.f32 0.01, %v2731_v55  ;;  %v14099_v37 = vld [vmem:[#allocation74_spill] sm:$0xff]  ;;  %v14104_v50 = vld [vmem:[#allocation28_spill] sm:$0xff] }
 0x3e6   :  { %3194 = vmatprep.subr.bf16.mxu1 %v2938_v9  ;;  %v2729_v30 = vadd.f32 %v14085_v62, %v2601_v40  ;;  %v2797_v57 = vmul.f32 0.01, %v2733_v5  ;;  %v2856_v63 = vmax.f32 %v14091_v38, %v14090_v39  ;;  %3082 = vmatpush1.bf16.msra.mxu0 %v2935_v46  ;;  %v2860_v18 = vmax.f32 %v14094_v60, %v14093_v17  ;;  %v14100_v56 = vld [vmem:[#allocation38_spill] sm:$0xff]  ;;  %v7776_v49 = vld [vmem:[#allocation2 + $0xc0] sm:$0xff]  }
 0x3e7   :  { %v2791_v34 = vmul.f32 0.01, %v2727_v31  ;;  %v2719_v54 = vadd.f32 %v14096_v0, %v14095_v44  ;;  %v2859_v48 = vmax.f32 %v2731_v55, %v2795_v13  ;;  %v2723_v29 = vadd.f32 %v14098_v21, %v14097_v3  ;;  %v14101_v33 = vld [vmem:[#allocation86_spill] sm:$0xff]  ;;  %v10409_v60 = vld [vmem:[%s13480_s2] sm:$0xff] }
 0x3e8   :  { %3195 = vmatpush1.bf16.msra.mxu1 %v2937_v12  ;;  %v2793_v14 = vmul.f32 0.01, %v2729_v30  ;;  %v2861_v25 = vmax.f32 %v2733_v5, %v2797_v57  ;;  %v2931_v59 = vpack.c.bf16 %v2858_v23, %v2854_v41  ;;  %v2721_v2 = vadd.f32 %v14096_v0, %v14099_v37  ;;  %v14102_v32 = vld [vmem:[#allocation30_spill] sm:$0xff]  ;;  %v14105_v5 = vld [vmem:[#allocation85_spill] sm:$0xff] }
 0x3e9   :  { %v2855_v20 = vmax.f32 %v2727_v31, %v2791_v34  ;;  %v2783_v11 = vmul.f32 0.01, %v2719_v54  ;;  %v2933_v53 = vpack.c.bf16 %v2860_v18, %v2856_v63  ;;  %v2787_v61 = vmul.f32 0.01, %v2723_v29  ;;  %v14106_v12 = vld [vmem:[#allocation33_spill] sm:$0xff]  ;;  %v14108_v13 = vld [vmem:[#allocation70_spill] sm:$0xff] }
 0x3ea   :  { %v2857_v35 = vmax.f32 %v2729_v30, %v2793_v14  ;;  %v2725_v43 = vadd.f32 %v14098_v21, %v14100_v56  ;;  %v8096_v19 = vmov 43   ;;  %v2785_v46 = vmul.f32 0.01, %v2721_v2  ;;  %v7777_v23 = vld [vmem:[#allocation2 + $0xc8] sm:$0xff]   ;;  %v14109_v30 = vld [vmem:[#allocation47_spill] sm:$0xff]  ;;  %v7778_v57 = vld [vmem:[#allocation2 + $0xd0] sm:$0xff]  }
 0x3eb   :  { %7656 = vset.pattern.permute.xlu1 %v8096_v19  ;;  %v2932_v24 = vpack.c.bf16 %v2859_v48, %v2855_v20  ;;  %v2847_v7 = vmax.f32 %v2719_v54, %v2783_v11  ;;  %v2846_v58 = vmax.f32 %v14102_v32, %v14101_v33  ;;  %v2851_v6 = vmax.f32 %v2723_v29, %v2787_v61  ;;  %v7779_v39 = vld [vmem:[#allocation2 + $0xd8] sm:$0xff]   ;;  %v7782_v38 = vld [vmem:[#allocation2 + $0xf0] sm:$0xff]   ;;  %v14115_v34 = vld [vmem:[#allocation48_spill] sm:$0xff] }
 0x3ec   :  { %3670 = vperm.xlu1 %7656, %v10179_v28   ;;  %v2934_v26 = vpack.c.bf16 %v2861_v25, %v2857_v35  ;;  %v2789_v9 = vmul.f32 0.01, %v2725_v43  ;;  %v2850_v55 = vmax.f32 %v14104_v50, %v14103_v45  ;;  %v2849_v40 = vmax.f32 %v2721_v2, %v2785_v46  ;;  %v14114_v63 = vld [vmem:[#allocation42_spill] sm:$0xff]  ;;  %v10415_v18 = vld [vmem:[%s13480_s2 + $0x8] sm:$0xff] }
 0x3ed   :  { %3083 = vmatprep.subr.bf16.mxu0 %v2932_v24  ;;  %v2848_v47 = vmax.f32 %v10111_v10, %v10250_v22  ;;  %v2852_v62 = vmax.f32 %v14106_v12, %v14105_v5  ;;  %v2928_v31 = vpack.c.bf16 %v2851_v6, %v2847_v7  ;;  %v8097_v28 = vmov 2   ;;  %v10402_v17 = vld [vmem:[%s13480_s2 + $0x10] sm:$0xff] }
 0x3ee   :  { %3196 = vmatprep.subr.bf16.mxu1 %v2934_v26  ;;  %3084 = vmatpush1.bf16.msra.mxu0 %v2931_v59  ;;  %v2853_v16 = vmax.f32 %v2725_v43, %v2789_v9  ;;  %v2927_v41 = vpack.c.bf16 %v2850_v55, %v2846_v58  ;;  %v8098_v10 = vmov 10   ;;  %v14107_v22 = vmov 0  }
 0x3ef   :  { %3197 = vmatpush1.bf16.msra.mxu1 %v2933_v53  ;;  %3085 = vmatprep.subr.bf16.mxu0 %v2928_v31  ;;  %v2929_v51 = vpack.c.bf16 %v2852_v62, %v2848_v47 }
 0x3f0   :  { %7658 = vset.pattern.permute.xlu1 %v8097_v28  ;;  %v2930_v42 = vpack.c.bf16 %v2853_v16, %v2849_v40  ;;  %7657 = vset.pattern.permute.xlu0 %v8097_v28 }
 0x3f1   :  { %3786 = vperm.xlu1 %7658, %v10214_v1   ;;  %3782 = vperm.xlu0 %7657, %v14092_v36  }
 0x3f2   :  { %3198 = vmatprep.subr.bf16.mxu1 %v2930_v42  ;;  %3086 = vmatpush1.bf16.msra.mxu0 %v2927_v41 }
 0x3f3   :  { %3199 = vmatpush1.bf16.msra.mxu1 %v2929_v51 }
 0x3f5   :  { %7659 = vset.pattern.permute.xlu1 %v8098_v10  ;;  %3104 = vmatmul.mubr.bf16.vlgmr.msra.gmra.mxu0 %v7776_v49 }
 0x3f6   :  { %3926 = vperm.xlu1 %7659, %v14092_v36   ;;  %3217 = vmatmul.mubr.bf16.vlgmr.msra.gmra.mxu1 %v7776_v49  ;;  %v7783_v36 = vld [vmem:[#allocation2 + $0xf8] sm:$0xff]  }
 0x3f7   :  { %3113 = vmatprep.mubr.bf16.mxu0 %v14107_v22  ;;  %3226 = vmatprep.mubr.bf16.mxu1 %v14107_v22 }
 0x3f8   :  { %3766 = vperm.xlu0 %7657, %v10155_v52  }
 0x3fa   :  { %7660 = vset.pattern.permute.xlu1 %v8097_v28 }
 0x3fb   :  { %3774 = vperm.xlu1 %7660, %v10139_v15  }
 0x3fc   :  { %3750 = vperm.xlu0 %7657, %v14108_v13  }
 0x3fd   :  { %3114 = vmatmul.mubr.bf16.gmra.mxu0 %v7777_v23 }
 0x3fe   :  { %3227 = vmatmul.mubr.bf16.gmra.mxu1 %v7777_v23  ;;  %3123 = vmatprep.mubr.bf16.mxu0 %v14107_v22 }
 0x3ff   :  { %3236 = vmatprep.mubr.bf16.mxu1 %v14107_v22  ;;  %3778 = vperm.xlu1 %7660, %v10227_v4  }
 0x400   :  { %3734 = vperm.xlu0 %7657, %v14109_v30  }
 0x403   :  { %7661 = vset.pattern.permute.xlu1 %v8098_v10 }
 0x404   :  { %3922 = vperm.xlu1 %7661, %v10227_v4   ;;  %7670 = vset.pattern.permute.xlu0 %v8098_v10  ;;  %v14111_v4 = vld [vmem:[#allocation55_spill] sm:$0xff] }
 0x405   :  { %3124 = vmatmul.mubr.bf16.gmra.mxu0 %v7778_v57  ;;  %3930 = vperm.xlu0 %7670, %v10214_v1   ;;  %v7780_v1 = vld [vmem:[#allocation2 + $0xe0] sm:$0xff]  }
 0x406   :  { %3237 = vmatmul.mubr.bf16.gmra.mxu1 %v7778_v57  ;;  %3133 = vmatprep.mubr.bf16.mxu0 %v14107_v22 }
 0x407   :  { %3246 = vmatprep.mubr.bf16.mxu1 %v14107_v22  ;;  %v2965_v44 = vpop.permute.xlu1 %2964  ;;  %v2961_v53 = vpop.permute.xlu0 %2960 }
 0x408   :  { %7662 = vset.pattern.permute.xlu1 %v8097_v28 }
 0x409   :  { %3770 = vperm.xlu1 %7662, %v10091_v27   ;;  %3918 = vperm.xlu0 %7670, %v10139_v15   ;;  %v14110_v15 = vld [vmem:[#allocation59_spill] sm:$0xff] }
 0x40b   :  { %v10420_v0 = vpop.permute.xlu1 %2968  ;;  %v10450_v56 = vpop.permute.xlu0 %2972 }
 0x40d   :  { %3134 = vmatmul.mubr.bf16.gmra.mxu0 %v7779_v39  ;;  %7663 = vset.pattern.permute.xlu1 %v8098_v10 }
 0x40e   :  { %3247 = vmatmul.mubr.bf16.gmra.mxu1 %v7779_v39  ;;  %3143 = vmatprep.mubr.bf16.mxu0 %v14107_v22 }
 0x40f   :  { %3256 = vmatprep.mubr.bf16.mxu1 %v14107_v22  ;;  %3910 = vperm.xlu1 %7663, %v10155_v52   ;;  %v7781_v52 = vld [vmem:[#allocation2 + $0xe8] sm:$0xff]   ;;  %v10422_v54 = vpop.permute.xlu1 %2976 }
 0x410   :  { %3914 = vperm.xlu0 %7670, %v10091_v27   ;;  %v14112_v27 = vld [vmem:[#allocation50_spill] sm:$0xff]  ;;  %v10454_v19 = vpop.permute.xlu0 %3426 }
 0x413   :  { %7664 = vset.pattern.permute.xlu1 %v8097_v28 }
 0x414   :  { %3758 = vperm.xlu1 %7664, %v10034_v8   ;;  %3902 = vperm.xlu0 %7670, %v10034_v8   ;;  %v14113_v8 = vld [vmem:[#allocation29_spill] sm:$0xff]  ;;  %v10424_v48 = vpop.permute.xlu1 %3430  ;;  %v10458_v46 = vpop.permute.xlu0 %3434 }
 0x415   :  { %3144 = vmatmul.mubr.bf16.gmra.mxu0 %v7780_v1 }
 0x416   :  { %3257 = vmatmul.mubr.bf16.gmra.mxu1 %v7780_v1  ;;  %3153 = vmatprep.mubr.bf16.mxu0 %v14107_v22 }
 0x417   :  { %3266 = vmatprep.mubr.bf16.mxu1 %v14107_v22 }
 0x418   :  { %3762 = vperm.xlu1 %7664, %v14110_v15   ;;  %3898 = vperm.xlu0 %7670, %v14111_v4   ;;  %v10462_v42 = vpop.permute.xlu0 %3438 }
 0x419   :  { %v10426_v14 = vpop.permute.xlu1 %2980 }
 0x41c   :  { %7665 = vset.pattern.permute.xlu1 %v8098_v10  ;;  %3886 = vperm.xlu0 %7670, %v14112_v27  }
 0x41d   :  { %3154 = vmatmul.mubr.bf16.gmra.mxu0 %v7781_v52  ;;  %3906 = vperm.xlu1 %7665, %v14110_v15   ;;  %v10428_v25 = vpop.permute.xlu1 %2984 }
 0x41e   :  { %3267 = vmatmul.mubr.bf16.gmra.mxu1 %v7781_v52  ;;  %3163 = vmatprep.mubr.bf16.mxu0 %v14107_v22 }
 0x41f   :  { %3276 = vmatprep.mubr.bf16.mxu1 %v14107_v22 }
 0x420   :  { %3882 = vperm.xlu0 %7670, %v14113_v8  }
 0x421   :  { %7666 = vset.pattern.permute.xlu1 %v8097_v28  ;;  %v10430_v3 = vpop.permute.xlu1 %2988 }
 0x422   :  { %3754 = vperm.xlu1 %7666, %v14111_v4  }
 0x424   :  { %3870 = vperm.xlu0 %7670, %v14114_v63  }
 0x425   :  { %3164 = vmatmul.mubr.bf16.gmra.mxu0 %v7782_v38 }
 0x426   :  { %3277 = vmatmul.mubr.bf16.gmra.mxu1 %v7782_v38  ;;  %3173 = vmatprep.mubr.bf16.mxu0 %v14107_v22 }
 0x427   :  { %3286 = vmatprep.mubr.bf16.mxu1 %v14107_v22  ;;  %7667 = vset.pattern.permute.xlu1 %v8098_v10  ;;  %v10432_v21 = vpop.permute.xlu1 %3446 }
 0x428   :  { %3894 = vperm.xlu1 %7667, %v14108_v13  }
 0x42b   :  { %v10434_v29 = vpop.permute.xlu1 %3454 }
 0x42c   :  { %7668 = vset.pattern.permute.xlu1 %v8097_v28 }
 0x42d   :  { %3174 = vmatmul.mubr.bf16.gmra.mxu0 %v7783_v36  ;;  %3742 = vperm.xlu1 %7668, %v14112_v27  }
 0x42e   :  { %3287 = vmatmul.mubr.bf16.gmra.mxu1 %v7783_v36  ;;  %4318 = vmatprep.mubr.bf16.mxu0 %v14107_v22 }
 0x42f   :  { %4431 = vmatprep.mubr.bf16.mxu1 %v14107_v22 }
 0x430   :  { %v10436_v20 = vpop.permute.xlu1 %2996 }
 0x431   :  { %3746 = vperm.xlu1 %7668, %v14115_v34  }
 0x435   :  { %7669 = vset.pattern.permute.xlu1 %v8098_v10  ;;  %v10438_v59 = vpop.permute.xlu1 %3000 }
 0x436   :  { %3890 = vperm.xlu1 %7669, %v14115_v34  }
 0x43a   :  { %7671 = vset.pattern.permute.xlu1 %v8097_v28 }
 0x43b   :  { %3738 = vperm.xlu1 %7671, %v14113_v8  }
 0x43c   :  { %v10440_v11 = vpop.permute.xlu1 %3658 }
 0x43f   :  { %7672 = vset.pattern.permute.xlu1 %v8098_v10 }
 0x440   :  { %3878 = vperm.xlu1 %7672, %v10402_v17  }
 0x441   :  { %v10442_v37 = vpop.permute.xlu1 %3458 }
 0x444   :  { %7673 = vset.pattern.permute.xlu1 %v8097_v28 }
 0x445   :  { %3726 = vperm.xlu1 %7673, %v10409_v60  }
 0x446   :  { %v10444_v2 = vpop.permute.xlu1 %3012 }
 0x449   :  { %3730 = vperm.xlu1 %7673, %v10415_v18  }
 0x44b   :  { %v10446_v35 = vpop.permute.xlu1 %3466 }
 0x44d   :  { %7674 = vset.pattern.permute.xlu1 %v8098_v10 }
 0x44e   :  { %3874 = vperm.xlu1 %7674, %v10415_v18  }
 0x44f   :  { %v10448_v61 = vpop.permute.xlu1 %3470 }
 0x455   :  { %v10452_v43 = vpop.permute.xlu1 %3020 }
 0x45a   :  { %v10456_v24 = vpop.permute.xlu1 %3478 }
 0x45e   :  { %v10460_v45 = vpop.permute.xlu1 %3482 }
 0x467   :  { %v10465_v27 = vpop.permute.xlu1 %3670 }
 0x4b5   :  { %v3105_v7 = vpop.f32.mrf.mxu0 }
 0x4b6   :  { %v3106_v33 = vadd.f32 %v3105_v7, %v2961_v53  ;;  %v3218_v32 = vpop.f32.mrf.mxu1 }
 0x4b7   :  { %v3219_v58 = vadd.f32 %v3218_v32, %v2961_v53  ;;  %v3107_v26 = vpop.f32.mrf.mxu0 }
 0x4b8   :  { %v3108_v6 = vadd.f32 %v3107_v26, %v2961_v53  ;;  %v3220_v9 = vpop.f32.mrf.mxu1  ;;  %v3297_v50 = vmul.f32 0.01, %v3106_v33 }
 0x4b9   :  { %v3299_v55 = vmul.f32 0.01, %v3219_v58  ;;  %v3221_v40 = vadd.f32 %v3220_v9, %v2961_v53  ;;  %v3109_v47 = vpop.f32.mrf.mxu0 }
 0x4ba   :  { %v3298_v5 = vmul.f32 0.01, %v3108_v6  ;;  %v3110_v12 = vadd.f32 %v3109_v47, %v2965_v44  ;;  %v3222_v62 = vpop.f32.mrf.mxu1  ;;  %v3361_v10 = vmax.f32 %v3106_v33, %v3297_v50  ;;  %v10472_v50 = vpop.permute.xlu0 %3442 }
 0x4bb   :  { %v3300_v31 = vmul.f32 0.01, %v3221_v40  ;;  %v3223_v16 = vadd.f32 %v3222_v62, %v2965_v44  ;;  %v3111_v28 = vpop.f32.mrf.mxu0  ;;  %v3363_v23 = vmax.f32 %v3219_v58, %v3299_v55 }
 0x4bc   :  { %v3301_v41 = vmul.f32 0.01, %v3110_v12  ;;  %v3112_v51 = vadd.f32 %v3111_v28, %v2965_v44  ;;  %v3224_v49 = vpop.f32.mrf.mxu1  ;;  %v3362_v39 = vmax.f32 %v3108_v6, %v3298_v5 }
 0x4bd   :  { %v3303_v13 = vmul.f32 0.01, %v3223_v16  ;;  %v3225_v30 = vadd.f32 %v3224_v49, %v2965_v44  ;;  %v3115_v57 = vpop.f32.mrf.mxu0  ;;  %v3364_v8 = vmax.f32 %v3221_v40, %v3300_v31  ;;  %v3489_v40 = vmul.f32 %v10454_v19, %v3361_v10 }
 0x4be   :  { %v3365_v1 = vmax.f32 %v3110_v12, %v3301_v41  ;;  %v3302_v15 = vmul.f32 0.01, %v3112_v51  ;;  %v3116_v4 = vadd.f32 %v3115_v57, %v10420_v0  ;;  %v3228_v52 = vpop.f32.mrf.mxu1  ;;  %v3491_v31 = vmul.f32 %v10454_v19, %v3363_v23  ;;  %v10481_v57 = vpop.permute.xlu1 %3786 }
 0x4bf   :  { %v3367_v38 = vmax.f32 %v3223_v16, %v3303_v13  ;;  %v3304_v63 = vmul.f32 0.01, %v3225_v30  ;;  %v3229_v36 = vadd.f32 %v3228_v52, %v10420_v0  ;;  %v3117_v34 = vpop.f32.mrf.mxu0  ;;  %v3490_v49 = vmul.f32 %v10454_v19, %v3362_v39 }
 0x4c0   :  { %v3493_v53 = vmul.f32 %v10424_v48, %v3365_v1  ;;  %v3366_v7 = vmax.f32 %v3112_v51, %v3302_v15  ;;  %v3305_v33 = vmul.f32 0.01, %v3116_v4  ;;  %v3118_v44 = vadd.f32 %v3117_v34, %v10420_v0  ;;  %v3230_v32 = vpop.f32.mrf.mxu1 }
 0x4c1   :  { %v3495_v58 = vmul.f32 %v10424_v48, %v3367_v38  ;;  %v3368_v26 = vmax.f32 %v3225_v30, %v3304_v63  ;;  %v3307_v6 = vmul.f32 0.01, %v3229_v36  ;;  %v3231_v9 = vadd.f32 %v3230_v32, %v10420_v0  ;;  %v3119_v55 = vpop.f32.mrf.mxu0 }
 0x4c2   :  { %v3494_v47 = vmul.f32 %v10424_v48, %v3366_v7  ;;  %v3369_v5 = vmax.f32 %v3116_v4, %v3305_v33  ;;  %v3306_v12 = vmul.f32 0.01, %v3118_v44  ;;  %v3232_v62 = vpop.f32.mrf.mxu1  ;;  %v3492_v0 = vmul.f32 %v10454_v19, %v3364_v8  ;;  %v10488_v33 = vpop.permute.xlu0 %3450 }
 0x4c3   :  { %v3496_v16 = vmul.f32 %v10424_v48, %v3368_v26  ;;  %v3371_v28 = vmax.f32 %v3229_v36, %v3307_v6  ;;  %v3308_v41 = vmul.f32 0.01, %v3231_v9  ;;  %v3121_v51 = vpop.f32.mrf.mxu0  ;;  %v3120_v30 = vadd.f32 %v3119_v55, %v10450_v56 }
 0x4c4   :  { %v3370_v13 = vmax.f32 %v3118_v44, %v3306_v12  ;;  %v3234_v10 = vpop.f32.mrf.mxu1  ;;  %v3553_v1 = vadd.f32 %v3493_v53, %v3489_v40  ;;  %v3579_v15 = vadd.f32 %v3495_v58, %v3491_v31  ;;  %v3233_v23 = vadd.f32 %v3232_v62, %v10450_v56 }
 0x4c5   :  { %v3372_v4 = vmax.f32 %v3231_v9, %v3308_v41  ;;  %v3125_v52 = vpop.f32.mrf.mxu0  ;;  %v3566_v48 = vadd.f32 %v3494_v47, %v3490_v49  ;;  %v3497_v38 = vmul.f32 %v10458_v46, %v3369_v5  ;;  %v3309_v63 = vmul.f32 0.01, %v3120_v30 }
 0x4c6   :  { %v3122_v39 = vadd.f32 %v3121_v51, %v10450_v56  ;;  %v3238_v36 = vpop.f32.mrf.mxu1  ;;  %v3592_v19 = vadd.f32 %v3496_v16, %v3492_v0  ;;  %v3499_v8 = vmul.f32 %v10458_v46, %v3371_v28  ;;  %v3311_v34 = vmul.f32 0.01, %v3233_v23  ;;  %v10496_v28 = vpop.permute.xlu1 %3926 }
 0x4c7   :  { %v3235_v7 = vadd.f32 %v3234_v10, %v10450_v56  ;;  %v3127_v53 = vpop.f32.mrf.mxu0  ;;  %v3498_v44 = vmul.f32 %v10458_v46, %v3370_v13  ;;  %v3373_v32 = vmax.f32 %v3120_v30, %v3309_v63  ;;  %v3126_v26 = vadd.f32 %v3125_v52, %v10422_v54 }
 0x4c8   :  { %v3310_v58 = vmul.f32 0.01, %v3122_v39  ;;  %v3240_v6 = vpop.f32.mrf.mxu1  ;;  %v3500_v9 = vmul.f32 %v10458_v46, %v3372_v4  ;;  %v3375_v55 = vmax.f32 %v3233_v23, %v3311_v34  ;;  %v3239_v47 = vadd.f32 %v3238_v36, %v10422_v54  ;;  %v10502_v34 = vpop.permute.xlu0 %3462 }
 0x4c9   :  { %v3312_v40 = vmul.f32 0.01, %v3235_v7  ;;  %v3129_v5 = vpop.f32.mrf.mxu0  ;;  %v3501_v12 = vmul.f32 %v10462_v42, %v3373_v32  ;;  %v3313_v62 = vmul.f32 0.01, %v3126_v26  ;;  %v3128_v31 = vadd.f32 %v3127_v53, %v10422_v54 }
 0x4ca   :  { %v3374_v56 = vmax.f32 %v3122_v39, %v3310_v58  ;;  %v3242_v16 = vpop.f32.mrf.mxu1  ;;  %v3503_v41 = vmul.f32 %v10462_v42, %v3375_v55  ;;  %v3315_v49 = vmul.f32 0.01, %v3239_v47  ;;  %v3241_v46 = vadd.f32 %v3240_v6, %v10422_v54 }
 0x4cb   :  { %v3376_v51 = vmax.f32 %v3235_v7, %v3312_v40  ;;  %v3131_v0 = vpop.f32.mrf.mxu0  ;;  %v3554_v13 = vadd.f32 %v3553_v1, %v3497_v38  ;;  %v3377_v10 = vmax.f32 %v3126_v26, %v3313_v62  ;;  %v3314_v4 = vmul.f32 0.01, %v3128_v31 }
 0x4cc   :  { %v3502_v30 = vmul.f32 %v10462_v42, %v3374_v56  ;;  %v3244_v23 = vpop.f32.mrf.mxu1  ;;  %v3580_v52 = vadd.f32 %v3579_v15, %v3499_v8  ;;  %v3379_v39 = vmax.f32 %v3239_v47, %v3315_v49  ;;  %v3316_v36 = vmul.f32 0.01, %v3241_v46  ;;  %v10508_v56 = vpop.permute.xlu1 %3774 }
 0x4cd   :  { %v3504_v63 = vmul.f32 %v10462_v42, %v3376_v51  ;;  %v3135_v53 = vpop.f32.mrf.mxu0  ;;  %v3567_v32 = vadd.f32 %v3566_v48, %v3498_v44  ;;  %v3593_v7 = vadd.f32 %v3592_v19, %v3500_v9  ;;  %v3378_v58 = vmax.f32 %v3128_v31, %v3314_v4 }
 0x4ce   :  { %v3130_v54 = vadd.f32 %v3129_v5, %v10426_v14  ;;  %v3248_v6 = vpop.f32.mrf.mxu1  ;;  %v3555_v1 = vadd.f32 %v3554_v13, %v3501_v12  ;;  %v3581_v38 = vadd.f32 %v3580_v52, %v3503_v41  ;;  %v3380_v55 = vmax.f32 %v3241_v46, %v3316_v36  ;;  %v10512_v12 = vpop.permute.xlu0 %2992 }
 0x4cf   :  { %v3243_v26 = vadd.f32 %v3242_v16, %v10426_v14  ;;  %v3137_v40 = vpop.f32.mrf.mxu0  ;;  %v3568_v15 = vadd.f32 %v3567_v32, %v3502_v30  ;;  %v3505_v42 = vmul.f32 %v10472_v50, %v3377_v10  ;;  %v3132_v47 = vadd.f32 %v3131_v0, %v10426_v14 }
 0x4d0   :  { %v3317_v8 = vmul.f32 0.01, %v3130_v54  ;;  %v3250_v48 = vpop.f32.mrf.mxu1  ;;  %v3594_v19 = vadd.f32 %v3593_v7, %v3504_v63  ;;  %v3507_v44 = vmul.f32 %v10472_v50, %v3379_v39  ;;  %v3245_v5 = vadd.f32 %v3244_v23, %v10426_v14 }
 0x4d1   :  { %v3319_v9 = vmul.f32 0.01, %v3243_v26  ;;  %v3139_v62 = vpop.f32.mrf.mxu0  ;;  %v3506_v31 = vmul.f32 %v10472_v50, %v3378_v58  ;;  %v3318_v41 = vmul.f32 0.01, %v3132_v47  ;;  %v3136_v51 = vadd.f32 %v3135_v53, %v10428_v25 }
 0x4d2   :  { %v3381_v16 = vmax.f32 %v3130_v54, %v3317_v8  ;;  %v3252_v49 = vpop.f32.mrf.mxu1  ;;  %v3508_v46 = vmul.f32 %v10472_v50, %v3380_v55  ;;  %v3320_v13 = vmul.f32 0.01, %v3245_v5  ;;  %v3249_v30 = vadd.f32 %v3248_v6, %v10428_v25  ;;  %v10522_v6 = vpop.permute.xlu1 %3778 }
 0x4d3   :  { %v3383_v0 = vmax.f32 %v3243_v26, %v3319_v9  ;;  %v3141_v10 = vpop.f32.mrf.mxu0  ;;  %v3382_v14 = vmax.f32 %v3132_v47, %v3318_v41  ;;  %v3321_v23 = vmul.f32 0.01, %v3136_v51  ;;  %v3138_v52 = vadd.f32 %v3137_v40, %v10428_v25  ;;  %14116 = vst [vmem:[#allocation22_spill] sm:$0xff] %v10522_v6 }
 0x4d4   :  { %v3509_v4 = vmul.f32 %v10432_v21, %v3381_v16  ;;  %v3254_v63 = vpop.f32.mrf.mxu1  ;;  %v3384_v36 = vmax.f32 %v3245_v5, %v3320_v13  ;;  %v3323_v32 = vmul.f32 0.01, %v3249_v30  ;;  %v3251_v53 = vadd.f32 %v3250_v48, %v10428_v25  ;;  %v10526_v16 = vpop.permute.xlu0 %3004 }
 0x4d5   :  { %v3511_v39 = vmul.f32 %v10432_v21, %v3383_v0  ;;  %v3145_v7 = vpop.f32.mrf.mxu0  ;;  %v3556_v50 = vadd.f32 %v3555_v1, %v3505_v42  ;;  %v3582_v58 = vadd.f32 %v3581_v38, %v3507_v44  ;;  %v3385_v54 = vmax.f32 %v3136_v51, %v3321_v23 }
 0x4d6   :  { %v3322_v55 = vmul.f32 0.01, %v3138_v52  ;;  %v3258_v26 = vpop.f32.mrf.mxu1  ;;  %v3510_v8 = vmul.f32 %v10432_v21, %v3382_v14  ;;  %v3512_v47 = vmul.f32 %v10432_v21, %v3384_v36  ;;  %v3387_v40 = vmax.f32 %v3249_v30, %v3323_v32  ;;  %v10538_v32 = vpop.permute.xlu1 %3922 }
 0x4d7   :  { %v3324_v9 = vmul.f32 0.01, %v3251_v53  ;;  %v3147_v5 = vpop.f32.mrf.mxu0  ;;  %v3569_v41 = vadd.f32 %v3568_v15, %v3506_v31  ;;  %v3595_v0 = vadd.f32 %v3594_v19, %v3508_v46  ;;  %v3140_v1 = vadd.f32 %v3139_v62, %v10430_v3  ;;  %14117 = vst [vmem:[#allocation60_spill] sm:$0xff] %v10538_v32 }
 0x4d8   :  { %v3386_v25 = vmax.f32 %v3138_v52, %v3322_v55  ;;  %v3260_v38 = vpop.f32.mrf.mxu1  ;;  %v3557_v42 = vadd.f32 %v3556_v50, %v3509_v4  ;;  %v3583_v48 = vadd.f32 %v3582_v58, %v3511_v39  ;;  %v3253_v51 = vadd.f32 %v3252_v49, %v10430_v3  ;;  %v10544_v55 = vpop.permute.xlu0 %3008 }
 0x4d9   :  { %v3388_v44 = vmax.f32 %v3251_v53, %v3324_v9  ;;  %v3149_v13 = vpop.f32.mrf.mxu0  ;;  %v3513_v14 = vmul.f32 %v10488_v33, %v3385_v54  ;;  %v3515_v21 = vmul.f32 %v10488_v33, %v3387_v40  ;;  %v3325_v30 = vmul.f32 0.01, %v3140_v1 }
 0x4da   :  { %v3142_v23 = vadd.f32 %v3141_v10, %v10430_v3  ;;  %v3262_v36 = vpop.f32.mrf.mxu1  ;;  %v3570_v15 = vadd.f32 %v3569_v41, %v3510_v8  ;;  %v3596_v19 = vadd.f32 %v3595_v0, %v3512_v47  ;;  %v3327_v31 = vmul.f32 0.01, %v3253_v51 }
 0x4db   :  { %v3255_v62 = vadd.f32 %v3254_v63, %v10430_v3  ;;  %v3151_v46 = vpop.f32.mrf.mxu0  ;;  %v3514_v4 = vmul.f32 %v10488_v33, %v3386_v25  ;;  %v3389_v52 = vmax.f32 %v3140_v1, %v3325_v30  ;;  %v10536_v49 = vadd.f32 %v3145_v7, %v10512_v12 }
 0x4dc   :  { %v3326_v39 = vmul.f32 0.01, %v3142_v23  ;;  %v3264_v53 = vpop.f32.mrf.mxu1  ;;  %v3516_v50 = vmul.f32 %v10488_v33, %v3388_v44  ;;  %v3391_v10 = vmax.f32 %v3253_v51, %v3327_v31  ;;  %v10542_v54 = vadd.f32 %v3258_v26, %v10512_v12 }
 0x4dd   :  { %v3328_v58 = vmul.f32 0.01, %v3255_v62  ;;  %v10546_v3 = vpop.f32.mrf.mxu0  ;;  %v3558_v63 = vadd.f32 %v3557_v42, %v3513_v14  ;;  %v3584_v8 = vadd.f32 %v3583_v48, %v3515_v21  ;;  %v3517_v47 = vmul.f32 %v10434_v29, %v3389_v52 }
 0x4de   :  { %v3390_v7 = vmax.f32 %v3142_v23, %v3326_v39  ;;  %v10549_v40 = vpop.f32.mrf.mxu1  ;;  %v3519_v9 = vmul.f32 %v10434_v29, %v3391_v10  ;;  %v3329_v33 = vmul.f32 0.01, %v10536_v49  ;;  %v10554_v0 = vadd.f32 %v3147_v5, %v10512_v12  ;;  %v10564_v5 = vpop.permute.xlu1 %3770 }
 0x4df   :  { %v3392_v41 = vmax.f32 %v3255_v62, %v3328_v58  ;;  %v10556_v26 = vpop.f32.mrf.mxu0  ;;  %v3571_v25 = vadd.f32 %v3570_v15, %v3514_v4  ;;  %v3559_v1 = vadd.f32 %v3558_v63, %v3517_v47  ;;  %v3331_v48 = vmul.f32 0.01, %v10542_v54  ;;  %v10568_v39 = vpop.permute.xlu0 %3016 }
 0x4e0   :  { %v3518_v42 = vmul.f32 %v10434_v29, %v3390_v7  ;;  %v3597_v44 = vadd.f32 %v3596_v19, %v3516_v50  ;;  %v3585_v51 = vadd.f32 %v3584_v8, %v3519_v9  ;;  %v3261_v21 = vadd.f32 %v3260_v38, %v10512_v12  ;;  %v10562_v30 = vpop.f32.mrf.mxu1 }
 0x4e1   :  { %v3520_v14 = vmul.f32 %v10434_v29, %v3392_v41  ;;  %v3560_v23 = vrot.slane %v3559_v1, 4  ;;  %v3393_v15 = vmax.f32 %v10536_v49, %v3329_v33  ;;  %v3330_v4 = vmul.f32 0.01, %v10554_v0  ;;  %v10570_v19 = vpop.f32.mrf.mxu0 }
 0x4e2   :  { %v3572_v31 = vadd.f32 %v3571_v25, %v3518_v42  ;;  %v3586_v62 = vrot.slane %v3585_v51, 4  ;;  %v3395_v12 = vmax.f32 %v10542_v54, %v3331_v48  ;;  %v3150_v38 = vadd.f32 %v3149_v13, %v10436_v20  ;;  %v10575_v47 = vpop.f32.mrf.mxu1 }
 0x4e3   :  { %v3598_v52 = vadd.f32 %v3597_v44, %v3520_v14  ;;  %v3561_v50 = vadd.f32 %v3560_v23, %v3559_v1  ;;  %v3332_v63 = vmul.f32 0.01, %v3261_v21  ;;  %v3263_v8 = vadd.f32 %v3262_v36, %v10436_v20  ;;  %v3161_v54 = vpop.f32.mrf.mxu0  ;;  %v10579_v14 = vpop.permute.xlu1 %3910 }
 0x4e4   :  { %v3573_v29 = vrot.slane %v3572_v31, 4  ;;  %v3587_v10 = vadd.f32 %v3586_v62, %v3585_v51  ;;  %v3333_v9 = vmul.f32 0.01, %v3150_v38  ;;  %v3152_v41 = vadd.f32 %v3151_v46, %v10436_v20  ;;  %14118 = vst [vmem:[#allocation66_spill] sm:$0xff] %v10579_v14 }
 0x4e5   :  { %v3599_v58 = vrot.slane %v3598_v52, 4  ;;  %v3562_v49 = vrot.slane %v3561_v50, 2  ;;  %v3335_v1 = vmul.f32 0.01, %v3263_v8  ;;  %v3265_v42 = vadd.f32 %v3264_v53, %v10436_v20 }
 0x4e6   :  { %v3574_v7 = vadd.f32 %v3573_v29, %v3572_v31  ;;  %v3588_v33 = vrot.slane %v3587_v10, 2  ;;  %v3397_v44 = vmax.f32 %v3150_v38, %v3333_v9  ;;  %v3334_v51 = vmul.f32 0.01, %v3152_v41  ;;  %v10581_v31 = vpop.permute.xlu0 %3474  ;;  %v3274_v29 = vpop.f32.mrf.mxu1 }
 0x4e7   :  { %v3600_v25 = vadd.f32 %v3599_v58, %v3598_v52  ;;  %v3563_v48 = vadd.f32 %v3562_v49, %v3561_v50  ;;  %v3399_v62 = vmax.f32 %v3263_v8, %v3335_v1  ;;  %v3336_v22 = vmul.f32 0.01, %v3265_v42  ;;  %v3165_v49 = vpop.f32.mrf.mxu0 }
 0x4e8   :  { %v3575_v13 = vrot.slane %v3574_v7, 2  ;;  %v3589_v36 = vadd.f32 %v3588_v33, %v3587_v10  ;;  %v3394_v52 = vmax.f32 %v10554_v0, %v3330_v4  ;;  %v3396_v58 = vmax.f32 %v3261_v21, %v3332_v63 }
 0x4e9   :  { %v3601_v23 = vrot.slane %v3600_v25, 2  ;;  %v3564_v46 = vrot.slane %v3563_v48, 1  ;;  %v3525_v50 = vmul.f32 %v10502_v34, %v3397_v44  ;;  %v3398_v38 = vmax.f32 %v3152_v41, %v3334_v51  ;;  %v10593_v41 = vpop.permute.xlu1 %3758 }
 0x4ea   :  { %v3576_v32 = vadd.f32 %v3575_v13, %v3574_v7  ;;  %v3590_v20 = vrot.slane %v3589_v36, 1  ;;  %v3521_v10 = vmul.f32 %v10442_v37, %v3393_v15  ;;  %v3527_v8 = vmul.f32 %v10502_v34, %v3399_v62  ;;  %v3278_v13 = vpop.f32.mrf.mxu1 }
 0x4eb   :  { %v3602_v53 = vadd.f32 %v3601_v23, %v3600_v25  ;;  %v3565_v9 = vadd.f32 %v3564_v46, %v3563_v48  ;;  %v3523_v6 = vmul.f32 %v10442_v37, %v3395_v12  ;;  %v3400_v7 = vmax.f32 %v3265_v42, %v3336_v22  ;;  %v10598_v22 = vpop.permute.xlu0 %3486  ;;  %v3167_v42 = vpop.f32.mrf.mxu0 }
 0x4ec   :  { %v3577_v14 = vrot.slane %v3576_v32, 1  ;;  %v3591_v33 = vadd.f32 %v3590_v20, %v3589_v36  ;;  %v3522_v21 = vmul.f32 %v10442_v37, %v3394_v52  ;;  %v3524_v4 = vmul.f32 %v10442_v37, %v3396_v58  ;;  %v3280_v62 = vpop.f32.mrf.mxu1 }
 0x4ed   :  { %v3603_v1 = vrot.slane %v3602_v53, 1  ;;  %v3661_v0 = vadd.f32 %v10440_v11, %v3565_v9  ;;  %v3156_v63 = vadd.f32 %v10546_v3, %v10438_v59  ;;  %v3605_v25 = vadd.f32 %v3525_v50, %v3521_v10 }
 0x4ee   :  { %v3578_v15 = vadd.f32 %v3577_v14, %v3576_v32  ;;  %v3526_v48 = vmul.f32 %v10502_v34, %v3398_v38  ;;  %v3269_v12 = vadd.f32 %v10549_v40, %v10438_v59  ;;  %v3631_v51 = vadd.f32 %v3527_v8, %v3523_v6 }
 0x4ef   :  { %v3604_v44 = vadd.f32 %v3603_v1, %v3602_v53  ;;  %v3337_v36 = vmul.f32 0.01, %v3156_v63  ;;  %v3158_v37 = vadd.f32 %v10556_v26, %v10438_v59  ;;  %v3663_v3 = vadd.f32 %v10440_v11, %v3591_v33  ;;  %v3169_v53 = vpop.f32.mrf.mxu0  ;;  %v10618_v33 = vpop.permute.xlu0 %3782 }
 0x4f0   :  { %v3528_v23 = vmul.f32 %v10502_v34, %v3400_v7  ;;  %v3339_v32 = vmul.f32 0.01, %v3269_v12  ;;  %v3271_v14 = vadd.f32 %v10562_v30, %v10438_v59  ;;  %7848 = vtanh.f32 %v3661_v0  ;;  %v10613_v30 = vpop.permute.xlu1 %3762  ;;  %v3282_v1 = vpop.f32.mrf.mxu1 }
 0x4f1   :  { %v3401_v40 = vmax.f32 %v3156_v63, %v3337_v36  ;;  %v3338_v46 = vmul.f32 0.01, %v3158_v37  ;;  %v3160_v52 = vadd.f32 %v10570_v19, %v10526_v16  ;;  %v3662_v6 = vadd.f32 %v10440_v11, %v3578_v15  ;;  %v3171_v15 = vpop.f32.mrf.mxu0 }
 0x4f2   :  { %v3403_v58 = vmax.f32 %v3269_v12, %v3339_v32  ;;  %v3340_v20 = vmul.f32 0.01, %v3271_v14  ;;  %v3273_v26 = vadd.f32 %v10575_v47, %v10526_v16  ;;  %v3664_v34 = vadd.f32 %v10440_v11, %v3604_v44 }
 0x4f3   :  { %v3402_v50 = vmax.f32 %v3158_v37, %v3338_v46  ;;  %v3341_v38 = vmul.f32 0.01, %v3160_v52  ;;  %v3162_v59 = vadd.f32 %v3161_v54, %v10526_v16  ;;  %v3529_v9 = vmul.f32 %v10446_v35, %v3401_v40 }
 0x4f4   :  { %v3531_v19 = vmul.f32 %v10446_v35, %v3403_v58  ;;  %v3343_v10 = vmul.f32 0.01, %v3273_v26  ;;  %v3275_v8 = vadd.f32 %v3274_v29, %v10526_v16  ;;  %7850 = vtanh.f32 %v3663_v3  ;;  %v3284_v3 = vpop.f32.mrf.mxu1  ;;  %v10625_v46 = vpop.permute.xlu1 %3906 }
 0x4f5   :  { %v3618_v47 = vadd.f32 %v3526_v48, %v3522_v21  ;;  %v3404_v7 = vmax.f32 %v3271_v14, %v3340_v20  ;;  %v3342_v11 = vmul.f32 0.01, %v3162_v59  ;;  %7852 = vtanh.f32 %v3662_v6 }
 0x4f6   :  { %v3530_v0 = vmul.f32 %v10446_v35, %v3402_v50  ;;  %v3405_v54 = vmax.f32 %v3160_v52, %v3341_v38  ;;  %v3344_v63 = vmul.f32 0.01, %v3275_v8  ;;  %7854 = vtanh.f32 %v3664_v34  ;;  %v3288_v50 = vpop.f32.mrf.mxu1 }
 0x4f7   :  { %v3644_v12 = vadd.f32 %v3528_v23, %v3524_v4  ;;  %v3407_v44 = vmax.f32 %v3273_v26, %v3343_v10  ;;  %v3166_v36 = vadd.f32 %v3165_v49, %v10544_v55  ;;  %v3606_v37 = vadd.f32 %v3605_v25, %v3529_v9  ;;  %v10629_v25 = vpop.permute.xlu0 %3766 }
 0x4f8   :  { %v3632_v16 = vadd.f32 %v3631_v51, %v3531_v19  ;;  %v3406_v29 = vmax.f32 %v3162_v59, %v3342_v11  ;;  %v3279_v32 = vadd.f32 %v3278_v13, %v10544_v55  ;;  %v3532_v21 = vmul.f32 %v10446_v35, %v3404_v7  ;;  %v3175_v51 = vpop.f32.mrf.mxu0 }
 0x4f9   :  { %v3408_v48 = vmax.f32 %v3275_v8, %v3344_v63  ;;  %v3345_v14 = vmul.f32 0.01, %v3166_v36  ;;  %v3168_v40 = vadd.f32 %v3167_v42, %v10544_v55  ;;  %v3619_v52 = vadd.f32 %v3618_v47, %v3530_v0 }
 0x4fa   :  { %v3533_v4 = vmul.f32 %v10448_v61, %v3405_v54  ;;  %v3347_v23 = vmul.f32 0.01, %v3279_v32  ;;  %v3281_v49 = vadd.f32 %v3280_v62, %v10544_v55  ;;  %v3535_v13 = vmul.f32 %v10448_v61, %v3407_v44  ;;  %v3177_v47 = vpop.f32.mrf.mxu0 }
 0x4fb   :  { %v3409_v6 = vmax.f32 %v3166_v36, %v3345_v14  ;;  %v3346_v58 = vmul.f32 0.01, %v3168_v40  ;;  %v3170_v35 = vadd.f32 %v3169_v53, %v10444_v2  ;;  %v3534_v20 = vmul.f32 %v10448_v61, %v3406_v29  ;;  %v10645_v36 = vpop.permute.xlu0 %3750  ;;  %v3290_v29 = vpop.f32.mrf.mxu1 }
 0x4fc   :  { %v3411_v42 = vmax.f32 %v3279_v32, %v3347_v23  ;;  %v3348_v26 = vmul.f32 0.01, %v3281_v49  ;;  %v3283_v34 = vadd.f32 %v3282_v1, %v10444_v2  ;;  %v3536_v38 = vmul.f32 %v10448_v61, %v3408_v48  ;;  %v10643_v61 = vpop.permute.xlu1 %3754 }
 0x4fd   :  { %v3410_v59 = vmax.f32 %v3168_v40, %v3346_v58  ;;  %v3349_v55 = vmul.f32 0.01, %v3170_v35  ;;  %v3172_v62 = vadd.f32 %v3171_v15, %v10444_v2  ;;  %v10637_v9 = vpop.eup %7848  ;;  %v3537_v19 = vmul.f32 %v10581_v31, %v3409_v6 }
 0x4fe   :  { %14119 = vst [vmem:[#allocation20_spill] sm:$0xff] %v10637_v9  ;;  %v3539_v10 = vmul.f32 %v10581_v31, %v3411_v42  ;;  %v3351_v53 = vmul.f32 0.01, %v3283_v34  ;;  %v3285_v8 = vadd.f32 %v3284_v3, %v10444_v2  ;;  %v3645_v7 = vadd.f32 %v3644_v12, %v3532_v21  ;;  %v3292_v42 = vpop.f32.mrf.mxu1 }
 0x4ff   :  { %v3538_v1 = vmul.f32 %v10581_v31, %v3410_v59  ;;  %v3412_v11 = vmax.f32 %v3281_v49, %v3348_v26  ;;  %v3350_v0 = vmul.f32 0.01, %v3172_v62  ;;  %v3607_v54 = vadd.f32 %v3606_v37, %v3533_v4  ;;  %v3179_v49 = vpop.f32.mrf.mxu0 }
 0x500   :  { %v3633_v63 = vadd.f32 %v3632_v16, %v3535_v13  ;;  %v3413_v15 = vmax.f32 %v3170_v35, %v3349_v55  ;;  %v3415_v44 = vmax.f32 %v3283_v34, %v3351_v53  ;;  %v3620_v32 = vadd.f32 %v3619_v52, %v3534_v20  ;;  %v10661_v59 = vpop.permute.xlu1 %3894 }
 0x501   :  { %v3646_v48 = vadd.f32 %v3645_v7, %v3536_v38  ;;  %v3352_v14 = vmul.f32 0.01, %v3285_v8  ;;  %v3176_v2 = vadd.f32 %v3175_v51, %v10568_v39  ;;  %v10648_v3 = vpop.eup %7850  ;;  %v3608_v12 = vadd.f32 %v3607_v54, %v3537_v19  ;;  %v3181_v54 = vpop.f32.mrf.mxu0 }
 0x502   :  { %14120 = vst [vmem:[#allocation80_spill] sm:$0xff] %v10648_v3  ;;  %v3634_v21 = vadd.f32 %v3633_v63, %v3539_v10  ;;  %v3414_v40 = vmax.f32 %v3172_v62, %v3350_v0  ;;  %v3289_v23 = vadd.f32 %v3288_v50, %v10568_v39  ;;  %v10651_v37 = vpop.eup %7852  ;;  %v3621_v16 = vadd.f32 %v3620_v32, %v3538_v1  ;;  %v10665_v10 = vpop.permute.xlu0 %3734 }
 0x503   :  { %14121 = vst [vmem:[#allocation19_spill] sm:$0xff] %v10651_v37  ;;  %v3540_v4 = vmul.f32 %v10581_v31, %v3412_v11  ;;  %v3353_v13 = vmul.f32 0.01, %v3176_v2  ;;  %v3178_v52 = vadd.f32 %v3177_v47, %v10568_v39  ;;  %v10655_v6 = vpop.eup %7854  ;;  %v3541_v51 = vmul.f32 %v10456_v24, %v3413_v15  ;;  %14123 = vst [vmem:[#allocation58_spill] sm:$0xff] %v10665_v10  ;;  %v3294_v32 = vpop.f32.mrf.mxu1 }
 0x504   :  { %14122 = vst [vmem:[#allocation52_spill] sm:$0xff] %v10655_v6  ;;  %v3543_v58 = vmul.f32 %v10456_v24, %v3415_v44  ;;  %v3355_v35 = vmul.f32 0.01, %v3289_v23  ;;  %v3291_v20 = vadd.f32 %v3290_v29, %v10568_v39  ;;  %v3416_v26 = vmax.f32 %v3285_v8, %v3352_v14 }
 0x505   :  { %v3417_v34 = vmax.f32 %v3176_v2, %v3353_v13  ;;  %v3354_v50 = vmul.f32 0.01, %v3178_v52  ;;  %v3180_v38 = vadd.f32 %v3179_v49, %v10452_v43  ;;  %v3542_v31 = vmul.f32 %v10456_v24, %v3414_v40  ;;  %v10675_v13 = vpop.permute.xlu1 %3742 }
 0x506   :  { %v3419_v55 = vmax.f32 %v3289_v23, %v3355_v35  ;;  %v3356_v62 = vmul.f32 0.01, %v3291_v20  ;;  %v3693_v19 = vsub.f32 0.0, %v10637_v9  ;;  %v3293_v8 = vadd.f32 %v3292_v42, %v10452_v43 }
 0x507   :  { %v3545_v53 = vmul.f32 %v10460_v45, %v3417_v34  ;;  %v3418_v47 = vmax.f32 %v3178_v52, %v3354_v50  ;;  %v3357_v39 = vmul.f32 0.01, %v3180_v38  ;;  %v3647_v7 = vadd.f32 %v3646_v48, %v3540_v4 }
 0x508   :  { %v3609_v1 = vadd.f32 %v3608_v12, %v3541_v51  ;;  %v3547_v11 = vmul.f32 %v10460_v45, %v3419_v55  ;;  %v3695_v0 = vsub.f32 0.0, %v10648_v3  ;;  %v3635_v63 = vadd.f32 %v3634_v21, %v3543_v58  ;;  %v10679_v58 = vpop.permute.xlu0 %3930 }
 0x509   :  { %v3544_v15 = vmul.f32 %v10456_v24, %v3416_v26  ;;  %v3421_v44 = vmax.f32 %v3180_v38, %v3357_v39  ;;  %v3359_v29 = vmul.f32 0.01, %v3293_v8  ;;  %v3622_v14 = vadd.f32 %v3621_v16, %v3542_v31 }
 0x50a   :  { %v3610_v2 = vadd.f32 %v3609_v1, %v3545_v53  ;;  %v3420_v40 = vmax.f32 %v3291_v20, %v3356_v62  ;;  %v3697_v23 = vmul.f32 1.442695, %v3693_v19  ;;  %v3546_v49 = vmul.f32 %v10460_v45, %v3418_v47 }
 0x50b   :  { %v3549_v48 = vmul.f32 %v10598_v22, %v3421_v44  ;;  %v3423_v12 = vmax.f32 %v3293_v8, %v3359_v29  ;;  %v3182_v4 = vadd.f32 %v3181_v54, %v10452_v43  ;;  %v3636_v52 = vadd.f32 %v3635_v63, %v3547_v11 }
 0x50c   :  { %v3701_v21 = vmul.f32 1.442695, %v3695_v0  ;;  %v3694_v24 = vsub.f32 0.0, %v10651_v37  ;;  %v3295_v51 = vadd.f32 %v3294_v32, %v10452_v43  ;;  %v3696_v42 = vsub.f32 0.0, %v10655_v6  ;;  %v10692_v0 = vpop.permute.xlu0 %3918 }
 0x50d   :  { %v3611_v16 = vadd.f32 %v3610_v2, %v3549_v48  ;;  %v3551_v35 = vmul.f32 %v10598_v22, %v3423_v12  ;;  %v3358_v20 = vmul.f32 0.01, %v3182_v4  ;;  %v3648_v26 = vadd.f32 %v3647_v7, %v3544_v15  ;;  %v10689_v7 = vpop.permute.xlu1 %3746 }
 0x50e   :  { %v3548_v34 = vmul.f32 %v10460_v45, %v3420_v40  ;;  %v3360_v50 = vmul.f32 0.01, %v3295_v51  ;;  %7856 = vpow2.f32 %v3697_v23  ;;  %v13645_v62 = vmov 18  }
 0x50f   :  { %v3612_v38 = vrot.slane %v3611_v16, 4  ;;  %v3637_v31 = vadd.f32 %v3636_v52, %v3551_v35  ;;  %v3422_v55 = vmax.f32 %v3182_v4, %v3358_v20  ;;  %7676 = vset.pattern.permute.xlu1 %v13645_v62  ;;  %7675 = vset.pattern.permute.xlu0 %v13645_v62  ;;  %v3623_v43 = vadd.f32 %v3622_v14, %v3546_v49 }
 0x510   :  { %7858 = vpow2.f32 %v3701_v21  ;;  %v3699_v19 = vmul.f32 1.442695, %v3694_v24  ;;  %v3424_v53 = vmax.f32 %v3295_v51, %v3360_v50  ;;  %4179 = vperm.xlu1 %7676, %v10415_v18   ;;  %4175 = vperm.xlu0 %7675, %v10409_v60   ;;  %v3703_v8 = vmul.f32 1.442695, %v3696_v42  ;;  %v10698_v18 = vld [vmem:[%s13480_s2 + $0x18] sm:$0xff]  ;;  %v10703_v12 = vpop.permute.xlu0 %3914 }
 0x511   :  { %v3613_v47 = vadd.f32 %v3612_v38, %v3611_v16  ;;  %v3638_v45 = vrot.slane %v3637_v31, 4  ;;  %v3550_v39 = vmul.f32 %v10598_v22, %v3422_v55  ;;  %v3649_v1 = vadd.f32 %v3648_v26, %v3548_v34  ;;  %14124 = vst [vmem:[#allocation45_spill] sm:$0xff] %v10698_v18  ;;  %v10701_v49 = vpop.permute.xlu1 %3890 }
 0x512   :  { %v3552_v11 = vmul.f32 %v10598_v22, %v3424_v53  ;;  %7860 = vpow2.f32 %v3699_v19  ;;  %14125 = vst [vmem:[#allocation37_spill] sm:$0xff] %v10701_v49  ;;  %v13647_v4 = vmov 26   ;;  %v14153_v6 = vmov 26  }
 0x513   :  { %v3614_v54 = vrot.slane %v3613_v47, 2  ;;  %v3639_v63 = vadd.f32 %v3638_v45, %v3637_v31  ;;  %v3624_v15 = vadd.f32 %v3623_v43, %v3550_v39  ;;  %7862 = vpow2.f32 %v3703_v8  ;;  %v10727_v43 = vld [vmem:[%s13480_s2 + $0x10] sm:$0xff] }
 0x514   :  { %v3650_v44 = vadd.f32 %v3649_v1, %v3552_v11  ;;  %4183 = vperm.xlu1 %7676, %v10402_v17   ;;  %4187 = vperm.xlu0 %7675, %v10698_v18   ;;  %v10708_v17 = vld [vmem:[%s13480_s2 + $0x20] sm:$0xff]  ;;  %14128 = vst [vmem:[#allocation76_spill] sm:$0xff] %v10727_v43  ;;  %v10730_v53 = vpop.permute.xlu0 %3902 }
 0x515   :  { %v3615_v29 = vadd.f32 %v3614_v54, %v3613_v47  ;;  %v3640_v32 = vrot.slane %v3639_v63, 2  ;;  %v3625_v14 = vrot.slane %v3624_v15, 4  ;;  %14126 = vst [vmem:[#allocation78_spill] sm:$0xff] %v10708_v17  ;;  %v10716_v55 = vpop.permute.xlu1 %3738  ;;  %v14129_v47 = vld [vmem:[#allocation35_spill] sm:$0xff] }
 0x516   :  { %v3651_v22 = vrot.slane %v3650_v44, 4 }
 0x517   :  { %v3616_v2 = vrot.slane %v3615_v29, 1  ;;  %v3641_v40 = vadd.f32 %v3640_v32, %v3639_v63  ;;  %v3626_v23 = vadd.f32 %v3625_v14, %v3624_v15  ;;  %v14131_v15 = vld [vmem:[#allocation36_spill] sm:$0xff] }
 0x518   :  { %v3652_v48 = vadd.f32 %v3651_v22, %v3650_v44  ;;  %4191 = vperm.xlu1 %7676, %v10708_v17   ;;  %7677 = vset.pattern.permute.xlu0 %v13647_v4 }
 0x519   :  { %v3617_v52 = vadd.f32 %v3616_v2, %v3615_v29  ;;  %v3642_v21 = vrot.slane %v3641_v40, 1  ;;  %v3627_v24 = vrot.slane %v3626_v23, 2  ;;  %4641 = vperm.xlu0 %7677, %v10409_v60   ;;  %v10721_v60 = vld [vmem:[%s13480_s2 + $0x8] sm:$0xff] }
 0x51a   :  { %v3653_v51 = vrot.slane %v3652_v48, 2  ;;  %14127 = vst [vmem:[#allocation77_spill] sm:$0xff] %v10721_v60  ;;  %v10743_v2 = vld [vmem:[%s13480_s2 + $0x28] sm:$0xff] }
 0x51b   :  { %v3673_v16 = vadd.f32 %v10465_v27, %v3617_v52  ;;  %v3643_v35 = vadd.f32 %v3642_v21, %v3641_v40  ;;  %v3628_v20 = vadd.f32 %v3627_v24, %v3626_v23  ;;  %v7857_v42 = vpop.eup %7856  ;;  %14132 = vst [vmem:[#allocation49_spill] sm:$0xff] %v10743_v2  ;;  %v14133_v40 = vld [vmem:[#allocation12_spill] sm:$0xff]  ;;  %v10752_v21 = vpop.permute.xlu1 %3878 }
 0x51c   :  { %v3654_v26 = vadd.f32 %v3653_v51, %v3652_v48  ;;  %7678 = vset.pattern.permute.xlu1 %v13647_v4  ;;  %v3709_v39 = vrot.slane %v7857_v42, 7  ;;  %14135 = vst [vmem:[#allocation83_spill] sm:$0xff] %v10752_v21 }
 0x51d   :  { %v7859_v34 = vpop.eup %7858  ;;  %v3681_v50 = vrot.slane %v3673_v16, 7  ;;  %v3675_v38 = vadd.f32 %v10465_v27, %v3643_v35  ;;  %v3629_v31 = vrot.slane %v3628_v20, 1  ;;  %4645 = vperm.xlu1 %7678, %v10721_v60   ;;  %4649 = vperm.xlu0 %7677, %v10727_v43   ;;  %v10754_v16 = vpop.permute.xlu0 %3898 }
 0x51e   :  { %v3655_v19 = vrot.slane %v3654_v26, 1  ;;  %v3711_v29 = vrot.slane %v7859_v34, 7 }
 0x51f   :  { %v3689_v45 = vsub.f32 %v14129_v47, %v3681_v50  ;;  %v3683_v8 = vrot.slane %v3675_v38, 7  ;;  %v3630_v1 = vadd.f32 %v3629_v31, %v3628_v20  ;;  %v7861_v54 = vpop.eup %7860  ;;  %v14136_v20 = vld [vmem:[#allocation39_spill] sm:$0xff]  ;;  %v14137_v50 = vld [vmem:[#allocation40_spill] sm:$0xff]  ;;  %v10776_v47 = vld [vmem:[%s13480_s2 + $0x30] sm:$0xff] }
 0x520   :  { %v3656_v11 = vadd.f32 %v3655_v19, %v3654_v26  ;;  %v7863_v14 = vpop.eup %7862  ;;  %v3710_v24 = vrot.slane %v7861_v54, 7  ;;  %14138 = vst [vmem:[#allocation56_spill] sm:$0xff] %v10776_v47 }
 0x521   :  { %v10733_v63 = vmul.f32 %v3709_v39, %v3689_v45  ;;  %v3691_v44 = vsub.f32 %v14131_v15, %v3683_v8  ;;  %v3674_v32 = vadd.f32 %v10465_v27, %v3630_v1  ;;  %7679 = vset.pattern.permute.xlu1 %v13645_v62  ;;  %4653 = vperm.xlu0 %7677, %v10698_v18   ;;  %v3712_v26 = vrot.slane %v7863_v14, 7 }
 0x522   :  { %v3676_v22 = vadd.f32 %v10465_v27, %v3656_v11  ;;  %4195 = vperm.xlu1 %7679, %v10743_v2  }
 0x523   :  { %14130 = vst [vmem:[#allocation53_spill] sm:$0xff] %v10733_v63  ;;  %v10748_v23 = vrot.slane %v10733_v63, %v14133_v40  ;;  %v10750_v48 = vmul.f32 %v3711_v29, %v3691_v44  ;;  %v3682_v52 = vrot.slane %v3674_v32, 7  ;;  %v10873_v63 = vld [vmem:[%s13480_s2 + $0x48] sm:$0xff] }
 0x524   :  { %v3684_v51 = vrot.slane %v3676_v22, 7  ;;  %14151 = vst [vmem:[#allocation21_spill] sm:$0xff] %v10873_v63 }
 0x525   :  { %14134 = vst [vmem:[#allocation41_spill] sm:$0xff] %v10750_v48  ;;  %v10758_v27 = vrot.slane %v10750_v48, %v14133_v40  ;;  %v3829_v35 = vmul.f32 %v10748_v23, %v10645_v36  ;;  %v3690_v42 = vsub.f32 %v14136_v20, %v3682_v52  ;;  %4657 = vperm.xlu0 %7677, %v10708_v17   ;;  %v10810_v52 = vpop.permute.xlu1 %3726 }
 0x526   :  { %v3813_v34 = vmul.f32 %v10748_v23, %v10665_v10  ;;  %v3692_v38 = vsub.f32 %v14137_v50, %v3684_v51  ;;  %v10769_v31 = vmul.f32 %v10748_v23, %v10675_v13  ;;  %v3865_v19 = vmul.f32 %v10748_v23, %v10481_v57  ;;  %4199 = vperm.xlu1 %7679, %v10776_v47  }
 0x527   :  { %v3831_v45 = vmul.f32 %v10758_v27, %v10645_v36  ;;  %v10782_v39 = vadd.f32 %v10661_v59, %v3829_v35  ;;  %v10784_v8 = vmul.f32 %v3710_v24, %v3690_v42  ;;  %v3825_v1 = vmul.f32 %v10748_v23, %v10689_v7  ;;  %v10825_v42 = vpop.permute.xlu0 %3886 }
 0x528   :  { %v3815_v11 = vmul.f32 %v10758_v27, %v10665_v10  ;;  %v10790_v54 = vmul.f32 %v3712_v26, %v3692_v38  ;;  %v3867_v15 = vmul.f32 %v10758_v27, %v10481_v57  ;;  %v10795_v44 = vadd.f32 %v10679_v58, %v3865_v19  ;;  %14143 = vst [vmem:[#allocation79_spill] sm:$0xff] %v10825_v42  ;;  %v10830_v26 = vld [vmem:[%s13480_s2 + $0x38] sm:$0xff] }
 0x529   :  { %14139 = vst [vmem:[#allocation27_spill] sm:$0xff] %v10782_v39  ;;  %14140 = vst [vmem:[#allocation61_spill] sm:$0xff] %v10784_v8  ;;  %v10798_v29 = vadd.f32 %v10661_v59, %v3831_v45  ;;  %v10802_v32 = vrot.slane %v10784_v8, %v14133_v40  ;;  %v10806_v14 = vmul.f32 %v10758_v27, %v10675_v13  ;;  %4665 = vperm.xlu0 %7677, %v10776_v47   ;;  %v3731_v60 = vpop.permute.xlu1 %3730 }
 0x52a   :  { %14141 = vst [vmem:[#allocation72_spill] sm:$0xff] %v10790_v54  ;;  %v3827_v22 = vmul.f32 %v10758_v27, %v10689_v7  ;;  %v10814_v24 = vmul.f32 0.01, %v10782_v39  ;;  %v10818_v51 = vrot.slane %v10790_v54, %v14133_v40  ;;  %v10821_v35 = vadd.f32 %v10679_v58, %v3867_v15  ;;  %14144 = vst [vmem:[#allocation51_spill] sm:$0xff] %v10830_v26 }
 0x52b   :  { %14142 = vst [vmem:[#allocation57_spill] sm:$0xff] %v10798_v29  ;;  %v3853_v20 = vmul.f32 %v10748_v23, %v10508_v56  ;;  %4203 = vperm.xlu1 %7679, %v10830_v26   ;;  %v10834_v50 = vmul.f32 0.01, %v10798_v29  ;;  %v10838_v38 = vmul.f32 %v10802_v32, %v10675_v13  ;;  %v10841_v19 = vmul.f32 0.01, %v10795_v44  ;;  %v10912_v47 = vpop.permute.xlu0 %3882 }
 0x52c   :  { %v3855_v45 = vmul.f32 %v10758_v27, %v10508_v56  ;;  %v10847_v15 = vmul.f32 %v10818_v51, %v10675_v13  ;;  %v10850_v62 = vmul.f32 0.01, %v10821_v35  ;;  %v10854_v4 = vmul.f32 %v10802_v32, %v10689_v7  ;;  %14157 = vst [vmem:[#allocation82_spill] sm:$0xff] %v10912_v47 }
 0x52d   :  { %14145 = vst [vmem:[#allocation71_spill] sm:$0xff] %v10834_v50  ;;  %14146 = vst [vmem:[#allocation73_spill] sm:$0xff] %v10838_v38  ;;  %v10857_v54 = vadd.f32 %v10692_v0, %v3853_v20  ;;  %v10863_v40 = vadd.f32 %v10701_v49, %v3825_v1  ;;  %v10866_v48 = vadd.f32 %v10701_v49, %v3827_v22  ;;  %4677 = vperm.xlu0 %7677, %v10873_v63  }
 0x52e   :  { %14147 = vst [vmem:[#allocation34_spill] sm:$0xff] %v10847_v15  ;;  %14148 = vst [vmem:[#allocation32_spill] sm:$0xff] %v10854_v4  ;;  %v10860_v8 = vadd.f32 %v10692_v0, %v3855_v45  ;;  %v3849_v13 = vmul.f32 %v10748_v23, %v10564_v5  ;;  %v10878_v20 = vmul.f32 %v10818_v51, %v10689_v7 }
 0x52f   :  { %14149 = vst [vmem:[#allocation65_spill] sm:$0xff] %v10863_v40  ;;  %14150 = vst [vmem:[#allocation62_spill] sm:$0xff] %v10866_v48  ;;  %v10881_v1 = vmul.f32 0.01, %v10857_v54  ;;  %v3851_v22 = vmul.f32 %v10758_v27, %v10564_v5  ;;  %v3817_v45 = vmul.f32 %v10748_v23, %v10716_v55  ;;  %7680 = vset.pattern.permute.xlu1 %v14153_v6  ;;  %v10892_v37 = vmul.f32 0.01, %v10863_v40  ;;  %v10994_v38 = vpop.permute.xlu0 %3870 }
 0x530   :  { %14152 = vst [vmem:[#allocation31_spill] sm:$0xff] %v10878_v20  ;;  %v10889_v3 = vmul.f32 0.01, %v10860_v8  ;;  %v10895_v7 = vadd.f32 %v10703_v12, %v3849_v13  ;;  %v10899_v9 = vmul.f32 %v10802_v32, %v10716_v55  ;;  %4661 = vperm.xlu1 %7680, %v10743_v2   ;;  %v10903_v18 = vmul.f32 0.01, %v10866_v48  ;;  %14172 = vst [vmem:[#allocation50_spill] sm:$0xff] %v10994_v38 }
 0x531   :  { %14154 = vst [vmem:[#allocation46_spill] sm:$0xff] %v10892_v37  ;;  %v10906_v17 = vadd.f32 %v10703_v12, %v3851_v22  ;;  %v3819_v43 = vmul.f32 %v10758_v27, %v10716_v55  ;;  %v3837_v13 = vmul.f32 %v10748_v23, %v10593_v41  ;;  %v3839_v2 = vmul.f32 %v10758_v27, %v10593_v41 }
 0x532   :  { %14155 = vst [vmem:[#allocation68_spill] sm:$0xff] %v10899_v9  ;;  %14156 = vst [vmem:[#allocation81_spill] sm:$0xff] %v10903_v18  ;;  %v10916_v9 = vmul.f32 %v10818_v51, %v10716_v55  ;;  %v10921_v10 = vadd.f32 %v10752_v21, %v3813_v34  ;;  %v10924_v22 = vadd.f32 %v10752_v21, %v3815_v11  ;;  %v14161_v48 = vmov 18   ;;  %v10940_v34 = vld [vmem:[%s13480_s2 + $0x40] sm:$0xff] }
 0x533   :  { %7684 = vset.pattern.permute.xlu0 %v14161_v48  ;;  %v10928_v18 = vmul.f32 0.01, %v10895_v7  ;;  %v10931_v40 = vadd.f32 %v10730_v53, %v3837_v13  ;;  %v3833_v55 = vmul.f32 %v10748_v23, %v10643_v61  ;;  %v10944_v11 = vmul.f32 0.01, %v10906_v17 }
 0x534   :  { %14158 = vst [vmem:[#allocation75_spill] sm:$0xff] %v10916_v9  ;;  %14159 = vst [vmem:[#allocation74_spill] sm:$0xff] %v10921_v10  ;;  %v3835_v9 = vmul.f32 %v10758_v27, %v10643_v61  ;;  %4207 = vperm.xlu0 %7684, %v10940_v34   ;;  %v10947_v21 = vadd.f32 %v10730_v53, %v3839_v2  ;;  %v10950_v13 = vmul.f32 0.01, %v10921_v10  ;;  %v10953_v37 = vmul.f32 0.01, %v10924_v22 }
 0x535   :  { %14160 = vst [vmem:[#allocation38_spill] sm:$0xff] %v10924_v22  ;;  %4669 = vperm.xlu1 %7680, %v10830_v26   ;;  %v10957_v20 = vmul.f32 0.01, %v10931_v40  ;;  %v10960_v15 = vadd.f32 %v10754_v16, %v3833_v55  ;;  %v3805_v2 = vmul.f32 %v10748_v23, %v10810_v52  ;;  %v10972_v22 = vmul.f32 %v10802_v32, %v10810_v52 }
 0x536   :  { %14162 = vst [vmem:[#allocation86_spill] sm:$0xff] %v10950_v13  ;;  %14163 = vst [vmem:[#allocation30_spill] sm:$0xff] %v10953_v37  ;;  %v10963_v49 = vadd.f32 %v10754_v16, %v3835_v9  ;;  %v10968_v10 = vmul.f32 0.01, %v10947_v21  ;;  %v3807_v26 = vmul.f32 %v10758_v27, %v10810_v52  ;;  %v10978_v55 = vadd.f32 %v10825_v42, %v10769_v31  ;;  %v10980_v37 = vpop.permute.xlu1 %3874  ;;  %v10999_v31 = vld [vmem:[%s13480_s2 + $0x58] sm:$0xff] }
 0x537   :  { %14164 = vst [vmem:[#allocation84_spill] sm:$0xff] %v10960_v15  ;;  %14166 = vst [vmem:[#allocation85_spill] sm:$0xff] %v10972_v22  ;;  %v10983_v9 = vmul.f32 0.01, %v10960_v15  ;;  %v10987_v13 = vmul.f32 %v10818_v51, %v10810_v52  ;;  %v10991_v4 = vadd.f32 %v10825_v42, %v10806_v14  ;;  %v3809_v22 = vmul.f32 %v10748_v23, %v3731_v60 }
 0x538   :  { %14165 = vst [vmem:[#allocation28_spill] sm:$0xff] %v10963_v49  ;;  %14167 = vst [vmem:[#allocation33_spill] sm:$0xff] %v10978_v55  ;;  %4219 = vperm.xlu0 %7684, %v10999_v31   ;;  %v11003_v29 = vmul.f32 0.01, %v10963_v49  ;;  %v11006_v52 = vmul.f32 0.01, %v10978_v55  ;;  %v11009_v14 = vmul.f32 %v10802_v32, %v3731_v60  ;;  %v11014_v42 = vmul.f32 %v10818_v51, %v3731_v60 }
 0x539   :  { %14168 = vst [vmem:[#allocation70_spill] sm:$0xff] %v10980_v37  ;;  %14169 = vst [vmem:[#allocation47_spill] sm:$0xff] %v10983_v9  ;;  %7681 = vset.pattern.permute.xlu1 %v14161_v48  ;;  %v11017_v50 = vadd.f32 %v10912_v47, %v3817_v45  ;;  %v11020_v15 = vadd.f32 %v10912_v47, %v3819_v43  ;;  %v11023_v49 = vadd.f32 %v10980_v37, %v3809_v22  ;;  %v8101_v47 = vmov 34  }
 0x53a   :  { %14170 = vst [vmem:[#allocation59_spill] sm:$0xff] %v10987_v13  ;;  %14171 = vst [vmem:[#allocation55_spill] sm:$0xff] %v10991_v4  ;;  %v3811_v13 = vmul.f32 %v10758_v27, %v3731_v60  ;;  %4211 = vperm.xlu1 %7681, %v10873_v63   ;;  %v11033_v60 = vadd.f32 %v10994_v38, %v3805_v2  ;;  %v3862_v45 = vmul.f32 %v10802_v32, %v10618_v33 }
 0x53b   :  { %14173 = vst [vmem:[#allocation29_spill] sm:$0xff] %v11003_v29  ;;  %14174 = vst [vmem:[#allocation42_spill] sm:$0xff] %v11006_v52  ;;  %v11038_v43 = vmul.f32 0.01, %v11017_v50  ;;  %v11041_v22 = vmul.f32 0.01, %v11020_v15  ;;  %v11044_v63 = vadd.f32 %v10994_v38, %v3807_v26  ;;  %v3864_v38 = vmul.f32 %v10818_v51, %v10618_v33 }
 0x53c   :  { %14175 = vst [vmem:[#allocation48_spill] sm:$0xff] %v11009_v14  ;;  %14176 = vst [vmem:[#allocation35_spill] sm:$0xff] %v11014_v42  ;;  %v11027_v14 = vmul.f32 0.01, %v10991_v4  ;;  %v11030_v55 = vadd.f32 %v10980_v37, %v3811_v13  ;;  %v3866_v42 = vmul.f32 %v10802_v32, %v10481_v57  ;;  %v11051_v13 = vld [vmem:[%s13480_s2 + $0x60] sm:$0xff]  ;;  %v3990_v26 = vadd.f32 %v10496_v28, %v3862_v45 }
 0x53d   :  { %14177 = vst [vmem:[#allocation36_spill] sm:$0xff] %v11017_v50  ;;  %14178 = vst [vmem:[#allocation39_spill] sm:$0xff] %v11020_v15  ;;  %4223 = vperm.xlu0 %7684, %v11051_v13   ;;  %v11055_v2 = vmul.f32 0.01, %v11023_v49  ;;  %v11061_v15 = vmul.f32 0.01, %v11033_v60  ;;  %v3863_v45 = vmul.f32 %v10758_v27, %v10618_v33 }
 0x53e   :  { %14179 = vst [vmem:[#allocation40_spill] sm:$0xff] %v11023_v49  ;;  %14180 = vst [vmem:[#allocation87_spill] sm:$0xff] %v11027_v14  ;;  %v11058_v37 = vmul.f32 0.01, %v11030_v55  ;;  %v3861_v49 = vmul.f32 %v10748_v23, %v10618_v33  ;;  %v14191_v52 = vld [vmem:[#allocation60_spill] sm:$0xff] }
 0x53f   :  { %14181 = vst [vmem:[#allocation88_spill] sm:$0xff] %v11030_v55  ;;  %14182 = vst [vmem:[#allocation89_spill] sm:$0xff] %v11033_v60  ;;  %v11074_v55 = vld [vmem:[%s13480_s2 + $0x50] sm:$0xff]  ;;  %v3992_v60 = vadd.f32 %v10496_v28, %v3864_v38  ;;  %v3991_v33 = vadd.f32 %v10496_v28, %v3863_v45 }
 0x540   :  { %14183 = vst [vmem:[#allocation90_spill] sm:$0xff] %v11038_v43  ;;  %14184 = vst [vmem:[#allocation91_spill] sm:$0xff] %v11041_v22  ;;  %v3868_v22 = vmul.f32 %v10818_v51, %v10481_v57  ;;  %4215 = vperm.xlu1 %7681, %v11074_v55   ;;  %v4123_v57 = vmax.f32 %v10821_v35, %v10850_v62  ;;  %v3989_v50 = vadd.f32 %v10496_v28, %v3861_v49  ;;  %v11089_v43 = vld [vmem:[%s13480_s2 + $0x70] sm:$0xff] }
 0x541   :  { %14185 = vst [vmem:[#allocation92_spill] sm:$0xff] %v11044_v63  ;;  %14186 = vst [vmem:[#allocation93_spill] sm:$0xff] %v11055_v2  ;;  %v3994_v63 = vadd.f32 %v10679_v58, %v3866_v42  ;;  %v4121_v42 = vmax.f32 %v10795_v44, %v10841_v19  ;;  %4231 = vperm.xlu0 %7684, %v11089_v43   ;;  %v3854_v62 = vmul.f32 %v10802_v32, %v10508_v56  ;;  %v14190_v35 = vld [vmem:[#allocation22_spill] sm:$0xff] }
 0x542   :  { %14187 = vst [vmem:[#allocation94_spill] sm:$0xff] %v11058_v37  ;;  %14188 = vst [vmem:[#allocation95_spill] sm:$0xff] %v11061_v15  ;;  %v4054_v37 = vmul.f32 0.01, %v3990_v26  ;;  %v3996_v15 = vadd.f32 %v10679_v58, %v3868_v22  ;;  %v3858_v38 = vmul.f32 %v10802_v32, %v14190_v35  ;;  %v4056_v58 = vmul.f32 0.01, %v3992_v60 }
 0x543   :  { %v4058_v2 = vmul.f32 0.01, %v3994_v63  ;;  %14189 = vst [vmem:[#allocation96_spill] sm:$0xff] %v11089_v43  ;;  %v4053_v49 = vmul.f32 0.01, %v3989_v50  ;;  %v3982_v14 = vadd.f32 %v10692_v0, %v3854_v62  ;;  %v3856_v28 = vmul.f32 %v10818_v51, %v10508_v56 }
 0x544   :  { %v4118_v44 = vmax.f32 %v3990_v26, %v4054_v37  ;;  %v4060_v22 = vmul.f32 0.01, %v3996_v15  ;;  %7682 = vset.pattern.permute.xlu1 %v8101_v47  ;;  %v4055_v4 = vmul.f32 0.01, %v3991_v33  ;;  %v3986_v43 = vadd.f32 %v14191_v52, %v3858_v38  ;;  %v11104_v37 = vld [vmem:[%s13480_s2] sm:$0x1] }
 0x545   :  { %v4122_v19 = vmax.f32 %v3994_v63, %v4058_v2  ;;  %4873 = vperm.xlu1 %7682, %v11104_v37   ;;  %v4120_v2 = vmax.f32 %v3992_v60, %v4056_v58  ;;  %v4117_v45 = vmax.f32 %v3989_v50, %v4053_v49  ;;  %7688 = vset.pattern.permute.xlu0 %v14153_v6  ;;  %v4046_v62 = vmul.f32 0.01, %v3982_v14 }
 0x546   :  { %v4124_v26 = vmax.f32 %v3996_v15, %v4060_v22  ;;  %v4119_v47 = vmax.f32 %v3991_v33, %v4055_v4  ;;  %v4050_v29 = vmul.f32 0.01, %v3986_v43  ;;  %v3860_v38 = vmul.f32 %v10818_v51, %v14190_v35  ;;  %4689 = vperm.xlu0 %7688, %v11051_v13  }
 0x547   :  { %v4171_v63 = vpack.c.bf16 %v4122_v19, %v4118_v44  ;;  %v4170_v9 = vpack.c.bf16 %v4121_v42, %v4117_v45  ;;  %v3984_v39 = vadd.f32 %v10692_v0, %v3856_v28  ;;  %v3857_v60 = vmul.f32 %v10748_v23, %v14190_v35 }
 0x548   :  { %v4173_v56 = vpack.c.bf16 %v4124_v26, %v4120_v2  ;;  %v4172_v15 = vpack.c.bf16 %v4123_v57, %v4119_v47  ;;  %v4110_v50 = vmax.f32 %v3982_v14, %v4046_v62  ;;  %v4114_v44 = vmax.f32 %v3986_v43, %v4050_v29 }
 0x549   :  { %4286 = vmatprep.subr.bf16.mxu0 %v4171_v63  ;;  %v3988_v4 = vadd.f32 %v14191_v52, %v3860_v38  ;;  %7683 = vset.pattern.permute.xlu1 %v14153_v6  ;;  %v4048_v33 = vmul.f32 0.01, %v3984_v39  ;;  %v3985_v19 = vadd.f32 %v14191_v52, %v3857_v60  ;;  %v4109_v42 = vmax.f32 %v10857_v54, %v10881_v1  ;;  %v11132_v1 = vld [vmem:[%s13480_s2 + $0x78] sm:$0xff] }
 0x54a   :  { %4399 = vmatprep.subr.bf16.mxu1 %v4173_v56  ;;  %4287 = vmatpush1.bf16.msra.mxu0 %v4170_v9  ;;  %v3859_v0 = vmul.f32 %v10758_v27, %v14190_v35  ;;  %v4167_v58 = vpack.c.bf16 %v4114_v44, %v4110_v50  ;;  %v4111_v29 = vmax.f32 %v10860_v8, %v10889_v3  ;;  %v14192_v8 = vld [vmem:[#allocation66_spill] sm:$0xff] }
 0x54b   :  { %4400 = vmatpush1.bf16.msra.mxu1 %v4172_v15  ;;  %v4052_v57 = vmul.f32 0.01, %v3988_v4  ;;  %v3846_v14 = vmul.f32 %v10802_v32, %v10629_v25  ;;  %4673 = vperm.xlu1 %7683, %v10940_v34   ;;  %v4112_v9 = vmax.f32 %v3984_v39, %v4048_v33  ;;  %v4049_v43 = vmul.f32 0.01, %v3985_v19  ;;  %v11150_v15 = vld [vmem:[%s13480_s2 + $0x68] sm:$0xff] }
 0x54c   :  { %v3987_v22 = vadd.f32 %v14191_v52, %v3859_v0  ;;  %v3850_v54 = vmul.f32 %v10802_v32, %v10564_v5  ;;  %4701 = vperm.xlu0 %7688, %v11132_v1   ;;  %4288 = vmatprep.subr.bf16.mxu0 %v4167_v58  ;;  %v3848_v39 = vmul.f32 %v10818_v51, %v10629_v25 }
 0x54d   :  { %v4116_v3 = vmax.f32 %v3988_v4, %v4052_v57  ;;  %v3974_v35 = vadd.f32 %v14192_v8, %v3846_v14  ;;  %v3852_v52 = vmul.f32 %v10818_v51, %v10564_v5  ;;  %v4113_v49 = vmax.f32 %v3985_v19, %v4049_v43 }
 0x54e   :  { %v4051_v28 = vmul.f32 0.01, %v3987_v22  ;;  %v3978_v63 = vadd.f32 %v10703_v12, %v3850_v54  ;;  %v3845_v2 = vmul.f32 %v10748_v23, %v10629_v25  ;;  %v3976_v47 = vadd.f32 %v14192_v8, %v3848_v39 }
 0x54f   :  { %v4169_v26 = vpack.c.bf16 %v4116_v3, %v4112_v9  ;;  %v4038_v45 = vmul.f32 0.01, %v3974_v35  ;;  %v3980_v62 = vadd.f32 %v10703_v12, %v3852_v52  ;;  %7685 = vset.pattern.permute.xlu1 %v14161_v48  ;;  %v4166_v38 = vpack.c.bf16 %v4113_v49, %v4109_v42 }
 0x550   :  { %v4115_v56 = vmax.f32 %v3987_v22, %v4051_v28  ;;  %v4042_v60 = vmul.f32 0.01, %v3978_v63  ;;  %v3973_v5 = vadd.f32 %v14192_v8, %v3845_v2  ;;  %4227 = vperm.xlu1 %7685, %v11150_v15   ;;  %v4040_v44 = vmul.f32 0.01, %v3976_v47 }
 0x551   :  { %4401 = vmatprep.subr.bf16.mxu1 %v4169_v26  ;;  %v4102_v50 = vmax.f32 %v3974_v35, %v4038_v45  ;;  %v4044_v4 = vmul.f32 0.01, %v3980_v62  ;;  %v4105_v12 = vmax.f32 %v10895_v7, %v10928_v18  ;;  %4289 = vmatpush1.bf16.msra.mxu0 %v4166_v38  ;;  %v3847_v0 = vmul.f32 %v10758_v27, %v10629_v25 }
 0x552   :  { %v4168_v33 = vpack.c.bf16 %v4115_v56, %v4111_v29  ;;  %v4106_v19 = vmax.f32 %v3978_v63, %v4042_v60  ;;  %v4037_v42 = vmul.f32 0.01, %v3973_v5  ;;  %v4104_v58 = vmax.f32 %v3976_v47, %v4040_v44 }
 0x553   :  { %v4108_v57 = vmax.f32 %v3980_v62, %v4044_v4  ;;  %v4107_v14 = vmax.f32 %v10906_v17, %v10944_v11  ;;  %v3838_v9 = vmul.f32 %v10802_v32, %v10593_v41  ;;  %v3975_v18 = vadd.f32 %v14192_v8, %v3847_v0  ;;  %v14193_v0 = vld [vmem:[#allocation27_spill] sm:$0xff] }
 0x554   :  { %4402 = vmatpush1.bf16.msra.mxu1 %v4168_v33  ;;  %v4163_v43 = vpack.c.bf16 %v4106_v19, %v4102_v50  ;;  %v4101_v22 = vmax.f32 %v3973_v5, %v4037_v42  ;;  %v3842_v7 = vmul.f32 %v10802_v32, %v10613_v30  ;;  %v3840_v25 = vmul.f32 %v10818_v51, %v10593_v41 }
 0x555   :  { %v4165_v29 = vpack.c.bf16 %v4108_v57, %v4104_v58  ;;  %v3966_v54 = vadd.f32 %v10730_v53, %v3838_v9  ;;  %v3844_v17 = vmul.f32 %v10818_v51, %v10613_v30  ;;  %7686 = vset.pattern.permute.xlu1 %v14153_v6  ;;  %v4039_v3 = vmul.f32 0.01, %v3975_v18  ;;  %v14194_v9 = vld [vmem:[#allocation47_spill] sm:$0xff] }
 0x556   :  { %4290 = vmatprep.subr.bf16.mxu0 %v4163_v43  ;;  %v4162_v11 = vpack.c.bf16 %v4105_v12, %v4101_v22  ;;  %v3970_v35 = vadd.f32 %v10625_v46, %v3842_v7  ;;  %v3841_v8 = vmul.f32 %v10748_v23, %v10613_v30  ;;  %4681 = vperm.xlu1 %7686, %v11074_v55   ;;  %v14195_v43 = vld [vmem:[#allocation84_spill] sm:$0xff]  ;;  %v14196_v7 = vld [vmem:[#allocation71_spill] sm:$0xff] }
 0x557   :  { %4403 = vmatprep.subr.bf16.mxu1 %v4165_v29  ;;  %v4030_v39 = vmul.f32 0.01, %v3966_v54  ;;  %v3968_v52 = vadd.f32 %v10730_v53, %v3840_v25  ;;  %v3972_v41 = vadd.f32 %v10625_v46, %v3844_v17  ;;  %v4093_v49 = vmax.f32 %v10931_v40, %v10957_v20  ;;  %v14197_v29 = vld [vmem:[#allocation57_spill] sm:$0xff]  ;;  %v14199_v25 = vld [vmem:[#allocation28_spill] sm:$0xff] }
 0x558   :  { %4291 = vmatpush1.bf16.msra.mxu0 %v4162_v11  ;;  %v4103_v28 = vmax.f32 %v3975_v18, %v4039_v3  ;;  %v4034_v63 = vmul.f32 0.01, %v3970_v35  ;;  %v3969_v2 = vadd.f32 %v10625_v46, %v3841_v8  ;;  %v3843_v26 = vmul.f32 %v10758_v27, %v10613_v30 }
 0x559   :  { %v4094_v23 = vmax.f32 %v3966_v54, %v4030_v39  ;;  %v4032_v45 = vmul.f32 0.01, %v3968_v52  ;;  %v4036_v47 = vmul.f32 0.01, %v3972_v41  ;;  %v4095_v62 = vmax.f32 %v10947_v21, %v10968_v10  ;;  %v14200_v39 = vld [vmem:[#allocation73_spill] sm:$0xff] }
 0x55a   :  { %v4164_v53 = vpack.c.bf16 %v4107_v14, %v4103_v28  ;;  %v4098_v38 = vmax.f32 %v3970_v35, %v4034_v63  ;;  %v4033_v56 = vmul.f32 0.01, %v3969_v2  ;;  %v3971_v60 = vadd.f32 %v10625_v46, %v3843_v26  ;;  %4685 = vperm.xlu1 %7686, %v10999_v31   ;;  %v14204_v26 = vld [vmem:[#allocation34_spill] sm:$0xff] }
 0x55b   :  { %v4096_v40 = vmax.f32 %v3968_v52, %v4032_v45  ;;  %v4100_v20 = vmax.f32 %v3972_v41, %v4036_v47  ;;  %v3830_v5 = vmul.f32 %v10802_v32, %v10645_v36  ;;  %v3834_v30 = vmul.f32 %v10802_v32, %v10643_v61  ;;  %v14202_v41 = vld [vmem:[#allocation32_spill] sm:$0xff]  ;;  %v14205_v45 = vld [vmem:[#allocation31_spill] sm:$0xff] }
 0x55c   :  { %4404 = vmatpush1.bf16.msra.mxu1 %v4164_v53  ;;  %v4159_v27 = vpack.c.bf16 %v4098_v38, %v4094_v23  ;;  %v4097_v50 = vmax.f32 %v3969_v2, %v4033_v56  ;;  %v4035_v44 = vmul.f32 0.01, %v3971_v60  ;;  %v3832_v10 = vmul.f32 %v10818_v51, %v10645_v36  ;;  %v14206_v38 = vld [vmem:[#allocation42_spill] sm:$0xff]  ;;  %v14207_v56 = vld [vmem:[#allocation33_spill] sm:$0xff] }
 0x55d   :  { %v4161_v21 = vpack.c.bf16 %v4100_v20, %v4096_v40  ;;  %v3958_v46 = vadd.f32 %v10661_v59, %v3830_v5  ;;  %v3962_v4 = vadd.f32 %v10754_v16, %v3834_v30  ;;  %v3836_v12 = vmul.f32 %v10818_v51, %v10643_v61  ;;  %v14208_v40 = vld [vmem:[#allocation46_spill] sm:$0xff]  ;;  %v14209_v20 = vld [vmem:[#allocation65_spill] sm:$0xff] }
 0x55e   :  { %4292 = vmatprep.subr.bf16.mxu0 %v4159_v27  ;;  %v4158_v33 = vpack.c.bf16 %v4097_v50, %v4093_v49  ;;  %v4099_v19 = vmax.f32 %v3971_v60, %v4035_v44  ;;  %v3960_v42 = vadd.f32 %v10661_v59, %v3832_v10  ;;  %v4085_v58 = vmax.f32 %v14193_v0, %v10814_v24  ;;  %v14198_v59 = vld [vmem:[#allocation29_spill] sm:$0xff]  ;;  %v14210_v44 = vld [vmem:[#allocation87_spill] sm:$0xff] }
 0x55f   :  { %4405 = vmatprep.subr.bf16.mxu1 %v4161_v21  ;;  %v4022_v57 = vmul.f32 0.01, %v3958_v46  ;;  %v4026_v14 = vmul.f32 0.01, %v3962_v4  ;;  %v3964_v36 = vadd.f32 %v10754_v16, %v3836_v12  ;;  %v4089_v22 = vmax.f32 %v14195_v43, %v14194_v9  ;;  %7687 = vset.pattern.permute.xlu1 %v14161_v48  ;;  %v14201_v48 = vld [vmem:[#allocation79_spill] sm:$0xff]  ;;  %v14203_v49 = vld [vmem:[#allocation37_spill] sm:$0xff] }
 0x560   :  { %4293 = vmatpush1.bf16.msra.mxu0 %v4158_v33  ;;  %v4160_v61 = vpack.c.bf16 %v4099_v19, %v4095_v62  ;;  %v4024_v18 = vmul.f32 0.01, %v3960_v42  ;;  %v4087_v54 = vmax.f32 %v14197_v29, %v14196_v7  ;;  %v4091_v17 = vmax.f32 %v14199_v25, %v14198_v59  ;;  %4235 = vperm.xlu1 %7687, %v11132_v1   ;;  %v14211_v10 = vld [vmem:[#allocation55_spill] sm:$0xff]  ;;  %v14212_v33 = vld [vmem:[#allocation81_spill] sm:$0xff]  ;;  %v14213_v19 = vld [vmem:[#allocation62_spill] sm:$0xff] }
 0x561   :  { %v4086_v24 = vmax.f32 %v3958_v46, %v4022_v57  ;;  %v4090_v11 = vmax.f32 %v3962_v4, %v4026_v14  ;;  %v4028_v3 = vmul.f32 0.01, %v3964_v36  ;;  %v4154_v16 = vpack.c.bf16 %v4089_v22, %v4085_v58  ;;  %v14215_v14 = vld [vmem:[#allocation68_spill] sm:$0xff] }
 0x562   :  { %4406 = vmatpush1.bf16.msra.mxu1 %v4160_v61  ;;  %v4088_v35 = vmax.f32 %v3960_v42, %v4024_v18  ;;  %v4156_v8 = vpack.c.bf16 %v4091_v17, %v4087_v54  ;;  %v3950_v52 = vadd.f32 %v14201_v48, %v14200_v39  ;;  %v3954_v28 = vadd.f32 %v14203_v49, %v14202_v41  ;;  %v14217_v18 = vld [vmem:[#allocation75_spill] sm:$0xff]  ;;  %v14219_v17 = vld [vmem:[#allocation86_spill] sm:$0xff] }
 0x563   :  { %v4155_v63 = vpack.c.bf16 %v4090_v11, %v4086_v24  ;;  %v4092_v2 = vmax.f32 %v3964_v36, %v4028_v3  ;;  %v3952_v23 = vadd.f32 %v14201_v48, %v14204_v26  ;;  %v3956_v47 = vadd.f32 %v14203_v49, %v14205_v45  ;;  %v14216_v36 = vld [vmem:[#allocation82_spill] sm:$0xff]  ;;  %v14218_v54 = vld [vmem:[#allocation83_spill] sm:$0xff]  ;;  %v14228_v26 = vld [vmem:[#allocation85_spill] sm:$0xff] }
 0x564   :  { %v4014_v62 = vmul.f32 0.01, %v3950_v52  ;;  %v4018_v53 = vmul.f32 0.01, %v3954_v28  ;;  %v4077_v60 = vmax.f32 %v14207_v56, %v14206_v38  ;;  %v4081_v5 = vmax.f32 %v14209_v20, %v14208_v40  ;;  %7689 = vset.pattern.permute.xlu1 %v14153_v6  ;;  %v14214_v6 = vld [vmem:[#allocation58_spill] sm:$0xff]  ;;  %v14231_v56 = vld [vmem:[#allocation48_spill] sm:$0xff] }
 0x565   :  { %4294 = vmatprep.subr.bf16.mxu0 %v4155_v63  ;;  %v4157_v30 = vpack.c.bf16 %v4092_v2, %v4088_v35  ;;  %v4016_v27 = vmul.f32 0.01, %v3952_v23  ;;  %v4020_v50 = vmul.f32 0.01, %v3956_v47  ;;  %v4079_v21 = vmax.f32 %v14211_v10, %v14210_v44  ;;  %4693 = vperm.xlu1 %7689, %v11150_v15   ;;  %v14220_v24 = vld [vmem:[#allocation74_spill] sm:$0xff]  ;;  %v14227_v63 = vld [vmem:[#allocation39_spill] sm:$0xff] }
 0x566   :  { %4295 = vmatpush1.bf16.msra.mxu0 %v4154_v16  ;;  %v4078_v46 = vmax.f32 %v3950_v52, %v4014_v62  ;;  %v4082_v4 = vmax.f32 %v3954_v28, %v4018_v53  ;;  %v4150_v12 = vpack.c.bf16 %v4081_v5, %v4077_v60  ;;  %v4083_v42 = vmax.f32 %v14213_v19, %v14212_v33  ;;  %v14222_v35 = vld [vmem:[#allocation90_spill] sm:$0xff]  ;;  %v14226_v28 = vld [vmem:[#allocation91_spill] sm:$0xff] }
 0x567   :  { %4407 = vmatprep.subr.bf16.mxu1 %v4157_v30  ;;  %v4080_v0 = vmax.f32 %v3952_v23, %v4016_v27  ;;  %v4084_v58 = vmax.f32 %v3956_v47, %v4020_v50  ;;  %v3814_v57 = vmul.f32 %v10802_v32, %v14214_v6  ;;  %v3946_v9 = vadd.f32 %v14216_v36, %v14215_v14  ;;  %v14221_v32 = vld [vmem:[#allocation96_spill] sm:$0xff]  ;;  %v14225_v48 = vld [vmem:[#allocation38_spill] sm:$0xff]  ;;  %v14233_v27 = vld [vmem:[#allocation59_spill] sm:$0xff] }
 0x568   :  { %4408 = vmatpush1.bf16.msra.mxu1 %v4156_v8  ;;  %v4151_v43 = vpack.c.bf16 %v4082_v4, %v4078_v46  ;;  %v4152_v22 = vpack.c.bf16 %v4083_v42, %v4079_v21  ;;  %v3816_v61 = vmul.f32 %v10818_v51, %v14214_v6  ;;  %v3948_v7 = vadd.f32 %v14216_v36, %v14217_v18  ;;  %v14223_v8 = vld [vmem:[#allocation36_spill] sm:$0xff]  ;;  %v14224_v51 = vld [vmem:[#allocation30_spill] sm:$0xff]  ;;  %v14234_v46 = vld [vmem:[#allocation35_spill] sm:$0xff] }
 0x569   :  { %v4153_v29 = vpack.c.bf16 %v4084_v58, %v4080_v0  ;;  %v3942_v59 = vadd.f32 %v14218_v54, %v3814_v57  ;;  %v4010_v25 = vmul.f32 0.01, %v3946_v9  ;;  %v4069_v11 = vmax.f32 %v14220_v24, %v14219_v17  ;;  %4697 = vperm.xlu1 %7689, %v14221_v32   ;;  %v14229_v23 = vld [vmem:[#allocation50_spill] sm:$0xff]  ;;  %v14230_v47 = vld [vmem:[#allocation92_spill] sm:$0xff]  ;;  %v14235_v42 = vld [vmem:[#allocation95_spill] sm:$0xff] }
 0x56a   :  { %4296 = vmatprep.subr.bf16.mxu0 %v4151_v43  ;;  %v3944_v3 = vadd.f32 %v14218_v54, %v3816_v61  ;;  %v4012_v16 = vmul.f32 0.01, %v3948_v7  ;;  %v4073_v39 = vmax.f32 %v14223_v8, %v14222_v35  ;;  %v4071_v52 = vmax.f32 %v14225_v48, %v14224_v51  ;;  %v14232_v60 = vld [vmem:[#allocation70_spill] sm:$0xff]  ;;  %v14236_v0 = vld [vmem:[#allocation89_spill] sm:$0xff]  ;;  %v14243_v51 = vld [vmem:[#allocation76_spill] sm:$0xff] }
 0x56b   :  { %4409 = vmatprep.subr.bf16.mxu1 %v4153_v29  ;;  %4297 = vmatpush1.bf16.msra.mxu0 %v4150_v12  ;;  %v4006_v41 = vmul.f32 0.01, %v3942_v59  ;;  %v4074_v49 = vmax.f32 %v3946_v9, %v4010_v25  ;;  %v4075_v2 = vmax.f32 %v14227_v63, %v14226_v28  ;;  %v3934_v45 = vadd.f32 %v14229_v23, %v14228_v26  ;;  %v14237_v36 = vld [vmem:[#allocation93_spill] sm:$0xff]  ;;  %v14238_v9 = vld [vmem:[#allocation40_spill] sm:$0xff]  ;;  %v14239_v18 = vld [vmem:[#allocation94_spill] sm:$0xff] }
 0x56c   :  { %v3999_v62 = vmul.f32 0.01, %v14230_v47  ;;  %4410 = vmatpush1.bf16.msra.mxu1 %v4152_v22  ;;  %v4008_v53 = vmul.f32 0.01, %v3944_v3  ;;  %v4076_v38 = vmax.f32 %v3948_v7, %v4012_v16  ;;  %v3938_v40 = vadd.f32 %v14232_v60, %v14231_v56  ;;  %v14240_v7 = vld [vmem:[#allocation88_spill] sm:$0xff]  ;;  %v7786_v48 = vld [vmem:[#allocation2 + $0x90] sm:$0xff]  }
 0x56d   :  { %v4070_v20 = vmax.f32 %v3942_v59, %v4006_v41  ;;  %v4146_v5 = vpack.c.bf16 %v4073_v39, %v4069_v11  ;;  %v3998_v30 = vmul.f32 0.01, %v3934_v45  ;;  %v3936_v50 = vadd.f32 %v14229_v23, %v14233_v27  ;;  %v14242_v39 = vld [vmem:[#allocation56_spill] sm:$0xff]  ;;  %v7790_v41 = vld [vmem:[#allocation2 + $0xb0] sm:$0xff]   ;;  %v11327_v63 = vld [vmem:[%s13480_s2 + $0x18] sm:$0xff] }
 0x56e   :  { %v4072_v44 = vmax.f32 %v3944_v3, %v4008_v53  ;;  %v4148_v10 = vpack.c.bf16 %v4075_v2, %v4071_v52  ;;  %v4002_v21 = vmul.f32 0.01, %v3938_v40  ;;  %v3940_v4 = vadd.f32 %v14232_v60, %v14234_v46  ;;  %v7784_v3 = vld [vmem:[#allocation2 + $0x80] sm:$0xff]   ;;  %v14246_v52 = vld [vmem:[#allocation21_spill] sm:$0xff] }
 0x56f   :  { %v4147_v12 = vpack.c.bf16 %v4074_v49, %v4070_v20  ;;  %v4062_v33 = vmax.f32 %v3934_v45, %v3998_v30  ;;  %v4000_v19 = vmul.f32 0.01, %v3936_v50  ;;  %v4061_v58 = vmax.f32 %v14236_v0, %v14235_v42  ;;  %v7791_v49 = vld [vmem:[#allocation2 + $0xb8] sm:$0xff]   ;;  %v14248_v28 = vld [vmem:[#allocation49_spill] sm:$0xff] }
 0x570   :  { %v4149_v6 = vpack.c.bf16 %v4076_v38, %v4072_v44  ;;  %v4066_v57 = vmax.f32 %v3938_v40, %v4002_v21  ;;  %v4004_v14 = vmul.f32 0.01, %v3940_v4  ;;  %v4065_v43 = vmax.f32 %v14238_v9, %v14237_v36  ;;  %v14249_v2 = vld [vmem:[#allocation77_spill] sm:$0xff] }
 0x571   :  { %4298 = vmatprep.subr.bf16.mxu0 %v4147_v12  ;;  %v4064_v22 = vmax.f32 %v3936_v50, %v4000_v19  ;;  %v4063_v61 = vmax.f32 %v14230_v47, %v3999_v62  ;;  %v4067_v29 = vmax.f32 %v14240_v7, %v14239_v18  ;;  %v8102_v25 = vmov 42  }
 0x572   :  { %4411 = vmatprep.subr.bf16.mxu1 %v4149_v6  ;;  %4299 = vmatpush1.bf16.msra.mxu0 %v4146_v5  ;;  %v4143_v54 = vpack.c.bf16 %v4066_v57, %v4062_v33  ;;  %v4068_v59 = vmax.f32 %v3940_v4, %v4004_v14  ;;  %v4142_v24 = vpack.c.bf16 %v4065_v43, %v4061_v58  ;;  %v8103_v16 = vmov 1  }
 0x573   :  { %4412 = vmatpush1.bf16.msra.mxu1 %v4148_v10  ;;  %7690 = vset.pattern.permute.xlu1 %v8102_v25  ;;  %v4144_v11 = vpack.c.bf16 %v4067_v29, %v4063_v61  ;;  %v14241_v35 = vmov 0   ;;  %v8104_v8 = vmov 9  }
 0x574   :  { %4300 = vmatprep.subr.bf16.mxu0 %v4143_v54  ;;  %v4145_v17 = vpack.c.bf16 %v4068_v59, %v4064_v22  ;;  %4885 = vperm.xlu1 %7690, %v11104_v37   ;;  %v7785_v37 = vld [vmem:[#allocation2 + $0x88] sm:$0xff]  }
 0x575   :  { %7691 = vset.pattern.permute.xlu0 %v8103_v16 }
 0x576   :  { %4413 = vmatprep.subr.bf16.mxu1 %v4145_v17  ;;  %4301 = vmatpush1.bf16.msra.mxu0 %v4142_v24 }
 0x577   :  { %4414 = vmatpush1.bf16.msra.mxu1 %v4144_v11  ;;  %4973 = vperm.xlu0 %7691, %v14221_v32  }
 0x578   :  { %7692 = vset.pattern.permute.xlu1 %v8103_v16 }
 0x579   :  { %4319 = vmatmul.mubr.bf16.vlgmr.msra.gmra.mxu0 %v7784_v3  ;;  %4977 = vperm.xlu1 %7692, %v11132_v1  }
 0x57a   :  { %4432 = vmatmul.mubr.bf16.vlgmr.msra.gmra.mxu1 %v7784_v3  ;;  %4328 = vmatprep.mubr.bf16.mxu0 %v14241_v35 }
 0x57b   :  { %4441 = vmatprep.mubr.bf16.mxu1 %v14241_v35  ;;  %4957 = vperm.xlu0 %7691, %v11074_v55  }
 0x57d   :  { %7693 = vset.pattern.permute.xlu1 %v8104_v8 }
 0x57e   :  { %5117 = vperm.xlu1 %7693, %v14221_v32   ;;  %v7787_v32 = vld [vmem:[#allocation2 + $0x98] sm:$0xff]  }
 0x57f   :  { %4941 = vperm.xlu0 %7691, %v14242_v39  }
 0x581   :  { %4329 = vmatmul.mubr.bf16.gmra.mxu0 %v7785_v37 }
 0x582   :  { %4442 = vmatmul.mubr.bf16.gmra.mxu1 %v7785_v37  ;;  %4338 = vmatprep.mubr.bf16.mxu0 %v14241_v35 }
 0x583   :  { %4451 = vmatprep.mubr.bf16.mxu1 %v14241_v35  ;;  %7694 = vset.pattern.permute.xlu1 %v8103_v16 }
 0x584   :  { %4965 = vperm.xlu1 %7694, %v11051_v13   ;;  %4925 = vperm.xlu0 %7691, %v14243_v51  }
 0x588   :  { %4969 = vperm.xlu1 %7694, %v11150_v15   ;;  %7704 = vset.pattern.permute.xlu0 %v8104_v8 }
 0x589   :  { %4339 = vmatmul.mubr.bf16.gmra.mxu0 %v7786_v48  ;;  %5121 = vperm.xlu0 %7704, %v11132_v1   ;;  %v7788_v1 = vld [vmem:[#allocation2 + $0xa0] sm:$0xff]  }
 0x58a   :  { %4452 = vmatmul.mubr.bf16.gmra.mxu1 %v7786_v48  ;;  %4348 = vmatprep.mubr.bf16.mxu0 %v14241_v35 }
 0x58b   :  { %4461 = vmatprep.mubr.bf16.mxu1 %v14241_v35  ;;  %v4180_v26 = vpop.permute.xlu1 %4179  ;;  %v4176_v44 = vpop.permute.xlu0 %4175 }
 0x58c   :  { %7695 = vset.pattern.permute.xlu1 %v8104_v8 }
 0x58d   :  { %5113 = vperm.xlu1 %7695, %v11150_v15   ;;  %5109 = vperm.xlu0 %7704, %v11051_v13   ;;  %v14244_v13 = vld [vmem:[#allocation51_spill] sm:$0xff]  ;;  %v7789_v15 = vld [vmem:[#allocation2 + $0xa8] sm:$0xff]  }
 0x58f   :  { %v11337_v23 = vpop.permute.xlu1 %4183  ;;  %v11367_v21 = vpop.permute.xlu0 %4187 }
 0x591   :  { %4349 = vmatmul.mubr.bf16.gmra.mxu0 %v7787_v32  ;;  %7696 = vset.pattern.permute.xlu1 %v8103_v16 }
 0x592   :  { %4462 = vmatmul.mubr.bf16.gmra.mxu1 %v7787_v32  ;;  %4358 = vmatprep.mubr.bf16.mxu0 %v14241_v35 }
 0x593   :  { %4471 = vmatprep.mubr.bf16.mxu1 %v14241_v35  ;;  %4961 = vperm.xlu1 %7696, %v10999_v31   ;;  %v11339_v45 = vpop.permute.xlu1 %4191 }
 0x594   :  { %5105 = vperm.xlu0 %7704, %v10999_v31   ;;  %v14245_v31 = vld [vmem:[#allocation78_spill] sm:$0xff]  ;;  %v4642_v14 = vpop.permute.xlu0 %4641 }
 0x597   :  { %7697 = vset.pattern.permute.xlu1 %v8104_v8 }
 0x598   :  { %5101 = vperm.xlu1 %7697, %v11074_v55   ;;  %5093 = vperm.xlu0 %7704, %v10940_v34   ;;  %v14247_v55 = vld [vmem:[#allocation45_spill] sm:$0xff]  ;;  %v11341_v47 = vpop.permute.xlu1 %4645 }
 0x599   :  { %4359 = vmatmul.mubr.bf16.gmra.mxu0 %v7788_v1 }
 0x59a   :  { %4472 = vmatmul.mubr.bf16.gmra.mxu1 %v7788_v1  ;;  %4368 = vmatprep.mubr.bf16.mxu0 %v14241_v35 }
 0x59b   :  { %4481 = vmatprep.mubr.bf16.mxu1 %v14241_v35 }
 0x59c   :  { %7698 = vset.pattern.permute.xlu1 %v8103_v16  ;;  %5089 = vperm.xlu0 %7704, %v14244_v13  }
 0x59d   :  { %4949 = vperm.xlu1 %7698, %v10940_v34   ;;  %v11307_v34 = vld [vmem:[%s13480_s2] sm:$0xff]  ;;  %v11343_v62 = vpop.permute.xlu1 %4195 }
 0x5a0   :  { %5077 = vperm.xlu0 %7704, %v14245_v31  }
 0x5a1   :  { %4369 = vmatmul.mubr.bf16.gmra.mxu0 %v7789_v15  ;;  %4953 = vperm.xlu1 %7698, %v14246_v52   ;;  %v11345_v53 = vpop.permute.xlu1 %4199 }
 0x5a2   :  { %4482 = vmatmul.mubr.bf16.gmra.mxu1 %v7789_v15  ;;  %4378 = vmatprep.mubr.bf16.mxu0 %v14241_v35 }
 0x5a3   :  { %4491 = vmatprep.mubr.bf16.mxu1 %v14241_v35 }
 0x5a4   :  { %5073 = vperm.xlu0 %7704, %v14247_v55   ;;  %v4650_v55 = vpop.permute.xlu0 %4649 }
 0x5a5   :  { %7699 = vset.pattern.permute.xlu1 %v8104_v8 }
 0x5a6   :  { %5097 = vperm.xlu1 %7699, %v14246_v52   ;;  %v11347_v38 = vpop.permute.xlu1 %4203 }
 0x5a8   :  { %5061 = vperm.xlu0 %7704, %v11307_v34  }
 0x5a9   :  { %4379 = vmatmul.mubr.bf16.gmra.mxu0 %v7790_v41 }
 0x5aa   :  { %4492 = vmatmul.mubr.bf16.gmra.mxu1 %v7790_v41  ;;  %4388 = vmatprep.mubr.bf16.mxu0 %v14241_v35 }
 0x5ab   :  { %4501 = vmatprep.mubr.bf16.mxu1 %v14241_v35  ;;  %7700 = vset.pattern.permute.xlu1 %v8103_v16  ;;  %v11349_v56 = vpop.permute.xlu1 %4661 }
 0x5ac   :  { %4945 = vperm.xlu1 %7700, %v14244_v13  }
 0x5b0   :  { %7701 = vset.pattern.permute.xlu1 %v8104_v8  ;;  %v11351_v60 = vpop.permute.xlu1 %4669 }
 0x5b1   :  { %4389 = vmatmul.mubr.bf16.gmra.mxu0 %v7791_v49  ;;  %5085 = vperm.xlu1 %7701, %v14242_v39  }
 0x5b2   :  { %4502 = vmatmul.mubr.bf16.gmra.mxu1 %v7791_v49  ;;  %5509 = vmatprep.mubr.bf16.mxu0 %v14241_v35 }
 0x5b3   :  { %5622 = vmatprep.mubr.bf16.mxu1 %v14241_v35 }
 0x5b5   :  { %7702 = vset.pattern.permute.xlu1 %v8103_v16  ;;  %v11353_v40 = vpop.permute.xlu1 %4211 }
 0x5b6   :  { %4933 = vperm.xlu1 %7702, %v14245_v31  }
 0x5ba   :  { %4937 = vperm.xlu1 %7702, %v14248_v28  }
 0x5bb   :  { %v11355_v20 = vpop.permute.xlu1 %4215 }
 0x5be   :  { %7703 = vset.pattern.permute.xlu1 %v8104_v8 }
 0x5bf   :  { %5081 = vperm.xlu1 %7703, %v14248_v28  }
 0x5c0   :  { %v11357_v5 = vpop.permute.xlu1 %4873 }
 0x5c3   :  { %7705 = vset.pattern.permute.xlu1 %v8103_v16 }
 0x5c4   :  { %4929 = vperm.xlu1 %7705, %v11327_v63  }
 0x5c6   :  { %v11359_v30 = vpop.permute.xlu1 %4673 }
 0x5c8   :  { %7706 = vset.pattern.permute.xlu1 %v8104_v8 }
 0x5c9   :  { %5069 = vperm.xlu1 %7706, %v14243_v51  }
 0x5cb   :  { %v11361_v27 = vpop.permute.xlu1 %4227 }
 0x5cd   :  { %7707 = vset.pattern.permute.xlu1 %v8103_v16 }
 0x5ce   :  { %4917 = vperm.xlu1 %7707, %v11307_v34  }
 0x5d1   :  { %v11363_v50 = vpop.permute.xlu1 %4681 }
 0x5d2   :  { %4921 = vperm.xlu1 %7707, %v14249_v2  }
 0x5d5   :  { %v11365_v10 = vpop.permute.xlu1 %4685 }
 0x5d6   :  { %7708 = vset.pattern.permute.xlu1 %v8104_v8 }
 0x5d7   :  { %5065 = vperm.xlu1 %7708, %v14249_v2  }
 0x5db   :  { %v11369_v46 = vpop.permute.xlu1 %4235 }
 0x5e0   :  { %v11371_v61 = vpop.permute.xlu1 %4693 }
 0x639   :  { %v4320_v4 = vpop.f32.mrf.mxu0 }
 0x63a   :  { %v4321_v12 = vadd.f32 %v4320_v4, %v4176_v44  ;;  %v4433_v33 = vpop.f32.mrf.mxu1 }
 0x63b   :  { %v4434_v19 = vadd.f32 %v4433_v33, %v4176_v44  ;;  %v4322_v42 = vpop.f32.mrf.mxu0 }
 0x63c   :  { %v4323_v0 = vadd.f32 %v4322_v42, %v4176_v44  ;;  %v4435_v58 = vpop.f32.mrf.mxu1  ;;  %v4512_v36 = vmul.f32 0.01, %v4321_v12 }
 0x63d   :  { %v4436_v6 = vadd.f32 %v4435_v58, %v4176_v44  ;;  %v4324_v57 = vpop.f32.mrf.mxu0  ;;  %v4514_v22 = vmul.f32 0.01, %v4434_v19  ;;  %v11377_v44 = vpop.permute.xlu1 %4697 }
 0x63e   :  { %v4325_v9 = vadd.f32 %v4324_v57, %v4180_v26  ;;  %v4437_v43 = vpop.f32.mrf.mxu1  ;;  %v4513_v29 = vmul.f32 0.01, %v4323_v0  ;;  %v4576_v16 = vmax.f32 %v4321_v12, %v4512_v36 }
 0x63f   :  { %v4438_v18 = vadd.f32 %v4437_v43, %v4180_v26  ;;  %v4326_v7 = vpop.f32.mrf.mxu0  ;;  %v4515_v54 = vmul.f32 0.01, %v4436_v6  ;;  %v4578_v48 = vmax.f32 %v4434_v19, %v4514_v22 }
 0x640   :  { %v4516_v59 = vmul.f32 0.01, %v4325_v9  ;;  %v4327_v25 = vadd.f32 %v4326_v7, %v4180_v26  ;;  %v4439_v17 = vpop.f32.mrf.mxu1  ;;  %v4577_v31 = vmax.f32 %v4323_v0, %v4513_v29  ;;  %v4704_v0 = vmul.f32 %v4642_v14, %v4576_v16 }
 0x641   :  { %v4518_v24 = vmul.f32 0.01, %v4438_v18  ;;  %v4440_v11 = vadd.f32 %v4439_v17, %v4180_v26  ;;  %v4330_v3 = vpop.f32.mrf.mxu0  ;;  %v4579_v52 = vmax.f32 %v4436_v6, %v4515_v54  ;;  %v4706_v6 = vmul.f32 %v4642_v14, %v4578_v48 }
 0x642   :  { %v4580_v37 = vmax.f32 %v4325_v9, %v4516_v59  ;;  %v4517_v8 = vmul.f32 0.01, %v4327_v25  ;;  %v4331_v39 = vadd.f32 %v4330_v3, %v11337_v23  ;;  %v4443_v51 = vpop.f32.mrf.mxu1  ;;  %v4705_v43 = vmul.f32 %v4642_v14, %v4577_v31  ;;  %v4654_v3 = vpop.permute.xlu0 %4653 }
 0x643   :  { %v4582_v32 = vmax.f32 %v4438_v18, %v4518_v24  ;;  %v4519_v1 = vmul.f32 0.01, %v4440_v11  ;;  %v4444_v13 = vadd.f32 %v4443_v51, %v11337_v23  ;;  %v4332_v15 = vpop.f32.mrf.mxu0  ;;  %v4707_v22 = vmul.f32 %v4642_v14, %v4579_v52  ;;  %v11386_v51 = vpop.permute.xlu1 %4885 }
 0x644   :  { %v4520_v41 = vmul.f32 0.01, %v4331_v39  ;;  %v4333_v49 = vadd.f32 %v4332_v15, %v11337_v23  ;;  %v4445_v28 = vpop.f32.mrf.mxu1  ;;  %v4708_v2 = vmul.f32 %v11341_v47, %v4580_v37  ;;  %v4581_v26 = vmax.f32 %v4327_v25, %v4517_v8 }
 0x645   :  { %v4522_v4 = vmul.f32 0.01, %v4444_v13  ;;  %v4446_v12 = vadd.f32 %v4445_v28, %v11337_v23  ;;  %v4334_v33 = vpop.f32.mrf.mxu0  ;;  %v4710_v19 = vmul.f32 %v11341_v47, %v4582_v32  ;;  %v4583_v57 = vmax.f32 %v4440_v11, %v4519_v1 }
 0x646   :  { %v4521_v42 = vmul.f32 0.01, %v4333_v49  ;;  %v4447_v58 = vpop.f32.mrf.mxu1  ;;  %v4584_v18 = vmax.f32 %v4331_v39, %v4520_v41  ;;  %v4335_v7 = vadd.f32 %v4334_v33, %v11367_v21  ;;  %v4768_v54 = vadd.f32 %v4708_v2, %v4704_v0 }
 0x647   :  { %v4523_v36 = vmul.f32 0.01, %v4446_v12  ;;  %v4336_v9 = vpop.f32.mrf.mxu0  ;;  %v4709_v59 = vmul.f32 %v11341_v47, %v4581_v26  ;;  %v4586_v23 = vmax.f32 %v4444_v13, %v4522_v4  ;;  %v4448_v25 = vadd.f32 %v4447_v58, %v11367_v21 }
 0x648   :  { %v4449_v29 = vpop.f32.mrf.mxu1  ;;  %v4794_v24 = vadd.f32 %v4710_v19, %v4706_v6  ;;  %v4585_v16 = vmax.f32 %v4333_v49, %v4521_v42  ;;  %v4524_v37 = vmul.f32 0.01, %v4335_v7  ;;  %v4337_v11 = vadd.f32 %v4336_v9, %v11367_v21 }
 0x649   :  { %v4340_v17 = vpop.f32.mrf.mxu0  ;;  %v4711_v14 = vmul.f32 %v11341_v47, %v4583_v57  ;;  %v4587_v39 = vmax.f32 %v4446_v12, %v4523_v36  ;;  %v4526_v48 = vmul.f32 0.01, %v4448_v25  ;;  %v4450_v32 = vadd.f32 %v4449_v29, %v11367_v21 }
 0x64a   :  { %v4453_v8 = vpop.f32.mrf.mxu1  ;;  %v4712_v13 = vmul.f32 %v4650_v55, %v4584_v18  ;;  %v4588_v15 = vmax.f32 %v4335_v7, %v4524_v37  ;;  %v4525_v31 = vmul.f32 0.01, %v4337_v11  ;;  %v4341_v52 = vadd.f32 %v4340_v17, %v11339_v45  ;;  %v4658_v18 = vpop.permute.xlu0 %4657 }
 0x64b   :  { %v4342_v1 = vpop.f32.mrf.mxu0  ;;  %v4714_v49 = vmul.f32 %v4650_v55, %v4586_v23  ;;  %v4590_v28 = vmax.f32 %v4448_v25, %v4526_v48  ;;  %v4527_v2 = vmul.f32 0.01, %v4450_v32  ;;  %v4454_v26 = vadd.f32 %v4453_v8, %v11339_v45  ;;  %v11393_v37 = vpop.permute.xlu1 %4977 }
 0x64c   :  { %v4455_v41 = vpop.f32.mrf.mxu1  ;;  %v4713_v47 = vmul.f32 %v4650_v55, %v4585_v16  ;;  %v4589_v12 = vmax.f32 %v4337_v11, %v4525_v31  ;;  %v4528_v33 = vmul.f32 0.01, %v4341_v52  ;;  %v4343_v19 = vadd.f32 %v4342_v1, %v11339_v45 }
 0x64d   :  { %v4344_v4 = vpop.f32.mrf.mxu0  ;;  %v4715_v21 = vmul.f32 %v4650_v55, %v4587_v39  ;;  %v4591_v58 = vmax.f32 %v4450_v32, %v4527_v2  ;;  %v4530_v0 = vmul.f32 0.01, %v4454_v26  ;;  %v4456_v6 = vadd.f32 %v4455_v41, %v11339_v45 }
 0x64e   :  { %v4457_v42 = vpop.f32.mrf.mxu1  ;;  %v4781_v36 = vadd.f32 %v4709_v59, %v4705_v43  ;;  %v4807_v9 = vadd.f32 %v4711_v14, %v4707_v22  ;;  %v4716_v7 = vmul.f32 %v4654_v3, %v4588_v15  ;;  %v4529_v29 = vmul.f32 0.01, %v4343_v19 }
 0x64f   :  { %v4346_v57 = vpop.f32.mrf.mxu0  ;;  %v4769_v25 = vadd.f32 %v4768_v54, %v4712_v13  ;;  %v4795_v17 = vadd.f32 %v4794_v24, %v4714_v49  ;;  %v4718_v16 = vmul.f32 %v4654_v3, %v4590_v28  ;;  %v4531_v11 = vmul.f32 0.01, %v4456_v6 }
 0x650   :  { %v4459_v23 = vpop.f32.mrf.mxu1  ;;  %v4782_v48 = vadd.f32 %v4781_v36, %v4713_v47  ;;  %v4717_v55 = vmul.f32 %v4654_v3, %v4589_v12  ;;  %v4592_v39 = vmax.f32 %v4341_v52, %v4528_v33  ;;  %v4345_v32 = vadd.f32 %v4344_v4, %v11343_v62  ;;  %v4666_v47 = vpop.permute.xlu0 %4665 }
 0x651   :  { %v4350_v8 = vpop.f32.mrf.mxu0  ;;  %v4808_v1 = vadd.f32 %v4807_v9, %v4715_v21  ;;  %v4719_v43 = vmul.f32 %v4654_v3, %v4591_v58  ;;  %v4594_v22 = vmax.f32 %v4454_v26, %v4530_v0  ;;  %v4458_v59 = vadd.f32 %v4457_v42, %v11343_v62 }
 0x652   :  { %v4463_v45 = vpop.f32.mrf.mxu1  ;;  %v4770_v15 = vadd.f32 %v4769_v25, %v4716_v7  ;;  %v4593_v54 = vmax.f32 %v4343_v19, %v4529_v29  ;;  %v4532_v24 = vmul.f32 0.01, %v4345_v32  ;;  %v4347_v13 = vadd.f32 %v4346_v57, %v11343_v62  ;;  %v11400_v19 = vpop.permute.xlu1 %5117 }
 0x653   :  { %v4352_v14 = vpop.f32.mrf.mxu0  ;;  %v4796_v41 = vadd.f32 %v4795_v17, %v4718_v16  ;;  %v4595_v49 = vmax.f32 %v4456_v6, %v4531_v11  ;;  %v4534_v28 = vmul.f32 0.01, %v4458_v59  ;;  %v4460_v52 = vadd.f32 %v4459_v23, %v11343_v62 }
 0x654   :  { %v4465_v31 = vpop.f32.mrf.mxu1  ;;  %v4783_v4 = vadd.f32 %v4782_v48, %v4717_v55  ;;  %v4720_v12 = vmul.f32 %v4658_v18, %v4592_v39  ;;  %v4533_v3 = vmul.f32 0.01, %v4347_v13  ;;  %v4351_v26 = vadd.f32 %v4350_v8, %v11345_v53 }
 0x655   :  { %v4354_v2 = vpop.f32.mrf.mxu0  ;;  %v4809_v42 = vadd.f32 %v4808_v1, %v4719_v43  ;;  %v4722_v21 = vmul.f32 %v4658_v18, %v4594_v22  ;;  %v4535_v58 = vmul.f32 0.01, %v4460_v52  ;;  %v4464_v0 = vadd.f32 %v4463_v45, %v11345_v53 }
 0x656   :  { %v4467_v33 = vpop.f32.mrf.mxu1  ;;  %v4721_v6 = vmul.f32 %v4658_v18, %v4593_v54  ;;  %v4596_v36 = vmax.f32 %v4345_v32, %v4532_v24  ;;  %v4536_v9 = vmul.f32 0.01, %v4351_v26  ;;  %v4353_v62 = vadd.f32 %v4352_v14, %v11345_v53  ;;  %v11405_v24 = vpop.permute.xlu0 %4677 }
 0x657   :  { %v4356_v57 = vpop.f32.mrf.mxu0  ;;  %v4723_v29 = vmul.f32 %v4658_v18, %v4595_v49  ;;  %v4598_v23 = vmax.f32 %v4458_v59, %v4534_v28  ;;  %v4538_v25 = vmul.f32 0.01, %v4464_v0  ;;  %v4466_v17 = vadd.f32 %v4465_v31, %v11345_v53  ;;  %v11412_v31 = vpop.permute.xlu1 %4965 }
 0x658   :  { %v4469_v7 = vpop.f32.mrf.mxu1  ;;  %v4771_v11 = vadd.f32 %v4770_v15, %v4720_v12  ;;  %v4597_v8 = vmax.f32 %v4347_v13, %v4533_v3  ;;  %v4600_v48 = vmax.f32 %v4351_v26, %v4536_v9  ;;  %v4537_v55 = vmul.f32 0.01, %v4353_v62 }
 0x659   :  { %v4360_v16 = vpop.f32.mrf.mxu0  ;;  %v4797_v1 = vadd.f32 %v4796_v41, %v4722_v21  ;;  %v4599_v45 = vmax.f32 %v4460_v52, %v4535_v58  ;;  %v4602_v43 = vmax.f32 %v4464_v0, %v4538_v25  ;;  %v4539_v22 = vmul.f32 0.01, %v4466_v17 }
 0x65a   :  { %v4473_v39 = vpop.f32.mrf.mxu1  ;;  %v4784_v54 = vadd.f32 %v4783_v4, %v4721_v6  ;;  %v4724_v18 = vmul.f32 %v11349_v56, %v4596_v36  ;;  %v4601_v59 = vmax.f32 %v4353_v62, %v4537_v55  ;;  %v4355_v14 = vadd.f32 %v4354_v2, %v11347_v38 }
 0x65b   :  { %v4362_v32 = vpop.f32.mrf.mxu0  ;;  %v4810_v15 = vadd.f32 %v4809_v42, %v4723_v29  ;;  %v4726_v13 = vmul.f32 %v11349_v56, %v4598_v23  ;;  %v4603_v41 = vmax.f32 %v4466_v17, %v4539_v22  ;;  %v4468_v49 = vadd.f32 %v4467_v33, %v11347_v38 }
 0x65c   :  { %v11409_v53 = vpop.f32.mrf.mxu1  ;;  %v4725_v52 = vmul.f32 %v11349_v56, %v4597_v8  ;;  %v4728_v4 = vmul.f32 %v4666_v47, %v4600_v48  ;;  %v4540_v12 = vmul.f32 0.01, %v4355_v14  ;;  %v4357_v3 = vadd.f32 %v4356_v57, %v11347_v38  ;;  %v4208_v48 = vpop.permute.xlu0 %4207 }
 0x65d   :  { %v4364_v28 = vpop.f32.mrf.mxu0  ;;  %v4727_v2 = vmul.f32 %v11349_v56, %v4599_v45  ;;  %v4730_v21 = vmul.f32 %v4666_v47, %v4602_v43  ;;  %v4542_v58 = vmul.f32 0.01, %v4468_v49  ;;  %v4470_v42 = vadd.f32 %v4469_v7, %v11347_v38 }
 0x65e   :  { %v4477_v26 = vpop.f32.mrf.mxu1  ;;  %v4772_v6 = vadd.f32 %v4771_v11, %v4724_v18  ;;  %v4729_v36 = vmul.f32 %v4666_v47, %v4601_v59  ;;  %v4604_v9 = vmax.f32 %v4355_v14, %v4540_v12  ;;  %v4541_v62 = vmul.f32 0.01, %v4357_v3  ;;  %v11424_v11 = vpop.permute.xlu1 %4969 }
 0x65f   :  { %v4366_v0 = vpop.f32.mrf.mxu0  ;;  %v4798_v29 = vadd.f32 %v4797_v1, %v4726_v13  ;;  %v4731_v23 = vmul.f32 %v4666_v47, %v4603_v41  ;;  %v4606_v25 = vmax.f32 %v4468_v49, %v4542_v58  ;;  %v4543_v17 = vmul.f32 0.01, %v4470_v42 }
 0x660   :  { %v4479_v33 = vpop.f32.mrf.mxu1  ;;  %v4785_v57 = vadd.f32 %v4784_v54, %v4725_v52  ;;  %v4773_v55 = vadd.f32 %v4772_v6, %v4728_v4  ;;  %v4732_v56 = vmul.f32 %v11351_v60, %v4604_v9  ;;  %v4605_v45 = vmax.f32 %v4357_v3, %v4541_v62 }
 0x661   :  { %v11419_v8 = vpop.f32.mrf.mxu0  ;;  %v4811_v38 = vadd.f32 %v4810_v15, %v4727_v2  ;;  %v4799_v7 = vadd.f32 %v4798_v29, %v4730_v21  ;;  %v4734_v22 = vmul.f32 %v11351_v60, %v4606_v25  ;;  %v4607_v1 = vmax.f32 %v4470_v42, %v4543_v17  ;;  %v11433_v21 = vpop.permute.xlu0 %4219 }
 0x662   :  { %v11422_v43 = vpop.f32.mrf.mxu1  ;;  %v4786_v47 = vadd.f32 %v4785_v57, %v4729_v36  ;;  %v4774_v18 = vadd.f32 %v4773_v55, %v4732_v56  ;;  %v4733_v59 = vmul.f32 %v11351_v60, %v4605_v45  ;;  %v4361_v14 = vadd.f32 %v4360_v16, %v4208_v48  ;;  %v11435_v62 = vpop.permute.xlu1 %5113 }
 0x663   :  { %v4812_v54 = vadd.f32 %v4811_v38, %v4731_v23  ;;  %v4800_v13 = vadd.f32 %v4799_v7, %v4734_v22  ;;  %v4735_v41 = vmul.f32 %v11351_v60, %v4607_v1  ;;  %v11429_v49 = vpop.f32.mrf.mxu0  ;;  %v4474_v2 = vadd.f32 %v4473_v39, %v4208_v48  ;;  %14250 = vst [vmem:[#allocation22_spill] sm:$0xff] %v11435_v62 }
 0x664   :  { %v4775_v52 = vrot.slane %v4774_v18, 4  ;;  %v4787_v4 = vadd.f32 %v4786_v47, %v4733_v59  ;;  %v11431_v15 = vpop.f32.mrf.mxu1  ;;  %v4544_v6 = vmul.f32 0.01, %v4361_v14  ;;  %v4363_v36 = vadd.f32 %v4362_v32, %v4208_v48 }
 0x665   :  { %v4801_v12 = vrot.slane %v4800_v13, 4  ;;  %v4813_v3 = vadd.f32 %v4812_v54, %v4735_v41  ;;  %v4365_v60 = vadd.f32 %v4364_v28, %v11353_v40  ;;  %v4374_v29 = vpop.f32.mrf.mxu0  ;;  %v4478_v17 = vadd.f32 %v4477_v26, %v11353_v40 }
 0x666   :  { %v4776_v58 = vadd.f32 %v4775_v52, %v4774_v18  ;;  %v4788_v42 = vrot.slane %v4787_v4, 4  ;;  %v4367_v57 = vadd.f32 %v4366_v0, %v11353_v40  ;;  %v4487_v39 = vpop.f32.mrf.mxu1  ;;  %v4546_v45 = vmul.f32 0.01, %v4474_v2  ;;  %v11444_v0 = vpop.permute.xlu0 %4223 }
 0x667   :  { %v4802_v16 = vadd.f32 %v4801_v12, %v4800_v13  ;;  %v4814_v9 = vrot.slane %v4813_v3, 4  ;;  %v11441_v38 = vadd.f32 %v11409_v53, %v4208_v48  ;;  %v4608_v22 = vmax.f32 %v4361_v14, %v4544_v6  ;;  %v4376_v54 = vpop.f32.mrf.mxu0 }
 0x668   :  { %v4777_v23 = vrot.slane %v4776_v58, 2  ;;  %v4789_v25 = vadd.f32 %v4788_v42, %v4787_v4  ;;  %v4545_v1 = vmul.f32 0.01, %v4363_v36  ;;  %v4548_v18 = vmul.f32 0.01, %v4365_v60  ;;  %v4489_v4 = vpop.f32.mrf.mxu1 }
 0x669   :  { %v4803_v55 = vrot.slane %v4802_v16, 2  ;;  %v4815_v56 = vadd.f32 %v4814_v9, %v4813_v3  ;;  %v4480_v59 = vadd.f32 %v4479_v33, %v11353_v40  ;;  %v4550_v41 = vmul.f32 0.01, %v4478_v17  ;;  %v11447_v3 = vpop.permute.xlu1 %4961 }
 0x66a   :  { %v4778_v32 = vadd.f32 %v4777_v23, %v4776_v58  ;;  %v4790_v7 = vrot.slane %v4789_v25, 2  ;;  %v4549_v52 = vmul.f32 0.01, %v4367_v57  ;;  %v4610_v53 = vmax.f32 %v4474_v2, %v4546_v45  ;;  %v4380_v23 = vpop.f32.mrf.mxu0  ;;  %v4493_v2 = vpop.f32.mrf.mxu1 }
 0x66b   :  { %v4804_v47 = vadd.f32 %v4803_v55, %v4802_v16  ;;  %v4816_v28 = vrot.slane %v4815_v56, 2  ;;  %v4547_v48 = vmul.f32 0.01, %v11441_v38  ;;  %v4736_v42 = vmul.f32 %v11359_v30, %v4608_v22  ;;  %v11459_v22 = vpop.permute.xlu0 %4231 }
 0x66c   :  { %v4779_v26 = vrot.slane %v4778_v32, 1  ;;  %v4791_v13 = vadd.f32 %v4790_v7, %v4789_v25  ;;  %v4609_v6 = vmax.f32 %v4363_v36, %v4545_v1  ;;  %v4612_v16 = vmax.f32 %v4365_v60, %v4548_v18 }
 0x66d   :  { %v4805_v12 = vrot.slane %v4804_v47, 1  ;;  %v4817_v33 = vadd.f32 %v4816_v28, %v4815_v56  ;;  %v4551_v9 = vmul.f32 0.01, %v4480_v59  ;;  %v4614_v7 = vmax.f32 %v4478_v17, %v4550_v41  ;;  %v11464_v28 = vpop.permute.xlu1 %5101  ;;  %v4495_v41 = vpop.f32.mrf.mxu1 }
 0x66e   :  { %v4780_v14 = vadd.f32 %v4779_v26, %v4778_v32  ;;  %v4792_v58 = vrot.slane %v4791_v13, 1  ;;  %v4613_v62 = vmax.f32 %v4367_v57, %v4549_v52  ;;  %v4738_v35 = vmul.f32 %v11359_v30, %v4610_v53 }
 0x66f   :  { %v4806_v40 = vadd.f32 %v4805_v12, %v4804_v47  ;;  %v4371_v32 = vadd.f32 %v11419_v8, %v11355_v20  ;;  %v4484_v36 = vadd.f32 %v11422_v43, %v11355_v20  ;;  %v4611_v56 = vmax.f32 %v11441_v38, %v4547_v48  ;;  %v4382_v43 = vpop.f32.mrf.mxu0 }
 0x670   :  { %v4876_v25 = vadd.f32 %v11357_v5, %v4780_v14  ;;  %v4793_v55 = vadd.f32 %v4792_v58, %v4791_v13  ;;  %v4373_v17 = vadd.f32 %v11429_v49, %v11355_v20  ;;  %v4818_v57 = vrot.slane %v4817_v33, 1 }
 0x671   :  { %v4878_v45 = vadd.f32 %v11357_v5, %v4806_v40  ;;  %v4737_v1 = vmul.f32 %v11359_v30, %v4609_v6  ;;  %v4615_v47 = vmax.f32 %v4480_v59, %v4551_v9  ;;  %v4486_v8 = vadd.f32 %v11431_v15, %v11355_v20  ;;  %v11477_v40 = vpop.permute.xlu0 %4689 }
 0x672   :  { %7864 = vtanh.f32 %v4876_v25  ;;  %v4877_v60 = vadd.f32 %v11357_v5, %v4793_v55  ;;  %v4740_v18 = vmul.f32 %v11405_v24, %v4612_v16  ;;  %v4742_v26 = vmul.f32 %v11405_v24, %v4614_v7 }
 0x673   :  { %v4741_v38 = vmul.f32 %v11405_v24, %v4613_v62  ;;  %v4375_v13 = vadd.f32 %v4374_v29, %v11433_v21  ;;  %7866 = vtanh.f32 %v4878_v45  ;;  %v4552_v49 = vmul.f32 0.01, %v4371_v32  ;;  %v4384_v62 = vpop.f32.mrf.mxu0  ;;  %v11479_v45 = vpop.permute.xlu1 %4949 }
 0x674   :  { %v4554_v52 = vmul.f32 0.01, %v4484_v36  ;;  %v4488_v59 = vadd.f32 %v4487_v39, %v11433_v21  ;;  %7868 = vtanh.f32 %v4877_v60  ;;  %v4553_v12 = vmul.f32 0.01, %v4373_v17  ;;  %v4497_v39 = vpop.f32.mrf.mxu1 }
 0x675   :  { %v4555_v53 = vmul.f32 0.01, %v4486_v8  ;;  %v4377_v20 = vadd.f32 %v4376_v54, %v11433_v21  ;;  %v4819_v15 = vadd.f32 %v4818_v57, %v4817_v33  ;;  %v4743_v48 = vmul.f32 %v11405_v24, %v4615_v47  ;;  %v4386_v57 = vpop.f32.mrf.mxu0 }
 0x676   :  { %v4556_v14 = vmul.f32 0.01, %v4375_v13  ;;  %v4490_v58 = vadd.f32 %v4489_v4, %v11433_v21  ;;  %v4739_v29 = vmul.f32 %v11359_v30, %v4611_v56  ;;  %v4820_v6 = vadd.f32 %v4740_v18, %v4736_v42 }
 0x677   :  { %v4558_v16 = vmul.f32 0.01, %v4488_v59  ;;  %v4557_v9 = vmul.f32 0.01, %v4377_v20  ;;  %v4846_v25 = vadd.f32 %v4742_v26, %v4738_v35  ;;  %v4833_v55 = vadd.f32 %v4741_v38, %v4737_v1  ;;  %v4499_v1 = vpop.f32.mrf.mxu1 }
 0x678   :  { %v4616_v7 = vmax.f32 %v4371_v32, %v4552_v49  ;;  %v4559_v54 = vmul.f32 0.01, %v4490_v58  ;;  %v4618_v33 = vmax.f32 %v4484_v36, %v4554_v52  ;;  %v4617_v24 = vmax.f32 %v4373_v17, %v4553_v12  ;;  %v11496_v52 = vpop.permute.xlu1 %4953 }
 0x679   :  { %v4619_v60 = vmax.f32 %v4486_v8, %v4555_v53  ;;  %v4381_v21 = vadd.f32 %v4380_v23, %v11444_v0  ;;  %v4879_v4 = vadd.f32 %v11357_v5, %v4819_v15  ;;  %v4859_v30 = vadd.f32 %v4743_v48, %v4739_v29  ;;  %v4503_v48 = vpop.f32.mrf.mxu1 }
 0x67a   :  { %v4620_v42 = vmax.f32 %v4375_v13, %v4556_v14  ;;  %v4494_v56 = vadd.f32 %v4493_v2, %v11444_v0  ;;  %v4622_v47 = vmax.f32 %v4488_v59, %v4558_v16  ;;  %v4621_v18 = vmax.f32 %v4377_v20, %v4557_v9  ;;  %v11490_v2 = vpop.permute.xlu0 %4701 }
 0x67b   :  { %v4623_v35 = vmax.f32 %v4490_v58, %v4559_v54  ;;  %v4383_v32 = vadd.f32 %v4382_v43, %v11444_v0  ;;  %v4744_v26 = vmul.f32 %v11363_v50, %v4616_v7  ;;  %v4560_v36 = vmul.f32 0.01, %v4381_v21 }
 0x67c   :  { %v4562_v17 = vmul.f32 0.01, %v4494_v56  ;;  %v4496_v8 = vadd.f32 %v4495_v41, %v11444_v0  ;;  %v4746_v23 = vmul.f32 %v11363_v50, %v4618_v33  ;;  %v4745_v5 = vmul.f32 %v11363_v50, %v4617_v24  ;;  %v4390_v41 = vpop.f32.mrf.mxu0 }
 0x67d   :  { %v4747_v38 = vmul.f32 %v11363_v50, %v4619_v60  ;;  %v4385_v13 = vadd.f32 %v4384_v62, %v11361_v27  ;;  %v4748_v43 = vmul.f32 %v11365_v10, %v4620_v42  ;;  %v4561_v59 = vmul.f32 0.01, %v4383_v32 }
 0x67e   :  { %v4563_v12 = vmul.f32 0.01, %v4496_v8  ;;  %v4498_v0 = vadd.f32 %v4497_v39, %v11361_v27  ;;  %v4750_v53 = vmul.f32 %v11365_v10, %v4622_v47  ;;  %v4749_v20 = vmul.f32 %v11365_v10, %v4621_v18 }
 0x67f   :  { %v11493_v49 = vpop.eup %7864  ;;  %v4751_v50 = vmul.f32 %v11365_v10, %v4623_v35  ;;  %v4564_v15 = vmul.f32 0.01, %v4385_v13  ;;  %v4821_v14 = vadd.f32 %v4820_v6, %v4744_v26  ;;  %v4624_v58 = vmax.f32 %v4381_v21, %v4560_v36  ;;  %v4392_v10 = vpop.f32.mrf.mxu0 }
 0x680   :  { %14251 = vst [vmem:[#allocation60_spill] sm:$0xff] %v11493_v49  ;;  %v4626_v62 = vmax.f32 %v4494_v56, %v4562_v17  ;;  %v4566_v29 = vmul.f32 0.01, %v4498_v0  ;;  %v11502_v16 = vpop.eup %7866  ;;  %v4896_v9 = vsub.f32 0.0, %v11493_v49  ;;  %v4847_v7 = vadd.f32 %v4846_v25, %v4746_v23  ;;  %v4505_v56 = vpop.f32.mrf.mxu1 }
 0x681   :  { %14252 = vst [vmem:[#allocation66_spill] sm:$0xff] %v11502_v16  ;;  %v4834_v54 = vadd.f32 %v4833_v55, %v4745_v5  ;;  %v4860_v39 = vadd.f32 %v4859_v30, %v4747_v38  ;;  %v11505_v33 = vpop.eup %7868  ;;  %7870 = vtanh.f32 %v4879_v4  ;;  %v4822_v24 = vadd.f32 %v4821_v14, %v4748_v43  ;;  %v11508_v26 = vpop.permute.xlu0 %4973 }
 0x682   :  { %14253 = vst [vmem:[#allocation27_spill] sm:$0xff] %v11505_v33  ;;  %v4625_v60 = vmax.f32 %v4383_v32, %v4561_v59  ;;  %v4627_v42 = vmax.f32 %v4496_v8, %v4563_v12  ;;  %v4848_v47 = vadd.f32 %v4847_v7, %v4750_v53  ;;  %v4628_v21 = vmax.f32 %v4385_v13, %v4564_v15  ;;  %v11512_v30 = vpop.permute.xlu1 %5097  ;;  %v4394_v43 = vpop.f32.mrf.mxu0 }
 0x683   :  { %v4835_v18 = vadd.f32 %v4834_v54, %v4749_v20  ;;  %v4861_v6 = vadd.f32 %v4860_v39, %v4751_v50  ;;  %v4898_v35 = vsub.f32 0.0, %v11502_v16  ;;  %v4752_v25 = vmul.f32 %v11477_v40, %v4624_v58  ;;  %14254 = vst [vmem:[#allocation47_spill] sm:$0xff] %v11512_v30  ;;  %v4507_v20 = vpop.f32.mrf.mxu1 }
 0x684   :  { %v4754_v55 = vmul.f32 %v11477_v40, %v4626_v62  ;;  %v4630_v4 = vmax.f32 %v4498_v0, %v4566_v29  ;;  %v11514_v36 = vmul.f32 1.442695, %v4896_v9  ;;  %v4897_v32 = vsub.f32 0.0, %v11505_v33 }
 0x685   :  { %v4387_v17 = vadd.f32 %v4386_v57, %v11361_v27  ;;  %v4500_v8 = vadd.f32 %v4499_v1, %v11361_v27  ;;  %v4753_v23 = vmul.f32 %v11477_v40, %v4625_v60  ;;  %v4755_v5 = vmul.f32 %v11477_v40, %v4627_v42 }
 0x686   :  { %v4391_v38 = vadd.f32 %v4390_v41, %v11459_v22  ;;  %v4504_v13 = vadd.f32 %v4503_v48, %v11459_v22  ;;  %v4756_v59 = vmul.f32 %v11371_v61, %v4628_v21  ;;  %v4393_v53 = vadd.f32 %v4392_v10, %v11459_v22  ;;  %v11528_v48 = vpop.permute.xlu0 %4957  ;;  %v11530_v58 = vpop.permute.xlu1 %4945 }
 0x687   :  { %v4565_v12 = vmul.f32 0.01, %v4387_v17  ;;  %v4567_v0 = vmul.f32 0.01, %v4500_v8  ;;  %v4758_v57 = vmul.f32 %v11371_v61, %v4630_v4  ;;  %v4506_v1 = vadd.f32 %v4505_v56, %v11459_v22  ;;  %v4396_v4 = vpop.f32.mrf.mxu0 }
 0x688   :  { %v4568_v50 = vmul.f32 0.01, %v4391_v38  ;;  %v4570_v27 = vmul.f32 0.01, %v4504_v13  ;;  %v4569_v14 = vmul.f32 0.01, %v4393_v53  ;;  %v4395_v41 = vadd.f32 %v4394_v43, %v11369_v46 }
 0x689   :  { %v4629_v15 = vmax.f32 %v4387_v17, %v4565_v12  ;;  %v4631_v40 = vmax.f32 %v4500_v8, %v4567_v0  ;;  %v4571_v9 = vmul.f32 0.01, %v4506_v1  ;;  %v4508_v7 = vadd.f32 %v4507_v20, %v11369_v46  ;;  %v4509_v17 = vpop.f32.mrf.mxu1 }
 0x68a   :  { %v4632_v62 = vmax.f32 %v4391_v38, %v4568_v50  ;;  %v4634_v29 = vmax.f32 %v4504_v13, %v4570_v27  ;;  %v4823_v54 = vadd.f32 %v4822_v24, %v4752_v25  ;;  %v4849_v39 = vadd.f32 %v4848_v47, %v4754_v55  ;;  %v11542_v20 = vpop.permute.xlu0 %4941 }
 0x68b   :  { %v4836_v60 = vadd.f32 %v4835_v18, %v4753_v23  ;;  %v4572_v42 = vmul.f32 0.01, %v4395_v41  ;;  %v4633_v21 = vmax.f32 %v4393_v53, %v4569_v14  ;;  %v4574_v56 = vmul.f32 0.01, %v4508_v7  ;;  %14256 = vst [vmem:[#allocation71_spill] sm:$0xff] %v11542_v20 }
 0x68c   :  { %v4760_v22 = vmul.f32 %v11377_v44, %v4632_v62  ;;  %v4762_v10 = vmul.f32 %v11377_v44, %v4634_v29  ;;  %v4862_v8 = vadd.f32 %v4861_v6, %v4755_v5  ;;  %v4824_v43 = vadd.f32 %v4823_v54, %v4756_v59  ;;  %v11545_v59 = vpop.permute.xlu1 %5085  ;;  %v7991_v62 = vld [vmem:[%s13480_s2 + $0x8] sm:$0xff] }
 0x68d   :  { %v4635_v12 = vmax.f32 %v4506_v1, %v4571_v9  ;;  %v4636_v38 = vmax.f32 %v4395_v41, %v4572_v42  ;;  %v4850_v13 = vadd.f32 %v4849_v39, %v4758_v57  ;;  %v4757_v0 = vmul.f32 %v11371_v61, %v4629_v15  ;;  %14257 = vst [vmem:[#allocation57_spill] sm:$0xff] %v11545_v59 }
 0x68e   :  { %v4759_v24 = vmul.f32 %v11371_v61, %v4631_v40  ;;  %v4638_v47 = vmax.f32 %v4508_v7, %v4574_v56  ;;  %v11537_v18 = vpop.eup %7870  ;;  %v4825_v25 = vadd.f32 %v4824_v43, %v4760_v22  ;;  %v4397_v23 = vadd.f32 %v4396_v4, %v11369_v46 }
 0x68f   :  { %14255 = vst [vmem:[#allocation84_spill] sm:$0xff] %v11537_v18  ;;  %v4764_v55 = vmul.f32 %v11490_v2, %v4636_v38  ;;  %v4510_v53 = vadd.f32 %v4509_v17, %v11369_v46  ;;  %v4851_v6 = vadd.f32 %v4850_v13, %v4762_v10  ;;  %v4761_v5 = vmul.f32 %v11377_v44, %v4633_v21  ;;  %v11563_v21 = vpop.permute.xlu0 %4925 }
 0x690   :  { %v4766_v57 = vmul.f32 %v11490_v2, %v4638_v47  ;;  %v4763_v61 = vmul.f32 %v11377_v44, %v4635_v12  ;;  %v4573_v27 = vmul.f32 0.01, %v4397_v23  ;;  %v13711_v15 = vmov 17   ;;  %14258 = vst [vmem:[#allocation29_spill] sm:$0xff] %v11563_v21  ;;  %v11565_v56 = vpop.permute.xlu1 %4933 }
 0x691   :  { %v4826_v50 = vadd.f32 %v4825_v25, %v4764_v55  ;;  %v4575_v1 = vmul.f32 0.01, %v4510_v53  ;;  %7710 = vset.pattern.permute.xlu1 %v13711_v15  ;;  %7709 = vset.pattern.permute.xlu0 %v13711_v15  ;;  %v4904_v46 = vmul.f32 1.442695, %v4898_v35  ;;  %v4899_v40 = vsub.f32 0.0, %v11537_v18  ;;  %v11584_v55 = vld [vmem:[%s13480_s2] sm:$0xff] }
 0x692   :  { %v4837_v14 = vadd.f32 %v4836_v60, %v4757_v0  ;;  %v4852_v41 = vadd.f32 %v4851_v6, %v4766_v57  ;;  %5370 = vperm.xlu1 %7710, %v7991_v62   ;;  %5366 = vperm.xlu0 %7709, %v11307_v34   ;;  %v4863_v44 = vadd.f32 %v4862_v8, %v4759_v24  ;;  %7872 = vpow2.f32 %v11514_v36  ;;  %v11570_v36 = vld [vmem:[%s13480_s2 + $0x10] sm:$0xff]  ;;  %v11577_v0 = vld [vmem:[%s13480_s2 + $0x20] sm:$0xff] }
 0x693   :  { %v4827_v29 = vrot.slane %v4826_v50, 4  ;;  %v4637_v9 = vmax.f32 %v4397_v23, %v4573_v27  ;;  %v4639_v7 = vmax.f32 %v4510_v53, %v4575_v1  ;;  %7874 = vpow2.f32 %v4904_v46  ;;  %14259 = vst [vmem:[#allocation28_spill] sm:$0xff] %v11570_v36  ;;  %14260 = vst [vmem:[#allocation73_spill] sm:$0xff] %v11577_v0  ;;  %v11587_v53 = vpop.permute.xlu0 %5121 }
 0x694   :  { %v4838_v54 = vadd.f32 %v4837_v14, %v4761_v5  ;;  %v4853_v39 = vrot.slane %v4852_v41, 4  ;;  %v4864_v35 = vadd.f32 %v4863_v44, %v4763_v61  ;;  %v4902_v10 = vmul.f32 1.442695, %v4897_v32  ;;  %14261 = vst [vmem:[#allocation79_spill] sm:$0xff] %v11584_v55  ;;  %v11589_v6 = vpop.permute.xlu1 %4937 }
 0x695   :  { %v4828_v42 = vadd.f32 %v4827_v29, %v4826_v50  ;;  %v4765_v60 = vmul.f32 %v11490_v2, %v4637_v9  ;;  %v4767_v22 = vmul.f32 %v11490_v2, %v4639_v7  ;;  %v4906_v4 = vmul.f32 1.442695, %v4899_v40  ;;  %v14263_v7 = vld [vmem:[#allocation63_spill] sm:$0xff] }
 0x696   :  { %v4854_v34 = vadd.f32 %v4853_v39, %v4852_v41  ;;  %5374 = vperm.xlu1 %7710, %v11570_v36   ;;  %5378 = vperm.xlu0 %7709, %v11327_v63   ;;  %7876 = vpow2.f32 %v4902_v10  ;;  %v13716_v24 = vmov 25   ;;  %v14262_v41 = vld [vmem:[#allocation69_spill] sm:$0xff]  ;;  %v11607_v10 = vld [vmem:[%s13480_s2 + $0x18] sm:$0xff]  ;;  %v14285_v18 = vmov 17  }
 0x697   :  { %v4829_v2 = vrot.slane %v4828_v42, 2  ;;  %v4839_v17 = vadd.f32 %v4838_v54, %v4765_v60  ;;  %v4865_v8 = vadd.f32 %v4864_v35, %v4767_v22  ;;  %7878 = vpow2.f32 %v4906_v4  ;;  %v11597_v39 = vpop.permute.xlu0 %5109  ;;  %14266 = vst [vmem:[#allocation34_spill] sm:$0xff] %v11607_v10  ;;  %v11615_v4 = vld [vmem:[%s13480_s2 + $0x28] sm:$0xff] }
 0x698   :  { %v4855_v43 = vrot.slane %v4854_v34, 2  ;;  %v11599_v35 = vpop.permute.xlu1 %5081  ;;  %14268 = vst [vmem:[#allocation42_spill] sm:$0xff] %v11615_v4 }
 0x699   :  { %v4830_v32 = vadd.f32 %v4829_v2, %v4828_v42  ;;  %v4840_v12 = vrot.slane %v4839_v17, 4  ;;  %v4866_v38 = vrot.slane %v4865_v8, 4  ;;  %14264 = vst [vmem:[#allocation32_spill] sm:$0xff] %v11599_v35  ;;  %v14269_v2 = vld [vmem:[#allocation13_spill] sm:$0xff] }
 0x69a   :  { %v4856_v13 = vadd.f32 %v4855_v43, %v4854_v34  ;;  %5382 = vperm.xlu1 %7710, %v11577_v0   ;;  %7711 = vset.pattern.permute.xlu0 %v13716_v24 }
 0x69b   :  { %v4831_v63 = vrot.slane %v4830_v32, 1  ;;  %v4841_v47 = vadd.f32 %v4840_v12, %v4839_v17  ;;  %v4867_v25 = vadd.f32 %v4866_v38, %v4865_v8  ;;  %5832 = vperm.xlu0 %7711, %v11584_v55   ;;  %v14270_v38 = vld [vmem:[#allocation64_spill] sm:$0xff] }
 0x69c   :  { %v4857_v23 = vrot.slane %v4856_v13, 1 }
 0x69d   :  { %v4832_v5 = vadd.f32 %v4831_v63, %v4830_v32  ;;  %v4842_v57 = vrot.slane %v4841_v47, 2  ;;  %v4868_v61 = vrot.slane %v4867_v25, 2  ;;  %v14271_v63 = vld [vmem:[#allocation54_spill] sm:$0xff] }
 0x69e   :  { %v4858_v50 = vadd.f32 %v4857_v23, %v4856_v13  ;;  %7712 = vset.pattern.permute.xlu1 %v13716_v24 }
 0x69f   :  { %v4888_v27 = vadd.f32 %v11386_v51, %v4832_v5  ;;  %v4843_v1 = vadd.f32 %v4842_v57, %v4841_v47  ;;  %v4869_v46 = vadd.f32 %v4868_v61, %v4867_v25  ;;  %5836 = vperm.xlu1 %7712, %v7991_v62   ;;  %5840 = vperm.xlu0 %7711, %v11570_v36   ;;  %v7873_v14 = vpop.eup %7872 }
 0x6a0   :  { %v4890_v40 = vadd.f32 %v11386_v51, %v4858_v50  ;;  %v7875_v42 = vpop.eup %7874  ;;  %v5106_v50 = vpop.permute.xlu0 %5105 }
 0x6a1   :  { %v4892_v44 = vsub.f32 %v14262_v41, %v4888_v27  ;;  %v4844_v29 = vrot.slane %v4843_v1, 1  ;;  %v4870_v9 = vrot.slane %v4869_v46, 1  ;;  %v11641_v27 = vpop.permute.xlu1 %4929 }
 0x6a2   :  { %v4894_v54 = vsub.f32 %v14263_v7, %v4890_v40 }
 0x6a3   :  { %v11601_v60 = vmul.f32 %v7873_v14, %v4892_v44  ;;  %v4845_v22 = vadd.f32 %v4844_v29, %v4843_v1  ;;  %v4871_v62 = vadd.f32 %v4870_v9, %v4869_v46  ;;  %7713 = vset.pattern.permute.xlu1 %v13711_v15  ;;  %5844 = vperm.xlu0 %7711, %v11607_v10   ;;  %v7877_v12 = vpop.eup %7876  ;;  %v11646_v1 = vld [vmem:[%s13480_s2 + $0x30] sm:$0xff] }
 0x6a4   :  { %v11610_v34 = vmul.f32 %v7875_v42, %v4894_v54  ;;  %5386 = vperm.xlu1 %7713, %v11615_v4   ;;  %v7879_v5 = vpop.eup %7878  ;;  %14272 = vst [vmem:[#allocation33_spill] sm:$0xff] %v11646_v1 }
 0x6a5   :  { %14265 = vst [vmem:[#allocation37_spill] sm:$0xff] %v11601_v60  ;;  %v11620_v17 = vrot.slane %v11601_v60, %v14269_v2  ;;  %v4889_v8 = vadd.f32 %v11386_v51, %v4845_v22  ;;  %v4891_v43 = vadd.f32 %v11386_v51, %v4871_v62 }
 0x6a6   :  { %14267 = vst [vmem:[#allocation31_spill] sm:$0xff] %v11610_v34  ;;  %v11626_v32 = vrot.slane %v11610_v34, %v14269_v2 }
 0x6a7   :  { %v4893_v13 = vsub.f32 %v14270_v38, %v4889_v8  ;;  %v4895_v47 = vsub.f32 %v14271_v63, %v4891_v43  ;;  %v5056_v25 = vmul.f32 %v11620_v17, %v11393_v37  ;;  %v5016_v23 = vmul.f32 %v11620_v17, %v11589_v6  ;;  %5848 = vperm.xlu0 %7711, %v11577_v0   ;;  %v11688_v8 = vld [vmem:[%s13480_s2 + $0x38] sm:$0xff] }
 0x6a8   :  { %v5058_v51 = vmul.f32 %v11626_v32, %v11393_v37  ;;  %v5044_v57 = vmul.f32 %v11620_v17, %v11412_v31  ;;  %v5046_v61 = vmul.f32 %v11626_v32, %v11412_v31  ;;  %5390 = vperm.xlu1 %7713, %v11646_v1   ;;  %v5018_v44 = vmul.f32 %v11626_v32, %v11589_v6 }
 0x6a9   :  { %v11649_v46 = vmul.f32 %v7877_v12, %v4893_v13  ;;  %v11651_v40 = vmul.f32 %v7879_v5, %v4895_v47  ;;  %v11654_v14 = vadd.f32 %v11587_v53, %v5056_v25  ;;  %v11679_v22 = vadd.f32 %v11599_v35, %v5016_v23  ;;  %14276 = vst [vmem:[#allocation55_spill] sm:$0xff] %v11688_v8  ;;  %v5094_v25 = vpop.permute.xlu0 %5093  ;;  %v11707_v23 = vpop.permute.xlu1 %5069 }
 0x6aa   :  { %v11657_v41 = vadd.f32 %v11587_v53, %v5058_v51  ;;  %v11662_v29 = vadd.f32 %v11597_v39, %v5044_v57  ;;  %v11665_v9 = vadd.f32 %v11597_v39, %v5046_v61  ;;  %v5040_v47 = vmul.f32 %v11620_v17, %v11447_v3  ;;  %14277 = vst [vmem:[#allocation81_spill] sm:$0xff] %v11707_v23  ;;  %v11724_v57 = vld [vmem:[%s13480_s2 + $0x48] sm:$0xff] }
 0x6ab   :  { %14273 = vst [vmem:[#allocation46_spill] sm:$0xff] %v11649_v46  ;;  %14274 = vst [vmem:[#allocation65_spill] sm:$0xff] %v11651_v40  ;;  %v11669_v7 = vrot.slane %v11649_v46, %v14269_v2  ;;  %v11673_v54 = vrot.slane %v11651_v40, %v14269_v2  ;;  %v11676_v42 = vmul.f32 0.01, %v11654_v14  ;;  %5856 = vperm.xlu0 %7711, %v11646_v1   ;;  %v11901_v1 = vld [vmem:[%s13480_s2 + $0x50] sm:$0xff] }
 0x6ac   :  { %14275 = vst [vmem:[#allocation87_spill] sm:$0xff] %v11679_v22  ;;  %v11683_v62 = vmul.f32 0.01, %v11657_v41  ;;  %5394 = vperm.xlu1 %7713, %v11688_v8   ;;  %v11696_v12 = vmul.f32 0.01, %v11662_v29  ;;  %v11716_v51 = vadd.f32 %v11599_v35, %v5018_v44  ;;  %14281 = vst [vmem:[#allocation82_spill] sm:$0xff] %v11724_v57  ;;  %v5004_v55 = vmul.f32 %v11620_v17, %v11563_v21 }
 0x6ad   :  { %v5057_v2 = vmul.f32 %v11669_v7, %v11393_v37  ;;  %v5059_v43 = vmul.f32 %v11673_v54, %v11393_v37  ;;  %v5045_v38 = vmul.f32 %v11669_v7, %v11412_v31  ;;  %v5047_v13 = vmul.f32 %v11673_v54, %v11412_v31 }
 0x6ae   :  { %v11703_v63 = vmul.f32 0.01, %v11665_v9  ;;  %v11713_v5 = vmul.f32 %v11669_v7, %v11589_v6  ;;  %14279 = vst [vmem:[#allocation58_spill] sm:$0xff] %v11716_v51  ;;  %v11719_v31 = vmul.f32 0.01, %v11679_v22  ;;  %v11734_v44 = vmul.f32 %v11673_v54, %v11589_v6 }
 0x6af   :  { %5868 = vperm.xlu0 %7711, %v11724_v57   ;;  %v11728_v61 = vadd.f32 %v11587_v53, %v5057_v2  ;;  %v5041_v15 = vmul.f32 %v11669_v7, %v11447_v3  ;;  %v11740_v40 = vadd.f32 %v11587_v53, %v5059_v43  ;;  %v5042_v2 = vmul.f32 %v11626_v32, %v11447_v3 }
 0x6b0   :  { %14278 = vst [vmem:[#allocation62_spill] sm:$0xff] %v11713_v5  ;;  %14280 = vst [vmem:[#allocation68_spill] sm:$0xff] %v11719_v31  ;;  %7714 = vset.pattern.permute.xlu1 %v13716_v24  ;;  %v5043_v37 = vmul.f32 %v11673_v54, %v11447_v3  ;;  %v11750_v6 = vadd.f32 %v11597_v39, %v5045_v38  ;;  %v11753_v46 = vadd.f32 %v11597_v39, %v5047_v13  ;;  %v11829_v31 = vld [vmem:[%s13480_s2 + $0x58] sm:$0xff] }
 0x6b1   :  { %14282 = vst [vmem:[#allocation75_spill] sm:$0xff] %v11734_v44  ;;  %5852 = vperm.xlu1 %7714, %v11615_v4   ;;  %v11757_v43 = vadd.f32 %v5106_v50, %v5040_v47  ;;  %v11759_v34 = vadd.f32 %v5106_v50, %v5041_v15  ;;  %v11761_v24 = vadd.f32 %v5106_v50, %v5042_v2  ;;  %v5090_v47 = vpop.permute.xlu0 %5089  ;;  %v11786_v2 = vmul.f32 0.01, %v11728_v61 }
 0x6b2   :  { %v11763_v60 = vadd.f32 %v5106_v50, %v5043_v37  ;;  %v5028_v3 = vmul.f32 %v11620_v17, %v11479_v45  ;;  %v5029_v39 = vmul.f32 %v11669_v7, %v11479_v45  ;;  %v5030_v13 = vmul.f32 %v11626_v32, %v11479_v45  ;;  %v11777_v50 = vpop.permute.xlu1 %4917  ;;  %v11782_v37 = vld [vmem:[%s13480_s2 + $0x40] sm:$0xff] }
 0x6b3   :  { %14283 = vst [vmem:[#allocation83_spill] sm:$0xff] %v11757_v43  ;;  %14284 = vst [vmem:[#allocation86_spill] sm:$0xff] %v11761_v24  ;;  %7718 = vset.pattern.permute.xlu0 %v14285_v18  ;;  %v11769_v38 = vmul.f32 0.01, %v11757_v43  ;;  %v5031_v15 = vmul.f32 %v11673_v54, %v11479_v45  ;;  %v11789_v53 = vmul.f32 0.01, %v11716_v51  ;;  %v5024_v22 = vmul.f32 %v11620_v17, %v11530_v58 }
 0x6b4   :  { %14287 = vst [vmem:[#allocation96_spill] sm:$0xff] %v11782_v37  ;;  %5398 = vperm.xlu0 %7718, %v11782_v37   ;;  %v11792_v33 = vmul.f32 0.01, %v11761_v24  ;;  %v11794_v45 = vadd.f32 %v5094_v25, %v5028_v3  ;;  %v11798_v16 = vmul.f32 0.01, %v11740_v40  ;;  %v11803_v4 = vadd.f32 %v5094_v25, %v5030_v13 }
 0x6b5   :  { %14286 = vst [vmem:[#allocation74_spill] sm:$0xff] %v11769_v38  ;;  %14288 = vst [vmem:[#allocation90_spill] sm:$0xff] %v11789_v53  ;;  %5860 = vperm.xlu1 %7714, %v11688_v8   ;;  %v11801_v49 = vmul.f32 0.01, %v11750_v6  ;;  %v11808_v10 = vmul.f32 0.01, %v11753_v46  ;;  %v5006_v8 = vmul.f32 %v11626_v32, %v11563_v21  ;;  %v11820_v13 = vadd.f32 %v5094_v25, %v5029_v39  ;;  %v5078_v5 = vpop.permute.xlu0 %5077 }
 0x6b6   :  { %14289 = vst [vmem:[#allocation36_spill] sm:$0xff] %v11792_v33  ;;  %14290 = vst [vmem:[#allocation30_spill] sm:$0xff] %v11794_v45  ;;  %v11811_v0 = vmul.f32 0.01, %v11759_v34  ;;  %v11814_v3 = vmul.f32 0.01, %v11763_v60  ;;  %v11822_v53 = vadd.f32 %v5094_v25, %v5031_v15  ;;  %v5025_v25 = vmul.f32 %v11669_v7, %v11530_v58  ;;  %v11852_v59 = vpop.permute.xlu1 %4921 }
 0x6b7   :  { %14291 = vst [vmem:[#allocation38_spill] sm:$0xff] %v11803_v4  ;;  %v11835_v44 = vmul.f32 0.01, %v11794_v45  ;;  %v5026_v39 = vmul.f32 %v11626_v32, %v11530_v58  ;;  %v11843_v15 = vmul.f32 0.01, %v11803_v4  ;;  %v11846_v51 = vadd.f32 %v11707_v23, %v5004_v55 }
 0x6b8   :  { %14292 = vst [vmem:[#allocation91_spill] sm:$0xff] %v11822_v53  ;;  %5410 = vperm.xlu0 %7718, %v11829_v31   ;;  %v5027_v21 = vmul.f32 %v11673_v54, %v11530_v58  ;;  %v11850_v35 = vadd.f32 %v5090_v47, %v5024_v22  ;;  %v11856_v33 = vadd.f32 %v11707_v23, %v5006_v8  ;;  %v11876_v8 = vld [vmem:[%s13480_s2 + $0x60] sm:$0xff]  ;;  %v11890_v23 = vmul.f32 0.01, %v11822_v53 }
 0x6b9   :  { %14293 = vst [vmem:[#allocation39_spill] sm:$0xff] %v11835_v44  ;;  %7715 = vset.pattern.permute.xlu1 %v14285_v18  ;;  %14294 = vst [vmem:[#allocation85_spill] sm:$0xff] %v11843_v15  ;;  %v11858_v24 = vadd.f32 %v5090_v47, %v5025_v25  ;;  %v11860_v38 = vadd.f32 %v5090_v47, %v5026_v39  ;;  %v5012_v55 = vmul.f32 %v11620_v17, %v11565_v56  ;;  %v14323_v44 = vmov 25  }
 0x6ba   :  { %14295 = vst [vmem:[#allocation50_spill] sm:$0xff] %v11846_v51  ;;  %14296 = vst [vmem:[#allocation92_spill] sm:$0xff] %v11850_v35  ;;  %5402 = vperm.xlu1 %7715, %v11724_v57   ;;  %v11864_v43 = vadd.f32 %v5090_v47, %v5027_v21  ;;  %v11867_v58 = vmul.f32 0.01, %v11850_v35  ;;  %v5013_v22 = vmul.f32 %v11669_v7, %v11565_v56  ;;  %v11880_v25 = vmul.f32 0.01, %v11820_v13 }
 0x6bb   :  { %14297 = vst [vmem:[#allocation48_spill] sm:$0xff] %v11856_v33  ;;  %14298 = vst [vmem:[#allocation70_spill] sm:$0xff] %v11858_v24  ;;  %v5014_v57 = vmul.f32 %v11626_v32, %v11565_v56  ;;  %v11883_v21 = vmul.f32 0.01, %v11860_v38  ;;  %v5015_v47 = vmul.f32 %v11673_v54, %v11565_v56  ;;  %v11887_v39 = vadd.f32 %v5078_v5, %v5012_v55 }
 0x6bc   :  { %14299 = vst [vmem:[#allocation59_spill] sm:$0xff] %v11860_v38  ;;  %14300 = vst [vmem:[#allocation35_spill] sm:$0xff] %v11864_v43  ;;  %5414 = vperm.xlu0 %7718, %v11876_v8   ;;  %v11896_v30 = vadd.f32 %v5078_v5, %v5013_v22  ;;  %v11905_v56 = vmul.f32 0.01, %v11846_v51  ;;  %v11908_v55 = vmul.f32 0.01, %v11856_v33  ;;  %v5000_v20 = vmul.f32 %v11620_v17, %v11852_v59  ;;  %v11924_v33 = vpop.permute.xlu1 %5065 }
 0x6bd   :  { %14301 = vst [vmem:[#allocation95_spill] sm:$0xff] %v11867_v58  ;;  %14302 = vst [vmem:[#allocation89_spill] sm:$0xff] %v11876_v8  ;;  %v11910_v53 = vadd.f32 %v5078_v5, %v5014_v57  ;;  %v11915_v22 = vmul.f32 0.01, %v11858_v24  ;;  %v11918_v36 = vmul.f32 0.01, %v11864_v43  ;;  %v5002_v51 = vmul.f32 %v11626_v32, %v11852_v59 }
 0x6be   :  { %14303 = vst [vmem:[#allocation93_spill] sm:$0xff] %v11883_v21  ;;  %14304 = vst [vmem:[#allocation40_spill] sm:$0xff] %v11887_v39  ;;  %5406 = vperm.xlu1 %7715, %v11901_v1   ;;  %v11929_v57 = vld [vmem:[%s13480_s2 + $0x70] sm:$0xff]  ;;  %v11934_v4 = vadd.f32 %v5078_v5, %v5015_v47  ;;  %v11937_v15 = vmul.f32 0.01, %v11887_v39  ;;  %v5008_v58 = vmul.f32 %v11620_v17, %v11641_v27  ;;  %v8107_v5 = vmov 33  }
 0x6bf   :  { %14305 = vst [vmem:[#allocation94_spill] sm:$0xff] %v11896_v30  ;;  %14306 = vst [vmem:[#allocation88_spill] sm:$0xff] %v11905_v56  ;;  %v5074_v56 = vpop.permute.xlu0 %5073  ;;  %v11942_v35 = vmul.f32 0.01, %v11896_v30  ;;  %v5009_v43 = vmul.f32 %v11669_v7, %v11641_v27  ;;  %v11951_v47 = vmul.f32 0.01, %v11910_v53  ;;  %v11956_v38 = vadd.f32 %v11924_v33, %v5000_v20 }
 0x6c0   :  { %14307 = vst [vmem:[#allocation56_spill] sm:$0xff] %v11908_v55  ;;  %14308 = vst [vmem:[#allocation76_spill] sm:$0xff] %v11910_v53  ;;  %5422 = vperm.xlu0 %7718, %v11929_v57   ;;  %v5011_v55 = vmul.f32 %v11673_v54, %v11641_v27  ;;  %v11953_v21 = vadd.f32 %v5074_v56, %v5008_v58  ;;  %v11959_v30 = vadd.f32 %v11924_v33, %v5002_v51 }
 0x6c1   :  { %14309 = vst [vmem:[#allocation51_spill] sm:$0xff] %v11915_v22  ;;  %14310 = vst [vmem:[#allocation78_spill] sm:$0xff] %v11918_v36  ;;  %v5010_v36 = vmul.f32 %v11626_v32, %v11641_v27  ;;  %v11969_v27 = vmul.f32 %v11669_v7, %v11852_v59  ;;  %v4999_v45 = vmul.f32 %v11673_v54, %v11777_v50 }
 0x6c2   :  { %14311 = vst [vmem:[#allocation21_spill] sm:$0xff] %v11924_v33  ;;  %14312 = vst [vmem:[#allocation45_spill] sm:$0xff] %v11934_v4  ;;  %7716 = vset.pattern.permute.xlu1 %v8107_v5  ;;  %v11971_v5 = vadd.f32 %v5074_v56, %v5009_v43  ;;  %v11975_v20 = vadd.f32 %v5074_v56, %v5011_v55  ;;  %v11979_v51 = vmul.f32 0.01, %v11953_v21 }
 0x6c3   :  { %14313 = vst [vmem:[#allocation49_spill] sm:$0xff] %v11937_v15  ;;  %14314 = vst [vmem:[#allocation77_spill] sm:$0xff] %v11942_v35  ;;  %v11964_v35 = vld [vmem:[%s13480_s2] sm:$0x1]  ;;  %v11973_v58 = vadd.f32 %v5074_v56, %v5010_v36  ;;  %v4996_v33 = vmul.f32 %v11620_v17, %v11777_v50  ;;  %v11989_v36 = vmul.f32 0.01, %v11934_v4  ;;  %v5062_v55 = vpop.permute.xlu0 %5061  ;;  %v12002_v22 = vmul.f32 %v11673_v54, %v11852_v59 }
 0x6c4   :  { %14315 = vst [vmem:[#allocation69_spill] sm:$0xff] %v11951_v47  ;;  %14316 = vst [vmem:[#allocation63_spill] sm:$0xff] %v11953_v21  ;;  %6064 = vperm.xlu1 %7716, %v11964_v35   ;;  %7722 = vset.pattern.permute.xlu0 %v14323_v44  ;;  %v12008_v4 = vmul.f32 0.01, %v11959_v30  ;;  %v12012_v43 = vmul.f32 0.01, %v11971_v5  ;;  %v5053_v59 = vmul.f32 %v11669_v7, %v11508_v26 }
 0x6c5   :  { %14317 = vst [vmem:[#allocation13_spill] sm:$0xff] %v11956_v38  ;;  %14318 = vst [vmem:[#allocation64_spill] sm:$0xff] %v11959_v30  ;;  %5880 = vperm.xlu0 %7722, %v11876_v8   ;;  %v11994_v56 = vmul.f32 0.01, %v11973_v58  ;;  %v12005_v8 = vmul.f32 0.01, %v11956_v38  ;;  %v12022_v38 = vadd.f32 %v5062_v55, %v4996_v33  ;;  %v5315_v21 = vmax.f32 %v11740_v40, %v11798_v16 }
 0x6c6   :  { %14319 = vst [vmem:[#allocation54_spill] sm:$0xff] %v11964_v35  ;;  %14320 = vst [vmem:[#allocation97_spill] sm:$0xff] %v11969_v27  ;;  %v4997_v35 = vmul.f32 %v11669_v7, %v11777_v50  ;;  %v4998_v27 = vmul.f32 %v11626_v32, %v11777_v50  ;;  %v12015_v50 = vmul.f32 0.01, %v11975_v20  ;;  %v5181_v33 = vadd.f32 %v11400_v19, %v5053_v59  ;;  %v12064_v40 = vld [vmem:[%s13480_s2 + $0x68] sm:$0xff] }
 0x6c7   :  { %14321 = vst [vmem:[#allocation98_spill] sm:$0xff] %v11973_v58  ;;  %14322 = vst [vmem:[#allocation99_spill] sm:$0xff] %v11975_v20  ;;  %v12033_v20 = vld [vmem:[%s13480_s2 + $0x78] sm:$0xff]  ;;  %v5301_v59 = vmax.f32 %v11750_v6, %v11801_v49  ;;  %v5051_v16 = vmul.f32 %v11673_v54, %v11424_v11 }
 0x6c8   :  { %14324 = vst [vmem:[#allocation100_spill] sm:$0xff] %v11979_v51  ;;  %14325 = vst [vmem:[#allocation101_spill] sm:$0xff] %v11994_v56  ;;  %7717 = vset.pattern.permute.xlu1 %v14323_v44  ;;  %v12024_v30 = vadd.f32 %v5062_v55, %v4997_v35  ;;  %v5052_v35 = vmul.f32 %v11620_v17, %v11508_v26  ;;  %v5050_v56 = vmul.f32 %v11626_v32, %v11424_v11 }
 0x6c9   :  { %14326 = vst [vmem:[#allocation102_spill] sm:$0xff] %v12002_v22  ;;  %14327 = vst [vmem:[#allocation103_spill] sm:$0xff] %v12005_v8  ;;  %5864 = vperm.xlu1 %7717, %v11782_v37   ;;  %v5055_v8 = vmul.f32 %v11673_v54, %v11508_v26  ;;  %5892 = vperm.xlu0 %7722, %v12033_v20   ;;  %v12038_v37 = vadd.f32 %v5062_v55, %v4999_v45  ;;  %v5245_v22 = vmul.f32 0.01, %v5181_v33 }
 0x6ca   :  { %14328 = vst [vmem:[#allocation104_spill] sm:$0xff] %v12008_v4  ;;  %14329 = vst [vmem:[#allocation105_spill] sm:$0xff] %v12015_v50  ;;  %v12026_v4 = vadd.f32 %v5062_v55, %v4998_v27  ;;  %v5313_v27 = vmax.f32 %v11728_v61, %v11786_v2  ;;  %v5054_v50 = vmul.f32 %v11626_v32, %v11508_v26 }
 0x6cb   :  { %v5183_v51 = vadd.f32 %v11400_v19, %v5055_v8  ;;  %v5180_v45 = vadd.f32 %v11400_v19, %v5052_v35  ;;  %v5049_v55 = vmul.f32 %v11669_v7, %v11424_v11  ;;  %v5303_v26 = vmax.f32 %v11753_v46, %v11808_v10  ;;  %v14331_v35 = vld [vmem:[#allocation22_spill] sm:$0xff] }
 0x6cc   :  { %v5182_v2 = vadd.f32 %v11400_v19, %v5054_v50  ;;  %v14330_v8 = vmov 0   ;;  %v5309_v49 = vmax.f32 %v5181_v33, %v5245_v22  ;;  %v5048_v19 = vmul.f32 %v11620_v17, %v11424_v11 }
 0x6cd   :  { %7719 = vset.pattern.permute.xlu1 %v14285_v18  ;;  %v5247_v61 = vmul.f32 0.01, %v5183_v51  ;;  %7725 = vset.pattern.permute.xlu0 %v14330_v8  ;;  %v5244_v6 = vmul.f32 0.01, %v5180_v45  ;;  %v5177_v24 = vadd.f32 %v14331_v35, %v5049_v55  ;;  %v5179_v46 = vadd.f32 %v14331_v35, %v5051_v16 }
 0x6ce   :  { %5418 = vperm.xlu1 %7719, %v12064_v40   ;;  %6188 = vperm.xlu0 %7725, %v11929_v57   ;;  %v5246_v10 = vmul.f32 0.01, %v5182_v2  ;;  %v5362_v58 = vpack.c.bf16 %v5313_v27, %v5309_v49  ;;  %v5176_v22 = vadd.f32 %v14331_v35, %v5048_v19  ;;  %v5178_v15 = vadd.f32 %v14331_v35, %v5050_v56  ;;  %v14336_v35 = vld [vmem:[#allocation33_spill] sm:$0xff] }
 0x6cf   :  { %v5311_v50 = vmax.f32 %v5183_v51, %v5247_v61  ;;  %v5308_v47 = vmax.f32 %v5180_v45, %v5244_v6  ;;  %v5241_v53 = vmul.f32 0.01, %v5177_v24  ;;  %v5243_v55 = vmul.f32 0.01, %v5179_v46 }
 0x6d0   :  { %v5310_v8 = vmax.f32 %v5182_v2, %v5246_v10  ;;  %5477 = vmatprep.subr.bf16.mxu0 %v5362_v58  ;;  %v14332_v51 = vmax.f32 %v11654_v14, %v11676_v42  ;;  %v5240_v39 = vmul.f32 0.01, %v5176_v22  ;;  %v5037_v11 = vmul.f32 %v11669_v7, %v11528_v48 }
 0x6d1   :  { %v5364_v33 = vpack.c.bf16 %v5315_v21, %v5311_v50  ;;  %v5305_v16 = vmax.f32 %v5177_v24, %v5241_v53  ;;  %v14333_v21 = vmax.f32 %v11657_v41, %v11683_v62  ;;  %v5307_v56 = vmax.f32 %v5179_v46, %v5243_v55  ;;  %v14338_v50 = vld [vmem:[#allocation91_spill] sm:$0xff] }
 0x6d2   :  { %7720 = vset.pattern.permute.xlu1 %v14323_v44  ;;  %v5361_v61 = vpack.c.bf16 %v14332_v51, %v5308_v47  ;;  %v5242_v45 = vmul.f32 0.01, %v5178_v15  ;;  %v5297_v58 = vmax.f32 %v11759_v34, %v11811_v0  ;;  %6172 = vperm.xlu0 %7725, %v11901_v1   ;;  %v5304_v14 = vmax.f32 %v5176_v22, %v5240_v39 }
 0x6d3   :  { %5872 = vperm.xlu1 %7720, %v11901_v1   ;;  %5590 = vmatprep.subr.bf16.mxu1 %v5364_v33  ;;  %v5363_v27 = vpack.c.bf16 %v14333_v21, %v5310_v8  ;;  %v5358_v24 = vpack.c.bf16 %v5305_v16, %v5301_v59  ;;  %v5165_v42 = vadd.f32 %v11464_v28, %v5037_v11  ;;  %v14339_v21 = vld [vmem:[#allocation71_spill] sm:$0xff] }
 0x6d4   :  { %5478 = vmatpush1.bf16.msra.mxu0 %v5361_v61  ;;  %v5039_v53 = vmul.f32 %v11673_v54, %v11528_v48  ;;  %v5360_v47 = vpack.c.bf16 %v5307_v56, %v5303_v26  ;;  %v5306_v2 = vmax.f32 %v5178_v15, %v5242_v45  ;;  %v5299_v41 = vmax.f32 %v11763_v60, %v11814_v3  ;;  %v14340_v56 = vld [vmem:[#allocation28_spill] sm:$0xff]  ;;  %v14341_v45 = vld [vmem:[#allocation83_spill] sm:$0xff] }
 0x6d5   :  { %5591 = vmatpush1.bf16.msra.mxu1 %v5363_v27  ;;  %v5036_v62 = vmul.f32 %v11620_v17, %v11528_v48  ;;  %5479 = vmatprep.subr.bf16.mxu0 %v5358_v24  ;;  %v14334_v0 = vmax.f32 %v11662_v29, %v11696_v12  ;;  %v5229_v39 = vmul.f32 0.01, %v5165_v42  ;;  %v5038_v8 = vmul.f32 %v11626_v32, %v11528_v48 }
 0x6d6   :  { %v5167_v59 = vadd.f32 %v11464_v28, %v5039_v53  ;;  %5592 = vmatprep.subr.bf16.mxu1 %v5360_v47  ;;  %v14335_v60 = vmax.f32 %v11665_v9, %v11703_v63  ;;  %v5033_v26 = vmul.f32 %v11669_v7, %v11496_v52  ;;  %v5285_v29 = vmax.f32 %v11820_v13, %v11880_v25  ;;  %v14337_v63 = vld [vmem:[#allocation47_spill] sm:$0xff]  ;;  %v14344_v47 = vld [vmem:[#allocation86_spill] sm:$0xff] }
 0x6d7   :  { %v5357_v34 = vpack.c.bf16 %v5304_v14, %v14334_v0  ;;  %5876 = vperm.xlu1 %7720, %v11829_v31   ;;  %v5164_v15 = vadd.f32 %v11464_v28, %v5036_v62  ;;  %v5293_v12 = vmax.f32 %v5165_v42, %v5229_v39  ;;  %v5166_v48 = vadd.f32 %v11464_v28, %v5038_v8 }
 0x6d8   :  { %v5359_v3 = vpack.c.bf16 %v5306_v2, %v14335_v60  ;;  %v5231_v49 = vmul.f32 0.01, %v5167_v59  ;;  %v5035_v6 = vmul.f32 %v11673_v54, %v11496_v52  ;;  %6156 = vperm.xlu0 %7725, %v14336_v35   ;;  %v5161_v19 = vadd.f32 %v14337_v63, %v5033_v26  ;;  %v14345_v2 = vld [vmem:[#allocation36_spill] sm:$0xff] }
 0x6d9   :  { %5480 = vmatpush1.bf16.msra.mxu0 %v5357_v34  ;;  %v5228_v9 = vmul.f32 0.01, %v5164_v15  ;;  %v5287_v10 = vmax.f32 %v14338_v50, %v11890_v23  ;;  %v5032_v13 = vmul.f32 %v11620_v17, %v11496_v52  ;;  %v5354_v25 = vpack.c.bf16 %v5297_v58, %v5293_v12  ;;  %v14347_v34 = vld [vmem:[#allocation57_spill] sm:$0xff]  ;;  %v14348_v12 = vld [vmem:[#allocation51_spill] sm:$0xff] }
 0x6da   :  { %5593 = vmatpush1.bf16.msra.mxu1 %v5359_v3  ;;  %v5295_v46 = vmax.f32 %v5167_v59, %v5231_v49  ;;  %v5230_v22 = vmul.f32 0.01, %v5166_v48  ;;  %v5163_v28 = vadd.f32 %v14337_v63, %v5035_v6  ;;  %v5225_v55 = vmul.f32 0.01, %v5161_v19  ;;  %v14349_v49 = vld [vmem:[#allocation70_spill] sm:$0xff] }
 0x6db   :  { %7721 = vset.pattern.permute.xlu1 %v14285_v18  ;;  %v5292_v33 = vmax.f32 %v5164_v15, %v5228_v9  ;;  %v5160_v51 = vadd.f32 %v14337_v63, %v5032_v13  ;;  %v5034_v61 = vmul.f32 %v11626_v32, %v11496_v52  ;;  %5481 = vmatprep.subr.bf16.mxu0 %v5354_v25  ;;  %v14342_v18 = vld [vmem:[#allocation74_spill] sm:$0xff]  ;;  %v12135_v52 = vmul.f32 0.01, %v12022_v38  ;;  %v14351_v9 = vld [vmem:[#allocation39_spill] sm:$0xff] }
 0x6dc   :  { %5426 = vperm.xlu1 %7721, %v12033_v20   ;;  %v5356_v23 = vpack.c.bf16 %v5299_v41, %v5295_v46  ;;  %v5294_v16 = vmax.f32 %v5166_v48, %v5230_v22  ;;  %v5227_v11 = vmul.f32 0.01, %v5163_v28  ;;  %v5021_v27 = vmul.f32 %v11669_v7, %v14339_v21  ;;  %6140 = vperm.xlu0 %7725, %v14340_v56   ;;  %v14353_v25 = vld [vmem:[#allocation78_spill] sm:$0xff]  ;;  %v14354_v46 = vld [vmem:[#allocation35_spill] sm:$0xff] }
 0x6dd   :  { %v14343_v58 = vmax.f32 %v14341_v45, %v14342_v18  ;;  %v5289_v14 = vmax.f32 %v5161_v19, %v5225_v55  ;;  %v5224_v42 = vmul.f32 0.01, %v5160_v51  ;;  %v5162_v53 = vadd.f32 %v14337_v63, %v5034_v61  ;;  %v14358_v61 = vld [vmem:[#allocation85_spill] sm:$0xff]  ;;  %v14360_v56 = vld [vmem:[#allocation75_spill] sm:$0xff] }
 0x6de   :  { %5594 = vmatprep.subr.bf16.mxu1 %v5356_v23  ;;  %v14346_v41 = vmax.f32 %v14344_v47, %v14345_v2  ;;  %v5291_v0 = vmax.f32 %v5163_v28, %v5227_v11  ;;  %v5149_v39 = vadd.f32 %v14347_v34, %v5021_v27  ;;  %v5023_v3 = vmul.f32 %v11673_v54, %v14339_v21  ;;  %v14355_v28 = vld [vmem:[#allocation62_spill] sm:$0xff] }
 0x6df   :  { %v5353_v24 = vpack.c.bf16 %v14343_v58, %v5292_v33  ;;  %v5350_v59 = vpack.c.bf16 %v5289_v14, %v5285_v29  ;;  %v5288_v8 = vmax.f32 %v5160_v51, %v5224_v42  ;;  %v5226_v60 = vmul.f32 0.01, %v5162_v53  ;;  %v14350_v29 = vld [vmem:[#allocation30_spill] sm:$0xff]  ;;  %v14356_v33 = vld [vmem:[#allocation32_spill] sm:$0xff]  ;;  %v14361_v42 = vld [vmem:[#allocation77_spill] sm:$0xff] }
 0x6e0   :  { %v5355_v62 = vpack.c.bf16 %v14346_v41, %v5294_v16  ;;  %7723 = vset.pattern.permute.xlu1 %v14323_v44  ;;  %v5352_v15 = vpack.c.bf16 %v5291_v0, %v5287_v10  ;;  %v5213_v26 = vmul.f32 0.01, %v5149_v39  ;;  %v5281_v48 = vmax.f32 %v14349_v49, %v14348_v12  ;;  %v14357_v51 = vld [vmem:[#allocation38_spill] sm:$0xff]  ;;  %v14363_v0 = vld [vmem:[#allocation45_spill] sm:$0xff] }
 0x6e1   :  { %5482 = vmatpush1.bf16.msra.mxu0 %v5353_v24  ;;  %v5020_v6 = vmul.f32 %v11620_v17, %v14339_v21  ;;  %5884 = vperm.xlu1 %7723, %v12064_v40   ;;  %v14352_v63 = vmax.f32 %v14350_v29, %v14351_v9  ;;  %v5290_v50 = vmax.f32 %v5162_v53, %v5226_v60  ;;  %v14362_v53 = vld [vmem:[#allocation94_spill] sm:$0xff]  ;;  %v12179_v49 = vmul.f32 0.01, %v12026_v4 }
 0x6e2   :  { %5595 = vmatpush1.bf16.msra.mxu1 %v5355_v62  ;;  %5483 = vmatprep.subr.bf16.mxu0 %v5350_v59  ;;  %v5151_v13 = vadd.f32 %v14347_v34, %v5023_v3  ;;  %v5022_v44 = vmul.f32 %v11626_v32, %v14339_v21  ;;  %v5277_v10 = vmax.f32 %v5149_v39, %v5213_v26  ;;  %v12167_v21 = vmul.f32 0.01, %v12024_v30  ;;  %v14364_v39 = vld [vmem:[#allocation29_spill] sm:$0xff]  ;;  %v14366_v26 = vld [vmem:[#allocation87_spill] sm:$0xff] }
 0x6e3   :  { %v5349_v19 = vpack.c.bf16 %v5288_v8, %v14352_v63  ;;  %5596 = vmatprep.subr.bf16.mxu1 %v5352_v15  ;;  %v5283_v22 = vmax.f32 %v14354_v46, %v14353_v25  ;;  %v5148_v17 = vadd.f32 %v14347_v34, %v5020_v6  ;;  %v5145_v55 = vadd.f32 %v14356_v33, %v14355_v28  ;;  %v14365_v15 = vld [vmem:[#allocation68_spill] sm:$0xff]  ;;  %v14368_v6 = vld [vmem:[#allocation95_spill] sm:$0xff]  ;;  %v14370_v63 = vld [vmem:[#allocation90_spill] sm:$0xff] }
 0x6e4   :  { %v14359_v23 = vmax.f32 %v14357_v51, %v14358_v61  ;;  %v5215_v11 = vmul.f32 0.01, %v5151_v13  ;;  %v5150_v27 = vadd.f32 %v14347_v34, %v5022_v44  ;;  %v5147_v32 = vadd.f32 %v14356_v33, %v14360_v56  ;;  %v14373_v44 = vld [vmem:[#allocation59_spill] sm:$0xff]  ;;  %v14376_v61 = vld [vmem:[#allocation40_spill] sm:$0xff]  ;;  %v14379_v56 = vld [vmem:[#allocation97_spill] sm:$0xff] }
 0x6e5   :  { %5484 = vmatpush1.bf16.msra.mxu0 %v5349_v19  ;;  %v5346_v45 = vpack.c.bf16 %v5281_v48, %v5277_v10  ;;  %v5212_v18 = vmul.f32 0.01, %v5148_v17  ;;  %v5209_v58 = vmul.f32 0.01, %v5145_v55  ;;  %5888 = vperm.xlu1 %7723, %v11929_v57   ;;  %v5269_v47 = vmax.f32 %v14362_v53, %v14361_v42  ;;  %v14367_v48 = vld [vmem:[#allocation92_spill] sm:$0xff]  ;;  %v14371_v19 = vld [vmem:[#allocation58_spill] sm:$0xff] }
 0x6e6   :  { %v5351_v16 = vpack.c.bf16 %v5290_v50, %v14359_v23  ;;  %v5279_v24 = vmax.f32 %v5151_v13, %v5215_v11  ;;  %v5214_v14 = vmul.f32 0.01, %v5150_v27  ;;  %v5211_v2 = vmul.f32 0.01, %v5147_v32  ;;  %v14374_v10 = vld [vmem:[#allocation93_spill] sm:$0xff] }
 0x6e7   :  { %5485 = vmatprep.subr.bf16.mxu0 %v5346_v45  ;;  %v5276_v41 = vmax.f32 %v5148_v17, %v5212_v18  ;;  %v5273_v62 = vmax.f32 %v5145_v55, %v5209_v58  ;;  %v5271_v34 = vmax.f32 %v14363_v0, %v11989_v36  ;;  %v5005_v59 = vmul.f32 %v11669_v7, %v14364_v39  ;;  %v14372_v36 = vld [vmem:[#allocation81_spill] sm:$0xff]  ;;  %v14381_v45 = vld [vmem:[#allocation76_spill] sm:$0xff] }
 0x6e8   :  { %5597 = vmatpush1.bf16.msra.mxu1 %v5351_v16  ;;  %v5348_v8 = vpack.c.bf16 %v5283_v22, %v5279_v24  ;;  %v5278_v60 = vmax.f32 %v5150_v27, %v5214_v14  ;;  %v5275_v3 = vmax.f32 %v5147_v32, %v5211_v2  ;;  %v5272_v12 = vmax.f32 %v14366_v26, %v14365_v15  ;;  %v14377_v23 = vld [vmem:[#allocation49_spill] sm:$0xff]  ;;  %v14384_v24 = vld [vmem:[#allocation88_spill] sm:$0xff]  ;;  %v14385_v14 = vld [vmem:[#allocation50_spill] sm:$0xff] }
 0x6e9   :  { %v14369_v29 = vmax.f32 %v14367_v48, %v14368_v6  ;;  %v5274_v50 = vmax.f32 %v14371_v19, %v14370_v63  ;;  %v5133_v13 = vadd.f32 %v14372_v36, %v5005_v59  ;;  %v5191_v7 = vmul.f32 0.01, %v12038_v37  ;;  %v14380_v32 = vld [vmem:[#allocation21_spill] sm:$0xff]  ;;  %v14388_v2 = vld [vmem:[#allocation99_spill] sm:$0xff]  ;;  %v14389_v59 = vld [vmem:[#allocation56_spill] sm:$0xff] }
 0x6ea   :  { %5598 = vmatprep.subr.bf16.mxu1 %v5348_v8  ;;  %v14375_v25 = vmax.f32 %v14373_v44, %v14374_v10  ;;  %v5342_v22 = vpack.c.bf16 %v5273_v62, %v5269_v47  ;;  %v5007_v17 = vmul.f32 %v11673_v54, %v14364_v39  ;;  %v5252_v28 = vmax.f32 %v12022_v38, %v12135_v52  ;;  %v14382_v38 = vld [vmem:[#allocation69_spill] sm:$0xff]  ;;  %v14390_v8 = vld [vmem:[#allocation48_spill] sm:$0xff]  ;;  %v14391_v15 = vld [vmem:[#allocation54_spill] sm:$0xff] }
 0x6eb   :  { %v5345_v9 = vpack.c.bf16 %v14369_v29, %v5276_v41  ;;  %v5344_v33 = vpack.c.bf16 %v5275_v3, %v5271_v34  ;;  %v5197_v55 = vmul.f32 0.01, %v5133_v13  ;;  %v5265_v51 = vmax.f32 %v11971_v5, %v12012_v43  ;;  %v14386_v43 = vld [vmem:[#allocation102_spill] sm:$0xff]  ;;  %v14387_v47 = vld [vmem:[#allocation105_spill] sm:$0xff]  ;;  %v14395_v19 = vld [vmem:[#allocation103_spill] sm:$0xff] }
 0x6ec   :  { %v5347_v46 = vpack.c.bf16 %v14375_v25, %v5278_v60  ;;  %v14378_v16 = vmax.f32 %v14376_v61, %v14377_v23  ;;  %v5135_v27 = vadd.f32 %v14372_v36, %v5007_v17  ;;  %v5129_v54 = vadd.f32 %v14380_v32, %v14379_v56  ;;  %v14401_v17 = vld [vmem:[#allocation64_spill] sm:$0xff]  ;;  %v14407_v56 = vld [vmem:[#allocation34_spill] sm:$0xff] }
 0x6ed   :  { %5486 = vmatpush1.bf16.msra.mxu0 %v5345_v9  ;;  %v14383_v52 = vmax.f32 %v14381_v45, %v14382_v38  ;;  %v5261_v58 = vmax.f32 %v5133_v13, %v5197_v55  ;;  %v5260_v5 = vmax.f32 %v14385_v14, %v14384_v24  ;;  %v5131_v42 = vadd.f32 %v14380_v32, %v14386_v43  ;;  %v7792_v23 = vld [vmem:[#allocation2 + $0x40] sm:$0xff]   ;;  %v7799_v45 = vld [vmem:[#allocation2 + $0x78] sm:$0xff]  }
 0x6ee   :  { %5599 = vmatpush1.bf16.msra.mxu1 %v5347_v46  ;;  %5487 = vmatprep.subr.bf16.mxu0 %v5342_v22  ;;  %v5341_v11 = vpack.c.bf16 %v5272_v12, %v14378_v16  ;;  %v5199_v53 = vmul.f32 0.01, %v5135_v27  ;;  %v5267_v41 = vmax.f32 %v14388_v2, %v14387_v47  ;;  %v5193_v62 = vmul.f32 0.01, %v5129_v54  ;;  %v14400_v22 = vld [vmem:[#allocation104_spill] sm:$0xff]  ;;  %v7794_v16 = vld [vmem:[#allocation2 + $0x50] sm:$0xff]  }
 0x6ef   :  { %5600 = vmatprep.subr.bf16.mxu1 %v5344_v33  ;;  %v5343_v18 = vpack.c.bf16 %v5274_v50, %v14383_v52  ;;  %v5253_v0 = vmax.f32 %v12024_v30, %v12167_v21  ;;  %v8108_v34 = vmov 41   ;;  %v5338_v39 = vpack.c.bf16 %v5265_v51, %v5261_v58  ;;  %v14392_v30 = vld [vmem:[#allocation63_spill] sm:$0xff]  ;;  %v14393_v21 = vld [vmem:[#allocation100_spill] sm:$0xff]  ;;  %v14396_v50 = vld [vmem:[#allocation13_spill] sm:$0xff] }
 0x6f0   :  { %7724 = vset.pattern.permute.xlu1 %v8108_v34  ;;  %v5262_v60 = vmax.f32 %v14390_v8, %v14389_v59  ;;  %v5195_v3 = vmul.f32 0.01, %v5131_v42  ;;  %v5263_v26 = vmax.f32 %v5135_v27, %v5199_v53  ;;  %v5257_v12 = vmax.f32 %v5129_v54, %v5193_v62  ;;  %v7795_v27 = vld [vmem:[#allocation2 + $0x58] sm:$0xff]   ;;  %v7796_v32 = vld [vmem:[#allocation2 + $0x60] sm:$0xff]   ;;  %v7798_v54 = vld [vmem:[#allocation2 + $0x70] sm:$0xff]  }
 0x6f1   :  { %5488 = vmatpush1.bf16.msra.mxu0 %v5341_v11  ;;  %6076 = vperm.xlu1 %7724, %v14391_v15   ;;  %v5255_v48 = vmax.f32 %v12038_v37, %v5191_v7  ;;  %v8109_v6 = vmov 8   ;;  %v14394_v29 = vmax.f32 %v14392_v30, %v14393_v21  ;;  %v5256_v36 = vmax.f32 %v14396_v50, %v14395_v19  ;;  %v14397_v37 = vld [vmem:[#allocation98_spill] sm:$0xff]  ;;  %v14398_v7 = vld [vmem:[#allocation101_spill] sm:$0xff]  ;;  %v14414_v50 = vld [vmem:[#allocation67_spill] sm:$0xff] }
 0x6f2   :  { %5601 = vmatpush1.bf16.msra.mxu1 %v5343_v18  ;;  %7738 = vset.pattern.permute.xlu0 %v8109_v6  ;;  %v5259_v63 = vmax.f32 %v5131_v42, %v5195_v3  ;;  %v5340_v13 = vpack.c.bf16 %v5267_v41, %v5263_v26  ;;  %v5334_v44 = vpack.c.bf16 %v5257_v12, %v5253_v0  ;;  %v14402_v55 = vmov 0   ;;  %v14406_v11 = vld [vmem:[#allocation73_spill] sm:$0xff]  ;;  %v14410_v38 = vld [vmem:[#allocation42_spill] sm:$0xff] }
 0x6f3   :  { %5489 = vmatprep.subr.bf16.mxu0 %v5338_v39  ;;  %v5337_v9 = vpack.c.bf16 %v14394_v29, %v5260_v5  ;;  %6336 = vperm.xlu0 %7738, %v12033_v20   ;;  %v5254_v10 = vmax.f32 %v12026_v4, %v12179_v49  ;;  %v14399_v25 = vmax.f32 %v14397_v37, %v14398_v7  ;;  %v14403_v4 = vld [vmem:[#allocation89_spill] sm:$0xff]  ;;  %v14411_v29 = vld [vmem:[#allocation43_spill] sm:$0xff]  ;;  %v14418_v37 = vld [vmem:[#allocation24_spill] sm:$0xff] }
 0x6f4   :  { %v5258_v33 = vmax.f32 %v14401_v17, %v14400_v22  ;;  %5602 = vmatprep.subr.bf16.mxu1 %v5340_v13  ;;  %v5336_v51 = vpack.c.bf16 %v5259_v63, %v5255_v48  ;;  %v5333_v61 = vpack.c.bf16 %v5256_v36, %v5252_v28  ;;  %v14404_v28 = vld [vmem:[#allocation96_spill] sm:$0xff]  ;;  %v14415_v36 = vld [vmem:[#allocation25_spill] sm:$0xff]  ;;  %v14419_v7 = vsub.f32 0.0, %v14418_v37 }
 0x6f5   :  { %5490 = vmatpush1.bf16.msra.mxu0 %v5337_v9  ;;  %v5339_v46 = vpack.c.bf16 %v14399_v25, %v5262_v60  ;;  %7726 = vset.pattern.permute.xlu1 %v14402_v55  ;;  %v8009_v52 = vld [vmem:[%s13480_s2 + $0x8] sm:$0xff]  ;;  %v14412_v9 = vld [vmem:[#allocation23_spill] sm:$0xff]  ;;  %v14416_v13 = vsub.f32 0.0, %v14415_v36 }
 0x6f6   :  { %5491 = vmatprep.subr.bf16.mxu0 %v5334_v44  ;;  %6192 = vperm.xlu1 %7726, %v12033_v20   ;;  %v5335_v49 = vpack.c.bf16 %v5258_v33, %v5254_v10  ;;  %v7793_v20 = vld [vmem:[#allocation2 + $0x48] sm:$0xff]   ;;  %v14413_v63 = vsub.f32 0.0, %v14412_v9  ;;  %v14417_v10 = vld [vmem:[#allocation18_spill] sm:$0xff] }
 0x6f7   :  { %5603 = vmatpush1.bf16.msra.mxu1 %v5339_v46  ;;  %6324 = vperm.xlu0 %7738, %v14403_v4   ;;  %v12332_v44 = vsub.f32 %v14416_v13, %v14414_v50  ;;  %v12337_v25 = vsub.f32 %v14419_v7, %v14417_v10 }
 0x6f8   :  { %5604 = vmatprep.subr.bf16.mxu1 %v5336_v51  ;;  %v12327_v19 = vsub.f32 %v14413_v63, %v14411_v29 }
 0x6f9   :  { %5492 = vmatpush1.bf16.msra.mxu0 %v5333_v61 }
 0x6fa   :  { %7727 = vset.pattern.permute.xlu1 %v8109_v6 }
 0x6fb   :  { %5605 = vmatpush1.bf16.msra.mxu1 %v5335_v49  ;;  %6332 = vperm.xlu1 %7727, %v11929_v57   ;;  %v14405_v57 = vld [vmem:[#allocation55_spill] sm:$0xff]  ;;  %v14420_v49 = vld [vmem:[#allocation20_spill] sm:$0xff] }
 0x6fc   :  { %5510 = vmatmul.mubr.bf16.vlgmr.msra.gmra.mxu0 %v7792_v23  ;;  %6320 = vperm.xlu0 %7738, %v11829_v31  }
 0x6fd   :  { %5519 = vmatprep.mubr.bf16.mxu0 %v14402_v55 }
 0x6fe   :  { %5623 = vmatmul.mubr.bf16.vlgmr.msra.gmra.mxu1 %v7792_v23 }
 0x6ff   :  { %5632 = vmatprep.mubr.bf16.mxu1 %v14402_v55  ;;  %7728 = vset.pattern.permute.xlu1 %v14402_v55 }
 0x700   :  { %6180 = vperm.xlu1 %7728, %v14403_v4   ;;  %6308 = vperm.xlu0 %7738, %v14404_v28  }
 0x704   :  { %5520 = vmatmul.mubr.bf16.gmra.mxu0 %v7793_v20  ;;  %6184 = vperm.xlu1 %7728, %v12064_v40  }
 0x705   :  { %5529 = vmatprep.mubr.bf16.mxu0 %v14402_v55  ;;  %6304 = vperm.xlu0 %7738, %v14405_v57  }
 0x706   :  { %5633 = vmatmul.mubr.bf16.gmra.mxu1 %v7793_v20  ;;  %v14427_v20 = vld [vmem:[#allocation60_spill] sm:$0xff] }
 0x707   :  { %5642 = vmatprep.mubr.bf16.mxu1 %v14402_v55 }
 0x708   :  { %7729 = vset.pattern.permute.xlu1 %v8109_v6 }
 0x709   :  { %6328 = vperm.xlu1 %7729, %v12064_v40   ;;  %6292 = vperm.xlu0 %7738, %v14406_v11   ;;  %v14408_v40 = vld [vmem:[#allocation79_spill] sm:$0xff] }
 0x70c   :  { %5530 = vmatmul.mubr.bf16.gmra.mxu0 %v7794_v16 }
 0x70d   :  { %5539 = vmatprep.mubr.bf16.mxu0 %v14402_v55  ;;  %7730 = vset.pattern.permute.xlu1 %v14402_v55  ;;  %v5371_v18 = vpop.permute.xlu1 %5370  ;;  %v5367_v34 = vpop.permute.xlu0 %5366 }
 0x70e   :  { %5643 = vmatmul.mubr.bf16.gmra.mxu1 %v7794_v16  ;;  %6176 = vperm.xlu1 %7730, %v11829_v31   ;;  %v14409_v31 = vld [vmem:[#allocation82_spill] sm:$0xff] }
 0x70f   :  { %5652 = vmatprep.mubr.bf16.mxu1 %v14402_v55  ;;  %6288 = vperm.xlu0 %7738, %v14407_v56  }
 0x711   :  { %v12294_v58 = vpop.permute.xlu1 %5374  ;;  %v12320_v59 = vpop.permute.xlu0 %5378 }
 0x712   :  { %7731 = vset.pattern.permute.xlu1 %v8109_v6 }
 0x713   :  { %6316 = vperm.xlu1 %7731, %v11901_v1   ;;  %6276 = vperm.xlu0 %7738, %v14408_v40   ;;  %v7797_v1 = vld [vmem:[#allocation2 + $0x68] sm:$0xff]  }
 0x714   :  { %5540 = vmatmul.mubr.bf16.gmra.mxu0 %v7795_v27 }
 0x715   :  { %5549 = vmatprep.mubr.bf16.mxu0 %v14402_v55  ;;  %v12296_v24 = vpop.permute.xlu1 %5382 }
 0x716   :  { %5653 = vmatmul.mubr.bf16.gmra.mxu1 %v7795_v27  ;;  %v5833_v46 = vpop.permute.xlu0 %5832 }
 0x717   :  { %5662 = vmatprep.mubr.bf16.mxu1 %v14402_v55  ;;  %7732 = vset.pattern.permute.xlu1 %v14402_v55 }
 0x718   :  { %6164 = vperm.xlu1 %7732, %v14404_v28   ;;  %v14421_v28 = vld [vmem:[#allocation44_spill] sm:$0xff] }
 0x71a   :  { %v12298_v14 = vpop.permute.xlu1 %5836  ;;  %v5841_v13 = vpop.permute.xlu0 %5840 }
 0x71c   :  { %5550 = vmatmul.mubr.bf16.gmra.mxu0 %v7796_v32  ;;  %6168 = vperm.xlu1 %7732, %v14409_v31  }
 0x71d   :  { %5559 = vmatprep.mubr.bf16.mxu0 %v14402_v55 }
 0x71e   :  { %5663 = vmatmul.mubr.bf16.gmra.mxu1 %v7796_v32  ;;  %v14424_v32 = vld [vmem:[#allocation19_spill] sm:$0xff] }
 0x71f   :  { %5672 = vmatprep.mubr.bf16.mxu1 %v14402_v55  ;;  %v12300_v5 = vpop.permute.xlu1 %5386 }
 0x720   :  { %7733 = vset.pattern.permute.xlu1 %v8109_v6 }
 0x721   :  { %6312 = vperm.xlu1 %7733, %v14409_v31  }
 0x723   :  { %v12302_v43 = vpop.permute.xlu1 %5390 }
 0x724   :  { %5560 = vmatmul.mubr.bf16.gmra.mxu0 %v7797_v1 }
 0x725   :  { %5569 = vmatprep.mubr.bf16.mxu0 %v14402_v55  ;;  %7734 = vset.pattern.permute.xlu1 %v14402_v55 }
 0x726   :  { %5673 = vmatmul.mubr.bf16.gmra.mxu1 %v7797_v1  ;;  %6160 = vperm.xlu1 %7734, %v14405_v57   ;;  %v14422_v57 = vld [vmem:[#allocation26_spill] sm:$0xff]  ;;  %v14425_v1 = vld [vmem:[#allocation80_spill] sm:$0xff] }
 0x727   :  { %5682 = vmatprep.mubr.bf16.mxu1 %v14402_v55  ;;  %v12304_v42 = vpop.permute.xlu1 %5394  ;;  %v14423_v16 = vsub.f32 0.0, %v14422_v57 }
 0x72a   :  { %7735 = vset.pattern.permute.xlu1 %v8109_v6 }
 0x72b   :  { %6300 = vperm.xlu1 %7735, %v14336_v35   ;;  %v8008_v35 = vld [vmem:[%s13480_s2 + $0x10] sm:$0xff] }
 0x72c   :  { %5570 = vmatmul.mubr.bf16.gmra.mxu0 %v7798_v54  ;;  %v12306_v53 = vpop.permute.xlu1 %5852 }
 0x72d   :  { %5579 = vmatprep.mubr.bf16.mxu0 %v14402_v55 }
 0x72e   :  { %5683 = vmatmul.mubr.bf16.gmra.mxu1 %v7798_v54 }
 0x72f   :  { %5692 = vmatprep.mubr.bf16.mxu1 %v14402_v55  ;;  %7736 = vset.pattern.permute.xlu1 %v14402_v55 }
 0x730   :  { %6148 = vperm.xlu1 %7736, %v14406_v11   ;;  %v12308_v47 = vpop.permute.xlu1 %5860  ;;  %v12344_v11 = vsub.f32 %v14423_v16, %v14421_v28 }
 0x734   :  { %5580 = vmatmul.mubr.bf16.gmra.mxu0 %v7799_v45  ;;  %6152 = vperm.xlu1 %7736, %v14410_v38  }
 0x735   :  { %6723 = vmatprep.mubr.bf16.mxu0 %v14402_v55  ;;  %v12310_v2 = vpop.permute.xlu1 %5402 }
 0x736   :  { %5693 = vmatmul.mubr.bf16.gmra.mxu1 %v7799_v45 }
 0x737   :  { %6836 = vmatprep.mubr.bf16.mxu1 %v14402_v55 }
 0x738   :  { %7737 = vset.pattern.permute.xlu1 %v8109_v6 }
 0x739   :  { %6296 = vperm.xlu1 %7737, %v14410_v38   ;;  %v12312_v41 = vpop.permute.xlu1 %5406 }
 0x73d   :  { %7739 = vset.pattern.permute.xlu1 %v14402_v55 }
 0x73e   :  { %6144 = vperm.xlu1 %7739, %v14407_v56  }
 0x73f   :  { %v12314_v62 = vpop.permute.xlu1 %6064 }
 0x742   :  { %7740 = vset.pattern.permute.xlu1 %v8109_v6 }
 0x743   :  { %6284 = vperm.xlu1 %7740, %v8008_v35  }
 0x744   :  { %v12316_v0 = vpop.permute.xlu1 %5864 }
 0x747   :  { %7741 = vset.pattern.permute.xlu1 %v14402_v55 }
 0x748   :  { %6132 = vperm.xlu1 %7741, %v14408_v40  }
 0x749   :  { %v12318_v39 = vpop.permute.xlu1 %5418 }
 0x74c   :  { %6136 = vperm.xlu1 %7741, %v8009_v52  }
 0x74e   :  { %v12322_v60 = vpop.permute.xlu1 %5872 }
 0x750   :  { %7742 = vset.pattern.permute.xlu1 %v8109_v6 }
 0x751   :  { %6280 = vperm.xlu1 %7742, %v8009_v52  }
 0x752   :  { %v12346_v27 = vpop.permute.xlu1 %5876 }
 0x7bc   :  { %v5511_v8 = vpop.f32.mrf.mxu0 }
 0x7bd   :  { %v5512_v3 = vadd.f32 %v5511_v8, %v5367_v34  ;;  %v14426_v8 = vld [vmem:[#allocation52_spill] sm:$0xff] }
 0x7be   :  { %v5624_v15 = vpop.f32.mrf.mxu1  ;;  %v5513_v26 = vpop.f32.mrf.mxu0 }
 0x7bf   :  { %v5703_v12 = vmul.f32 0.01, %v5512_v3  ;;  %v5625_v48 = vadd.f32 %v5624_v15, %v5367_v34  ;;  %v5514_v6 = vadd.f32 %v5513_v26, %v5367_v34 }
 0x7c0   :  { %v5626_v30 = vpop.f32.mrf.mxu1  ;;  %v5515_v21 = vpop.f32.mrf.mxu0 }
 0x7c1   :  { %v5767_v22 = vmax.f32 %v5512_v3, %v5703_v12  ;;  %v5705_v17 = vmul.f32 0.01, %v5625_v48  ;;  %v5704_v33 = vmul.f32 0.01, %v5514_v6  ;;  %v5627_v51 = vadd.f32 %v5626_v30, %v5367_v34 }
 0x7c2   :  { %v5516_v61 = vadd.f32 %v5515_v21, %v5371_v18  ;;  %v5628_v23 = vpop.f32.mrf.mxu1  ;;  %v5517_v4 = vpop.f32.mrf.mxu0 }
 0x7c3   :  { %v5769_v56 = vmax.f32 %v5625_v48, %v5705_v17  ;;  %v5706_v40 = vmul.f32 0.01, %v5627_v51  ;;  %v5629_v38 = vadd.f32 %v5628_v23, %v5371_v18  ;;  %v5518_v35 = vadd.f32 %v5517_v4, %v5371_v18 }
 0x7c4   :  { %v5707_v45 = vmul.f32 0.01, %v5516_v61  ;;  %v5630_v52 = vpop.f32.mrf.mxu1  ;;  %v5521_v34 = vpop.f32.mrf.mxu0  ;;  %v5895_v15 = vmul.f32 %v5833_v46, %v5767_v22  ;;  %v5768_v12 = vmax.f32 %v5514_v6, %v5704_v33 }
 0x7c5   :  { %v5897_v26 = vmul.f32 %v5833_v46, %v5769_v56  ;;  %v5631_v30 = vadd.f32 %v5630_v52, %v5371_v18  ;;  %v5709_v21 = vmul.f32 0.01, %v5629_v38  ;;  %v5708_v29 = vmul.f32 0.01, %v5518_v35 }
 0x7c6   :  { %v5771_v48 = vmax.f32 %v5516_v61, %v5707_v45  ;;  %v5522_v9 = vadd.f32 %v5521_v34, %v12294_v58  ;;  %v5634_v63 = vpop.f32.mrf.mxu1  ;;  %v5523_v50 = vpop.f32.mrf.mxu0  ;;  %v5770_v36 = vmax.f32 %v5627_v51, %v5706_v40  ;;  %v5896_v16 = vmul.f32 %v5833_v46, %v5768_v12 }
 0x7c7   :  { %v5710_v10 = vmul.f32 0.01, %v5631_v30  ;;  %v5635_v37 = vadd.f32 %v5634_v63, %v12294_v58  ;;  %v5524_v7 = vadd.f32 %v5523_v50, %v12294_v58  ;;  %v5773_v22 = vmax.f32 %v5629_v38, %v5709_v21  ;;  %v12358_v61 = vpop.permute.xlu1 %5426 }
 0x7c8   :  { %v5899_v17 = vmul.f32 %v12298_v14, %v5771_v48  ;;  %v5772_v23 = vmax.f32 %v5518_v35, %v5708_v29  ;;  %v5711_v6 = vmul.f32 0.01, %v5522_v9  ;;  %v5636_v18 = vpop.f32.mrf.mxu1  ;;  %v5525_v33 = vpop.f32.mrf.mxu0  ;;  %v5898_v29 = vmul.f32 %v5833_v46, %v5770_v36 }
 0x7c9   :  { %v5774_v4 = vmax.f32 %v5631_v30, %v5710_v10  ;;  %v5713_v28 = vmul.f32 0.01, %v5635_v37  ;;  %v5712_v57 = vmul.f32 0.01, %v5524_v7  ;;  %v5637_v51 = vadd.f32 %v5636_v18, %v12294_v58 }
 0x7ca   :  { %v5901_v56 = vmul.f32 %v12298_v14, %v5773_v22  ;;  %v5900_v40 = vmul.f32 %v12298_v14, %v5772_v23  ;;  %v5775_v45 = vmax.f32 %v5522_v9, %v5711_v6  ;;  %v5638_v52 = vpop.f32.mrf.mxu1  ;;  %v5527_v34 = vpop.f32.mrf.mxu0  ;;  %v5959_v63 = vadd.f32 %v5899_v17, %v5895_v15 }
 0x7cb   :  { %v5902_v38 = vmul.f32 %v12298_v14, %v5774_v4  ;;  %v5777_v35 = vmax.f32 %v5635_v37, %v5713_v28  ;;  %v5776_v48 = vmax.f32 %v5524_v7, %v5712_v57  ;;  %v5714_v21 = vmul.f32 0.01, %v5637_v51  ;;  %v5845_v22 = vpop.permute.xlu0 %5844  ;;  %v12367_v46 = vpop.permute.xlu1 %5884 }
 0x7cc   :  { %v5903_v30 = vmul.f32 %v5841_v13, %v5775_v45  ;;  %v5526_v50 = vadd.f32 %v5525_v33, %v12320_v59  ;;  %v5640_v10 = vpop.f32.mrf.mxu1  ;;  %v5531_v58 = vpop.f32.mrf.mxu0  ;;  %v5985_v12 = vadd.f32 %v5901_v56, %v5897_v26  ;;  %v5972_v18 = vadd.f32 %v5900_v40, %v5896_v16 }
 0x7cd   :  { %v5905_v3 = vmul.f32 %v5841_v13, %v5777_v35  ;;  %v5778_v23 = vmax.f32 %v5637_v51, %v5714_v21  ;;  %v5998_v9 = vadd.f32 %v5902_v38, %v5898_v29  ;;  %v5639_v31 = vadd.f32 %v5638_v52, %v12320_v59 }
 0x7ce   :  { %v5715_v6 = vmul.f32 0.01, %v5526_v50  ;;  %v5528_v14 = vadd.f32 %v5527_v34, %v12320_v59  ;;  %v5644_v37 = vpop.f32.mrf.mxu1  ;;  %v5533_v7 = vpop.f32.mrf.mxu0  ;;  %v5960_v15 = vadd.f32 %v5959_v63, %v5903_v30  ;;  %v5904_v17 = vmul.f32 %v5841_v13, %v5776_v48 }
 0x7cf   :  { %v5986_v36 = vadd.f32 %v5985_v12, %v5905_v3  ;;  %v5641_v33 = vadd.f32 %v5640_v10, %v12320_v59  ;;  %v5717_v4 = vmul.f32 0.01, %v5639_v31  ;;  %v5532_v57 = vadd.f32 %v5531_v58, %v12296_v24  ;;  %v5849_v59 = vpop.permute.xlu0 %5848 }
 0x7d0   :  { %v5779_v26 = vmax.f32 %v5526_v50, %v5715_v6  ;;  %v5716_v28 = vmul.f32 0.01, %v5528_v14  ;;  %v5646_v51 = vpop.f32.mrf.mxu1  ;;  %v5535_v16 = vpop.f32.mrf.mxu0  ;;  %v5906_v56 = vmul.f32 %v5841_v13, %v5778_v23  ;;  %v5645_v45 = vadd.f32 %v5644_v37, %v12296_v24 }
 0x7d1   :  { %v5718_v40 = vmul.f32 0.01, %v5641_v33  ;;  %v5534_v52 = vadd.f32 %v5533_v7, %v12296_v24  ;;  %v5781_v38 = vmax.f32 %v5639_v31, %v5717_v4  ;;  %v5719_v3 = vmul.f32 0.01, %v5532_v57  ;;  %v12374_v37 = vpop.permute.xlu1 %5888 }
 0x7d2   :  { %v5907_v34 = vmul.f32 %v5845_v22, %v5779_v26  ;;  %v5780_v35 = vmax.f32 %v5528_v14, %v5716_v28  ;;  %v5648_v48 = vpop.f32.mrf.mxu1  ;;  %v5537_v21 = vpop.f32.mrf.mxu0  ;;  %v5721_v63 = vmul.f32 0.01, %v5645_v45  ;;  %v5647_v50 = vadd.f32 %v5646_v51, %v12296_v24 }
 0x7d3   :  { %v5782_v29 = vmax.f32 %v5641_v33, %v5718_v40  ;;  %v5720_v30 = vmul.f32 0.01, %v5534_v52  ;;  %v5973_v10 = vadd.f32 %v5972_v18, %v5904_v17  ;;  %v5909_v58 = vmul.f32 %v5845_v22, %v5781_v38 }
 0x7d4   :  { %v5908_v13 = vmul.f32 %v5845_v22, %v5780_v35  ;;  %v5783_v12 = vmax.f32 %v5532_v57, %v5719_v3  ;;  %v5650_v23 = vpop.f32.mrf.mxu1  ;;  %v5541_v6 = vpop.f32.mrf.mxu0  ;;  %v5785_v31 = vmax.f32 %v5645_v45, %v5721_v63  ;;  %v5722_v26 = vmul.f32 0.01, %v5647_v50 }
 0x7d5   :  { %v5910_v7 = vmul.f32 %v5845_v22, %v5782_v29  ;;  %v5784_v14 = vmax.f32 %v5534_v52, %v5720_v30  ;;  %v5999_v4 = vadd.f32 %v5998_v9, %v5906_v56  ;;  %v5536_v33 = vadd.f32 %v5535_v16, %v12300_v5  ;;  %v12385_v35 = vpop.permute.xlu0 %5856 }
 0x7d6   :  { %v5911_v28 = vmul.f32 %v5849_v59, %v5783_v12  ;;  %v5654_v40 = vpop.f32.mrf.mxu1  ;;  %v5543_v54 = vpop.f32.mrf.mxu0  ;;  %v14428_v24 = vsub.f32 %v12327_v19, %v14420_v49  ;;  %v5961_v17 = vadd.f32 %v5960_v15, %v5907_v34  ;;  %v5987_v57 = vadd.f32 %v5986_v36, %v5909_v58 }
 0x7d7   :  { %v5974_v51 = vadd.f32 %v5973_v10, %v5908_v13  ;;  %v5786_v38 = vmax.f32 %v5647_v50, %v5722_v26  ;;  %v6000_v22 = vadd.f32 %v5999_v4, %v5910_v7  ;;  %v5723_v45 = vmul.f32 0.01, %v5536_v33  ;;  %v12389_v50 = vpop.permute.xlu1 %6076 }
 0x7d8   :  { %v12381_v18 = vsub.f32 %v14428_v24, %v14427_v20  ;;  %v5649_v52 = vadd.f32 %v5648_v48, %v12300_v5  ;;  %v5538_v9 = vadd.f32 %v5537_v21, %v12300_v5  ;;  %v5656_v56 = vpop.f32.mrf.mxu1  ;;  %v5545_v16 = vpop.f32.mrf.mxu0  ;;  %v5962_v3 = vadd.f32 %v5961_v17, %v5911_v28 }
 0x7d9   :  { %v5913_v29 = vmul.f32 %v5849_v59, %v5785_v31  ;;  %v5912_v63 = vmul.f32 %v5849_v59, %v5784_v14  ;;  %v5651_v19 = vadd.f32 %v5650_v23, %v12300_v5  ;;  %v5787_v49 = vmax.f32 %v5536_v33, %v5723_v45  ;;  %v12397_v17 = vpop.permute.xlu0 %5868 }
 0x7da   :  { %14429 = vst [vmem:[#allocation22_spill] sm:$0xff] %v12381_v18  ;;  %v5725_v20 = vmul.f32 0.01, %v5649_v52  ;;  %v5724_v15 = vmul.f32 0.01, %v5538_v9  ;;  %v5542_v36 = vadd.f32 %v5541_v6, %v12302_v43  ;;  %v5658_v34 = vpop.f32.mrf.mxu1  ;;  %v5547_v30 = vpop.f32.mrf.mxu0  ;;  %v5914_v48 = vmul.f32 %v5849_v59, %v5786_v38 }
 0x7db   :  { %v5726_v21 = vmul.f32 0.01, %v5651_v19  ;;  %v5655_v10 = vadd.f32 %v5654_v40, %v12302_v43  ;;  %v5544_v58 = vadd.f32 %v5543_v54, %v12302_v43  ;;  %v5915_v13 = vmul.f32 %v12306_v53, %v5787_v49 }
 0x7dc   :  { %v5789_v12 = vmax.f32 %v5649_v52, %v5725_v20  ;;  %v5788_v7 = vmax.f32 %v5538_v9, %v5724_v15  ;;  %v5727_v5 = vmul.f32 0.01, %v5542_v36  ;;  %v5660_v23 = vpop.f32.mrf.mxu1  ;;  %v5551_v31 = vpop.f32.mrf.mxu0  ;;  %v5657_v4 = vadd.f32 %v5656_v56, %v12302_v43  ;;  %v14430_v56 = vld [vmem:[#allocation66_spill] sm:$0xff] }
 0x7dd   :  { %v5790_v14 = vmax.f32 %v5651_v19, %v5726_v21  ;;  %v5729_v26 = vmul.f32 0.01, %v5655_v10  ;;  %v5728_v6 = vmul.f32 0.01, %v5544_v58  ;;  %v5988_v28 = vadd.f32 %v5987_v57, %v5913_v29 }
 0x7de   :  { %v5917_v59 = vmul.f32 %v12306_v53, %v5789_v12  ;;  %v5916_v33 = vmul.f32 %v12306_v53, %v5788_v7  ;;  %v5791_v40 = vmax.f32 %v5542_v36, %v5727_v5  ;;  %v5664_v24 = vpop.f32.mrf.mxu1  ;;  %v5553_v54 = vpop.f32.mrf.mxu0  ;;  %v5730_v9 = vmul.f32 0.01, %v5657_v4 }
 0x7df   :  { %v5918_v38 = vmul.f32 %v12306_v53, %v5790_v14  ;;  %v5793_v45 = vmax.f32 %v5655_v10, %v5729_v26  ;;  %v5792_v52 = vmax.f32 %v5544_v58, %v5728_v6  ;;  %v5975_v19 = vadd.f32 %v5974_v51, %v5912_v63  ;;  %v12407_v36 = vpop.permute.xlu1 %6192 }
 0x7e0   :  { %v6001_v49 = vadd.f32 %v6000_v22, %v5914_v48  ;;  %v5546_v20 = vadd.f32 %v5545_v16, %v12304_v42  ;;  %v5666_v43 = vpop.f32.mrf.mxu1  ;;  %v5555_v57 = vpop.f32.mrf.mxu0  ;;  %v14431_v29 = vsub.f32 %v12337_v25, %v14425_v1  ;;  %v5963_v21 = vadd.f32 %v5962_v3, %v5915_v13 }
 0x7e1   :  { %v5989_v12 = vadd.f32 %v5988_v28, %v5917_v59  ;;  %v5919_v53 = vmul.f32 %v12385_v35, %v5791_v40  ;;  %v5794_v10 = vmax.f32 %v5657_v4, %v5730_v9  ;;  %v5921_v51 = vmul.f32 %v12385_v35, %v5793_v45  ;;  %v5399_v1 = vpop.permute.xlu0 %5398 }
 0x7e2   :  { %v12405_v15 = vsub.f32 %v14431_v29, %v14430_v56  ;;  %v5731_v22 = vmul.f32 0.01, %v5546_v20  ;;  %v5659_v16 = vadd.f32 %v5658_v34, %v12304_v42  ;;  %v5548_v63 = vadd.f32 %v5547_v30, %v12304_v42  ;;  %v5668_v48 = vpop.f32.mrf.mxu1  ;;  %v5557_v58 = vpop.f32.mrf.mxu0 }
 0x7e3   :  { %v5976_v7 = vadd.f32 %v5975_v19, %v5916_v33  ;;  %v6002_v25 = vadd.f32 %v6001_v49, %v5918_v38  ;;  %v5920_v5 = vmul.f32 %v12385_v35, %v5792_v52  ;;  %v5661_v3 = vadd.f32 %v5660_v23, %v12304_v42 }
 0x7e4   :  { %14432 = vst [vmem:[#allocation33_spill] sm:$0xff] %v12405_v15  ;;  %v5795_v13 = vmax.f32 %v5546_v20, %v5731_v22  ;;  %v5733_v14 = vmul.f32 0.01, %v5659_v16  ;;  %v5732_v26 = vmul.f32 0.01, %v5548_v63  ;;  %v12415_v6 = vadd.f32 %v5551_v31, %v5399_v1  ;;  %v5670_v4 = vpop.f32.mrf.mxu1  ;;  %v12417_v28 = vpop.f32.mrf.mxu0 }
 0x7e5   :  { %v5964_v34 = vadd.f32 %v5963_v21, %v5919_v53  ;;  %v5922_v30 = vmul.f32 %v12385_v35, %v5794_v10  ;;  %v5734_v59 = vmul.f32 0.01, %v5661_v3  ;;  %v12420_v40 = vadd.f32 %v5664_v24, %v5399_v1  ;;  %v12433_v35 = vpop.permute.xlu1 %6332  ;;  %v14433_v10 = vld [vmem:[#allocation27_spill] sm:$0xff] }
 0x7e6   :  { %v5990_v33 = vadd.f32 %v5989_v12, %v5921_v51  ;;  %v5923_v38 = vmul.f32 %v12308_v47, %v5795_v13  ;;  %v5797_v45 = vmax.f32 %v5659_v16, %v5733_v14  ;;  %v5796_v52 = vmax.f32 %v5548_v63, %v5732_v26  ;;  %v12423_v42 = vpop.f32.mrf.mxu1  ;;  %v12431_v49 = vpop.f32.mrf.mxu0 }
 0x7e7   :  { %v5798_v23 = vmax.f32 %v5661_v3, %v5734_v59  ;;  %v5735_v31 = vmul.f32 0.01, %v12415_v6  ;;  %v12427_v9 = vmul.f32 0.01, %v12420_v40  ;;  %v12429_v19 = vadd.f32 %v5553_v54, %v5399_v1 }
 0x7e8   :  { %v5977_v24 = vadd.f32 %v5976_v7, %v5920_v5  ;;  %v5965_v20 = vadd.f32 %v5964_v34, %v5923_v38  ;;  %v5925_v56 = vmul.f32 %v12308_v47, %v5797_v45  ;;  %v5924_v29 = vmul.f32 %v12308_v47, %v5796_v52  ;;  %v12444_v3 = vpop.f32.mrf.mxu1  ;;  %v14436_v7 = vld [vmem:[#allocation84_spill] sm:$0xff] }
 0x7e9   :  { %v6003_v21 = vadd.f32 %v6002_v25, %v5922_v30  ;;  %v5926_v12 = vmul.f32 %v12308_v47, %v5798_v23  ;;  %v5667_v53 = vadd.f32 %v5666_v43, %v5399_v1  ;;  %v14434_v51 = vsub.f32 %v12332_v44, %v14424_v32  ;;  %v12456_v32 = vpop.f32.mrf.mxu0 }
 0x7ea   :  { %v5966_v22 = vrot.slane %v5965_v20, 4  ;;  %v5991_v16 = vadd.f32 %v5990_v33, %v5925_v56  ;;  %v5978_v63 = vadd.f32 %v5977_v24, %v5924_v29  ;;  %v14437_v5 = vsub.f32 %v12344_v11, %v14426_v8  ;;  %v12461_v33 = vpop.permute.xlu1 %6180  ;;  %v5678_v52 = vpop.f32.mrf.mxu1 }
 0x7eb   :  { %v12442_v54 = vsub.f32 %v14434_v51, %v14433_v10  ;;  %v6004_v25 = vadd.f32 %v6003_v21, %v5926_v12  ;;  %v5799_v47 = vmax.f32 %v12415_v6, %v5735_v31  ;;  %v5801_v43 = vmax.f32 %v12420_v40, %v12427_v9 }
 0x7ec   :  { %v12450_v13 = vsub.f32 %v14437_v5, %v14436_v7  ;;  %v5736_v44 = vmul.f32 0.01, %v12429_v19  ;;  %v5967_v1 = vadd.f32 %v5966_v22, %v5965_v20  ;;  %v5992_v14 = vrot.slane %v5991_v16, 4  ;;  %v12464_v20 = vpop.f32.mrf.mxu0  ;;  %v5680_v7 = vpop.f32.mrf.mxu1 }
 0x7ed   :  { %14435 = vst [vmem:[#allocation47_spill] sm:$0xff] %v12442_v54  ;;  %v5979_v26 = vrot.slane %v5978_v63, 4  ;;  %v5556_v34 = vadd.f32 %v5555_v57, %v12310_v2  ;;  %v6005_v30 = vrot.slane %v6004_v25, 4  ;;  %v5738_v59 = vmul.f32 0.01, %v5667_v53  ;;  %v5411_v5 = vpop.permute.xlu0 %5410 }
 0x7ee   :  { %14438 = vst [vmem:[#allocation91_spill] sm:$0xff] %v12450_v13  ;;  %v5669_v11 = vadd.f32 %v5668_v48, %v12310_v2  ;;  %v5558_v8 = vadd.f32 %v5557_v58, %v12310_v2  ;;  %v5968_v6 = vrot.slane %v5967_v1, 2  ;;  %v5993_v38 = vadd.f32 %v5992_v14, %v5991_v16  ;;  %v12469_v14 = vpop.f32.mrf.mxu0 }
 0x7ef   :  { %v5980_v40 = vadd.f32 %v5979_v26, %v5978_v63  ;;  %v5739_v45 = vmul.f32 0.01, %v5556_v34  ;;  %v6006_v23 = vadd.f32 %v6005_v30, %v6004_v25  ;;  %v5671_v24 = vadd.f32 %v5670_v4, %v12310_v2  ;;  %v12471_v30 = vpop.permute.xlu1 %6184 }
 0x7f0   :  { %v5741_v31 = vmul.f32 0.01, %v5669_v11  ;;  %v5740_v9 = vmul.f32 0.01, %v5558_v8  ;;  %v5969_v57 = vadd.f32 %v5968_v6, %v5967_v1  ;;  %v5994_v56 = vrot.slane %v5993_v38, 2 }
 0x7f1   :  { %v5981_v29 = vrot.slane %v5980_v40, 2  ;;  %v5803_v48 = vmax.f32 %v5556_v34, %v5739_v45  ;;  %v6007_v21 = vrot.slane %v6006_v23, 2  ;;  %v5800_v58 = vmax.f32 %v12429_v19, %v5736_v44  ;;  %v5684_v45 = vpop.f32.mrf.mxu1 }
 0x7f2   :  { %v5802_v12 = vmax.f32 %v5667_v53, %v5738_v59  ;;  %v5805_v10 = vmax.f32 %v5669_v11, %v5741_v31  ;;  %v5970_v51 = vrot.slane %v5969_v57, 1  ;;  %v5995_v22 = vadd.f32 %v5994_v56, %v5993_v38 }
 0x7f3   :  { %v5982_v16 = vadd.f32 %v5981_v29, %v5980_v40  ;;  %v5804_v63 = vmax.f32 %v5558_v8, %v5740_v9  ;;  %v6008_v25 = vadd.f32 %v6007_v21, %v6006_v23  ;;  %v5927_v2 = vmul.f32 %v12316_v0, %v5799_v47 }
 0x7f4   :  { %v5931_v4 = vmul.f32 %v12397_v17, %v5803_v48  ;;  %v5742_v1 = vmul.f32 0.01, %v5671_v24  ;;  %v5971_v26 = vadd.f32 %v5970_v51, %v5969_v57  ;;  %v5996_v34 = vrot.slane %v5995_v22, 1  ;;  %v5573_v57 = vpop.f32.mrf.mxu0 }
 0x7f5   :  { %v5983_v19 = vrot.slane %v5982_v16, 1  ;;  %v5933_v53 = vmul.f32 %v12397_v17, %v5805_v10  ;;  %v6009_v44 = vrot.slane %v6008_v25, 1  ;;  %v5929_v59 = vmul.f32 %v12316_v0, %v5801_v43 }
 0x7f6   :  { %v5928_v11 = vmul.f32 %v12316_v0, %v5800_v58  ;;  %v5930_v8 = vmul.f32 %v12316_v0, %v5802_v12  ;;  %v5997_v47 = vadd.f32 %v5996_v34, %v5995_v22  ;;  %v5932_v38 = vmul.f32 %v12397_v17, %v5804_v63  ;;  %v5415_v58 = vpop.permute.xlu0 %5414 }
 0x7f7   :  { %v5984_v6 = vadd.f32 %v5983_v19, %v5982_v16  ;;  %v5562_v40 = vadd.f32 %v12417_v28, %v12312_v41  ;;  %v6010_v23 = vadd.f32 %v6009_v44, %v6008_v25  ;;  %v5806_v31 = vmax.f32 %v5671_v24, %v5742_v1  ;;  %v5686_v16 = vpop.f32.mrf.mxu1  ;;  %v5575_v1 = vpop.f32.mrf.mxu0 }
 0x7f8   :  { %v5675_v9 = vadd.f32 %v12423_v42, %v12312_v41  ;;  %v5564_v43 = vadd.f32 %v12431_v49, %v12312_v41  ;;  %v6067_v56 = vadd.f32 %v12314_v62, %v5971_v26  ;;  %v6011_v0 = vadd.f32 %v5931_v4, %v5927_v2  ;;  %v12489_v42 = vpop.permute.xlu1 %6328 }
 0x7f9   :  { %v6037_v29 = vadd.f32 %v5933_v53, %v5929_v59  ;;  %v5743_v48 = vmul.f32 0.01, %v5562_v40  ;;  %v6069_v21 = vadd.f32 %v12314_v62, %v5997_v47  ;;  %v5677_v24 = vadd.f32 %v12444_v3, %v12312_v41  ;;  %v5688_v44 = vpop.f32.mrf.mxu1 }
 0x7fa   :  { %v5745_v12 = vmul.f32 0.01, %v5675_v9  ;;  %v5744_v28 = vmul.f32 0.01, %v5564_v43  ;;  %v6068_v10 = vadd.f32 %v12314_v62, %v5984_v6  ;;  %v5566_v49 = vadd.f32 %v12456_v32, %v5411_v5 }
 0x7fb   :  { %v5807_v51 = vmax.f32 %v5562_v40, %v5743_v48  ;;  %v5679_v22 = vadd.f32 %v5678_v52, %v5411_v5  ;;  %v6070_v63 = vadd.f32 %v12314_v62, %v6010_v23  ;;  %v5934_v25 = vmul.f32 %v12397_v17, %v5806_v31  ;;  %v12497_v17 = vpop.permute.xlu0 %5422  ;;  %v5577_v40 = vpop.f32.mrf.mxu0 }
 0x7fc   :  { %v5809_v2 = vmax.f32 %v5675_v9, %v5745_v12  ;;  %v5746_v4 = vmul.f32 0.01, %v5677_v24  ;;  %7880 = vtanh.f32 %v6067_v56  ;;  %v5808_v26 = vmax.f32 %v5564_v43, %v5744_v28  ;;  %v12499_v23 = vpop.permute.xlu1 %6176  ;;  %v5690_v12 = vpop.f32.mrf.mxu1 }
 0x7fd   :  { %v5747_v34 = vmul.f32 0.01, %v5566_v49  ;;  %v5749_v41 = vmul.f32 0.01, %v5679_v22  ;;  %7882 = vtanh.f32 %v6069_v21  ;;  %v6024_v3 = vadd.f32 %v5932_v38, %v5928_v11 }
 0x7fe   :  { %v5935_v19 = vmul.f32 %v12322_v60, %v5807_v51  ;;  %v5568_v53 = vadd.f32 %v12464_v20, %v5411_v5  ;;  %7884 = vtanh.f32 %v6068_v10  ;;  %v5937_v32 = vmul.f32 %v12322_v60, %v5809_v2 }
 0x7ff   :  { %v5810_v52 = vmax.f32 %v5677_v24, %v5746_v4  ;;  %v5681_v62 = vadd.f32 %v5680_v7, %v5411_v5  ;;  %7886 = vtanh.f32 %v6070_v63  ;;  %v6050_v59 = vadd.f32 %v5934_v25, %v5930_v8 }
 0x800   :  { %v5811_v47 = vmax.f32 %v5566_v49, %v5747_v34  ;;  %v5748_v6 = vmul.f32 0.01, %v5568_v53  ;;  %v5936_v11 = vmul.f32 %v12322_v60, %v5808_v26  ;;  %v5813_v38 = vmax.f32 %v5679_v22, %v5749_v41  ;;  %v5581_v49 = vpop.f32.mrf.mxu0  ;;  %v12510_v2 = vpop.permute.xlu1 %6316 }
 0x801   :  { %v5750_v31 = vmul.f32 0.01, %v5681_v62  ;;  %v5572_v20 = vadd.f32 %v12469_v14, %v5415_v58  ;;  %v6012_v9 = vadd.f32 %v6011_v0, %v5935_v19  ;;  %v5685_v56 = vadd.f32 %v5684_v45, %v5415_v58  ;;  %v5694_v34 = vpop.f32.mrf.mxu1 }
 0x802   :  { %v5812_v43 = vmax.f32 %v5568_v53, %v5748_v6  ;;  %v5574_v7 = vadd.f32 %v5573_v57, %v5415_v58  ;;  %v6038_v5 = vadd.f32 %v6037_v29, %v5937_v32  ;;  %v5938_v48 = vmul.f32 %v12322_v60, %v5810_v52  ;;  %v5881_v57 = vpop.permute.xlu0 %5880  ;;  %v5583_v32 = vpop.f32.mrf.mxu0 }
 0x803   :  { %v5814_v21 = vmax.f32 %v5681_v62, %v5750_v31  ;;  %v5751_v8 = vmul.f32 0.01, %v5572_v20  ;;  %v5939_v28 = vmul.f32 %v12346_v27, %v5811_v47  ;;  %v5753_v24 = vmul.f32 0.01, %v5685_v56 }
 0x804   :  { %v5752_v10 = vmul.f32 0.01, %v5574_v7  ;;  %v5687_v51 = vadd.f32 %v5686_v16, %v5415_v58  ;;  %v5941_v22 = vmul.f32 %v12346_v27, %v5813_v38  ;;  %v5576_v14 = vadd.f32 %v5575_v1, %v12318_v39 }
 0x805   :  { %v5815_v63 = vmax.f32 %v5572_v20, %v5751_v8  ;;  %v5689_v45 = vadd.f32 %v5688_v44, %v12318_v39  ;;  %v5940_v0 = vmul.f32 %v12346_v27, %v5812_v43  ;;  %v5942_v60 = vmul.f32 %v12346_v27, %v5814_v21  ;;  %v5585_v21 = vpop.f32.mrf.mxu0 }
 0x806   :  { %v5817_v29 = vmax.f32 %v5685_v56, %v5753_v24  ;;  %v5754_v25 = vmul.f32 0.01, %v5687_v51  ;;  %v6025_v4 = vadd.f32 %v6024_v3, %v5936_v11  ;;  %v5816_v26 = vmax.f32 %v5574_v7, %v5752_v10 }
 0x807   :  { %v5755_v58 = vmul.f32 0.01, %v5576_v14  ;;  %v5757_v16 = vmul.f32 0.01, %v5689_v45  ;;  %v6051_v41 = vadd.f32 %v6050_v59, %v5938_v48  ;;  %v6013_v19 = vadd.f32 %v6012_v9, %v5939_v28 }
 0x808   :  { %v5943_v53 = vmul.f32 %v5881_v57, %v5815_v63  ;;  %v5578_v1 = vadd.f32 %v5577_v40, %v12318_v39  ;;  %v6039_v52 = vadd.f32 %v6038_v5, %v5941_v22  ;;  %v5945_v62 = vmul.f32 %v5881_v57, %v5817_v29  ;;  %v5696_v40 = vpop.f32.mrf.mxu1 }
 0x809   :  { %v5818_v44 = vmax.f32 %v5687_v51, %v5754_v25  ;;  %v5691_v27 = vadd.f32 %v5690_v12, %v12318_v39  ;;  %v12514_v47 = vpop.eup %7880  ;;  %v6026_v6 = vadd.f32 %v6025_v4, %v5940_v0  ;;  %v6052_v38 = vadd.f32 %v6051_v41, %v5942_v60  ;;  %v12525_v12 = vpop.permute.xlu1 %6164 }
 0x80a   :  { %14439 = vst [vmem:[#allocation71_spill] sm:$0xff] %v12514_v47  ;;  %v5819_v3 = vmax.f32 %v5576_v14, %v5755_v58  ;;  %v5756_v11 = vmul.f32 0.01, %v5578_v1  ;;  %v12516_v31 = vpop.eup %7882  ;;  %v5944_v20 = vmul.f32 %v5881_v57, %v5816_v26  ;;  %v5821_v59 = vmax.f32 %v5689_v45, %v5757_v16  ;;  %v5698_v25 = vpop.f32.mrf.mxu1 }
 0x80b   :  { %14440 = vst [vmem:[#allocation28_spill] sm:$0xff] %v12516_v31  ;;  %v5758_v9 = vmul.f32 0.01, %v5691_v27  ;;  %v5582_v43 = vadd.f32 %v5581_v49, %v12497_v17  ;;  %v12519_v56 = vpop.eup %7884  ;;  %v6014_v7 = vadd.f32 %v6013_v19, %v5943_v53  ;;  %v5695_v39 = vadd.f32 %v5694_v34, %v12497_v17  ;;  %v5893_v16 = vpop.permute.xlu0 %5892 }
 0x80c   :  { %14441 = vst [vmem:[#allocation83_spill] sm:$0xff] %v12519_v56  ;;  %v5820_v5 = vmax.f32 %v5578_v1, %v5756_v11  ;;  %v5584_v48 = vadd.f32 %v5583_v32, %v12497_v17  ;;  %v12523_v8 = vpop.eup %7886  ;;  %v6040_v28 = vadd.f32 %v6039_v52, %v5945_v62  ;;  %v5946_v24 = vmul.f32 %v5881_v57, %v5818_v44  ;;  %v5587_v62 = vpop.f32.mrf.mxu0 }
 0x80d   :  { %14442 = vst [vmem:[#allocation74_spill] sm:$0xff] %v12523_v8  ;;  %v5822_v10 = vmax.f32 %v5691_v27, %v5758_v9  ;;  %v5759_v51 = vmul.f32 0.01, %v5582_v43  ;;  %v5947_v49 = vmul.f32 %v12367_v46, %v5819_v3  ;;  %v5761_v22 = vmul.f32 0.01, %v5695_v39  ;;  %v12537_v44 = vpop.permute.xlu1 %6168 }
 0x80e   :  { %v5760_v63 = vmul.f32 0.01, %v5584_v48  ;;  %v5697_v14 = vadd.f32 %v5696_v40, %v12497_v17  ;;  %v5949_v45 = vmul.f32 %v12367_v46, %v5821_v59  ;;  %v5586_v60 = vadd.f32 %v5585_v21, %v12358_v61  ;;  %14443 = vst [vmem:[#allocation86_spill] sm:$0xff] %v12537_v44  ;;  %v5700_v59 = vpop.f32.mrf.mxu1 }
 0x80f   :  { %v5823_v0 = vmax.f32 %v5582_v43, %v5759_v51  ;;  %v6099_v29 = vsub.f32 0.0, %v12514_v47  ;;  %v5948_v4 = vmul.f32 %v12367_v46, %v5820_v5  ;;  %v5950_v57 = vmul.f32 %v12367_v46, %v5822_v10 }
 0x810   :  { %v5825_v26 = vmax.f32 %v5695_v39, %v5761_v22  ;;  %v5762_v58 = vmul.f32 0.01, %v5697_v14  ;;  %v6027_v34 = vadd.f32 %v6026_v6, %v5944_v20  ;;  %v5824_v19 = vmax.f32 %v5584_v48, %v5760_v63 }
 0x811   :  { %v5951_v41 = vmul.f32 %v12374_v37, %v5823_v0  ;;  %v5763_v17 = vmul.f32 0.01, %v5586_v60  ;;  %v6053_v53 = vadd.f32 %v6052_v38, %v5946_v24  ;;  %v6103_v32 = vmul.f32 1.442695, %v6099_v29  ;;  %v12549_v0 = vpop.permute.xlu1 %6312 }
 0x812   :  { %v5953_v1 = vmul.f32 %v12374_v37, %v5825_v26  ;;  %v5699_v52 = vadd.f32 %v5698_v25, %v12358_v61  ;;  %v6015_v27 = vadd.f32 %v6014_v7, %v5947_v49  ;;  %v6041_v3 = vadd.f32 %v6040_v28, %v5949_v45  ;;  %v12543_v28 = vpop.permute.xlu0 %6188  ;;  %14444 = vst [vmem:[#allocation36_spill] sm:$0xff] %v12549_v0 }
 0x813   :  { %v5826_v46 = vmax.f32 %v5697_v14, %v5762_v58  ;;  %v5827_v11 = vmax.f32 %v5586_v60, %v5763_v17  ;;  %v6028_v9 = vadd.f32 %v6027_v34, %v5948_v4  ;;  %v6054_v6 = vadd.f32 %v6053_v53, %v5950_v57 }
 0x814   :  { %v5765_v20 = vmul.f32 0.01, %v5699_v52  ;;  %v6101_v43 = vsub.f32 0.0, %v12516_v31  ;;  %v6016_v40 = vadd.f32 %v6015_v27, %v5951_v41  ;;  %v5952_v38 = vmul.f32 %v12374_v37, %v5824_v19 }
 0x815   :  { %v5955_v5 = vmul.f32 %v5893_v16, %v5827_v11  ;;  %v5588_v39 = vadd.f32 %v5587_v62, %v12358_v61  ;;  %v6042_v48 = vadd.f32 %v6041_v3, %v5953_v1  ;;  %7888 = vpow2.f32 %v6103_v32  ;;  %v12560_v11 = vpop.permute.xlu1 %6160 }
 0x816   :  { %v5829_v21 = vmax.f32 %v5699_v52, %v5765_v20  ;;  %v5701_v7 = vadd.f32 %v5700_v59, %v12358_v61  ;;  %v5954_v24 = vmul.f32 %v12374_v37, %v5826_v46  ;;  %v6100_v49 = vsub.f32 0.0, %v12519_v56  ;;  %v12558_v32 = vpop.permute.xlu0 %6172 }
 0x817   :  { %v6017_v10 = vadd.f32 %v6016_v40, %v5955_v5  ;;  %v5764_v51 = vmul.f32 0.01, %v5588_v39  ;;  %v6107_v63 = vmul.f32 1.442695, %v6101_v43  ;;  %v6102_v61 = vsub.f32 0.0, %v12523_v8 }
 0x818   :  { %v5957_v22 = vmul.f32 %v5893_v16, %v5829_v21  ;;  %v5766_v14 = vmul.f32 0.01, %v5701_v7  ;;  %v6029_v37 = vadd.f32 %v6028_v9, %v5952_v38  ;;  %v6105_v41 = vmul.f32 1.442695, %v6100_v49 }
 0x819   :  { %v6018_v60 = vrot.slane %v6017_v10, 4  ;;  %v5828_v29 = vmax.f32 %v5588_v39, %v5764_v51  ;;  %v6055_v17 = vadd.f32 %v6054_v6, %v5954_v24  ;;  %7890 = vpow2.f32 %v6107_v63  ;;  %v12565_v51 = vpop.permute.xlu1 %6300 }
 0x81a   :  { %v6043_v4 = vadd.f32 %v6042_v48, %v5957_v22  ;;  %v5830_v57 = vmax.f32 %v5701_v7, %v5766_v14  ;;  %v6109_v27 = vmul.f32 1.442695, %v6102_v61  ;;  %7892 = vpow2.f32 %v6105_v41  ;;  %v12562_v39 = vpop.permute.xlu0 %6156  ;;  %14446 = vst [vmem:[#allocation51_spill] sm:$0xff] %v12565_v51 }
 0x81b   :  { %v6019_v58 = vadd.f32 %v6018_v60, %v6017_v10  ;;  %v5956_v34 = vmul.f32 %v5893_v16, %v5828_v29  ;;  %14445 = vst [vmem:[#allocation57_spill] sm:$0xff] %v12562_v39 }
 0x81c   :  { %v6044_v53 = vrot.slane %v6043_v4, 4  ;;  %v5958_v1 = vmul.f32 %v5893_v16, %v5830_v57  ;;  %7894 = vpow2.f32 %v6109_v27 }
 0x81d   :  { %v6020_v52 = vrot.slane %v6019_v58, 2  ;;  %v6030_v62 = vadd.f32 %v6029_v37, %v5956_v34 }
 0x81e   :  { %v6045_v3 = vadd.f32 %v6044_v53, %v6043_v4  ;;  %v6056_v46 = vadd.f32 %v6055_v17, %v5958_v1  ;;  %v14447_v4 = vld [vmem:[#allocation53_spill] sm:$0xff]  ;;  %v12569_v34 = vpop.permute.xlu0 %6140 }
 0x81f   :  { %v6021_v59 = vadd.f32 %v6020_v52, %v6019_v58  ;;  %v6031_v9 = vrot.slane %v6030_v62, 4 }
 0x820   :  { %v6046_v20 = vrot.slane %v6045_v3, 2  ;;  %v6057_v43 = vrot.slane %v6056_v46, 4 }
 0x821   :  { %v6022_v40 = vrot.slane %v6021_v59, 1  ;;  %v6032_v38 = vadd.f32 %v6031_v9, %v6030_v62  ;;  %v6149_v62 = vpop.permute.xlu1 %6148 }
 0x822   :  { %v6047_v6 = vadd.f32 %v6046_v20, %v6045_v3  ;;  %v6058_v5 = vadd.f32 %v6057_v43, %v6056_v46  ;;  %v7889_v16 = vpop.eup %7888  ;;  %v14449_v3 = vld [vmem:[#allocation41_spill] sm:$0xff] }
 0x823   :  { %v6023_v48 = vadd.f32 %v6022_v40, %v6021_v59  ;;  %v6033_v21 = vrot.slane %v6032_v38, 2  ;;  %v6115_v58 = vrot.slane %v7889_v16, 7  ;;  %v14450_v40 = vld [vmem:[#allocation12_spill] sm:$0xff]  ;;  %v14452_v16 = vld [vmem:[#allocation61_spill] sm:$0xff] }
 0x824   :  { %v6048_v7 = vrot.slane %v6047_v6, 1  ;;  %v6059_v24 = vrot.slane %v6058_v5, 2 }
 0x825   :  { %v6079_v10 = vadd.f32 %v12389_v50, %v6023_v48  ;;  %v6034_v49 = vadd.f32 %v6033_v21, %v6032_v38 }
 0x826   :  { %v6049_v22 = vadd.f32 %v6048_v7, %v6047_v6  ;;  %v6060_v63 = vadd.f32 %v6059_v24, %v6058_v5  ;;  %v7891_v37 = vpop.eup %7890  ;;  %v6337_v7 = vpop.permute.xlu0 %6336 }
 0x827   :  { %v6087_v14 = vrot.slane %v6079_v10, 7  ;;  %v6035_v60 = vrot.slane %v6034_v49, 1  ;;  %v7893_v27 = vpop.eup %7892  ;;  %v6117_v59 = vrot.slane %v7891_v37, 7  ;;  %v14453_v10 = vld [vmem:[#allocation72_spill] sm:$0xff] }
 0x828   :  { %v6081_v29 = vadd.f32 %v12389_v50, %v6049_v22  ;;  %v6061_v61 = vrot.slane %v6060_v63, 1  ;;  %v6116_v21 = vrot.slane %v7893_v27, 7 }
 0x829   :  { %v6095_v57 = vsub.f32 %v14447_v4, %v6087_v14  ;;  %v6036_v41 = vadd.f32 %v6035_v60, %v6034_v49  ;;  %v7895_v43 = vpop.eup %7894 }
 0x82a   :  { %v6089_v17 = vrot.slane %v6081_v29, 7  ;;  %v6062_v53 = vadd.f32 %v6061_v61, %v6060_v63  ;;  %v6118_v22 = vrot.slane %v7895_v43, 7  ;;  %v6153_v63 = vpop.permute.xlu1 %6152  ;;  %v6325_v4 = vpop.permute.xlu0 %6324 }
 0x82b   :  { %v12571_v1 = vmul.f32 %v6115_v58, %v6095_v57  ;;  %v6080_v52 = vadd.f32 %v12389_v50, %v6036_v41 }
 0x82c   :  { %v6097_v46 = vsub.f32 %v14449_v3, %v6089_v17  ;;  %v6082_v9 = vadd.f32 %v12389_v50, %v6062_v53 }
 0x82d   :  { %14448 = vst [vmem:[#allocation70_spill] sm:$0xff] %v12571_v1  ;;  %v6088_v20 = vrot.slane %v6080_v52, 7  ;;  %v12578_v38 = vrot.slane %v12571_v1, %v14450_v40 }
 0x82e   :  { %v12580_v6 = vmul.f32 %v6117_v59, %v6097_v46  ;;  %v6090_v5 = vrot.slane %v6082_v9, 7  ;;  %v6297_v17 = vpop.permute.xlu1 %6296 }
 0x82f   :  { %v6096_v48 = vsub.f32 %v14452_v16, %v6088_v20  ;;  %v6235_v14 = vmul.f32 %v12578_v38, %v12562_v39  ;;  %v6271_v61 = vmul.f32 %v12578_v38, %v12407_v36  ;;  %v12616_v52 = vmul.f32 %v12578_v38, %v12569_v34 }
 0x830   :  { %14451 = vst [vmem:[#allocation30_spill] sm:$0xff] %v12580_v6  ;;  %v12585_v24 = vrot.slane %v12580_v6, %v14450_v40  ;;  %v6098_v49 = vsub.f32 %v14453_v10, %v6090_v5  ;;  %v6259_v3 = vmul.f32 %v12578_v38, %v12461_v33  ;;  %v12623_v46 = vmul.f32 %v12578_v38, %v6149_v62 }
 0x831   :  { %v12588_v50 = vmul.f32 %v6116_v21, %v6096_v48  ;;  %v12603_v57 = vadd.f32 %v12565_v51, %v6235_v14  ;;  %v12618_v27 = vadd.f32 %v6337_v7, %v6271_v61  ;;  %v6231_v9 = vmul.f32 %v12578_v38, %v6153_v63 }
 0x832   :  { %v12592_v60 = vmul.f32 %v6118_v22, %v6098_v49  ;;  %v6237_v29 = vmul.f32 %v12585_v24, %v12562_v39  ;;  %v6273_v41 = vmul.f32 %v12585_v24, %v12407_v36  ;;  %v6261_v20 = vmul.f32 %v12585_v24, %v12461_v33  ;;  %v6321_v22 = vpop.permute.xlu0 %6320  ;;  %v6145_v45 = vpop.permute.xlu1 %6144 }
 0x833   :  { %14454 = vst [vmem:[#allocation39_spill] sm:$0xff] %v12588_v50  ;;  %v12600_v37 = vrot.slane %v12588_v50, %v14450_v40  ;;  %14456 = vst [vmem:[#allocation35_spill] sm:$0xff] %v12603_v57  ;;  %v12631_v43 = vmul.f32 0.01, %v12603_v57  ;;  %v6233_v5 = vmul.f32 %v12585_v24, %v6153_v63  ;;  %v6255_v16 = vmul.f32 %v12578_v38, %v12499_v23 }
 0x834   :  { %14455 = vst [vmem:[#allocation78_spill] sm:$0xff] %v12592_v60  ;;  %v12607_v58 = vrot.slane %v12592_v60, %v14450_v40  ;;  %v12612_v53 = vadd.f32 %v12565_v51, %v6237_v29  ;;  %v12635_v40 = vmul.f32 %v12585_v24, %v12569_v34  ;;  %v12641_v48 = vmul.f32 %v12585_v24, %v6149_v62 }
 0x835   :  { %v6272_v59 = vmul.f32 %v12600_v37, %v12407_v36  ;;  %14458 = vst [vmem:[#allocation32_spill] sm:$0xff] %v12631_v43  ;;  %v12645_v10 = vadd.f32 %v6337_v7, %v6273_v41  ;;  %v6260_v49 = vmul.f32 %v12600_v37, %v12461_v33  ;;  %v12653_v29 = vmul.f32 0.01, %v12618_v27 }
 0x836   :  { %14457 = vst [vmem:[#allocation62_spill] sm:$0xff] %v12612_v53  ;;  %v6274_v21 = vmul.f32 %v12607_v58, %v12407_v36  ;;  %v12650_v14 = vmul.f32 0.01, %v12612_v53  ;;  %v6262_v61 = vmul.f32 %v12607_v58, %v12461_v33  ;;  %v12657_v19 = vadd.f32 %v6325_v4, %v6259_v3  ;;  %v6309_v56 = vpop.permute.xlu0 %6308  ;;  %v6285_v47 = vpop.permute.xlu1 %6284 }
 0x837   :  { %v12659_v26 = vadd.f32 %v6337_v7, %v6272_v59  ;;  %v6232_v36 = vmul.f32 %v12600_v37, %v6153_v63  ;;  %v6234_v41 = vmul.f32 %v12607_v58, %v6153_v63  ;;  %v12663_v25 = vadd.f32 %v6325_v4, %v6261_v20 }
 0x838   :  { %14459 = vst [vmem:[#allocation38_spill] sm:$0xff] %v12650_v14  ;;  %v12668_v13 = vmul.f32 %v12600_v37, %v6149_v62  ;;  %v12670_v31 = vadd.f32 %v6297_v17, %v6231_v9  ;;  %v12672_v33 = vadd.f32 %v6297_v17, %v6233_v5  ;;  %v12675_v3 = vmul.f32 %v12607_v58, %v6149_v62 }
 0x839   :  { %14460 = vst [vmem:[#allocation85_spill] sm:$0xff] %v12663_v25  ;;  %v12677_v59 = vadd.f32 %v6337_v7, %v6274_v21  ;;  %v12680_v63 = vmul.f32 0.01, %v12645_v10  ;;  %v12682_v20 = vadd.f32 %v6325_v4, %v6260_v49  ;;  %v12688_v9 = vadd.f32 %v6325_v4, %v6262_v61 }
 0x83a   :  { %14461 = vst [vmem:[#allocation75_spill] sm:$0xff] %v12670_v31  ;;  %14462 = vst [vmem:[#allocation77_spill] sm:$0xff] %v12672_v33  ;;  %v12691_v5 = vmul.f32 0.01, %v12657_v19  ;;  %v12694_v62 = vmul.f32 0.01, %v12659_v26  ;;  %v12699_v21 = vadd.f32 %v6297_v17, %v6232_v36  ;;  %v12701_v49 = vadd.f32 %v6297_v17, %v6234_v41 }
 0x83b   :  { %v12697_v7 = vmul.f32 0.01, %v12663_v25  ;;  %v12704_v8 = vmul.f32 0.01, %v12670_v31  ;;  %v12707_v4 = vmul.f32 0.01, %v12672_v33  ;;  %v6256_v61 = vmul.f32 %v12600_v37, %v12499_v23  ;;  %v6133_v33 = vpop.permute.xlu1 %6132 }
 0x83c   :  { %14464 = vst [vmem:[#allocation45_spill] sm:$0xff] %v12699_v21  ;;  %14465 = vst [vmem:[#allocation29_spill] sm:$0xff] %v12701_v49  ;;  %v6257_v15 = vmul.f32 %v12585_v24, %v12499_v23  ;;  %v12714_v54 = vmul.f32 0.01, %v12677_v59  ;;  %v12719_v36 = vmul.f32 0.01, %v12682_v20  ;;  %v6258_v41 = vmul.f32 %v12607_v58, %v12499_v23 }
 0x83d   :  { %14463 = vst [vmem:[#allocation94_spill] sm:$0xff] %v12697_v7  ;;  %14466 = vst [vmem:[#allocation68_spill] sm:$0xff] %v12704_v8  ;;  %v12724_v18 = vmul.f32 0.01, %v12688_v9  ;;  %v6243_v6 = vmul.f32 %v12578_v38, %v12525_v12  ;;  %v6245_v50 = vmul.f32 %v12585_v24, %v12525_v12  ;;  %v12735_v1 = vmul.f32 0.01, %v12699_v21 }
 0x83e   :  { %14467 = vst [vmem:[#allocation87_spill] sm:$0xff] %v12707_v4  ;;  %v12738_v23 = vmul.f32 0.01, %v12701_v49  ;;  %v12740_v55 = vadd.f32 %v6321_v22, %v6255_v16  ;;  %v12746_v53 = vadd.f32 %v6321_v22, %v6256_v61  ;;  %v12748_v43 = vadd.f32 %v6321_v22, %v6257_v15 }
 0x83f   :  { %14468 = vst [vmem:[#allocation92_spill] sm:$0xff] %v12735_v1  ;;  %v12750_v57 = vadd.f32 %v6321_v22, %v6258_v41  ;;  %v12753_v17 = vmul.f32 %v12578_v38, %v6145_v45  ;;  %v6244_v49 = vmul.f32 %v12600_v37, %v12525_v12  ;;  %v6246_v16 = vmul.f32 %v12607_v58, %v12525_v12 }
 0x840   :  { %14469 = vst [vmem:[#allocation95_spill] sm:$0xff] %v12738_v23  ;;  %14470 = vst [vmem:[#allocation90_spill] sm:$0xff] %v12748_v43  ;;  %v6305_v23 = vpop.permute.xlu0 %6304  ;;  %v12760_v60 = vmul.f32 %v12600_v37, %v6145_v45  ;;  %v12762_v14 = vadd.f32 %v6309_v56, %v6243_v6  ;;  %v12764_v61 = vadd.f32 %v6309_v56, %v6245_v50  ;;  %v12769_v22 = vmul.f32 0.01, %v12740_v55 }
 0x841   :  { %14471 = vst [vmem:[#allocation58_spill] sm:$0xff] %v12750_v57  ;;  %v6220_v15 = vmul.f32 %v12600_v37, %v12569_v34  ;;  %v12772_v41 = vmul.f32 %v12585_v24, %v6145_v45  ;;  %v6222_v12 = vmul.f32 %v12607_v58, %v12569_v34  ;;  %v6239_v4 = vmul.f32 %v12578_v38, %v12560_v11 }
 0x842   :  { %14472 = vst [vmem:[#allocation81_spill] sm:$0xff] %v12769_v22  ;;  %v12779_v6 = vmul.f32 0.01, %v12746_v53  ;;  %v12782_v50 = vmul.f32 0.01, %v12748_v43  ;;  %v6226_v8 = vmul.f32 %v12607_v58, %v6145_v45  ;;  %v6241_v31 = vmul.f32 %v12585_v24, %v12560_v11 }
 0x843   :  { %v12788_v21 = vmul.f32 0.01, %v12750_v57  ;;  %v12790_v1 = vadd.f32 %v6309_v56, %v6244_v49  ;;  %v12792_v34 = vadd.f32 %v6309_v56, %v6246_v16  ;;  %v12795_v51 = vadd.f32 %v6285_v47, %v12616_v52 }
 0x844   :  { %14473 = vst [vmem:[#allocation59_spill] sm:$0xff] %v12782_v50  ;;  %v12798_v39 = vmul.f32 0.01, %v12762_v14  ;;  %v12801_v0 = vmul.f32 0.01, %v12764_v61  ;;  %v12803_v45 = vadd.f32 %v6285_v47, %v6220_v15  ;;  %v6240_v44 = vmul.f32 %v12600_v37, %v12560_v11  ;;  %v6293_v16 = vpop.permute.xlu0 %6292 }
 0x845   :  { %14474 = vst [vmem:[#allocation93_spill] sm:$0xff] %v12788_v21  ;;  %14475 = vst [vmem:[#allocation40_spill] sm:$0xff] %v12795_v51  ;;  %v12808_v7 = vadd.f32 %v6285_v47, %v12635_v40  ;;  %v12810_v49 = vadd.f32 %v6285_v47, %v6222_v12  ;;  %v6242_v56 = vmul.f32 %v12607_v58, %v12560_v11  ;;  %v12826_v47 = vmul.f32 0.01, %v12790_v1  ;;  %v6137_v12 = vpop.permute.xlu1 %6136 }
 0x846   :  { %14476 = vst [vmem:[#allocation49_spill] sm:$0xff] %v12803_v45  ;;  %v12814_v52 = vadd.f32 %v6305_v23, %v6239_v4  ;;  %v12820_v57 = vadd.f32 %v6305_v23, %v6241_v31  ;;  %v12823_v21 = vadd.f32 %v6293_v16, %v12623_v46  ;;  %v12829_v40 = vmul.f32 0.01, %v12792_v34 }
 0x847   :  { %14477 = vst [vmem:[#allocation97_spill] sm:$0xff] %v12808_v7  ;;  %14478 = vst [vmem:[#allocation21_spill] sm:$0xff] %v12810_v49  ;;  %v12832_v11 = vmul.f32 0.01, %v12795_v51  ;;  %v12835_v4 = vadd.f32 %v6293_v16, %v12641_v48  ;;  %v12842_v15 = vmul.f32 0.01, %v12803_v45  ;;  %v12844_v25 = vadd.f32 %v6305_v23, %v6240_v44 }
 0x848   :  { %14479 = vst [vmem:[#allocation76_spill] sm:$0xff] %v12814_v52  ;;  %14480 = vst [vmem:[#allocation69_spill] sm:$0xff] %v12820_v57  ;;  %v12847_v50 = vmul.f32 0.01, %v12808_v7  ;;  %v12850_v43 = vmul.f32 0.01, %v12810_v49  ;;  %v12852_v48 = vadd.f32 %v6305_v23, %v6242_v56  ;;  %v12861_v46 = vadd.f32 %v6293_v16, %v12668_v13 }
 0x849   :  { %14481 = vst [vmem:[#allocation88_spill] sm:$0xff] %v12823_v21  ;;  %14482 = vst [vmem:[#allocation50_spill] sm:$0xff] %v12832_v11  ;;  %v12855_v22 = vmul.f32 0.01, %v12814_v52  ;;  %v12858_v31 = vmul.f32 0.01, %v12820_v57  ;;  %v12864_v44 = vadd.f32 %v6293_v16, %v12675_v3  ;;  %v12872_v23 = vmul.f32 %v12578_v38, %v6133_v33 }
 0x84a   :  { %14483 = vst [vmem:[#allocation102_spill] sm:$0xff] %v12835_v4  ;;  %14484 = vst [vmem:[#allocation105_spill] sm:$0xff] %v12842_v15  ;;  %v12867_v7 = vmul.f32 0.01, %v12823_v21  ;;  %v12875_v56 = vmul.f32 %v12600_v37, %v6133_v33  ;;  %v12878_v49 = vmul.f32 0.01, %v12835_v4  ;;  %v12884_v3 = vmul.f32 %v12585_v24, %v6133_v33  ;;  %v12897_v15 = vpop.permute.xlu1 %6280 }
 0x84b   :  { %14485 = vst [vmem:[#allocation99_spill] sm:$0xff] %v12847_v50  ;;  %14486 = vst [vmem:[#allocation56_spill] sm:$0xff] %v12850_v43  ;;  %v12881_v13 = vmul.f32 0.01, %v12844_v25  ;;  %v12887_v16 = vmul.f32 %v12607_v58, %v6133_v33  ;;  %v6215_v50 = vmul.f32 %v12578_v38, %v6137_v12  ;;  %v12891_v11 = vmul.f32 0.01, %v12852_v48 }
 0x84c   :  { %14487 = vst [vmem:[#allocation48_spill] sm:$0xff] %v12852_v48  ;;  %14488 = vst [vmem:[#allocation54_spill] sm:$0xff] %v12855_v22  ;;  %v6216_v43 = vmul.f32 %v12600_v37, %v6137_v12  ;;  %v6217_v45 = vmul.f32 %v12585_v24, %v6137_v12  ;;  %v12902_v33 = vmul.f32 0.01, %v12861_v46  ;;  %v6289_v48 = vpop.permute.xlu0 %6288  ;;  %v12912_v22 = vmul.f32 %v12607_v58, %v6137_v12 }
 0x84d   :  { %14489 = vst [vmem:[#allocation63_spill] sm:$0xff] %v12858_v31  ;;  %14490 = vst [vmem:[#allocation100_spill] sm:$0xff] %v12864_v44  ;;  %v12915_v52 = vadd.f32 %v6289_v48, %v12753_v17  ;;  %v12921_v31 = vadd.f32 %v6289_v48, %v12772_v41  ;;  %v12923_v57 = vadd.f32 %v6289_v48, %v6226_v8 }
 0x84e   :  { %14491 = vst [vmem:[#allocation103_spill] sm:$0xff] %v12867_v7  ;;  %14492 = vst [vmem:[#allocation13_spill] sm:$0xff] %v12872_v23  ;;  %v12926_v23 = vadd.f32 %v12897_v15, %v6215_v50  ;;  %v6268_v51 = vmul.f32 %v12600_v37, %v12543_v28  ;;  %v12931_v12 = vadd.f32 %v12897_v15, %v6216_v43 }
 0x84f   :  { %14493 = vst [vmem:[#allocation98_spill] sm:$0xff] %v12878_v49  ;;  %14494 = vst [vmem:[#allocation101_spill] sm:$0xff] %v12884_v3  ;;  %v12918_v3 = vadd.f32 %v6289_v48, %v12760_v60  ;;  %v12934_v17 = vadd.f32 %v12897_v15, %v6217_v45  ;;  %v6528_v60 = vmax.f32 %v12659_v26, %v12694_v62 }
 0x850   :  { %14495 = vst [vmem:[#allocation104_spill] sm:$0xff] %v12887_v16  ;;  %14496 = vst [vmem:[#allocation64_spill] sm:$0xff] %v12891_v11  ;;  %v12905_v16 = vmul.f32 0.01, %v12864_v44  ;;  %v6270_v41 = vmul.f32 %v12607_v58, %v12543_v28  ;;  %v6396_v8 = vadd.f32 %v12433_v35, %v6268_v51  ;;  %v6530_v50 = vmax.f32 %v12677_v59, %v12714_v54 }
 0x851   :  { %14498 = vst [vmem:[#allocation96_spill] sm:$0xff] %v12923_v57  ;;  %14499 = vst [vmem:[#allocation55_spill] sm:$0xff] %v12926_v23  ;;  %v6267_v48 = vmul.f32 %v12578_v38, %v12543_v28  ;;  %v6269_v43 = vmul.f32 %v12585_v24, %v12543_v28  ;;  %v6264_v49 = vmul.f32 %v12600_v37, %v12471_v30 }
 0x852   :  { %14497 = vst [vmem:[#allocation89_spill] sm:$0xff] %v12905_v16  ;;  %14500 = vst [vmem:[#allocation73_spill] sm:$0xff] %v12931_v12  ;;  %v6398_v45 = vadd.f32 %v12433_v35, %v6270_v41  ;;  %v6516_v26 = vmax.f32 %v12682_v20, %v12719_v36  ;;  %v6266_v51 = vmul.f32 %v12607_v58, %v12471_v30  ;;  %v6460_v62 = vmul.f32 0.01, %v6396_v8 }
 0x853   :  { %14501 = vst [vmem:[#allocation34_spill] sm:$0xff] %v12934_v17  ;;  %v6395_v54 = vadd.f32 %v12433_v35, %v6267_v48  ;;  %v6397_v59 = vadd.f32 %v12433_v35, %v6269_v43  ;;  %v6518_v4 = vmax.f32 %v12688_v9, %v12724_v18  ;;  %v6392_v41 = vadd.f32 %v12489_v42, %v6264_v49 }
 0x854   :  { %v6462_v28 = vmul.f32 0.01, %v6398_v45  ;;  %v6394_v17 = vadd.f32 %v12489_v42, %v6266_v51  ;;  %v6263_v7 = vmul.f32 %v12578_v38, %v12471_v30  ;;  %v6524_v20 = vmax.f32 %v6396_v8, %v6460_v62 }
 0x855   :  { %v6459_v36 = vmul.f32 0.01, %v6395_v54  ;;  %v6461_v21 = vmul.f32 0.01, %v6397_v59  ;;  %v6265_v23 = vmul.f32 %v12585_v24, %v12471_v30  ;;  %v6456_v44 = vmul.f32 0.01, %v6392_v41 }
 0x856   :  { %v6526_v48 = vmax.f32 %v6398_v45, %v6462_v28  ;;  %v6458_v35 = vmul.f32 0.01, %v6394_v17  ;;  %v6391_v43 = vadd.f32 %v12489_v42, %v6263_v7  ;;  %v6576_v18 = vpack.c.bf16 %v6528_v60, %v6524_v20 }
 0x857   :  { %v6523_v9 = vmax.f32 %v6395_v54, %v6459_v36  ;;  %v6525_v16 = vmax.f32 %v6397_v59, %v6461_v21  ;;  %v6393_v49 = vadd.f32 %v12489_v42, %v6265_v23  ;;  %v6520_v12 = vmax.f32 %v6392_v41, %v6456_v44 }
 0x858   :  { %v6578_v51 = vpack.c.bf16 %v6530_v50, %v6526_v48  ;;  %v6522_v11 = vmax.f32 %v6394_v17, %v6458_v35  ;;  %v6455_v57 = vmul.f32 0.01, %v6391_v43  ;;  %6691 = vmatprep.subr.bf16.mxu0 %v6576_v18  ;;  %v14502_v8 = vmax.f32 %v12618_v27, %v12653_v29 }
 0x859   :  { %v14503_v30 = vmax.f32 %v12645_v10, %v12680_v63  ;;  %v6457_v28 = vmul.f32 0.01, %v6393_v49  ;;  %v6252_v7 = vmul.f32 %v12600_v37, %v12558_v32  ;;  %v6572_v21 = vpack.c.bf16 %v6520_v12, %v6516_v26  ;;  %v14508_v12 = vld [vmem:[#allocation94_spill] sm:$0xff] }
 0x85a   :  { %v6575_v62 = vpack.c.bf16 %v14502_v8, %v6523_v9  ;;  %6804 = vmatprep.subr.bf16.mxu1 %v6578_v51  ;;  %v6574_v42 = vpack.c.bf16 %v6522_v11, %v6518_v4  ;;  %v6519_v23 = vmax.f32 %v6391_v43, %v6455_v57  ;;  %v6512_v44 = vmax.f32 %v12746_v53, %v12779_v6  ;;  %v14505_v11 = vld [vmem:[#allocation93_spill] sm:$0xff]  ;;  %v14506_v4 = vld [vmem:[#allocation58_spill] sm:$0xff] }
 0x85b   :  { %v6577_v45 = vpack.c.bf16 %v14503_v30, %v6525_v16  ;;  %v6521_v17 = vmax.f32 %v6393_v49, %v6457_v28  ;;  %v6380_v27 = vadd.f32 %v12510_v2, %v6252_v7  ;;  %v6254_v10 = vmul.f32 %v12607_v58, %v12558_v32  ;;  %v14507_v16 = vld [vmem:[#allocation85_spill] sm:$0xff] }
 0x85c   :  { %6692 = vmatpush1.bf16.msra.mxu0 %v6575_v62  ;;  %v12980_v29 = vmul.f32 0.01, %v12915_v52  ;;  %v14504_v63 = vmax.f32 %v12657_v19, %v12691_v5  ;;  %v6514_v53 = vmax.f32 %v14506_v4, %v14505_v11  ;;  %v6251_v6 = vmul.f32 %v12578_v38, %v12558_v32  ;;  %v14510_v5 = vld [vmem:[#allocation86_spill] sm:$0xff]  ;;  %v8011_v62 = vld [vmem:[%s13480_s2] sm:$0xff] }
 0x85d   :  { %6805 = vmatpush1.bf16.msra.mxu1 %v6577_v45  ;;  %6693 = vmatprep.subr.bf16.mxu0 %v6572_v21  ;;  %v14509_v60 = vmax.f32 %v14507_v16, %v14508_v12  ;;  %v6444_v26 = vmul.f32 0.01, %v6380_v27  ;;  %v6382_v54 = vadd.f32 %v12510_v2, %v6254_v10  ;;  %v6253_v59 = vmul.f32 %v12585_v24, %v12558_v32  ;;  %v13007_v32 = vld [vmem:[%s13480_s2 + $0x8] sm:$0xff]  ;;  %v14516_v16 = vld [vmem:[#allocation59_spill] sm:$0xff] }
 0x85e   :  { %6806 = vmatprep.subr.bf16.mxu1 %v6574_v42  ;;  %v6571_v57 = vpack.c.bf16 %v6519_v23, %v14504_v63  ;;  %v8110_v41 = vmov 16   ;;  %v6379_v19 = vadd.f32 %v12510_v2, %v6251_v6  ;;  %v6248_v20 = vmul.f32 %v12600_v37, %v14510_v5  ;;  %v13038_v6 = vld [vmem:[%s13480_s2 + $0x18] sm:$0xff] }
 0x85f   :  { %v6573_v50 = vpack.c.bf16 %v6521_v17, %v14509_v60  ;;  %7744 = vset.pattern.permute.xlu1 %v8110_v41  ;;  %7743 = vset.pattern.permute.xlu0 %v8110_v41  ;;  %v6500_v36 = vmax.f32 %v12790_v1, %v12826_v47  ;;  %v6250_v48 = vmul.f32 %v12607_v58, %v14510_v5  ;;  %v6446_v43 = vmul.f32 0.01, %v6382_v54  ;;  %v14511_v47 = vld [vmem:[#allocation36_spill] sm:$0xff]  ;;  %v14512_v17 = vld [vmem:[#allocation57_spill] sm:$0xff] }
 0x860   :  { %6584 = vperm.xlu1 %7744, %v13007_v32   ;;  %6694 = vmatpush1.bf16.msra.mxu0 %v6571_v57  ;;  %v6508_v35 = vmax.f32 %v6380_v27, %v6444_v26  ;;  %v6381_v18 = vadd.f32 %v12510_v2, %v6253_v59  ;;  %v6502_v9 = vmax.f32 %v12792_v34, %v12829_v40  ;;  %v6443_v1 = vmul.f32 0.01, %v6379_v19  ;;  %v14513_v27 = vld [vmem:[#allocation81_spill] sm:$0xff] }
 0x861   :  { %6807 = vmatpush1.bf16.msra.mxu1 %v6573_v50  ;;  %v6376_v49 = vadd.f32 %v14511_v47, %v6248_v20  ;;  %v6378_v51 = vadd.f32 %v14511_v47, %v6250_v48  ;;  %v6247_v8 = vmul.f32 %v12578_v38, %v14510_v5  ;;  %6580 = vperm.xlu0 %7743, %v8011_v62   ;;  %v13026_v38 = vld [vmem:[%s13480_s2 + $0x10] sm:$0xff]  ;;  %v14518_v50 = vld [vmem:[#allocation51_spill] sm:$0xff]  ;;  %v6416_v20 = vmul.f32 0.01, %v12918_v3  ;;  %v6277_v48 = vpop.permute.xlu0 %6276 }
 0x862   :  { %v6568_v30 = vpack.c.bf16 %v6512_v44, %v6508_v35  ;;  %v6510_v45 = vmax.f32 %v6382_v54, %v6446_v43  ;;  %v6445_v28 = vmul.f32 0.01, %v6381_v18  ;;  %v6249_v2 = vmul.f32 %v12585_v24, %v14510_v5  ;;  %v13057_v43 = vld [vmem:[%s13480_s2 + $0x20] sm:$0xff] }
 0x863   :  { %v6507_v34 = vmax.f32 %v6379_v19, %v6443_v1  ;;  %v6440_v40 = vmul.f32 0.01, %v6376_v49  ;;  %v6442_v7 = vmul.f32 0.01, %v6378_v51  ;;  %v6375_v21 = vadd.f32 %v14511_v47, %v6247_v8 }
 0x864   :  { %6588 = vperm.xlu1 %7744, %v13026_v38   ;;  %6695 = vmatprep.subr.bf16.mxu0 %v6568_v30  ;;  %v6570_v42 = vpack.c.bf16 %v6514_v53, %v6510_v45  ;;  %v6509_v23 = vmax.f32 %v6381_v18, %v6445_v28  ;;  %v6377_v44 = vadd.f32 %v14511_v47, %v6249_v2  ;;  %v8111_v8 = vmov 24   ;;  %v14524_v28 = vld [vmem:[#allocation64_spill] sm:$0xff]  ;;  %v14526_v2 = vld [vmem:[#allocation73_spill] sm:$0xff] }
 0x865   :  { %v6236_v24 = vmul.f32 %v12600_v37, %v14512_v17  ;;  %v14514_v10 = vmax.f32 %v12740_v55, %v14513_v27  ;;  %v6504_v57 = vmax.f32 %v6376_v49, %v6440_v40  ;;  %v6506_v11 = vmax.f32 %v6378_v51, %v6442_v7  ;;  %6592 = vperm.xlu0 %7743, %v13038_v6   ;;  %v14515_v37 = vld [vmem:[#allocation90_spill] sm:$0xff]  ;;  %v14521_v49 = vld [vmem:[#allocation92_spill] sm:$0xff]  ;;  %v14522_v51 = vld [vmem:[#allocation45_spill] sm:$0xff] }
 0x866   :  { %v6439_v4 = vmul.f32 0.01, %v6375_v21  ;;  %v13043_v53 = vadd.f32 %v12897_v15, %v12912_v22  ;;  %6808 = vmatprep.subr.bf16.mxu1 %v6570_v42  ;;  %v14517_v12 = vmax.f32 %v14515_v37, %v14516_v16  ;;  %v6441_v60 = vmul.f32 0.01, %v6377_v44  ;;  %v14528_v40 = vld [vmem:[#allocation104_spill] sm:$0xff]  ;;  %v14533_v27 = vld [vmem:[#allocation54_spill] sm:$0xff] }
 0x867   :  { %v6567_v63 = vpack.c.bf16 %v14514_v10, %v6507_v34  ;;  %v6364_v26 = vadd.f32 %v14518_v50, %v6236_v24  ;;  %v6564_v54 = vpack.c.bf16 %v6504_v57, %v6500_v36  ;;  %v6566_v59 = vpack.c.bf16 %v6506_v11, %v6502_v9  ;;  %v14532_v24 = vld [vmem:[#allocation76_spill] sm:$0xff]  ;;  %v14535_v57 = vld [vmem:[#allocation89_spill] sm:$0xff] }
 0x868   :  { %v6569_v55 = vpack.c.bf16 %v14517_v12, %v6509_v23  ;;  %v6503_v19 = vmax.f32 %v6375_v21, %v6439_v4  ;;  %v6238_v5 = vmul.f32 %v12607_v58, %v14512_v17  ;;  %v6505_v22 = vmax.f32 %v6377_v44, %v6441_v60  ;;  %6596 = vperm.xlu1 %7744, %v13057_v43   ;;  %v14529_v23 = vld [vmem:[#allocation35_spill] sm:$0xff]  ;;  %v14530_v44 = vld [vmem:[#allocation32_spill] sm:$0xff]  ;;  %v14538_v37 = vld [vmem:[#allocation29_spill] sm:$0xff] }
 0x869   :  { %6696 = vmatpush1.bf16.msra.mxu0 %v6567_v63  ;;  %v6428_v15 = vmul.f32 0.01, %v6364_v26  ;;  %v6496_v35 = vmax.f32 %v12844_v25, %v12881_v13  ;;  %v13061_v36 = vadd.f32 %v6277_v48, %v12875_v56  ;;  %v14519_v58 = vmax.f32 %v12762_v14, %v12798_v39  ;;  %7745 = vset.pattern.permute.xlu0 %v8111_v8  ;;  %v14523_v39 = vld [vmem:[#allocation96_spill] sm:$0xff]  ;;  %v14537_v4 = vld [vmem:[#allocation95_spill] sm:$0xff]  ;;  %v14539_v60 = vld [vmem:[#allocation105_spill] sm:$0xff] }
 0x86a   :  { %6809 = vmatpush1.bf16.msra.mxu1 %v6569_v55  ;;  %6697 = vmatprep.subr.bf16.mxu0 %v6564_v54  ;;  %v6366_v9 = vadd.f32 %v14518_v50, %v6238_v5  ;;  %v14520_v25 = vmax.f32 %v12764_v61, %v12801_v0  ;;  %v6484_v47 = vmax.f32 %v12861_v46, %v12902_v33  ;;  %v13076_v30 = vmul.f32 0.01, %v12921_v31  ;;  %v14525_v0 = vld [vmem:[#allocation48_spill] sm:$0xff]  ;;  %v14527_v46 = vld [vmem:[#allocation13_spill] sm:$0xff] }
 0x86b   :  { %6810 = vmatprep.subr.bf16.mxu1 %v6566_v59  ;;  %v6563_v18 = vpack.c.bf16 %v6503_v19, %v14519_v58  ;;  %v6492_v1 = vmax.f32 %v6364_v26, %v6428_v15  ;;  %v6488_v56 = vmax.f32 %v14522_v51, %v14521_v49  ;;  %v6418_v14 = vmul.f32 0.01, %v14523_v39  ;;  %7046 = vperm.xlu0 %7745, %v8011_v62   ;;  %v14536_v11 = vld [vmem:[#allocation100_spill] sm:$0xff]  ;;  %v14540_v50 = vld [vmem:[#allocation49_spill] sm:$0xff]  ;;  %v14541_v19 = vld [vmem:[#allocation55_spill] sm:$0xff] }
 0x86c   :  { %v6565_v13 = vpack.c.bf16 %v6505_v22, %v14520_v25  ;;  %v6430_v45 = vmul.f32 0.01, %v6366_v9  ;;  %v6498_v61 = vmax.f32 %v14525_v0, %v14524_v28  ;;  %v6408_v34 = vmul.f32 0.01, %v14526_v2  ;;  %7746 = vset.pattern.permute.xlu1 %v8111_v8  ;;  %v14544_v25 = vld [vmem:[#allocation38_spill] sm:$0xff]  ;;  %v14552_v51 = vld [vmem:[#allocation75_spill] sm:$0xff] }
 0x86d   :  { %6698 = vmatpush1.bf16.msra.mxu0 %v6563_v18  ;;  %v13083_v33 = vadd.f32 %v6277_v48, %v14527_v46  ;;  %v6342_v7 = vadd.f32 %v6277_v48, %v14528_v40  ;;  %v6560_v21 = vpack.c.bf16 %v6496_v35, %v6492_v1  ;;  %v14531_v17 = vmax.f32 %v14529_v23, %v14530_v44  ;;  %v14542_v35 = vld [vmem:[#allocation101_spill] sm:$0xff] }
 0x86e   :  { %6811 = vmatpush1.bf16.msra.mxu1 %v6565_v13  ;;  %v6494_v42 = vmax.f32 %v6366_v9, %v6430_v45  ;;  %v14534_v10 = vmax.f32 %v14532_v24, %v14533_v27  ;;  %v6486_v62 = vmax.f32 %v14536_v11, %v14535_v57  ;;  %v6490_v16 = vmax.f32 %v14538_v37, %v14537_v4  ;;  %v14543_v9 = vld [vmem:[#allocation62_spill] sm:$0xff]  ;;  %v14546_v1 = vld [vmem:[#allocation69_spill] sm:$0xff] }
 0x86f   :  { %v6404_v12 = vmul.f32 0.01, %v13061_v36  ;;  %6699 = vmatprep.subr.bf16.mxu0 %v6560_v21  ;;  %v6556_v55 = vpack.c.bf16 %v6488_v56, %v6484_v47  ;;  %v6476_v26 = vmax.f32 %v14540_v50, %v14539_v60  ;;  %v6480_v54 = vmax.f32 %v12918_v3, %v6416_v20  ;;  %v14547_v47 = vld [vmem:[#allocation63_spill] sm:$0xff]  ;;  %v14549_v20 = vld [vmem:[#allocation88_spill] sm:$0xff]  ;;  %v14556_v46 = vld [vmem:[#allocation21_spill] sm:$0xff]  ;;  %7050 = vperm.xlu1 %7746, %v13007_v32  }
 0x870   :  { %v6559_v63 = vpack.c.bf16 %v14534_v10, %v14531_v17  ;;  %v6479_v59 = vmax.f32 %v12915_v52, %v12980_v29  ;;  %v6407_v5 = vmul.f32 0.01, %v14541_v19  ;;  %v6410_v22 = vmul.f32 0.01, %v13043_v53  ;;  %v14550_v52 = vld [vmem:[#allocation103_spill] sm:$0xff]  ;;  %v14553_v56 = vld [vmem:[#allocation68_spill] sm:$0xff]  ;;  %7054 = vperm.xlu0 %7745, %v13026_v38  }
 0x871   :  { %v6562_v15 = vpack.c.bf16 %v6498_v61, %v6494_v42  ;;  %v6341_v58 = vadd.f32 %v6277_v48, %v14542_v35  ;;  %v6403_v18 = vmul.f32 0.01, %v13083_v33  ;;  %v14545_v13 = vmax.f32 %v14543_v9, %v14544_v25  ;;  %v14555_v61 = vld [vmem:[#allocation56_spill] sm:$0xff]  ;;  %v14557_v17 = vld [vmem:[#allocation99_spill] sm:$0xff]  ;;  %v14558_v24 = vld [vmem:[#allocation97_spill] sm:$0xff] }
 0x872   :  { %6700 = vmatpush1.bf16.msra.mxu0 %v6559_v63  ;;  %v14548_v49 = vmax.f32 %v14546_v1, %v14547_v47  ;;  %v14551_v29 = vmax.f32 %v14549_v20, %v14550_v52  ;;  %v14554_v45 = vmax.f32 %v14552_v51, %v14553_v56  ;;  %v6406_v0 = vmul.f32 0.01, %v6342_v7  ;;  %v14559_v63 = vld [vmem:[#allocation34_spill] sm:$0xff]  ;;  %v14564_v38 = vld [vmem:[#allocation87_spill] sm:$0xff]  ;;  %v8015_v50 = vld [vmem:[%s13480_s2 + $0x28] sm:$0xff] }
 0x873   :  { %6701 = vmatprep.subr.bf16.mxu0 %v6556_v55  ;;  %6812 = vmatprep.subr.bf16.mxu1 %v6562_v15  ;;  %v6558_v48 = vpack.c.bf16 %v6490_v16, %v6486_v62  ;;  %v6478_v40 = vmax.f32 %v14556_v46, %v14555_v61  ;;  %v6482_v21 = vmax.f32 %v14523_v39, %v6418_v14  ;;  %v6409_v57 = vmul.f32 0.01, %v14559_v63  ;;  %v14561_v11 = vld [vmem:[#allocation98_spill] sm:$0xff]  ;;  %v14566_v16 = vld [vmem:[#allocation40_spill] sm:$0xff] }
 0x874   :  { %v6561_v3 = vpack.c.bf16 %v14548_v49, %v14545_v13  ;;  %v6555_v28 = vpack.c.bf16 %v14554_v45, %v14551_v29  ;;  %v6552_v42 = vpack.c.bf16 %v6480_v54, %v6476_v26  ;;  %v6468_v23 = vmax.f32 %v13061_v36, %v6404_v12  ;;  %v14560_v36 = vld [vmem:[#allocation102_spill] sm:$0xff]  ;;  %7747 = vset.pattern.permute.xlu1 %v8110_v41  ;;  %v7801_v35 = vld [vmem:[#allocation2 + $0x8] sm:$0xff]   ;;  %v8022_v1 = vld [vmem:[%s13480_s2 + $0x60] sm:$0xff] }
 0x875   :  { %v6472_v44 = vmax.f32 %v14526_v2, %v6408_v34  ;;  %v6477_v27 = vmax.f32 %v14558_v24, %v14557_v17  ;;  %v6481_v10 = vmax.f32 %v12921_v31, %v13076_v30  ;;  %v6471_v32 = vmax.f32 %v14541_v19, %v6407_v5  ;;  %v14563_v34 = vld [vmem:[#allocation77_spill] sm:$0xff]  ;;  %v14567_v31 = vld [vmem:[#allocation50_spill] sm:$0xff]  ;;  %6600 = vperm.xlu1 %7747, %v8015_v50   ;;  %v8023_v49 = vld [vmem:[%s13480_s2] sm:$0x1] }
 0x876   :  { %6813 = vmatpush1.bf16.msra.mxu1 %v6561_v3  ;;  %6702 = vmatpush1.bf16.msra.mxu0 %v6555_v28  ;;  %v6405_v39 = vmul.f32 0.01, %v6341_v58  ;;  %v6467_v14 = vmax.f32 %v13083_v33, %v6403_v18  ;;  %v14562_v2 = vmax.f32 %v14560_v36, %v14561_v11  ;;  %v14565_v62 = vmax.f32 %v14563_v34, %v14564_v38  ;;  %v8016_v5 = vld [vmem:[%s13480_s2 + $0x30] sm:$0xff]  ;;  %v8020_v9 = vld [vmem:[%s13480_s2 + $0x58] sm:$0xff]  ;;  %v7804_v20 = vld [vmem:[#allocation2 + $0x20] sm:$0xff]  }
 0x877   :  { %6814 = vmatprep.subr.bf16.mxu1 %v6558_v48  ;;  %6703 = vmatprep.subr.bf16.mxu0 %v6552_v42  ;;  %v6554_v37 = vpack.c.bf16 %v6482_v21, %v6478_v40  ;;  %v14568_v30 = vmax.f32 %v14566_v16, %v14567_v31  ;;  %v6470_v55 = vmax.f32 %v6342_v7, %v6406_v0  ;;  %v14569_v15 = vmov 0   ;;  %v7802_v18 = vld [vmem:[#allocation2 + $0x10] sm:$0xff]   ;;  %v7803_v13 = vld [vmem:[#allocation2 + $0x18] sm:$0xff]   ;;  %v8025_v52 = vld [vmem:[%s13480_s2 + $0x68] sm:$0xff] }
 0x878   :  { %v6557_v4 = vpack.c.bf16 %v14565_v62, %v14562_v2  ;;  %v6474_v60 = vmax.f32 %v13043_v53, %v6410_v22  ;;  %v6548_v33 = vpack.c.bf16 %v6472_v44, %v6468_v23  ;;  %v6473_v26 = vmax.f32 %v14559_v63, %v6409_v57  ;;  %7058 = vperm.xlu0 %7745, %v13038_v6   ;;  %v8017_v6 = vld [vmem:[%s13480_s2 + $0x38] sm:$0xff]  ;;  %v8021_v25 = vld [vmem:[%s13480_s2 + $0x50] sm:$0xff]  ;;  %v7805_v51 = vld [vmem:[#allocation2 + $0x28] sm:$0xff]  }
 0x879   :  { %v6551_v12 = vpack.c.bf16 %v6479_v59, %v14568_v30  ;;  %v6469_v54 = vmax.f32 %v6341_v58, %v6405_v39  ;;  %v6553_v19 = vpack.c.bf16 %v6481_v10, %v6477_v27  ;;  %v6547_v53 = vpack.c.bf16 %v6471_v32, %v6467_v14  ;;  %v7800_v59 = vld [vmem:[#allocation2] sm:$0xff]   ;;  %6604 = vperm.xlu1 %7747, %v8016_v5   ;;  %v8024_v3 = vld [vmem:[%s13480_s2 + $0x70] sm:$0xff]  ;;  %v8026_v29 = vld [vmem:[%s13480_s2 + $0x78] sm:$0xff] }
 0x87a   :  { %6815 = vmatpush1.bf16.msra.mxu1 %v6557_v4  ;;  %v6550_v7 = vpack.c.bf16 %v6474_v60, %v6470_v55  ;;  %v8019_v58 = vld [vmem:[%s13480_s2 + $0x40] sm:$0xff]  ;;  %v8112_v47 = vmov 32   ;;  %v8113_v56 = vmov 40   ;;  %v7806_v45 = vld [vmem:[#allocation2 + $0x30] sm:$0xff]   ;;  %v7807_v28 = vld [vmem:[#allocation2 + $0x38] sm:$0xff]  }
 0x87b   :  { %6816 = vmatprep.subr.bf16.mxu1 %v6554_v37  ;;  %6704 = vmatpush1.bf16.msra.mxu0 %v6551_v12  ;;  %v6549_v22 = vpack.c.bf16 %v6473_v26, %v6469_v54  ;;  %v8027_v12 = vld [vmem:[%s13478_s0] sm:$0xff] }
 0x87c   :  { %6705 = vmatprep.subr.bf16.mxu0 %v6548_v33  ;;  %7062 = vperm.xlu0 %7745, %v13057_v43   ;;  %v8018_v43 = vld [vmem:[%s13480_s2 + $0x48] sm:$0xff]  ;;  %7896 = vlog2.f32 %v8027_v12 }
 0x87d   :  { %6608 = vperm.xlu1 %7747, %v8017_v6  }
 0x87e   :  { %6817 = vmatpush1.bf16.msra.mxu1 %v6553_v19 }
 0x87f   :  { %6818 = vmatprep.subr.bf16.mxu1 %v6550_v7  ;;  %6706 = vmatpush1.bf16.msra.mxu0 %v6547_v53 }
 0x880   :  { %7070 = vperm.xlu0 %7745, %v8016_v5  }
 0x881   :  { %7748 = vset.pattern.permute.xlu1 %v8111_v8 }
 0x882   :  { %6819 = vmatpush1.bf16.msra.mxu1 %v6549_v22  ;;  %6724 = vmatmul.mubr.bf16.vlgmr.msra.gmra.mxu0 %v7800_v59 }
 0x883   :  { %6733 = vmatprep.mubr.bf16.mxu0 %v14569_v15  ;;  %7066 = vperm.xlu1 %7748, %v8015_v50  }
 0x884   :  { %7082 = vperm.xlu0 %7745, %v8018_v43  }
 0x885   :  { %6837 = vmatmul.mubr.bf16.vlgmr.msra.gmra.mxu1 %v7800_v59 }
 0x886   :  { %6846 = vmatprep.mubr.bf16.mxu1 %v14569_v15 }
 0x887   :  { %7074 = vperm.xlu1 %7748, %v8017_v6  }
 0x888   :  { %7752 = vset.pattern.permute.xlu0 %v8110_v41 }
 0x889   :  { %6612 = vperm.xlu0 %7752, %v8019_v58  }
 0x88a   :  { %6734 = vmatmul.mubr.bf16.gmra.mxu0 %v7801_v35 }
 0x88b   :  { %6743 = vmatprep.mubr.bf16.mxu0 %v14569_v15  ;;  %7749 = vset.pattern.permute.xlu1 %v8110_v41 }
 0x88c   :  { %6616 = vperm.xlu1 %7749, %v8018_v43  }
 0x88d   :  { %6847 = vmatmul.mubr.bf16.gmra.mxu1 %v7801_v35  ;;  %6624 = vperm.xlu0 %7752, %v8020_v9  }
 0x88e   :  { %6856 = vmatprep.mubr.bf16.mxu1 %v14569_v15 }
 0x890   :  { %6620 = vperm.xlu1 %7749, %v8021_v25  }
 0x891   :  { %6628 = vperm.xlu0 %7752, %v8022_v1  }
 0x892   :  { %6744 = vmatmul.mubr.bf16.gmra.mxu0 %v7802_v18 }
 0x893   :  { %6753 = vmatprep.mubr.bf16.mxu0 %v14569_v15 }
 0x894   :  { %7750 = vset.pattern.permute.xlu1 %v8112_v47 }
 0x895   :  { %6857 = vmatmul.mubr.bf16.gmra.mxu1 %v7802_v18  ;;  %7278 = vperm.xlu1 %7750, %v8023_v49  }
 0x896   :  { %6866 = vmatprep.mubr.bf16.mxu1 %v14569_v15  ;;  %6636 = vperm.xlu0 %7752, %v8024_v3  }
 0x899   :  { %7751 = vset.pattern.permute.xlu1 %v8111_v8 }
 0x89a   :  { %6754 = vmatmul.mubr.bf16.gmra.mxu0 %v7803_v13  ;;  %7078 = vperm.xlu1 %7751, %v8019_v58  }
 0x89b   :  { %6763 = vmatprep.mubr.bf16.mxu0 %v14569_v15  ;;  %7756 = vset.pattern.permute.xlu0 %v8111_v8 }
 0x89c   :  { %7094 = vperm.xlu0 %7756, %v8022_v1  }
 0x89d   :  { %6867 = vmatmul.mubr.bf16.gmra.mxu1 %v7803_v13 }
 0x89e   :  { %6876 = vmatprep.mubr.bf16.mxu1 %v14569_v15  ;;  %7753 = vset.pattern.permute.xlu1 %v8110_v41 }
 0x89f   :  { %6632 = vperm.xlu1 %7753, %v8025_v52  }
 0x8a0   :  { %7106 = vperm.xlu0 %7756, %v8026_v29  }
 0x8a2   :  { %6764 = vmatmul.mubr.bf16.gmra.mxu0 %v7804_v20 }
 0x8a3   :  { %6773 = vmatprep.mubr.bf16.mxu0 %v14569_v15  ;;  %7754 = vset.pattern.permute.xlu1 %v8111_v8 }
 0x8a4   :  { %7759 = vset.pattern.permute.xlu0 %v8113_v56  ;;  %7086 = vperm.xlu1 %7754, %v8021_v25  }
 0x8a5   :  { %6877 = vmatmul.mubr.bf16.gmra.mxu1 %v7804_v20 }
 0x8a6   :  { %6886 = vmatprep.mubr.bf16.mxu1 %v14569_v15 }
 0x8a8   :  { %7090 = vperm.xlu1 %7754, %v8020_v9  }
 0x8aa   :  { %6774 = vmatmul.mubr.bf16.gmra.mxu0 %v7805_v51 }
 0x8ab   :  { %6783 = vmatprep.mubr.bf16.mxu0 %v14569_v15 }
 0x8ac   :  { %7755 = vset.pattern.permute.xlu1 %v8110_v41 }
 0x8ad   :  { %6887 = vmatmul.mubr.bf16.gmra.mxu1 %v7805_v51  ;;  %6640 = vperm.xlu1 %7755, %v8026_v29  }
 0x8ae   :  { %6896 = vmatprep.mubr.bf16.mxu1 %v14569_v15 }
 0x8b1   :  { %7757 = vset.pattern.permute.xlu1 %v8111_v8 }
 0x8b2   :  { %6784 = vmatmul.mubr.bf16.gmra.mxu0 %v7806_v45  ;;  %7098 = vperm.xlu1 %7757, %v8025_v52  }
 0x8b3   :  { %6793 = vmatprep.mubr.bf16.mxu0 %v14569_v15 }
 0x8b5   :  { %6897 = vmatmul.mubr.bf16.gmra.mxu1 %v7806_v45 }
 0x8b6   :  { %6906 = vmatprep.mubr.bf16.mxu1 %v14569_v15  ;;  %7102 = vperm.xlu1 %7757, %v8024_v3  }
 0x8ba   :  { %6794 = vmatmul.mubr.bf16.gmra.mxu0 %v7807_v28  ;;  %7758 = vset.pattern.permute.xlu1 %v8113_v56 }
 0x8bb   :  { %7290 = vperm.xlu1 %7758, %v8023_v49  }
 0x8bd   :  { %6907 = vmatmul.mubr.bf16.gmra.mxu1 %v7807_v28 }
 0x8db   :  { %v6585_v0 = vpop.permute.xlu1 %6584 }
 0x8dc   :  { %v6581_v41 = vpop.permute.xlu0 %6580 }
 0x8df   :  { %v6589_v48 = vpop.permute.xlu1 %6588 }
 0x8e0   :  { %v13210_v23 = vpop.permute.xlu0 %6592 }
 0x8e3   :  { %v13206_v61 = vpop.permute.xlu1 %6596 }
 0x8e6   :  { %v7047_v31 = vpop.permute.xlu0 %7046 }
 0x8ea   :  { %v13208_v46 = vpop.permute.xlu1 %7050 }
 0x8eb   :  { %v7055_v45 = vpop.permute.xlu0 %7054 }
 0x8f0   :  { %v13212_v32 = vpop.permute.xlu1 %6600 }
 0x8f4   :  { %v13218_v43 = vpop.permute.xlu1 %6604 }
 0x942   :  { %v6725_v40 = vpop.f32.mrf.mxu0 }
 0x943   :  { %v6726_v21 = vadd.f32 %v6725_v40, %v6581_v41 }
 0x944   :  { %v6727_v42 = vpop.f32.mrf.mxu0 }
 0x945   :  { %v6838_v44 = vpop.f32.mrf.mxu1  ;;  %v6917_v8 = vmul.f32 0.01, %v6726_v21  ;;  %v6728_v17 = vadd.f32 %v6727_v42, %v6581_v41 }
 0x946   :  { %v6839_v24 = vadd.f32 %v6838_v44, %v6581_v41  ;;  %v6729_v27 = vpop.f32.mrf.mxu0 }
 0x947   :  { %v6918_v10 = vmul.f32 0.01, %v6728_v17  ;;  %v6840_v63 = vpop.f32.mrf.mxu1  ;;  %v6730_v57 = vadd.f32 %v6729_v27, %v6585_v0  ;;  %v6981_v39 = vmax.f32 %v6726_v21, %v6917_v8 }
 0x948   :  { %v6919_v14 = vmul.f32 0.01, %v6839_v24  ;;  %v6841_v36 = vadd.f32 %v6840_v63, %v6581_v41  ;;  %v6731_v11 = vpop.f32.mrf.mxu0 }
 0x949   :  { %v6982_v2 = vmax.f32 %v6728_v17, %v6918_v10  ;;  %v6921_v34 = vmul.f32 0.01, %v6730_v57  ;;  %v6842_v38 = vpop.f32.mrf.mxu1  ;;  %v6732_v62 = vadd.f32 %v6731_v11, %v6585_v0  ;;  %v7109_v26 = vmul.f32 %v7047_v31, %v6981_v39 }
 0x94a   :  { %v6920_v4 = vmul.f32 0.01, %v6841_v36  ;;  %v6843_v37 = vadd.f32 %v6842_v38, %v6585_v0  ;;  %v6735_v16 = vpop.f32.mrf.mxu0  ;;  %v6983_v30 = vmax.f32 %v6839_v24, %v6919_v14  ;;  %v13225_v14 = vpop.permute.xlu1 %6608 }
 0x94b   :  { %v6985_v55 = vmax.f32 %v6730_v57, %v6921_v34  ;;  %v6922_v60 = vmul.f32 0.01, %v6732_v62  ;;  %v6844_v33 = vpop.f32.mrf.mxu1  ;;  %v6736_v50 = vadd.f32 %v6735_v16, %v6589_v48  ;;  %v7110_v53 = vmul.f32 %v7047_v31, %v6982_v2 }
 0x94c   :  { %v6984_v54 = vmax.f32 %v6841_v36, %v6920_v4  ;;  %v6923_v19 = vmul.f32 0.01, %v6843_v37  ;;  %v6845_v7 = vadd.f32 %v6844_v33, %v6585_v0  ;;  %v6737_v59 = vpop.f32.mrf.mxu0  ;;  %v7111_v25 = vmul.f32 %v7047_v31, %v6983_v30 }
 0x94d   :  { %v7113_v5 = vmul.f32 %v13208_v46, %v6985_v55  ;;  %v6986_v22 = vmax.f32 %v6732_v62, %v6922_v60  ;;  %v6925_v15 = vmul.f32 0.01, %v6736_v50  ;;  %v6848_v6 = vpop.f32.mrf.mxu1  ;;  %v6738_v35 = vadd.f32 %v6737_v59, %v6589_v48  ;;  %v7059_v60 = vpop.permute.xlu0 %7058 }
 0x94e   :  { %v6987_v58 = vmax.f32 %v6843_v37, %v6923_v19  ;;  %v6924_v18 = vmul.f32 0.01, %v6845_v7  ;;  %v6849_v9 = vadd.f32 %v6848_v6, %v6589_v48  ;;  %v6739_v13 = vpop.f32.mrf.mxu0  ;;  %v7112_v49 = vmul.f32 %v7047_v31, %v6984_v54  ;;  %v13233_v59 = vpop.permute.xlu1 %7066 }
 0x94f   :  { %v7114_v1 = vmul.f32 %v13208_v46, %v6986_v22  ;;  %v6989_v47 = vmax.f32 %v6736_v50, %v6925_v15  ;;  %v6926_v3 = vmul.f32 0.01, %v6738_v35  ;;  %v6850_v20 = vpop.f32.mrf.mxu1  ;;  %v7173_v0 = vadd.f32 %v7113_v5, %v7109_v26  ;;  %v13230_v50 = vpop.eup %7896 }
 0x950   :  { %v7115_v52 = vmul.f32 %v13208_v46, %v6987_v58  ;;  %v6988_v29 = vmax.f32 %v6845_v7, %v6924_v18  ;;  %v6927_v51 = vmul.f32 0.01, %v6849_v9  ;;  %v6851_v56 = vadd.f32 %v6850_v20, %v6589_v48  ;;  %v6741_v28 = vpop.f32.mrf.mxu0 }
 0x951   :  { %v6990_v41 = vmax.f32 %v6738_v35, %v6926_v3  ;;  %v6740_v40 = vadd.f32 %v6739_v13, %v13210_v23  ;;  %v6852_v21 = vpop.f32.mrf.mxu1  ;;  %v7117_v42 = vmul.f32 %v7055_v45, %v6989_v47  ;;  %v7186_v17 = vadd.f32 %v7114_v1, %v7110_v53 }
 0x952   :  { %v7116_v44 = vmul.f32 %v13208_v46, %v6988_v29  ;;  %v6991_v8 = vmax.f32 %v6849_v9, %v6927_v51  ;;  %v6928_v24 = vmul.f32 0.01, %v6851_v56  ;;  %v6745_v27 = vpop.f32.mrf.mxu0  ;;  %v7199_v10 = vadd.f32 %v7115_v52, %v7111_v25 }
 0x953   :  { %v6929_v63 = vmul.f32 0.01, %v6740_v40  ;;  %v6853_v57 = vadd.f32 %v6852_v21, %v13210_v23  ;;  %v7118_v39 = vmul.f32 %v7055_v45, %v6990_v41  ;;  %v6854_v48 = vpop.f32.mrf.mxu1  ;;  %v7174_v2 = vadd.f32 %v7173_v0, %v7117_v42 }
 0x954   :  { %v6992_v36 = vmax.f32 %v6851_v56, %v6928_v24  ;;  %v7119_v11 = vmul.f32 %v7055_v45, %v6991_v8  ;;  %v6742_v34 = vadd.f32 %v6741_v28, %v13210_v23  ;;  %v6747_v38 = vpop.f32.mrf.mxu0  ;;  %v7212_v62 = vadd.f32 %v7116_v44, %v7112_v49  ;;  %v13239_v24 = vpop.permute.xlu1 %7074 }
 0x955   :  { %v6993_v46 = vmax.f32 %v6740_v40, %v6929_v63  ;;  %v6931_v4 = vmul.f32 0.01, %v6853_v57  ;;  %v6855_v37 = vadd.f32 %v6854_v48, %v13210_v23  ;;  %v6858_v16 = vpop.f32.mrf.mxu1  ;;  %v7187_v30 = vadd.f32 %v7186_v17, %v7118_v39  ;;  %v7063_v40 = vpop.permute.xlu0 %7062 }
 0x956   :  { %v7120_v31 = vmul.f32 %v7055_v45, %v6992_v36  ;;  %v6930_v12 = vmul.f32 0.01, %v6742_v34  ;;  %v6746_v55 = vadd.f32 %v6745_v27, %v13206_v61  ;;  %v6749_v33 = vpop.f32.mrf.mxu0  ;;  %v6859_v19 = vadd.f32 %v6858_v16, %v13206_v61 }
 0x957   :  { %v6995_v26 = vmax.f32 %v6853_v57, %v6931_v4  ;;  %v6932_v54 = vmul.f32 0.01, %v6855_v37  ;;  %v7121_v7 = vmul.f32 %v7059_v60, %v6993_v46  ;;  %v6860_v53 = vpop.f32.mrf.mxu1  ;;  %v7200_v5 = vadd.f32 %v7199_v10, %v7119_v11 }
 0x958   :  { %v6994_v23 = vmax.f32 %v6742_v34, %v6930_v12  ;;  %v6933_v22 = vmul.f32 0.01, %v6746_v55  ;;  %v6748_v15 = vadd.f32 %v6747_v38, %v13206_v61  ;;  %v6751_v6 = vpop.f32.mrf.mxu0  ;;  %v7213_v35 = vadd.f32 %v7212_v62, %v7120_v31 }
 0x959   :  { %v6996_v58 = vmax.f32 %v6855_v37, %v6932_v54  ;;  %v6935_v18 = vmul.f32 0.01, %v6859_v19  ;;  %v7123_v9 = vmul.f32 %v7059_v60, %v6995_v26  ;;  %v6862_v25 = vpop.f32.mrf.mxu1  ;;  %v6861_v49 = vadd.f32 %v6860_v53, %v13206_v61 }
 0x95a   :  { %v6997_v13 = vmax.f32 %v6746_v55, %v6933_v22  ;;  %v7122_v1 = vmul.f32 %v7059_v60, %v6994_v23  ;;  %v6934_v47 = vmul.f32 0.01, %v6748_v15  ;;  %v6755_v3 = vpop.f32.mrf.mxu0  ;;  %v7175_v29 = vadd.f32 %v7174_v2, %v7121_v7  ;;  %v6617_v23 = vpop.permute.xlu1 %6616 }
 0x95b   :  { %v6999_v20 = vmax.f32 %v6859_v19, %v6935_v18  ;;  %v7124_v52 = vmul.f32 %v7059_v60, %v6996_v58  ;;  %v6750_v51 = vadd.f32 %v6749_v33, %v13212_v32  ;;  %v6864_v56 = vpop.f32.mrf.mxu1  ;;  %v7201_v45 = vadd.f32 %v7200_v5, %v7123_v9 }
 0x95c   :  { %v6998_v28 = vmax.f32 %v6748_v15, %v6934_v47  ;;  %v6936_v0 = vmul.f32 0.01, %v6861_v49  ;;  %v6863_v41 = vadd.f32 %v6862_v25, %v13212_v32  ;;  %v6757_v21 = vpop.f32.mrf.mxu0  ;;  %v7188_v42 = vadd.f32 %v7187_v30, %v7122_v1 }
 0x95d   :  { %v6937_v44 = vmul.f32 0.01, %v6750_v51  ;;  %v7125_v8 = vmul.f32 %v7063_v40, %v6997_v13  ;;  %v7127_v17 = vmul.f32 %v7063_v40, %v6999_v20  ;;  %v6868_v61 = vpop.f32.mrf.mxu1  ;;  %v6752_v57 = vadd.f32 %v6751_v6, %v13212_v32 }
 0x95e   :  { %v7000_v27 = vmax.f32 %v6861_v49, %v6936_v0  ;;  %v6939_v10 = vmul.f32 0.01, %v6863_v41  ;;  %v7126_v63 = vmul.f32 %v7063_v40, %v6998_v28  ;;  %v6759_v39 = vpop.f32.mrf.mxu0  ;;  %v7214_v48 = vadd.f32 %v7213_v35, %v7124_v52  ;;  %v7071_v52 = vpop.permute.xlu0 %7070 }
 0x95f   :  { %v7001_v36 = vmax.f32 %v6750_v51, %v6937_v44  ;;  %v7176_v11 = vadd.f32 %v7175_v29, %v7125_v8  ;;  %v6865_v2 = vadd.f32 %v6864_v56, %v13212_v32  ;;  %v6870_v34 = vpop.f32.mrf.mxu1  ;;  %v7202_v46 = vadd.f32 %v7201_v45, %v7127_v17 }
 0x960   :  { %v7003_v38 = vmax.f32 %v6863_v41, %v6939_v10  ;;  %v7128_v62 = vmul.f32 %v7063_v40, %v7000_v27  ;;  %v6938_v4 = vmul.f32 0.01, %v6752_v57  ;;  %v6761_v37 = vpop.f32.mrf.mxu0  ;;  %v7189_v16 = vadd.f32 %v7188_v42, %v7126_v63  ;;  %v13263_v27 = vpop.permute.xlu1 %6620 }
 0x961   :  { %v6940_v31 = vmul.f32 0.01, %v6865_v2  ;;  %v6756_v30 = vadd.f32 %v6755_v3, %v13218_v43  ;;  %v6869_v12 = vadd.f32 %v6868_v61, %v13218_v43  ;;  %v6872_v55 = vpop.f32.mrf.mxu1  ;;  %v7129_v60 = vmul.f32 %v13233_v59, %v7001_v36 }
 0x962   :  { %v7131_v33 = vmul.f32 %v13233_v59, %v7003_v38  ;;  %v7002_v26 = vmax.f32 %v6752_v57, %v6938_v4  ;;  %v6758_v32 = vadd.f32 %v6757_v21, %v13218_v43  ;;  %v13248_v54 = vpop.f32.mrf.mxu0  ;;  %v6871_v5 = vadd.f32 %v6870_v34, %v13218_v43 }
 0x963   :  { %v7004_v19 = vmax.f32 %v6865_v2, %v6940_v31  ;;  %v6941_v7 = vmul.f32 0.01, %v6756_v30  ;;  %v6943_v53 = vmul.f32 0.01, %v6869_v12  ;;  %v6874_v22 = vpop.f32.mrf.mxu1  ;;  %v6760_v35 = vadd.f32 %v6759_v39, %v13225_v14 }
 0x964   :  { %v7130_v15 = vmul.f32 %v13233_v59, %v7002_v26  ;;  %v6942_v6 = vmul.f32 0.01, %v6758_v32  ;;  %v6873_v58 = vadd.f32 %v6872_v55, %v13225_v14  ;;  %v13254_v18 = vpop.f32.mrf.mxu0  ;;  %v6944_v1 = vmul.f32 0.01, %v6871_v5  ;;  %v13269_v55 = vpop.permute.xlu1 %7278 }
 0x965   :  { %v7132_v9 = vmul.f32 %v13233_v59, %v7004_v19  ;;  %v7005_v25 = vmax.f32 %v6756_v30, %v6941_v7  ;;  %v7007_v13 = vmax.f32 %v6869_v12, %v6943_v53  ;;  %v13257_v47 = vpop.f32.mrf.mxu1  ;;  %v7215_v49 = vadd.f32 %v7214_v48, %v7128_v62 }
 0x966   :  { %v7006_v43 = vmax.f32 %v6758_v32, %v6942_v6  ;;  %v6945_v3 = vmul.f32 0.01, %v6760_v35  ;;  %v6947_v20 = vmul.f32 0.01, %v6873_v58  ;;  %v6769_v29 = vpop.f32.mrf.mxu0  ;;  %v7190_v51 = vadd.f32 %v7189_v16, %v7130_v15 }
 0x967   :  { %v7008_v56 = vmax.f32 %v6871_v5, %v6944_v1  ;;  %v7133_v45 = vmul.f32 %v7071_v52, %v7005_v25  ;;  %v7135_v28 = vmul.f32 %v7071_v52, %v7007_v13  ;;  %v13259_v0 = vpop.f32.mrf.mxu1  ;;  %v7177_v21 = vadd.f32 %v7176_v11, %v7129_v60  ;;  %v8028_v25 = vld [vmem:[%s13478_s0 + $0x10] sm:$0xff] }
 0x968   :  { %v7009_v41 = vmax.f32 %v6760_v35, %v6945_v3  ;;  %v7011_v40 = vmax.f32 %v6873_v58, %v6947_v20  ;;  %v7134_v59 = vmul.f32 %v7071_v52, %v7006_v43  ;;  %v6771_v42 = vpop.f32.mrf.mxu0  ;;  %v7216_v44 = vadd.f32 %v7215_v49, %v7132_v9  ;;  %v13289_v49 = vpop.permute.xlu0 %7082  ;;  %v8029_v3 = vld [vmem:[%s13478_s0 + $0x8] sm:$0xff] }
 0x969   :  { %v7203_v8 = vadd.f32 %v7202_v46, %v7131_v33  ;;  %v6762_v17 = vadd.f32 %v6761_v37, %v13225_v14  ;;  %v6875_v61 = vadd.f32 %v6874_v22, %v13225_v14  ;;  %v6882_v10 = vpop.f32.mrf.mxu1  ;;  %v7136_v39 = vmul.f32 %v7071_v52, %v7008_v56 }
 0x96a   :  { %v7137_v63 = vmul.f32 %v13239_v24, %v7009_v41  ;;  %v7139_v57 = vmul.f32 %v13239_v24, %v7011_v40  ;;  %v7178_v48 = vadd.f32 %v7177_v21, %v7133_v45  ;;  %v6775_v36 = vpop.f32.mrf.mxu0  ;;  %v7191_v2 = vadd.f32 %v7190_v51, %v7134_v59  ;;  %v8030_v51 = vld [vmem:[%s13478_s0 + $0x18] sm:$0xff]  ;;  %v13301_v40 = vpop.permute.xlu1 %7078  ;;  %s8114_s0 = smov [#allocation5]  }
 0x96b   :  { %v7204_v34 = vadd.f32 %v7203_v8, %v7135_v28  ;;  %v6946_v11 = vmul.f32 0.01, %v6762_v17  ;;  %v6948_v38 = vmul.f32 0.01, %v6875_v61  ;;  %v6884_v62 = vpop.f32.mrf.mxu1  ;;  %v6770_v4 = vadd.f32 %v6769_v29, %v6617_v23  ;;  %s7451_s29 = sshll.u32 %s8114_s0, 4  ;;  %s7452_s29 = int_to_ptr.vmem [resolvable:$true] %s7451_s29 }
 0x96c   :  { %v7179_v46 = vadd.f32 %v7178_v48, %v7137_v63  ;;  %v6883_v37 = vadd.f32 %v6882_v10, %v6617_v23  ;;  %v13267_v16 = vadd.f32 %v6771_v42, %v6617_v23  ;;  %v6777_v14 = vpop.f32.mrf.mxu0  ;;  %v13271_v60 = vadd.f32 %v6884_v62, %v6617_v23  ;;  %s8051_s30 = scalar_lea.vmem %s7452_s29, 16  ;;  %s8055_s4 = scalar_lea.vmem %s7452_s29, 32 }
 0x96d   :  { %v7205_v31 = vadd.f32 %v7204_v34, %v7139_v57  ;;  %v7010_v30 = vmax.f32 %v6762_v17, %v6946_v11  ;;  %v7012_v12 = vmax.f32 %v6875_v61, %v6948_v38  ;;  %v6888_v33 = vpop.f32.mrf.mxu1  ;;  %v7217_v32 = vadd.f32 %v7216_v44, %v7136_v39  ;;  %v6613_v39 = vpop.permute.xlu0 %6612  ;;  %p8052_p5 = scmp.ne.s32.totalorder %s7452_s29, %s8051_s30  ;;  %p8056_p6 = scmp.lt.s32.totalorder %s7452_s29, %s7452_s29 }
 0x96e   :  { %v7180_v26 = vrot.slane %v7179_v46, 4  ;;  %v6953_v19 = vmul.f32 0.01, %v6770_v4  ;;  %v6955_v7 = vmul.f32 0.01, %v6883_v37  ;;  %v13278_v35 = vpop.f32.mrf.mxu0  ;;  %v13284_v9 = vadd.f32 %v6775_v36, %v13263_v27  ;;  %p8057_p7 = scmp.lt.s32.totalorder %s8055_s4, %s8051_s30 }
 0x96f   :  { %v7206_v53 = vrot.slane %v7205_v31, 4  ;;  %v7138_v5 = vmul.f32 %v13239_v24, %v7010_v30  ;;  %v7140_v22 = vmul.f32 %v13239_v24, %v7012_v12  ;;  %v13276_v15 = vmul.f32 0.01, %v13267_v16  ;;  %v6890_v6 = vpop.f32.mrf.mxu1 }
 0x970   :  { %v7181_v58 = vadd.f32 %v7180_v26, %v7179_v46  ;;  %v13281_v23 = vmul.f32 0.01, %v13271_v60  ;;  %7898 = vlog2.f32 %v8028_v25  ;;  %v7017_v52 = vmax.f32 %v6770_v4, %v6953_v19  ;;  %v13303_v59 = vpop.f32.mrf.mxu0  ;;  %p8058_p8 = por %p8057_p7, %p8056_p6 }
 0x971   :  { %v7192_v13 = vadd.f32 %v7191_v2, %v7138_v5  ;;  %v7218_v24 = vadd.f32 %v7217_v32, %v7140_v22  ;;  %v7207_v1 = vadd.f32 %v7206_v53, %v7205_v31  ;;  %v13291_v43 = vpop.f32.mrf.mxu1  ;;  %7900 = vlog2.f32 %v8029_v3 }
 0x972   :  { %v7182_v20 = vrot.slane %v7181_v58, 2  ;;  %v7019_v29 = vmax.f32 %v6883_v37, %v6955_v7  ;;  %7902 = vlog2.f32 %v8030_v51  ;;  %v7018_v41 = vmax.f32 %v13267_v16, %v13276_v15  ;;  %v13321_v4 = vpop.f32.mrf.mxu0  ;;  %p8059_p9 = pnand %p8058_p8, %p8052_p5 }
 0x973   :  { %v7193_v56 = vrot.slane %v7192_v13, 4  ;;  %v7219_v45 = vrot.slane %v7218_v24, 4  ;;  %v7208_v28 = vrot.slane %v7207_v1, 2  ;;  %v7020_v42 = vmax.f32 %v13271_v60, %v13281_v23  ;;  %v13311_v17 = vpop.f32.mrf.mxu1 }
 0x974   :  { %v7183_v21 = vadd.f32 %v7182_v20, %v7181_v58  ;;  %v6957_v44 = vmul.f32 0.01, %v13284_v9  ;;  %v13309_v8 = vadd.f32 %v6888_v33, %v13263_v27  ;;  %v6778_v57 = vadd.f32 %v6777_v14, %v13263_v27  ;;  %v6787_v23 = vpop.f32.mrf.mxu0 }
 0x975   :  { %v7194_v61 = vadd.f32 %v7193_v56, %v7192_v13  ;;  %v7220_v10 = vadd.f32 %v7219_v45, %v7218_v24  ;;  %v7209_v63 = vadd.f32 %v7208_v28, %v7207_v1  ;;  %v13315_v36 = vmul.f32 %v13289_v49, %v7017_v52  ;;  %v13326_v12 = vpop.f32.mrf.mxu1 }
 0x976   :  { %v7184_v48 = vrot.slane %v7183_v21, 1  ;;  %v13318_v2 = vmul.f32 %v13289_v49, %v7019_v29  ;;  %v6891_v34 = vadd.f32 %v6890_v6, %v13263_v27  ;;  %v6958_v46 = vmul.f32 0.01, %v6778_v57  ;;  %v13328_v27 = vpop.permute.xlu1 %6632 }
 0x977   :  { %v7195_v11 = vrot.slane %v7194_v61, 2  ;;  %v7221_v38 = vrot.slane %v7220_v10, 2  ;;  %v7210_v62 = vrot.slane %v7209_v63, 1  ;;  %v7021_v31 = vmax.f32 %v13284_v9, %v6957_v44  ;;  %v6900_v24 = vpop.f32.mrf.mxu1 }
 0x978   :  { %v7185_v37 = vadd.f32 %v7184_v48, %v7183_v21  ;;  %v6959_v14 = vmul.f32 0.01, %v13309_v8  ;;  %v6766_v30 = vadd.f32 %v13248_v54, %v6613_v39  ;;  %v6960_v32 = vmul.f32 0.01, %v6891_v34 }
 0x979   :  { %v7196_v60 = vadd.f32 %v7195_v11, %v7194_v61  ;;  %v7211_v33 = vadd.f32 %v7210_v62, %v7209_v63  ;;  %v7222_v26 = vadd.f32 %v7221_v38, %v7220_v10  ;;  %v7022_v7 = vmax.f32 %v6778_v57, %v6958_v46  ;;  %v6789_v63 = vpop.f32.mrf.mxu0  ;;  %v6902_v11 = vpop.f32.mrf.mxu1 }
 0x97a   :  { %v7281_v19 = vadd.f32 %v13269_v55, %v7185_v37  ;;  %v6768_v53 = vadd.f32 %v13254_v18, %v6613_v39  ;;  %v6879_v5 = vadd.f32 %v13257_v47, %v6613_v39  ;;  %v6881_v54 = vadd.f32 %v13259_v0, %v6613_v39  ;;  %v6625_v0 = vpop.permute.xlu0 %6624  ;;  %v7087_v10 = vpop.permute.xlu1 %7086 }
 0x97b   :  { %v7197_v22 = vrot.slane %v7196_v60, 1  ;;  %v7223_v6 = vrot.slane %v7222_v26, 1  ;;  %v7283_v58 = vadd.f32 %v13269_v55, %v7211_v33  ;;  %v6949_v9 = vmul.f32 0.01, %v6766_v30  ;;  %v6791_v37 = vpop.f32.mrf.mxu0 }
 0x97c   :  { %7904 = vtanh.f32 %v7281_v19  ;;  %v6950_v25 = vmul.f32 0.01, %v6768_v53  ;;  %v6951_v13 = vmul.f32 0.01, %v6879_v5  ;;  %v6952_v18 = vmul.f32 0.01, %v6881_v54 }
 0x97d   :  { %v13335_v1 = vpop.eup %7898  ;;  %v7198_v3 = vadd.f32 %v7197_v22, %v7196_v60  ;;  %v7224_v20 = vadd.f32 %v7223_v6, %v7222_v26  ;;  %7906 = vtanh.f32 %v7283_v58  ;;  %v7023_v47 = vmax.f32 %v13309_v8, %v6959_v14  ;;  %v6904_v60 = vpop.f32.mrf.mxu1 }
 0x97e   :  { %v13337_v52 = vpop.eup %7900  ;;  %v7013_v29 = vmax.f32 %v6766_v30, %v6949_v9  ;;  %v7014_v51 = vmax.f32 %v6768_v53, %v6950_v25  ;;  %v7015_v56 = vmax.f32 %v6879_v5, %v6951_v13  ;;  %v7024_v44 = vmax.f32 %v6891_v34, %v6960_v32  ;;  %v6629_v19 = vpop.permute.xlu0 %6628 }
 0x97f   :  { %v13340_v45 = vpop.eup %7902  ;;  %v7282_v28 = vadd.f32 %v13269_v55, %v7198_v3  ;;  %v7284_v21 = vadd.f32 %v13269_v55, %v7224_v20  ;;  %v7016_v61 = vmax.f32 %v6881_v54, %v6952_v18  ;;  %v7146_v57 = vmul.f32 %v13289_v49, %v7018_v41  ;;  %v6795_v6 = vpop.f32.mrf.mxu0 }
 0x980   :  { %v7148_v8 = vmul.f32 %v13289_v49, %v7020_v42  ;;  %v7149_v39 = vmul.f32 %v7087_v10, %v7021_v31  ;;  %v7150_v48 = vmul.f32 %v7087_v10, %v7022_v7  ;;  %v7141_v38 = vmul.f32 %v13301_v40, %v7013_v29  ;;  %v7091_v7 = vpop.permute.xlu1 %7090  ;;  %v6908_v13 = vpop.f32.mrf.mxu1 }
 0x981   :  { %7908 = vtanh.f32 %v7282_v28  ;;  %v7142_v62 = vmul.f32 %v13301_v40, %v7014_v51  ;;  %v6780_v55 = vadd.f32 %v13278_v35, %v6625_v0  ;;  %v7143_v34 = vmul.f32 %v13301_v40, %v7015_v56 }
 0x982   :  { %7910 = vtanh.f32 %v7284_v21  ;;  %v7144_v46 = vmul.f32 %v13301_v40, %v7016_v61  ;;  %v7151_v16 = vmul.f32 %v7087_v10, %v7023_v47  ;;  %v7152_v15 = vmul.f32 %v7087_v10, %v7024_v44  ;;  %v6797_v61 = vpop.f32.mrf.mxu0 }
 0x983   :  { %v6782_v41 = vadd.f32 %v13303_v59, %v6625_v0  ;;  %v6893_v49 = vadd.f32 %v13291_v43, %v6625_v0  ;;  %v6895_v42 = vadd.f32 %v13311_v17, %v6625_v0  ;;  %v7225_v31 = vadd.f32 %v13315_v36, %v7141_v38 }
 0x984   :  { %v7238_v14 = vadd.f32 %v7146_v57, %v7142_v62  ;;  %v7251_v30 = vadd.f32 %v13318_v2, %v7143_v34  ;;  %v6961_v35 = vmul.f32 0.01, %v6780_v55  ;;  %v7264_v33 = vadd.f32 %v7148_v8, %v7144_v46  ;;  %v13379_v56 = vpop.permute.xlu1 %6640 }
 0x985   :  { %v6962_v26 = vmul.f32 0.01, %v6782_v41  ;;  %v6963_v32 = vmul.f32 0.01, %v6893_v49  ;;  %v6964_v40 = vmul.f32 0.01, %v6895_v42  ;;  %v13360_v59 = vadd.f32 %v13321_v4, %v6629_v19 }
 0x986   :  { %v7025_v53 = vmax.f32 %v6780_v55, %v6961_v35  ;;  %v13362_v43 = vadd.f32 %v6787_v23, %v6629_v19  ;;  %v13365_v17 = vadd.f32 %v13326_v12, %v6629_v19  ;;  %v13367_v22 = vadd.f32 %v6900_v24, %v6629_v19 }
 0x987   :  { %v7026_v36 = vmax.f32 %v6782_v41, %v6962_v26  ;;  %v7027_v5 = vmax.f32 %v6893_v49, %v6963_v32  ;;  %v7028_v2 = vmax.f32 %v6895_v42, %v6964_v40  ;;  %v7226_v58 = vadd.f32 %v7225_v31, %v7149_v39 }
 0x988   :  { %v7239_v54 = vadd.f32 %v7238_v14, %v7150_v48  ;;  %v7252_v9 = vadd.f32 %v7251_v30, %v7151_v16  ;;  %v7153_v25 = vmul.f32 %v7091_v7, %v7025_v53  ;;  %v7265_v4 = vadd.f32 %v7264_v33, %v7152_v15  ;;  %v6910_v48 = vpop.f32.mrf.mxu1  ;;  %v6799_v30 = vpop.f32.mrf.mxu0 }
 0x989   :  { %v13369_v3 = vpop.eup %7904  ;;  %v7154_v20 = vmul.f32 %v7091_v7, %v7026_v36  ;;  %v7155_v23 = vmul.f32 %v7091_v7, %v7027_v5  ;;  %v13372_v18 = vmul.f32 0.01, %v13360_v59  ;;  %v7156_v24 = vmul.f32 %v7091_v7, %v7028_v2  ;;  %v7099_v26 = vpop.permute.xlu1 %7098 }
 0x98a   :  { %v13374_v12 = vpop.eup %7906  ;;  %v7301_v47 = vsub.f32 0.0, %v13369_v3  ;;  %v6790_v29 = vadd.f32 %v6789_v63, %v13328_v27  ;;  %v6903_v51 = vadd.f32 %v6902_v11, %v13328_v27  ;;  %v13381_v0 = vadd.f32 %v7226_v58, %v7153_v25  ;;  %v6637_v63 = vpop.permute.xlu0 %6636 }
 0x98b   :  { %v6966_v28 = vmul.f32 0.01, %v13362_v43  ;;  %v6967_v21 = vmul.f32 0.01, %v13365_v17  ;;  %v6968_v44 = vmul.f32 0.01, %v13367_v22  ;;  %v6792_v39 = vadd.f32 %v6791_v37, %v13328_v27  ;;  %v6912_v32 = vpop.f32.mrf.mxu1 }
 0x98c   :  { %v7303_v10 = vsub.f32 0.0, %v13374_v12  ;;  %v6969_v57 = vmul.f32 0.01, %v6790_v29  ;;  %v6971_v8 = vmul.f32 0.01, %v6903_v51  ;;  %v6905_v38 = vadd.f32 %v6904_v60, %v13328_v27 }
 0x98d   :  { %v7305_v11 = vmul.f32 1.442695, %v7301_v47  ;;  %v13389_v62 = vadd.f32 %v6795_v6, %v6637_v63  ;;  %v13391_v55 = vadd.f32 %v6908_v13, %v6637_v63  ;;  %v7240_v46 = vadd.f32 %v7239_v54, %v7154_v20  ;;  %v6801_v13 = vpop.f32.mrf.mxu0 }
 0x98e   :  { %v13393_v34 = vpop.eup %7908  ;;  %v7253_v16 = vadd.f32 %v7252_v9, %v7155_v23  ;;  %v7266_v15 = vadd.f32 %v7265_v4, %v7156_v24  ;;  %v6970_v41 = vmul.f32 0.01, %v6792_v39  ;;  %v7033_v37 = vmax.f32 %v6790_v29, %v6969_v57  ;;  %v7095_v25 = vpop.permute.xlu0 %7094 }
 0x98f   :  { %v13395_v49 = vpop.eup %7910  ;;  %v7302_v42 = vsub.f32 0.0, %v13393_v34  ;;  %v6972_v31 = vmul.f32 0.01, %v6905_v38  ;;  %v6973_v14 = vmul.f32 0.01, %v13389_v62  ;;  %v7035_v27 = vmax.f32 %v6903_v51, %v6971_v8  ;;  %v6914_v24 = vpop.f32.mrf.mxu1 }
 0x990   :  { %v7034_v35 = vmax.f32 %v6792_v39, %v6970_v41  ;;  %v6975_v60 = vmul.f32 0.01, %v13391_v55  ;;  %v6798_v33 = vadd.f32 %v6797_v61, %v6637_v63  ;;  %7912 = vpow2.f32 %v7305_v11 }
 0x991   :  { %v7309_v40 = vmul.f32 1.442695, %v7303_v10  ;;  %v7036_v19 = vmax.f32 %v6905_v38, %v6972_v31  ;;  %v6911_v7 = vadd.f32 %v6910_v48, %v6637_v63  ;;  %v7304_v53 = vsub.f32 0.0, %v13395_v49 }
 0x992   :  { %v13401_v36 = vmul.f32 1.442695, %v7302_v42  ;;  %v7037_v5 = vmax.f32 %v13389_v62, %v6973_v14  ;;  %v6974_v2 = vmul.f32 0.01, %v6798_v33  ;;  %v7039_v6 = vmax.f32 %v13391_v55, %v6975_v60 }
 0x993   :  { %v6976_v58 = vmul.f32 0.01, %v6911_v7  ;;  %v7161_v54 = vmul.f32 %v7099_v26, %v7033_v37  ;;  %v7162_v9 = vmul.f32 %v7099_v26, %v7034_v35  ;;  %v7163_v20 = vmul.f32 %v7099_v26, %v7035_v27 }
 0x994   :  { %v7038_v4 = vmax.f32 %v6798_v33, %v6974_v2  ;;  %v7164_v23 = vmul.f32 %v7099_v26, %v7036_v19  ;;  %v7029_v47 = vmax.f32 %v13360_v59, %v13372_v18  ;;  %v7030_v51 = vmax.f32 %v13362_v43, %v6966_v28  ;;  %v7103_v18 = vpop.permute.xlu1 %7102 }
 0x995   :  { %v7040_v29 = vmax.f32 %v6911_v7, %v6976_v58  ;;  %v7031_v61 = vmax.f32 %v13365_v17, %v6967_v21  ;;  %v7032_v10 = vmax.f32 %v13367_v22, %v6968_v44  ;;  %v6800_v8 = vadd.f32 %v6799_v30, %v13379_v56 }
 0x996   :  { %v7157_v57 = vmul.f32 %v7095_v25, %v7029_v47  ;;  %v6913_v39 = vadd.f32 %v6912_v32, %v13379_v56  ;;  %v6802_v63 = vadd.f32 %v6801_v13, %v13379_v56  ;;  %v7158_v48 = vmul.f32 %v7095_v25, %v7030_v51 }
 0x997   :  { %v7159_v11 = vmul.f32 %v7095_v25, %v7031_v61  ;;  %v7160_v38 = vmul.f32 %v7095_v25, %v7032_v10  ;;  %v6915_v59 = vadd.f32 %v6914_v24, %v13379_v56  ;;  %v6977_v43 = vmul.f32 0.01, %v6800_v8  ;;  %v14570_v10 = vld [vmem:[#allocation70_spill] sm:$0xff] }
 0x998   :  { %v7228_v62 = vadd.f32 %v13381_v0, %v7157_v57  ;;  %v6979_v28 = vmul.f32 0.01, %v6913_v39  ;;  %v6978_v17 = vmul.f32 0.01, %v6802_v63  ;;  %v7241_v21 = vadd.f32 %v7240_v46, %v7158_v48  ;;  %v7107_v0 = vpop.permute.xlu0 %7106  ;;  %v14572_v48 = vld [vmem:[#allocation30_spill] sm:$0xff] }
 0x999   :  { %v7254_v22 = vadd.f32 %v7253_v16, %v7159_v11  ;;  %v7267_v44 = vadd.f32 %v7266_v15, %v7160_v38  ;;  %v6980_v55 = vmul.f32 0.01, %v6915_v59  ;;  %v7041_v41 = vmax.f32 %v6800_v8, %v6977_v43  ;;  %v14573_v38 = vld [vmem:[#allocation78_spill] sm:$0xff] }
 0x99a   :  { %v7043_v42 = vmax.f32 %v6913_v39, %v6979_v28  ;;  %v7042_v37 = vmax.f32 %v6802_v63, %v6978_v17  ;;  %v7165_v31 = vmul.f32 %v7103_v18, %v7037_v5  ;;  %v7166_v30 = vmul.f32 %v7103_v18, %v7038_v4 }
 0x99b   :  { %v7044_v14 = vmax.f32 %v6915_v59, %v6980_v55  ;;  %v7167_v27 = vmul.f32 %v7103_v18, %v7039_v6  ;;  %v7168_v35 = vmul.f32 %v7103_v18, %v7040_v29  ;;  %v7229_v60 = vadd.f32 %v7228_v62, %v7161_v54 }
 0x99c   :  { %v7242_v56 = vadd.f32 %v7241_v21, %v7162_v9  ;;  %v7255_v33 = vadd.f32 %v7254_v22, %v7163_v20  ;;  %v7268_v26 = vadd.f32 %v7267_v44, %v7164_v23  ;;  %v7169_v32 = vmul.f32 %v7107_v0, %v7041_v41 }
 0x99d   :  { %v7170_v19 = vmul.f32 %v7107_v0, %v7042_v37  ;;  %v7171_v7 = vmul.f32 %v7107_v0, %v7043_v42  ;;  %v7172_v46 = vmul.f32 %v7107_v0, %v7044_v14  ;;  %v13415_v16 = vpop.eup %7912  ;;  %v7230_v15 = vadd.f32 %v7229_v60, %v7165_v31  ;;  %v7291_v14 = vpop.permute.xlu1 %7290 }
 0x99e   :  { %v7243_v2 = vadd.f32 %v7242_v56, %v7166_v30  ;;  %v7256_v58 = vadd.f32 %v7255_v33, %v7167_v27  ;;  %v7269_v25 = vadd.f32 %v7268_v26, %v7168_v35  ;;  %7914 = vpow2.f32 %v7309_v40  ;;  %v14571_v40 = vld [vmem:[#allocation39_spill] sm:$0xff]  ;;  %v14574_v35 = vld [vmem:[#allocation16_spill] sm:$0xff] }
 0x99f   :  { %v7311_v5 = vmul.f32 1.442695, %v7304_v53  ;;  %v7231_v13 = vadd.f32 %v7230_v15, %v7169_v32  ;;  %7916 = vpow2.f32 %v13401_v36  ;;  %v13420_v57 = vmul.f32 %v14570_v10, %v14570_v10  ;;  %v14581_v10 = vld [vmem:[#allocation65_spill] sm:$0xff] }
 0x9a0   :  { %v7244_v6 = vadd.f32 %v7243_v2, %v7170_v19  ;;  %v7257_v4 = vadd.f32 %v7256_v58, %v7171_v7  ;;  %v7270_v54 = vadd.f32 %v7269_v25, %v7172_v46  ;;  %v13424_v53 = vmul.f32 %v14571_v40, %v14571_v40  ;;  %v14576_v46 = vld [vmem:[#allocation17_spill] sm:$0xff] }
 0x9a1   :  { %v7232_v9 = vrot.slane %v7231_v13, 4  ;;  %7918 = vpow2.f32 %v7311_v5  ;;  %v13428_v11 = vmul.f32 %v14572_v48, %v14572_v48  ;;  %v13432_v59 = vmul.f32 %v14573_v38, %v14573_v38 }
 0x9a2   :  { %v7245_v20 = vrot.slane %v7244_v6, 4  ;;  %v7258_v23 = vrot.slane %v7257_v4, 4  ;;  %v7271_v47 = vrot.slane %v7270_v54, 4  ;;  %v7358_v18 = vmul.f32 0.6931472, %v13230_v50 }
 0x9a3   :  { %v7233_v24 = vadd.f32 %v7232_v9, %v7231_v13  ;;  %v7333_v21 = vrot.slane %v13420_v57, 1  ;;  %v7334_v22 = vrot.slane %v13424_v53, 1  ;;  %v7360_v44 = vmul.f32 0.6931472, %v13337_v52 }
 0x9a4   :  { %v7246_v29 = vadd.f32 %v7245_v20, %v7244_v6  ;;  %v7259_v51 = vadd.f32 %v7258_v23, %v7257_v4  ;;  %v7272_v61 = vadd.f32 %v7271_v47, %v7270_v54  ;;  %v7362_v55 = vmul.f32 0.6931472, %v13335_v1  ;;  %v14575_v1 = vld [vmem:[#allocation14_spill] sm:$0xff]  ;;  %v14577_v4 = vld [vmem:[#allocation15_spill] sm:$0xff]  ;;  %v14578_v23 = vld [vmem:[#allocation37_spill] sm:$0xff] }
 0x9a5   :  { %v7234_v8 = vrot.slane %v7233_v24, 2  ;;  %v7335_v30 = vrot.slane %v13428_v11, 1  ;;  %v7364_v50 = vmul.f32 0.6931472, %v13340_v45  ;;  %v7365_v27 = vmul.f32 2.0, %v7358_v18 }
 0x9a6   :  { %v7247_v39 = vrot.slane %v7246_v29, 2  ;;  %v7260_v36 = vrot.slane %v7259_v51, 2  ;;  %v7273_v63 = vrot.slane %v7272_v61, 2  ;;  %v7373_v60 = vand.u32 2147483647, %v14574_v35 }
 0x9a7   :  { %v7235_v62 = vadd.f32 %v7234_v8, %v7233_v24  ;;  %v7366_v52 = vmul.f32 2.0, %v7360_v44  ;;  %v7367_v19 = vmul.f32 2.0, %v7362_v55  ;;  %v7374_v7 = vand.u32 2147483647, %v14575_v1  ;;  %v14579_v24 = vld [vmem:[#allocation46_spill] sm:$0xff] }
 0x9a8   :  { %v7248_v43 = vadd.f32 %v7247_v39, %v7246_v29  ;;  %v7261_v28 = vadd.f32 %v7260_v36, %v7259_v51  ;;  %v7274_v17 = vadd.f32 %v7273_v63, %v7272_v61  ;;  %v7375_v15 = vand.u32 2147483647, %v14576_v46  ;;  %v14580_v51 = vld [vmem:[#allocation31_spill] sm:$0xff]  ;;  %v14589_v46 = vld [vmem:[#allocation28_spill] sm:$0xff] }
 0x9a9   :  { %v7236_v41 = vrot.slane %v7235_v62, 1  ;;  %v7368_v45 = vmul.f32 2.0, %v7364_v50  ;;  %v7369_v6 = vadd.f32 0.6931472, %v7365_v27  ;;  %v7376_v54 = vand.u32 2147483647, %v14577_v4 }
 0x9aa   :  { %v7249_v42 = vrot.slane %v7248_v43, 1  ;;  %v7262_v37 = vrot.slane %v7261_v28, 1  ;;  %v7275_v31 = vrot.slane %v7274_v17, 1  ;;  %v7381_v9 = vrot.slane %v7373_v60, 6 }
 0x9ab   :  { %v7915_v56 = vpop.eup %7914  ;;  %v7237_v33 = vadd.f32 %v7236_v41, %v7235_v62  ;;  %v7370_v40 = vadd.f32 0.6931472, %v7366_v52  ;;  %v7371_v53 = vadd.f32 0.6931472, %v7367_v19  ;;  %v7382_v8 = vrot.slane %v7374_v7, 6  ;;  %v14585_v52 = vld [vmem:[#allocation47_spill] sm:$0xff] }
 0x9ac   :  { %v7250_v26 = vadd.f32 %v7249_v42, %v7248_v43  ;;  %v7263_v0 = vadd.f32 %v7262_v37, %v7261_v28  ;;  %v7276_v32 = vadd.f32 %v7275_v31, %v7274_v17  ;;  %v7917_v2 = vpop.eup %7916  ;;  %v7383_v39 = vrot.slane %v7375_v15, 6  ;;  %v14586_v19 = vld [vmem:[#allocation83_spill] sm:$0xff] }
 0x9ad   :  { %v7293_v58 = vadd.f32 %v7291_v14, %v7237_v33  ;;  %v7336_v38 = vrot.slane %v13432_v59, 1  ;;  %v7372_v18 = vadd.f32 0.6931472, %v7368_v45  ;;  %v7384_v62 = vrot.slane %v7376_v54, 6  ;;  %v14582_v59 = vld [vmem:[#allocation22_spill] sm:$0xff]  ;;  %v14591_v45 = vld [vmem:[#allocation91_spill] sm:$0xff] }
 0x9ae   :  { %v7294_v25 = vadd.f32 %v7291_v14, %v7250_v26  ;;  %v7295_v5 = vadd.f32 %v7291_v14, %v7263_v0  ;;  %v7296_v13 = vadd.f32 %v7291_v14, %v7276_v32  ;;  %v7919_v20 = vpop.eup %7918  ;;  %v7389_v43 = vadd.f32 %v7381_v9, %v7369_v6  ;;  %v14583_v26 = vld [vmem:[#allocation71_spill] sm:$0xff]  ;;  %v14592_v6 = vld [vmem:[#allocation74_spill] sm:$0xff] }
 0x9af   :  { %v7297_v47 = vsub.f32 %v14578_v23, %v7293_v58  ;;  %v7390_v41 = vadd.f32 %v7382_v8, %v7370_v40  ;;  %v7391_v42 = vadd.f32 %v7383_v39, %v7371_v53  ;;  %v7392_v27 = vadd.f32 %v7384_v62, %v7372_v18  ;;  %v14596_v62 = vld [vmem:[#allocation9_spill] sm:$0xff] }
 0x9b0   :  { %v7298_v29 = vsub.f32 %v14579_v24, %v7294_v25  ;;  %v7299_v61 = vsub.f32 %v14580_v51, %v7295_v5  ;;  %v7300_v57 = vsub.f32 %v14581_v10, %v7296_v13  ;;  %v14584_v0 = vsub.f32 %v14582_v59, %v14583_v26 }
 0x9b1   :  { %v7313_v36 = vmul.f32 %v13415_v16, %v7297_v47  ;;  %v7397_v16 = vrot.slane %v7389_v43, 1  ;;  %v14587_v1 = vsub.f32 %v14585_v52, %v14586_v19  ;;  %v7400_v54 = vrot.slane %v7392_v27, 1 }
 0x9b2   :  { %v7314_v63 = vmul.f32 %v7917_v2, %v7298_v29  ;;  %v7315_v48 = vmul.f32 %v7915_v56, %v7299_v61  ;;  %v7316_v11 = vmul.f32 %v7919_v20, %v7300_v57  ;;  %v7317_v32 = vsub.f32 %v14584_v0, %v13369_v3 }
 0x9b3   :  { %v7321_v28 = vmul.f32 %v7313_v36, %v7313_v36  ;;  %v7318_v7 = vsub.f32 %v14587_v1, %v13393_v34  ;;  %v14593_v3 = vsub.f32 %v14591_v45, %v14592_v6  ;;  %v7405_v47 = vadd.f32 %v7397_v16, %v7389_v43 }
 0x9b4   :  { %v7322_v17 = vmul.f32 %v7314_v63, %v7314_v63  ;;  %v7323_v44 = vmul.f32 %v7315_v48, %v7315_v48  ;;  %v7324_v55 = vmul.f32 %v7316_v11, %v7316_v11  ;;  %v7408_v10 = vadd.f32 %v7400_v54, %v7392_v27  ;;  %v14594_v11 = vld [vmem:[#allocation8_spill] sm:$0xff] }
 0x9b5   :  { %v7341_v37 = vadd.f32 %v7333_v21, %v7321_v28  ;;  %v7398_v21 = vrot.slane %v7390_v41, 1  ;;  %v7320_v4 = vsub.f32 %v14593_v3, %v13395_v49  ;;  %v14597_v43 = vrot.slane %v14596_v62, 4 }
 0x9b6   :  { %v7342_v31 = vadd.f32 %v7334_v22, %v7322_v17  ;;  %v7343_v14 = vadd.f32 %v7335_v30, %v7323_v44  ;;  %v7344_v50 = vadd.f32 %v7336_v38, %v7324_v55  ;;  %v7399_v22 = vrot.slane %v7391_v42, 1  ;;  %v14588_v30 = vld [vmem:[#allocation33_spill] sm:$0xff]  ;;  %v14598_v17 = vld [vmem:[#allocation11_spill] sm:$0xff] }
 0x9b7   :  { %v7345_v35 = vmul.f32 -0.5, %v7341_v37  ;;  %v14590_v15 = vsub.f32 %v14588_v30, %v14589_v46  ;;  %v7406_v24 = vadd.f32 %v7398_v21, %v7390_v41  ;;  %v14595_v38 = vrot.slane %v14594_v11, 4  ;;  %v14600_v41 = vld [vmem:[#allocation10_spill] sm:$0xff] }
 0x9b8   :  { %v7346_v60 = vmul.f32 -0.5, %v7342_v31  ;;  %v7347_v56 = vmul.f32 -0.5, %v7343_v14  ;;  %v7348_v33 = vmul.f32 -0.5, %v7344_v50  ;;  %v7407_v61 = vadd.f32 %v7399_v22, %v7391_v42 }
 0x9b9   :  { %v7319_v2 = vsub.f32 %v14590_v15, %v13374_v12  ;;  %v7508_v58 = vadd.f32 -1.837877, %v7345_v35  ;;  %v14599_v44 = vrot.slane %v14598_v17, 4  ;;  %v14601_v42 = vrot.slane %v14600_v41, 4 }
 0x9ba   :  { %v7509_v25 = vadd.f32 -1.837877, %v7346_v60  ;;  %v7510_v5 = vadd.f32 -1.837877, %v7347_v56  ;;  %v7511_v13 = vadd.f32 -1.837877, %v7348_v33 }
 0x9bb   :  { %v7353_v9 = vadd.f32 %v7508_v58, %v7317_v32 }
 0x9bc   :  { %v7354_v20 = vadd.f32 %v7509_v25, %v7318_v7  ;;  %v7355_v34 = vadd.f32 %v7510_v5, %v7319_v2  ;;  %v7356_v23 = vadd.f32 %v7511_v13, %v7320_v4 }
 0x9bd   :  { %v7409_v29 = vmul.f32 2.0, %v7353_v9 }
 0x9be   :  { %v7410_v51 = vmul.f32 2.0, %v7354_v20  ;;  %v7411_v12 = vmul.f32 2.0, %v7355_v34  ;;  %v7412_v57 = vmul.f32 2.0, %v7356_v23 }
 0x9bf   :  { %v7417_v40 = vrot.slane %v7409_v29, 6 }
 0x9c0   :  { %v7418_v53 = vrot.slane %v7410_v51, 6  ;;  %v7419_v8 = vrot.slane %v7411_v12, 6  ;;  %v7420_v39 = vrot.slane %v7412_v57, 6 }
 0x9c1   :  { %v7425_v36 = vsub.f32 %v7405_v47, %v7417_v40 }
 0x9c2   :  { %v7426_v63 = vsub.f32 %v7406_v24, %v7418_v53  ;;  %v7427_v49 = vsub.f32 %v7407_v61, %v7419_v8  ;;  %v7428_v48 = vsub.f32 %v7408_v10, %v7420_v39 }
 0x9c3   :  { %v7429_v18 = vmul.f32 %v7425_v36, %v14595_v38 }
 0x9c4   :  { %v7430_v28 = vmul.f32 %v7426_v63, %v14597_v43  ;;  %v7431_v55 = vmul.f32 %v7427_v49, %v14599_v44  ;;  %v7432_v37 = vmul.f32 %v7428_v48, %v14601_v42 }
 0x9c5   :  { %v7434_v31 = vsel %vm7433_vm0, %v7429_v18, 0.0 }
 0x9c6   :  { %v7435_v14 = vsel %vm7433_vm0, %v7430_v28, 0.0  ;;  %v7437_v27 = vsel %vm7433_vm0, %v7431_v55, 0.0  ;;  %v7439_v35 = vsel %vm7433_vm0, %v7432_v37, 0.0 }
 0x9c7   :  { %v7436_v50 = vadd.f32 %v7435_v14, %v7434_v31 }
 0x9c9   :  { %v7438_v16 = vadd.f32 %v7437_v27, %v7436_v50 }
 0x9cb   :  { %v7440_v60 = vadd.f32 %v7439_v35, %v7438_v16 }
 0x9cd   :  { %7441 = vadd.xlane.f32.xlu0 %v7440_v60 }
 0xa56   :  { %v7442_v56 = vpop.xlane.xlu0 %7441 }
 0xa57   :  { %7444 = vst.msk [vmem:[#allocation5 - $0x2] sm:$0x4] %vm7443_vm1, %v7442_v56 }
 0xa58   :  { %8062 = shalt.err (!%p8059_p9)
}
 0xa59   :  { %7454 = dma.vmem_to_hbm [thread:$0]  %s7452_s29, 16, %s13481_s3, [#allocation4]  }
 0xa5a   :  { %8073 = dma.done.wait [#allocation4], 16  }
 0xa5b   :  { %8074 = vsyncadd [#allocation4], 4294967280 }
 0xa5c   :  { %7458 = vsyncpa [#allocation3], 1 }
 0xa5d   :  { %7459 = vsyncpa [#allocation4], 1 }

</bundles_post_ra>
